<compile_context>
chip_gen: v7x
topology: tpu7x:2x2x1
jax: 0.10.0
libtpu: 0.0.40
codegen_flags: <defaults>
</compile_context>

<pallas_src>
import functools

import numpy as np
import jax
import jax.numpy as jnp
from jax.experimental import pallas as pl
from jax.experimental.pallas import tpu as pltpu


# ------------------------------ configuration ------------------------------

STEM_C = 8
# (cin, cout, stride, expand) per block -- 7 blocks like EfficientNet stages.
BLOCK_CFG = [
    (8, 8, 1, 1),
    (8, 12, 2, 2),
    (12, 16, 2, 2),
    (16, 24, 2, 2),
    (24, 32, 1, 2),
    (32, 40, 2, 2),
    (40, 48, 1, 2),
]
HEAD_C = 64
SELECTED_BLOCKS = (0, 1, 2, 4)   # Encoder features 4, 5, 6, 8 ; feature 11 = conv_head


# ------------------------------ small helpers ------------------------------

def _round_up(x, m):
    return (x + m - 1) // m * m


def _dims(h, w):
    """Padded-flat frame geometry for an HxW image (halo ring of 1, lane-pad to 128)."""
    hp, wp = h + 2, w + 2
    praw = hp * wp
    return {'h': h, 'w': w, 'hp': hp, 'wp': wp, 'praw': praw,
            'p': _round_up(praw, 128)}


def _make_mask(d):
    """(1, P) f32 mask: 1.0 on interior pixels, 0.0 on halo ring / lane padding."""
    m = np.zeros((1, d['p']), np.float32)
    for r in range(1, d['h'] + 1):
        m[0, r * d['wp'] + 1: r * d['wp'] + 1 + d['w']] = 1.0
    return jnp.asarray(m)


def _make_subsample_matrix(d_in, d_out, stride):
    """Exact 0/1 matrix (P_in, P_out): stride-subsample the interior of the input
    padded-flat frame and re-embed it (with a zero halo ring) into the output frame."""
    t = np.zeros((d_in['p'], d_out['p']), np.float32)
    for i in range(d_out['h']):
        for j in range(d_out['w']):
            src = (1 + stride * i) * d_in['wp'] + (1 + stride * j)
            dst = (1 + i) * d_out['wp'] + (1 + j)
            t[src, dst] = 1.0
    return jnp.asarray(t, jnp.bfloat16)            # 0/1 is exact in bf16


def _fold_bn(bn, eps=1e-3):                        # timm EfficientNet uses eps=1e-3
    gamma, beta, mean, var = bn
    scale = gamma / jnp.sqrt(var + eps)
    shift = beta - mean * scale
    return scale, shift


def _make_stem_taps(x_nhwc, d):
    """Wrapper-side 9-tap stack of the (tiny) stem input: (N, 9*Cin, P)."""
    n, _, _, c = x_nhwc.shape
    xp = jnp.pad(x_nhwc, ((0, 0), (2, 2), (2, 2), (0, 0)))       # halo-of-2 pad
    taps = [xp[:, dy:dy + d['hp'], dx:dx + d['wp'], :]
            for dy in range(3) for dx in range(3)]               # tap k = dy*3+dx
    t = jnp.concatenate(taps, axis=-1).reshape(n, d['praw'], 9 * c)
    t = jnp.pad(t, ((0, 0), (0, d['p'] - d['praw']), (0, 0)))
    return jnp.transpose(t, (0, 2, 1)).astype(jnp.bfloat16)      # (N, 9*Cin, P)


# ------------------------------ kernel helpers ------------------------------

def _silu(z):
    # z * sigmoid(z); exp and the approximate reciprocal both run on the EUP slot.
    return z * pl.reciprocal(1.0 + jnp.exp(-z), approx=True)


def _depthwise3x3(h, wd, wp, p):
    """3x3 depthwise conv in the (C, P) flat padded layout.

    `h` must have a zero halo ring / zero lane-pad.  Uses only 4 full-tensor lane
    rolls: the two horizontal taps are computed once and reused for all 3 rows,
    then the per-row combinations are shifted vertically by +/-wp.
    """
    hm1 = pltpu.roll(h, shift=1, axis=1)          # h[:, p-1]
    hp1 = pltpu.roll(h, shift=p - 1, axis=1)      # h[:, p+1]
    rows = []
    for a in range(3):                            # a = dy + 1
        rows.append(hm1 * wd[:, 3 * a:3 * a + 1]
                    + h * wd[:, 3 * a + 1:3 * a + 2]
                    + hp1 * wd[:, 3 * a + 2:3 * a + 3])
    out = rows[1]
    out = out + pltpu.roll(rows[0], shift=wp, axis=1)      # dy = -1 taps
    out = out + pltpu.roll(rows[2], shift=p - wp, axis=1)  # dy = +1 taps
    return out


# ------------------------------ fused backbone kernel ------------------------------

def _backbone_kernel(*refs, n_masks, block_meta, num_feats):
    ins = iter(refs[:len(refs) - num_feats])
    outs = refs[len(refs) - num_feats:]

    def load():
        return next(ins)[...]

    x_taps = load()                    # (9*Cin, P0) bf16
    w_stem = load()                    # (STEM_C, 9*Cin) bf16 (BN folded)
    b_stem = load()                    # (STEM_C, 1) f32
    t_stem = load()                    # (P0, P1) bf16 subsample+repad matrix
    masks = [load() for _ in range(n_masks)]

    # ---- conv_stem (single K=27 matmul) + bn1 + act1 ----
    s = jnp.dot(w_stem, x_taps, preferred_element_type=jnp.float32)
    s = _silu(s + b_stem)
    # stride-2 subsample + re-embed into the zero-halo 16x16 padded frame
    x = jnp.dot(s.astype(jnp.bfloat16), t_stem, preferred_element_type=jnp.float32)

    # ---- MBConv blocks ----
    # TODO(synk): the squeeze-excite gate of the real EfficientNet MBConv is omitted
    # in this synthetic backend (the Encoder wrapper itself is backend-agnostic).
    fi = 0
    for (has_expand, has_residual, is_stride2,
         wp_in, p_in, mask_idx, selected) in block_meta:
        if has_expand:
            w_exp = load()
            b_exp = load()
            h = _silu(jnp.dot(w_exp, x.astype(jnp.bfloat16),
                              preferred_element_type=jnp.float32) + b_exp)
        else:
            h = x
        h = h * masks[mask_idx]                 # zero halo ring + lane pad (conv padding)

        w_dw = load()
        b_dw = load()
        d = _silu(_depthwise3x3(h, w_dw, wp_in, p_in) + b_dw)

        w_proj = load()
        b_proj = load()
        if is_stride2:
            t_blk = load()                      # subsample BEFORE the project matmul
            d = jnp.dot(d.astype(jnp.bfloat16), t_blk,
                        preferred_element_type=jnp.float32)
        y = jnp.dot(w_proj, d.astype(jnp.bfloat16),
                    preferred_element_type=jnp.float32) + b_proj
        if has_residual:
            y = y + x
        x = y
        if selected:
            outs[fi][...] = y.astype(outs[fi].dtype)
            fi += 1

    # ---- conv_head (feature 11); bn2/act2/pool/classifier are dead -> skipped ----
    w_head = load()
    z = jnp.dot(w_head, x.astype(jnp.bfloat16), preferred_element_type=jnp.float32)
    outs[-1][...] = z.astype(outs[-1].dtype)


# ------------------------- synthetic backend params -------------------------

def _conv_init(key, shape, scale=0.1):
    return scale * jax.random.normal(key, shape, jnp.float32)


def _bn_init(key, c):
    k1, k2, k3, k4 = jax.random.split(key, 4)
    gamma = 1.0 + 0.1 * jax.random.normal(k1, (c,), jnp.float32)
    beta = 0.1 * jax.random.normal(k2, (c,), jnp.float32)
    mean = 0.1 * jax.random.normal(k3, (c,), jnp.float32)
    var = 1.0 + 0.1 * jax.random.uniform(k4, (c,), jnp.float32)
    return (gamma, beta, mean, var)


def init_backend_params(key):
    keys = jax.random.split(key, 64)
    ki = iter(keys)
    params = {'stem_w': _conv_init(next(ki), (3, 3, 3, STEM_C)),
              'bn1': _bn_init(next(ki), STEM_C)}
    blocks = []
    for (cin, cout, stride, expand) in BLOCK_CFG:
        cmid = cin * expand
        p = {}
        if expand != 1:
            p['w_exp'] = _conv_init(next(ki), (cin, cmid))
            p['bn_exp'] = _bn_init(next(ki), cmid)
        p['w_dw'] = _conv_init(next(ki), (3, 3, cmid))
        p['bn_dw'] = _bn_init(next(ki), cmid)
        p['w_proj'] = _conv_init(next(ki), (cmid, cout))
        p['bn_proj'] = _bn_init(next(ki), cout)
        blocks.append(p)
    params['blocks'] = blocks
    params['head_w'] = _conv_init(next(ki), (BLOCK_CFG[-1][1], HEAD_C))
    return params


def _fold_block_params(p, cfg):
    """Fold BN into conv weights and transpose to the (Cout, Cin)/(Cmid, 9) kernel layouts."""
    cin, cout, _, expand = cfg
    cmid = cin * expand
    out = {}
    if expand != 1:
        s, b = _fold_bn(p['bn_exp'])
        out['w_exp'] = (p['w_exp'] * s[None, :]).T.astype(jnp.bfloat16)   # (cmid, cin)
        out['b_exp'] = b.reshape(cmid, 1)
    s, b = _fold_bn(p['bn_dw'])
    out['w_dw'] = (p['w_dw'] * s[None, None, :]).reshape(9, cmid).T       # (cmid, 9) f32
    out['b_dw'] = b.reshape(cmid, 1)
    s, b = _fold_bn(p['bn_proj'])
    out['w_proj'] = (p['w_proj'] * s[None, :]).T.astype(jnp.bfloat16)     # (cout, cmid)
    out['b_proj'] = b.reshape(cout, 1)
    return out


# --------------------------------- Encoder ---------------------------------

def encoder_forward(x_nchw, params):
    """Mirrors Encoder.forward over the synthetic backend with a single fused
    Pallas kernel; returns features [4, 5, 6, 8, 11] in NCHW."""
    n, cin_img, h0, w0 = x_nchw.shape
    x_nhwc = jnp.transpose(x_nchw, (0, 2, 3, 1)).astype(jnp.float32)

    # ---- static geometry of the resolution chain ----
    d_stem_in = _dims(h0, w0)
    d_cur = _dims(h0 // 2, w0 // 2)                      # after the stride-2 stem
    block_dims_in, block_dims_out = [], []
    for (_, _, stride, _) in BLOCK_CFG:
        block_dims_in.append(d_cur)
        if stride == 2:
            d_cur = _dims(d_cur['h'] // 2, d_cur['w'] // 2)
        block_dims_out.append(d_cur)

    # distinct block-input resolutions -> tiny precomputed interior masks
    mask_keys, mask_arrays = [], []
    for d in block_dims_in:
        key = (d['h'], d['w'])
        if key not in mask_keys:
            mask_keys.append(key)
            mask_arrays.append(_make_mask(d))
    mask_idx_of = {k: i for i, k in enumerate(mask_keys)}

    # ---- fold BN into the stem weight, build the tap-stacked stem input ----
    s1, b1 = _fold_bn(params['bn1'])
    w_stem = (params['stem_w'] * s1[None, None, None, :]) \
        .reshape(9 * cin_img, STEM_C).T.astype(jnp.bfloat16)     # (STEM_C, 27)
    b_stem = b1.reshape(STEM_C, 1)
    x_taps = _make_stem_taps(x_nhwc, d_stem_in)                  # (N, 27, P0)

    # ---- assemble the single fused pallas_call ----
    inputs, in_specs = [], []

    def add_batched(a):
        inputs.append(a)
        in_specs.append(pl.BlockSpec((None,) + a.shape[1:],
                                     lambda i, _k=a.ndim - 1: (i,) + (0,) * _k))

    def add_const(a):
        inputs.append(a)
        in_specs.append(pl.BlockSpec(a.shape, lambda i, _nd=a.ndim: (0,) * _nd))

    add_batched(x_taps)
    add_const(w_stem)
    add_const(b_stem)
    add_const(_make_subsample_matrix(d_stem_in, block_dims_in[0], 2))
    for m in mask_arrays:
        add_const(m)

    block_meta = []
    for bi, cfg in enumerate(BLOCK_CFG):
        cin, cout, stride, expand = cfg
        fp = _fold_block_params(params['blocks'][bi], cfg)
        d_in, d_out = block_dims_in[bi], block_dims_out[bi]
        if expand != 1:
            add_const(fp['w_exp'])
            add_const(fp['b_exp'])
        add_const(fp['w_dw'])
        add_const(fp['b_dw'])
        add_const(fp['w_proj'])
        add_const(fp['b_proj'])
        if stride == 2:
            add_const(_make_subsample_matrix(d_in, d_out, 2))
        block_meta.append((expand != 1,
                           stride == 1 and cin == cout,
                           stride == 2,
                           d_in['wp'], d_in['p'],
                           mask_idx_of[(d_in['h'], d_in['w'])],
                           bi in SELECTED_BLOCKS))
    add_const(params['head_w'].T.astype(jnp.bfloat16))           # (HEAD_C, 48)

    # outputs: selected block outputs + conv_head, all lane-dense (C, 128*k) blocks
    feat_meta = [(BLOCK_CFG[bi][1], block_dims_out[bi]) for bi in SELECTED_BLOCKS]
    feat_meta.append((HEAD_C, block_dims_out[-1]))
    out_shape = tuple(jax.ShapeDtypeStruct((n, c, d['p']), jnp.float32)
                      for c, d in feat_meta)
    out_specs = tuple(pl.BlockSpec((None, c, d['p']), lambda i: (i, 0, 0))
                      for c, d in feat_meta)

    kernel = functools.partial(_backbone_kernel,
                               n_masks=len(mask_arrays),
                               block_meta=tuple(block_meta),
                               num_feats=len(feat_meta))
    raw = pl.pallas_call(
        kernel,
        out_shape=out_shape,
        grid=(n,),
        in_specs=in_specs,
        out_specs=out_specs,
        compiler_params=pltpu.CompilerParams(
            dimension_semantics=("parallel",)),        # shards batch over v7x's 2 TCs
    )(*inputs)

    # ---- wrapper-side layout plumbing: padded-flat (C, P) -> NCHW interior ----
    feats = []
    for r, (c, d) in zip(raw, feat_meta):
        img = r[:, :, :d['praw']].reshape(n, c, d['hp'], d['wp'])
        feats.append(img[:, :, 1:d['h'] + 1, 1:d['w'] + 1])
    return feats


if __name__ == "__main__":
    key = jax.random.PRNGKey(0)
    pkey, xkey = jax.random.split(key)
    params = init_backend_params(pkey)
    x = jax.random.normal(xkey, (2, 3, 32, 32), jnp.float32)      # NCHW, like PyTorch

    feats = jax.jit(encoder_forward)(x, params)
    feats = jax.block_until_ready(feats)

    expected = [(2, 8, 16, 16), (2, 12, 8, 8), (2, 16, 4, 4), (2, 32, 2, 2), (2, 64, 1, 1)]
    got = [tuple(f.shape) for f in feats]
    assert got == expected, f"unexpected feature shapes: {got}"
    assert all(bool(jnp.all(jnp.isfinite(f))) for f in feats), "non-finite outputs"
    print("KERNEL_OK")
</pallas_src>

<mosaic_0001>
module attributes {stable_mosaic.version = 11 : i64} {
  func.func @_backbone_kernel(%arg0: i32, %arg1: memref<1x27x1280xbf16, #tpu.memory_space<vmem>>, %arg2: memref<8x27xbf16, #tpu.memory_space<vmem>>, %arg3: memref<8x1xf32, #tpu.memory_space<vmem>>, %arg4: memref<1280x384xbf16, #tpu.memory_space<vmem>>, %arg5: memref<1x384xf32, #tpu.memory_space<vmem>>, %arg6: memref<1x128xf32, #tpu.memory_space<vmem>>, %arg7: memref<1x128xf32, #tpu.memory_space<vmem>>, %arg8: memref<1x128xf32, #tpu.memory_space<vmem>>, %arg9: memref<1x128xf32, #tpu.memory_space<vmem>>, %arg10: memref<8x9xf32, #tpu.memory_space<vmem>>, %arg11: memref<8x1xf32, #tpu.memory_space<vmem>>, %arg12: memref<8x8xbf16, #tpu.memory_space<vmem>>, %arg13: memref<8x1xf32, #tpu.memory_space<vmem>>, %arg14: memref<16x8xbf16, #tpu.memory_space<vmem>>, %arg15: memref<16x1xf32, #tpu.memory_space<vmem>>, %arg16: memref<16x9xf32, #tpu.memory_space<vmem>>, %arg17: memref<16x1xf32, #tpu.memory_space<vmem>>, %arg18: memref<12x16xbf16, #tpu.memory_space<vmem>>, %arg19: memref<12x1xf32, #tpu.memory_space<vmem>>, %arg20: memref<384x128xbf16, #tpu.memory_space<vmem>>, %arg21: memref<24x12xbf16, #tpu.memory_space<vmem>>, %arg22: memref<24x1xf32, #tpu.memory_space<vmem>>, %arg23: memref<24x9xf32, #tpu.memory_space<vmem>>, %arg24: memref<24x1xf32, #tpu.memory_space<vmem>>, %arg25: memref<16x24xbf16, #tpu.memory_space<vmem>>, %arg26: memref<16x1xf32, #tpu.memory_space<vmem>>, %arg27: memref<128x128xbf16, #tpu.memory_space<vmem>>, %arg28: memref<32x16xbf16, #tpu.memory_space<vmem>>, %arg29: memref<32x1xf32, #tpu.memory_space<vmem>>, %arg30: memref<32x9xf32, #tpu.memory_space<vmem>>, %arg31: memref<32x1xf32, #tpu.memory_space<vmem>>, %arg32: memref<24x32xbf16, #tpu.memory_space<vmem>>, %arg33: memref<24x1xf32, #tpu.memory_space<vmem>>, %arg34: memref<128x128xbf16, #tpu.memory_space<vmem>>, %arg35: memref<48x24xbf16, #tpu.memory_space<vmem>>, %arg36: memref<48x1xf32, #tpu.memory_space<vmem>>, %arg37: memref<48x9xf32, #tpu.memory_space<vmem>>, %arg38: memref<48x1xf32, #tpu.memory_space<vmem>>, %arg39: memref<32x48xbf16, #tpu.memory_space<vmem>>, %arg40: memref<32x1xf32, #tpu.memory_space<vmem>>, %arg41: memref<64x32xbf16, #tpu.memory_space<vmem>>, %arg42: memref<64x1xf32, #tpu.memory_space<vmem>>, %arg43: memref<64x9xf32, #tpu.memory_space<vmem>>, %arg44: memref<64x1xf32, #tpu.memory_space<vmem>>, %arg45: memref<40x64xbf16, #tpu.memory_space<vmem>>, %arg46: memref<40x1xf32, #tpu.memory_space<vmem>>, %arg47: memref<128x128xbf16, #tpu.memory_space<vmem>>, %arg48: memref<80x40xbf16, #tpu.memory_space<vmem>>, %arg49: memref<80x1xf32, #tpu.memory_space<vmem>>, %arg50: memref<80x9xf32, #tpu.memory_space<vmem>>, %arg51: memref<80x1xf32, #tpu.memory_space<vmem>>, %arg52: memref<48x80xbf16, #tpu.memory_space<vmem>>, %arg53: memref<48x1xf32, #tpu.memory_space<vmem>>, %arg54: memref<64x48xbf16, #tpu.memory_space<vmem>>, %arg55: memref<1x8x384xf32, #tpu.memory_space<vmem>>, %arg56: memref<1x12x128xf32, #tpu.memory_space<vmem>>, %arg57: memref<1x16x128xf32, #tpu.memory_space<vmem>>, %arg58: memref<1x32x128xf32, #tpu.memory_space<vmem>>, %arg59: memref<1x64x128xf32, #tpu.memory_space<vmem>>) attributes {dimension_semantics = [#tpu.dimension_semantics<parallel>], iteration_bounds = array<i64: 2>, scalar_prefetch = 0 : i64, scratch_operands = 0 : i64, tpu.core_type = #tpu.core_type<tc>, window_params = [{transform_indices = @transform_0, window_bounds = array<i64: 1, 27, 1280>}, {pipeline_mode = #tpu.pipeline_mode<synchronous>, transform_indices = @transform_1, window_bounds = array<i64: 8, 27>}, {pipeline_mode = #tpu.pipeline_mode<synchronous>, transform_indices = @transform_2, window_bounds = array<i64: 8, 1>}, {pipeline_mode = #tpu.pipeline_mode<synchronous>, transform_indices = @transform_3, window_bounds = array<i64: 1280, 384>}, {pipeline_mode = #tpu.pipeline_mode<synchronous>, transform_indices = @transform_4, window_bounds = array<i64: 1, 384>}, {pipeline_mode = #tpu.pipeline_mode<synchronous>, transform_indices = @transform_5, window_bounds = array<i64: 1, 128>}, {pipeline_mode = #tpu.pipeline_mode<synchronous>, transform_indices = @transform_6, window_bounds = array<i64: 1, 128>}, {pipeline_mode = #tpu.pipeline_mode<synchronous>, transform_indices = @transform_7, window_bounds = array<i64: 1, 128>}, {pipeline_mode = #tpu.pipeline_mode<synchronous>, transform_indices = @transform_8, window_bounds = array<i64: 1, 128>}, {pipeline_mode = #tpu.pipeline_mode<synchronous>, transform_indices = @transform_9, window_bounds = array<i64: 8, 9>}, {pipeline_mode = #tpu.pipeline_mode<synchronous>, transform_indices = @transform_10, window_bounds = array<i64: 8, 1>}, {pipeline_mode = #tpu.pipeline_mode<synchronous>, transform_indices = @transform_11, window_bounds = array<i64: 8, 8>}, {pipeline_mode = #tpu.pipeline_mode<synchronous>, transform_indices = @transform_12, window_bounds = array<i64: 8, 1>}, {pipeline_mode = #tpu.pipeline_mode<synchronous>, transform_indices = @transform_13, window_bounds = array<i64: 16, 8>}, {pipeline_mode = #tpu.pipeline_mode<synchronous>, transform_indices = @transform_14, window_bounds = array<i64: 16, 1>}, {pipeline_mode = #tpu.pipeline_mode<synchronous>, transform_indices = @transform_15, window_bounds = array<i64: 16, 9>}, {pipeline_mode = #tpu.pipeline_mode<synchronous>, transform_indices = @transform_16, window_bounds = array<i64: 16, 1>}, {pipeline_mode = #tpu.pipeline_mode<synchronous>, transform_indices = @transform_17, window_bounds = array<i64: 12, 16>}, {pipeline_mode = #tpu.pipeline_mode<synchronous>, transform_indices = @transform_18, window_bounds = array<i64: 12, 1>}, {pipeline_mode = #tpu.pipeline_mode<synchronous>, transform_indices = @transform_19, window_bounds = array<i64: 384, 128>}, {pipeline_mode = #tpu.pipeline_mode<synchronous>, transform_indices = @transform_20, window_bounds = array<i64: 24, 12>}, {pipeline_mode = #tpu.pipeline_mode<synchronous>, transform_indices = @transform_21, window_bounds = array<i64: 24, 1>}, {pipeline_mode = #tpu.pipeline_mode<synchronous>, transform_indices = @transform_22, window_bounds = array<i64: 24, 9>}, {pipeline_mode = #tpu.pipeline_mode<synchronous>, transform_indices = @transform_23, window_bounds = array<i64: 24, 1>}, {pipeline_mode = #tpu.pipeline_mode<synchronous>, transform_indices = @transform_24, window_bounds = array<i64: 16, 24>}, {pipeline_mode = #tpu.pipeline_mode<synchronous>, transform_indices = @transform_25, window_bounds = array<i64: 16, 1>}, {pipeline_mode = #tpu.pipeline_mode<synchronous>, transform_indices = @transform_26, window_bounds = array<i64: 128, 128>}, {pipeline_mode = #tpu.pipeline_mode<synchronous>, transform_indices = @transform_27, window_bounds = array<i64: 32, 16>}, {pipeline_mode = #tpu.pipeline_mode<synchronous>, transform_indices = @transform_28, window_bounds = array<i64: 32, 1>}, {pipeline_mode = #tpu.pipeline_mode<synchronous>, transform_indices = @transform_29, window_bounds = array<i64: 32, 9>}, {pipeline_mode = #tpu.pipeline_mode<synchronous>, transform_indices = @transform_30, window_bounds = array<i64: 32, 1>}, {pipeline_mode = #tpu.pipeline_mode<synchronous>, transform_indices = @transform_31, window_bounds = array<i64: 24, 32>}, {pipeline_mode = #tpu.pipeline_mode<synchronous>, transform_indices = @transform_32, window_bounds = array<i64: 24, 1>}, {pipeline_mode = #tpu.pipeline_mode<synchronous>, transform_indices = @transform_33, window_bounds = array<i64: 128, 128>}, {pipeline_mode = #tpu.pipeline_mode<synchronous>, transform_indices = @transform_34, window_bounds = array<i64: 48, 24>}, {pipeline_mode = #tpu.pipeline_mode<synchronous>, transform_indices = @transform_35, window_bounds = array<i64: 48, 1>}, {pipeline_mode = #tpu.pipeline_mode<synchronous>, transform_indices = @transform_36, window_bounds = array<i64: 48, 9>}, {pipeline_mode = #tpu.pipeline_mode<synchronous>, transform_indices = @transform_37, window_bounds = array<i64: 48, 1>}, {pipeline_mode = #tpu.pipeline_mode<synchronous>, transform_indices = @transform_38, window_bounds = array<i64: 32, 48>}, {pipeline_mode = #tpu.pipeline_mode<synchronous>, transform_indices = @transform_39, window_bounds = array<i64: 32, 1>}, {pipeline_mode = #tpu.pipeline_mode<synchronous>, transform_indices = @transform_40, window_bounds = array<i64: 64, 32>}, {pipeline_mode = #tpu.pipeline_mode<synchronous>, transform_indices = @transform_41, window_bounds = array<i64: 64, 1>}, {pipeline_mode = #tpu.pipeline_mode<synchronous>, transform_indices = @transform_42, window_bounds = array<i64: 64, 9>}, {pipeline_mode = #tpu.pipeline_mode<synchronous>, transform_indices = @transform_43, window_bounds = array<i64: 64, 1>}, {pipeline_mode = #tpu.pipeline_mode<synchronous>, transform_indices = @transform_44, window_bounds = array<i64: 40, 64>}, {pipeline_mode = #tpu.pipeline_mode<synchronous>, transform_indices = @transform_45, window_bounds = array<i64: 40, 1>}, {pipeline_mode = #tpu.pipeline_mode<synchronous>, transform_indices = @transform_46, window_bounds = array<i64: 128, 128>}, {pipeline_mode = #tpu.pipeline_mode<synchronous>, transform_indices = @transform_47, window_bounds = array<i64: 80, 40>}, {pipeline_mode = #tpu.pipeline_mode<synchronous>, transform_indices = @transform_48, window_bounds = array<i64: 80, 1>}, {pipeline_mode = #tpu.pipeline_mode<synchronous>, transform_indices = @transform_49, window_bounds = array<i64: 80, 9>}, {pipeline_mode = #tpu.pipeline_mode<synchronous>, transform_indices = @transform_50, window_bounds = array<i64: 80, 1>}, {pipeline_mode = #tpu.pipeline_mode<synchronous>, transform_indices = @transform_51, window_bounds = array<i64: 48, 80>}, {pipeline_mode = #tpu.pipeline_mode<synchronous>, transform_indices = @transform_52, window_bounds = array<i64: 48, 1>}, {pipeline_mode = #tpu.pipeline_mode<synchronous>, transform_indices = @transform_53, window_bounds = array<i64: 64, 48>}, {transform_indices = @transform_54, window_bounds = array<i64: 1, 8, 384>}, {transform_indices = @transform_55, window_bounds = array<i64: 1, 12, 128>}, {transform_indices = @transform_56, window_bounds = array<i64: 1, 16, 128>}, {transform_indices = @transform_57, window_bounds = array<i64: 1, 32, 128>}, {transform_indices = @transform_58, window_bounds = array<i64: 1, 64, 128>}]} {
    %c0 = arith.constant 0 : index
    %c0_0 = arith.constant 0 : index
    %c0_1 = arith.constant 0 : index
    %0 = vector.load %arg1[%c0, %c0_0, %c0_1] : memref<1x27x1280xbf16, #tpu.memory_space<vmem>>, vector<1x27x1280xbf16>
    %1 = vector.shape_cast %0 : vector<1x27x1280xbf16> to vector<27x1280xbf16>
    %c0_2 = arith.constant 0 : index
    %c0_3 = arith.constant 0 : index
    %2 = vector.load %arg2[%c0_2, %c0_3] : memref<8x27xbf16, #tpu.memory_space<vmem>>, vector<8x27xbf16>
    %c0_4 = arith.constant 0 : index
    %c0_5 = arith.constant 0 : index
    %3 = vector.load %arg3[%c0_4, %c0_5] : memref<8x1xf32, #tpu.memory_space<vmem>>, vector<8x1xf32>
    %c0_6 = arith.constant 0 : index
    %c0_7 = arith.constant 0 : index
    %4 = vector.load %arg4[%c0_6, %c0_7] : memref<1280x384xbf16, #tpu.memory_space<vmem>>, vector<1280x384xbf16>
    %c0_8 = arith.constant 0 : index
    %c0_9 = arith.constant 0 : index
    %5 = vector.load %arg5[%c0_8, %c0_9] : memref<1x384xf32, #tpu.memory_space<vmem>>, vector<1x384xf32>
    %c0_10 = arith.constant 0 : index
    %c0_11 = arith.constant 0 : index
    %6 = vector.load %arg6[%c0_10, %c0_11] : memref<1x128xf32, #tpu.memory_space<vmem>>, vector<1x128xf32>
    %c0_12 = arith.constant 0 : index
    %c0_13 = arith.constant 0 : index
    %7 = vector.load %arg7[%c0_12, %c0_13] : memref<1x128xf32, #tpu.memory_space<vmem>>, vector<1x128xf32>
    %c0_14 = arith.constant 0 : index
    %c0_15 = arith.constant 0 : index
    %8 = vector.load %arg8[%c0_14, %c0_15] : memref<1x128xf32, #tpu.memory_space<vmem>>, vector<1x128xf32>
    %c0_16 = arith.constant 0 : index
    %c0_17 = arith.constant 0 : index
    %9 = vector.load %arg9[%c0_16, %c0_17] : memref<1x128xf32, #tpu.memory_space<vmem>>, vector<1x128xf32>
    %cst = arith.constant dense<0.000000e+00> : vector<8x1280xf32>
    %10 = tpu.matmul %2, %1, %cst {dimension_numbers = #tpu.dot_dimension_numbers<[1], [0], [0], [1], [0, 0, 1, 1], [], []>} : vector<8x27xbf16>, vector<27x1280xbf16>, vector<8x1280xf32> -> vector<8x1280xf32>
    %11 = vector.broadcast %3 : vector<8x1xf32> to vector<8x1280xf32>
    %12 = arith.addf %10, %11 : vector<8x1280xf32>
    %cst_18 = arith.constant 0.000000e+00 : f32
    %13 = vector.broadcast %cst_18 : f32 to vector<8x1280xf32>
    %14 = arith.subf %13, %12 : vector<8x1280xf32>
    %15 = math.exp %14 : vector<8x1280xf32>
    %cst_19 = arith.constant 1.000000e+00 : f32
    %16 = vector.broadcast %cst_19 : f32 to vector<8x1280xf32>
    %17 = arith.addf %16, %15 : vector<8x1280xf32>
    %18 = tpu.reciprocal %17 {approx = true} : vector<8x1280xf32> -> vector<8x1280xf32>
    %19 = arith.mulf %12, %18 : vector<8x1280xf32>
    %20 = arith.truncf %19 : vector<8x1280xf32> to vector<8x1280xbf16>
    %cst_20 = arith.constant dense<0.000000e+00> : vector<8x384xf32>
    %21 = tpu.matmul %20, %4, %cst_20 {dimension_numbers = #tpu.dot_dimension_numbers<[1], [0], [0], [1], [0, 0, 1, 1], [], []>} : vector<8x1280xbf16>, vector<1280x384xbf16>, vector<8x384xf32> -> vector<8x384xf32>
    %22 = vector.broadcast %5 : vector<1x384xf32> to vector<8x384xf32>
    %23 = arith.mulf %21, %22 : vector<8x384xf32>
    %c0_21 = arith.constant 0 : index
    %c0_22 = arith.constant 0 : index
    %24 = vector.load %arg10[%c0_21, %c0_22] : memref<8x9xf32, #tpu.memory_space<vmem>>, vector<8x9xf32>
    %c0_23 = arith.constant 0 : index
    %c0_24 = arith.constant 0 : index
    %25 = vector.load %arg11[%c0_23, %c0_24] : memref<8x1xf32, #tpu.memory_space<vmem>>, vector<8x1xf32>
    %c1_i32 = arith.constant 1 : i32
    %26 = tpu.dynamic_rotate %23 by %c1_i32 dim 1 : vector<8x384xf32>, i32 -> vector<8x384xf32>
    %c383_i32 = arith.constant 383 : i32
    %27 = tpu.dynamic_rotate %23 by %c383_i32 dim 1 : vector<8x384xf32>, i32 -> vector<8x384xf32>
    %28 = vector.extract_strided_slice %24 {offsets = [0, 0], sizes = [8, 1], strides = [1, 1]} : vector<8x9xf32> to vector<8x1xf32>
    %29 = vector.broadcast %28 : vector<8x1xf32> to vector<8x384xf32>
    %30 = arith.mulf %26, %29 : vector<8x384xf32>
    %31 = vector.extract_strided_slice %24 {offsets = [0, 1], sizes = [8, 1], strides = [1, 1]} : vector<8x9xf32> to vector<8x1xf32>
    %32 = vector.broadcast %31 : vector<8x1xf32> to vector<8x384xf32>
    %33 = arith.mulf %23, %32 : vector<8x384xf32>
    %34 = arith.addf %30, %33 : vector<8x384xf32>
    %35 = vector.extract_strided_slice %24 {offsets = [0, 2], sizes = [8, 1], strides = [1, 1]} : vector<8x9xf32> to vector<8x1xf32>
    %36 = vector.broadcast %35 : vector<8x1xf32> to vector<8x384xf32>
    %37 = arith.mulf %27, %36 : vector<8x384xf32>
    %38 = arith.addf %34, %37 : vector<8x384xf32>
    %39 = vector.extract_strided_slice %24 {offsets = [0, 3], sizes = [8, 1], strides = [1, 1]} : vector<8x9xf32> to vector<8x1xf32>
    %40 = vector.broadcast %39 : vector<8x1xf32> to vector<8x384xf32>
    %41 = arith.mulf %26, %40 : vector<8x384xf32>
    %42 = vector.extract_strided_slice %24 {offsets = [0, 4], sizes = [8, 1], strides = [1, 1]} : vector<8x9xf32> to vector<8x1xf32>
    %43 = vector.broadcast %42 : vector<8x1xf32> to vector<8x384xf32>
    %44 = arith.mulf %23, %43 : vector<8x384xf32>
    %45 = arith.addf %41, %44 : vector<8x384xf32>
    %46 = vector.extract_strided_slice %24 {offsets = [0, 5], sizes = [8, 1], strides = [1, 1]} : vector<8x9xf32> to vector<8x1xf32>
    %47 = vector.broadcast %46 : vector<8x1xf32> to vector<8x384xf32>
    %48 = arith.mulf %27, %47 : vector<8x384xf32>
    %49 = arith.addf %45, %48 : vector<8x384xf32>
    %50 = vector.extract_strided_slice %24 {offsets = [0, 6], sizes = [8, 1], strides = [1, 1]} : vector<8x9xf32> to vector<8x1xf32>
    %51 = vector.broadcast %50 : vector<8x1xf32> to vector<8x384xf32>
    %52 = arith.mulf %26, %51 : vector<8x384xf32>
    %53 = vector.extract_strided_slice %24 {offsets = [0, 7], sizes = [8, 1], strides = [1, 1]} : vector<8x9xf32> to vector<8x1xf32>
    %54 = vector.broadcast %53 : vector<8x1xf32> to vector<8x384xf32>
    %55 = arith.mulf %23, %54 : vector<8x384xf32>
    %56 = arith.addf %52, %55 : vector<8x384xf32>
    %57 = vector.extract_strided_slice %24 {offsets = [0, 8], sizes = [8, 1], strides = [1, 1]} : vector<8x9xf32> to vector<8x1xf32>
    %58 = vector.broadcast %57 : vector<8x1xf32> to vector<8x384xf32>
    %59 = arith.mulf %27, %58 : vector<8x384xf32>
    %60 = arith.addf %56, %59 : vector<8x384xf32>
    %c18_i32 = arith.constant 18 : i32
    %61 = tpu.dynamic_rotate %38 by %c18_i32 dim 1 : vector<8x384xf32>, i32 -> vector<8x384xf32>
    %62 = arith.addf %49, %61 : vector<8x384xf32>
    %c366_i32 = arith.constant 366 : i32
    %63 = tpu.dynamic_rotate %60 by %c366_i32 dim 1 : vector<8x384xf32>, i32 -> vector<8x384xf32>
    %64 = arith.addf %62, %63 : vector<8x384xf32>
    %65 = vector.broadcast %25 : vector<8x1xf32> to vector<8x384xf32>
    %66 = arith.addf %64, %65 : vector<8x384xf32>
    %cst_25 = arith.constant 0.000000e+00 : f32
    %67 = vector.broadcast %cst_25 : f32 to vector<8x384xf32>
    %68 = arith.subf %67, %66 : vector<8x384xf32>
    %69 = math.exp %68 : vector<8x384xf32>
    %cst_26 = arith.constant 1.000000e+00 : f32
    %70 = vector.broadcast %cst_26 : f32 to vector<8x384xf32>
    %71 = arith.addf %70, %69 : vector<8x384xf32>
    %72 = tpu.reciprocal %71 {approx = true} : vector<8x384xf32> -> vector<8x384xf32>
    %73 = arith.mulf %66, %72 : vector<8x384xf32>
    %c0_27 = arith.constant 0 : index
    %c0_28 = arith.constant 0 : index
    %74 = vector.load %arg12[%c0_27, %c0_28] : memref<8x8xbf16, #tpu.memory_space<vmem>>, vector<8x8xbf16>
    %c0_29 = arith.constant 0 : index
    %c0_30 = arith.constant 0 : index
    %75 = vector.load %arg13[%c0_29, %c0_30] : memref<8x1xf32, #tpu.memory_space<vmem>>, vector<8x1xf32>
    %76 = arith.truncf %73 : vector<8x384xf32> to vector<8x384xbf16>
    %cst_31 = arith.constant dense<0.000000e+00> : vector<8x384xf32>
    %77 = tpu.matmul %74, %76, %cst_31 {dimension_numbers = #tpu.dot_dimension_numbers<[1], [0], [0], [1], [0, 0, 1, 1], [], []>} : vector<8x8xbf16>, vector<8x384xbf16>, vector<8x384xf32> -> vector<8x384xf32>
    %78 = vector.broadcast %75 : vector<8x1xf32> to vector<8x384xf32>
    %79 = arith.addf %77, %78 : vector<8x384xf32>
    %80 = arith.addf %79, %21 : vector<8x384xf32>
    %c0_32 = arith.constant 0 : index
    %c0_33 = arith.constant 0 : index
    %c0_34 = arith.constant 0 : index
    %81 = vector.load %arg55[%c0_32, %c0_33, %c0_34] : memref<1x8x384xf32, #tpu.memory_space<vmem>>, vector<1x8x384xf32>
    %82 = vector.shape_cast %81 : vector<1x8x384xf32> to vector<8x384xf32>
    %83 = vector.shape_cast %80 : vector<8x384xf32> to vector<1x8x384xf32>
    tpu.vector_store %arg55[%c0_32, %c0_33, %c0_34], %83 {strides = array<i32>} : memref<1x8x384xf32, #tpu.memory_space<vmem>>, vector<1x8x384xf32>,
    %c0_35 = arith.constant 0 : index
    %c0_36 = arith.constant 0 : index
    %84 = vector.load %arg14[%c0_35, %c0_36] : memref<16x8xbf16, #tpu.memory_space<vmem>>, vector<16x8xbf16>
    %c0_37 = arith.constant 0 : index
    %c0_38 = arith.constant 0 : index
    %85 = vector.load %arg15[%c0_37, %c0_38] : memref<16x1xf32, #tpu.memory_space<vmem>>, vector<16x1xf32>
    %86 = arith.truncf %80 : vector<8x384xf32> to vector<8x384xbf16>
    %cst_39 = arith.constant dense<0.000000e+00> : vector<16x384xf32>
    %87 = tpu.matmul %84, %86, %cst_39 {dimension_numbers = #tpu.dot_dimension_numbers<[1], [0], [0], [1], [0, 0, 1, 1], [], []>} : vector<16x8xbf16>, vector<8x384xbf16>, vector<16x384xf32> -> vector<16x384xf32>
    %88 = vector.broadcast %85 : vector<16x1xf32> to vector<16x384xf32>
    %89 = arith.addf %87, %88 : vector<16x384xf32>
    %cst_40 = arith.constant 0.000000e+00 : f32
    %90 = vector.broadcast %cst_40 : f32 to vector<16x384xf32>
    %91 = arith.subf %90, %89 : vector<16x384xf32>
    %92 = math.exp %91 : vector<16x384xf32>
    %cst_41 = arith.constant 1.000000e+00 : f32
    %93 = vector.broadcast %cst_41 : f32 to vector<16x384xf32>
    %94 = arith.addf %93, %92 : vector<16x384xf32>
    %95 = tpu.reciprocal %94 {approx = true} : vector<16x384xf32> -> vector<16x384xf32>
    %96 = arith.mulf %89, %95 : vector<16x384xf32>
    %97 = vector.broadcast %5 : vector<1x384xf32> to vector<16x384xf32>
    %98 = arith.mulf %96, %97 : vector<16x384xf32>
    %c0_42 = arith.constant 0 : index
    %c0_43 = arith.constant 0 : index
    %99 = vector.load %arg16[%c0_42, %c0_43] : memref<16x9xf32, #tpu.memory_space<vmem>>, vector<16x9xf32>
    %c0_44 = arith.constant 0 : index
    %c0_45 = arith.constant 0 : index
    %100 = vector.load %arg17[%c0_44, %c0_45] : memref<16x1xf32, #tpu.memory_space<vmem>>, vector<16x1xf32>
    %c1_i32_46 = arith.constant 1 : i32
    %101 = tpu.dynamic_rotate %98 by %c1_i32_46 dim 1 : vector<16x384xf32>, i32 -> vector<16x384xf32>
    %c383_i32_47 = arith.constant 383 : i32
    %102 = tpu.dynamic_rotate %98 by %c383_i32_47 dim 1 : vector<16x384xf32>, i32 -> vector<16x384xf32>
    %103 = vector.extract_strided_slice %99 {offsets = [0, 0], sizes = [16, 1], strides = [1, 1]} : vector<16x9xf32> to vector<16x1xf32>
    %104 = vector.broadcast %103 : vector<16x1xf32> to vector<16x384xf32>
    %105 = arith.mulf %101, %104 : vector<16x384xf32>
    %106 = vector.extract_strided_slice %99 {offsets = [0, 1], sizes = [16, 1], strides = [1, 1]} : vector<16x9xf32> to vector<16x1xf32>
    %107 = vector.broadcast %106 : vector<16x1xf32> to vector<16x384xf32>
    %108 = arith.mulf %98, %107 : vector<16x384xf32>
    %109 = arith.addf %105, %108 : vector<16x384xf32>
    %110 = vector.extract_strided_slice %99 {offsets = [0, 2], sizes = [16, 1], strides = [1, 1]} : vector<16x9xf32> to vector<16x1xf32>
    %111 = vector.broadcast %110 : vector<16x1xf32> to vector<16x384xf32>
    %112 = arith.mulf %102, %111 : vector<16x384xf32>
    %113 = arith.addf %109, %112 : vector<16x384xf32>
    %114 = vector.extract_strided_slice %99 {offsets = [0, 3], sizes = [16, 1], strides = [1, 1]} : vector<16x9xf32> to vector<16x1xf32>
    %115 = vector.broadcast %114 : vector<16x1xf32> to vector<16x384xf32>
    %116 = arith.mulf %101, %115 : vector<16x384xf32>
    %117 = vector.extract_strided_slice %99 {offsets = [0, 4], sizes = [16, 1], strides = [1, 1]} : vector<16x9xf32> to vector<16x1xf32>
    %118 = vector.broadcast %117 : vector<16x1xf32> to vector<16x384xf32>
    %119 = arith.mulf %98, %118 : vector<16x384xf32>
    %120 = arith.addf %116, %119 : vector<16x384xf32>
    %121 = vector.extract_strided_slice %99 {offsets = [0, 5], sizes = [16, 1], strides = [1, 1]} : vector<16x9xf32> to vector<16x1xf32>
    %122 = vector.broadcast %121 : vector<16x1xf32> to vector<16x384xf32>
    %123 = arith.mulf %102, %122 : vector<16x384xf32>
    %124 = arith.addf %120, %123 : vector<16x384xf32>
    %125 = vector.extract_strided_slice %99 {offsets = [0, 6], sizes = [16, 1], strides = [1, 1]} : vector<16x9xf32> to vector<16x1xf32>
    %126 = vector.broadcast %125 : vector<16x1xf32> to vector<16x384xf32>
    %127 = arith.mulf %101, %126 : vector<16x384xf32>
    %128 = vector.extract_strided_slice %99 {offsets = [0, 7], sizes = [16, 1], strides = [1, 1]} : vector<16x9xf32> to vector<16x1xf32>
    %129 = vector.broadcast %128 : vector<16x1xf32> to vector<16x384xf32>
    %130 = arith.mulf %98, %129 : vector<16x384xf32>
    %131 = arith.addf %127, %130 : vector<16x384xf32>
    %132 = vector.extract_strided_slice %99 {offsets = [0, 8], sizes = [16, 1], strides = [1, 1]} : vector<16x9xf32> to vector<16x1xf32>
    %133 = vector.broadcast %132 : vector<16x1xf32> to vector<16x384xf32>
    %134 = arith.mulf %102, %133 : vector<16x384xf32>
    %135 = arith.addf %131, %134 : vector<16x384xf32>
    %c18_i32_48 = arith.constant 18 : i32
    %136 = tpu.dynamic_rotate %113 by %c18_i32_48 dim 1 : vector<16x384xf32>, i32 -> vector<16x384xf32>
    %137 = arith.addf %124, %136 : vector<16x384xf32>
    %c366_i32_49 = arith.constant 366 : i32
    %138 = tpu.dynamic_rotate %135 by %c366_i32_49 dim 1 : vector<16x384xf32>, i32 -> vector<16x384xf32>
    %139 = arith.addf %137, %138 : vector<16x384xf32>
    %140 = vector.broadcast %100 : vector<16x1xf32> to vector<16x384xf32>
    %141 = arith.addf %139, %140 : vector<16x384xf32>
    %cst_50 = arith.constant 0.000000e+00 : f32
    %142 = vector.broadcast %cst_50 : f32 to vector<16x384xf32>
    %143 = arith.subf %142, %141 : vector<16x384xf32>
    %144 = math.exp %143 : vector<16x384xf32>
    %cst_51 = arith.constant 1.000000e+00 : f32
    %145 = vector.broadcast %cst_51 : f32 to vector<16x384xf32>
    %146 = arith.addf %145, %144 : vector<16x384xf32>
    %147 = tpu.reciprocal %146 {approx = true} : vector<16x384xf32> -> vector<16x384xf32>
    %148 = arith.mulf %141, %147 : vector<16x384xf32>
    %c0_52 = arith.constant 0 : index
    %c0_53 = arith.constant 0 : index
    %149 = vector.load %arg18[%c0_52, %c0_53] : memref<12x16xbf16, #tpu.memory_space<vmem>>, vector<12x16xbf16>
    %c0_54 = arith.constant 0 : index
    %c0_55 = arith.constant 0 : index
    %150 = vector.load %arg19[%c0_54, %c0_55] : memref<12x1xf32, #tpu.memory_space<vmem>>, vector<12x1xf32>
    %c0_56 = arith.constant 0 : index
    %c0_57 = arith.constant 0 : index
    %151 = vector.load %arg20[%c0_56, %c0_57] : memref<384x128xbf16, #tpu.memory_space<vmem>>, vector<384x128xbf16>
    %152 = arith.truncf %148 : vector<16x384xf32> to vector<16x384xbf16>
    %cst_58 = arith.constant dense<0.000000e+00> : vector<16x128xf32>
    %153 = tpu.matmul %152, %151, %cst_58 {dimension_numbers = #tpu.dot_dimension_numbers<[1], [0], [0], [1], [0, 0, 1, 1], [], []>} : vector<16x384xbf16>, vector<384x128xbf16>, vector<16x128xf32> -> vector<16x128xf32>
    %154 = arith.truncf %153 : vector<16x128xf32> to vector<16x128xbf16>
    %cst_59 = arith.constant dense<0.000000e+00> : vector<12x128xf32>
    %155 = tpu.matmul %149, %154, %cst_59 {dimension_numbers = #tpu.dot_dimension_numbers<[1], [0], [0], [1], [0, 0, 1, 1], [], []>} : vector<12x16xbf16>, vector<16x128xbf16>, vector<12x128xf32> -> vector<12x128xf32>
    %156 = vector.broadcast %150 : vector<12x1xf32> to vector<12x128xf32>
    %157 = arith.addf %155, %156 : vector<12x128xf32>
    %c0_60 = arith.constant 0 : index
    %c0_61 = arith.constant 0 : index
    %c0_62 = arith.constant 0 : index
    %158 = vector.load %arg56[%c0_60, %c0_61, %c0_62] : memref<1x12x128xf32, #tpu.memory_space<vmem>>, vector<1x12x128xf32>
    %159 = vector.shape_cast %158 : vector<1x12x128xf32> to vector<12x128xf32>
    %160 = vector.shape_cast %157 : vector<12x128xf32> to vector<1x12x128xf32>
    tpu.vector_store %arg56[%c0_60, %c0_61, %c0_62], %160 {strides = array<i32>} : memref<1x12x128xf32, #tpu.memory_space<vmem>>, vector<1x12x128xf32>,
    %c0_63 = arith.constant 0 : index
    %c0_64 = arith.constant 0 : index
    %161 = vector.load %arg21[%c0_63, %c0_64] : memref<24x12xbf16, #tpu.memory_space<vmem>>, vector<24x12xbf16>
    %c0_65 = arith.constant 0 : index
    %c0_66 = arith.constant 0 : index
    %162 = vector.load %arg22[%c0_65, %c0_66] : memref<24x1xf32, #tpu.memory_space<vmem>>, vector<24x1xf32>
    %163 = arith.truncf %157 : vector<12x128xf32> to vector<12x128xbf16>
    %cst_67 = arith.constant dense<0.000000e+00> : vector<24x128xf32>
    %164 = tpu.matmul %161, %163, %cst_67 {dimension_numbers = #tpu.dot_dimension_numbers<[1], [0], [0], [1], [0, 0, 1, 1], [], []>} : vector<24x12xbf16>, vector<12x128xbf16>, vector<24x128xf32> -> vector<24x128xf32>
    %165 = vector.broadcast %162 : vector<24x1xf32> to vector<24x128xf32>
    %166 = arith.addf %164, %165 : vector<24x128xf32>
    %cst_68 = arith.constant 0.000000e+00 : f32
    %167 = vector.broadcast %cst_68 : f32 to vector<24x128xf32>
    %168 = arith.subf %167, %166 : vector<24x128xf32>
    %169 = math.exp %168 : vector<24x128xf32>
    %cst_69 = arith.constant 1.000000e+00 : f32
    %170 = vector.broadcast %cst_69 : f32 to vector<24x128xf32>
    %171 = arith.addf %170, %169 : vector<24x128xf32>
    %172 = tpu.reciprocal %171 {approx = true} : vector<24x128xf32> -> vector<24x128xf32>
    %173 = arith.mulf %166, %172 : vector<24x128xf32>
    %174 = vector.broadcast %6 : vector<1x128xf32> to vector<24x128xf32>
    %175 = arith.mulf %173, %174 : vector<24x128xf32>
    %c0_70 = arith.constant 0 : index
    %c0_71 = arith.constant 0 : index
    %176 = vector.load %arg23[%c0_70, %c0_71] : memref<24x9xf32, #tpu.memory_space<vmem>>, vector<24x9xf32>
    %c0_72 = arith.constant 0 : index
    %c0_73 = arith.constant 0 : index
    %177 = vector.load %arg24[%c0_72, %c0_73] : memref<24x1xf32, #tpu.memory_space<vmem>>, vector<24x1xf32>
    %c1_i32_74 = arith.constant 1 : i32
    %178 = tpu.dynamic_rotate %175 by %c1_i32_74 dim 1 : vector<24x128xf32>, i32 -> vector<24x128xf32>
    %c127_i32 = arith.constant 127 : i32
    %179 = tpu.dynamic_rotate %175 by %c127_i32 dim 1 : vector<24x128xf32>, i32 -> vector<24x128xf32>
    %180 = vector.extract_strided_slice %176 {offsets = [0, 0], sizes = [24, 1], strides = [1, 1]} : vector<24x9xf32> to vector<24x1xf32>
    %181 = vector.broadcast %180 : vector<24x1xf32> to vector<24x128xf32>
    %182 = arith.mulf %178, %181 : vector<24x128xf32>
    %183 = vector.extract_strided_slice %176 {offsets = [0, 1], sizes = [24, 1], strides = [1, 1]} : vector<24x9xf32> to vector<24x1xf32>
    %184 = vector.broadcast %183 : vector<24x1xf32> to vector<24x128xf32>
    %185 = arith.mulf %175, %184 : vector<24x128xf32>
    %186 = arith.addf %182, %185 : vector<24x128xf32>
    %187 = vector.extract_strided_slice %176 {offsets = [0, 2], sizes = [24, 1], strides = [1, 1]} : vector<24x9xf32> to vector<24x1xf32>
    %188 = vector.broadcast %187 : vector<24x1xf32> to vector<24x128xf32>
    %189 = arith.mulf %179, %188 : vector<24x128xf32>
    %190 = arith.addf %186, %189 : vector<24x128xf32>
    %191 = vector.extract_strided_slice %176 {offsets = [0, 3], sizes = [24, 1], strides = [1, 1]} : vector<24x9xf32> to vector<24x1xf32>
    %192 = vector.broadcast %191 : vector<24x1xf32> to vector<24x128xf32>
    %193 = arith.mulf %178, %192 : vector<24x128xf32>
    %194 = vector.extract_strided_slice %176 {offsets = [0, 4], sizes = [24, 1], strides = [1, 1]} : vector<24x9xf32> to vector<24x1xf32>
    %195 = vector.broadcast %194 : vector<24x1xf32> to vector<24x128xf32>
    %196 = arith.mulf %175, %195 : vector<24x128xf32>
    %197 = arith.addf %193, %196 : vector<24x128xf32>
    %198 = vector.extract_strided_slice %176 {offsets = [0, 5], sizes = [24, 1], strides = [1, 1]} : vector<24x9xf32> to vector<24x1xf32>
    %199 = vector.broadcast %198 : vector<24x1xf32> to vector<24x128xf32>
    %200 = arith.mulf %179, %199 : vector<24x128xf32>
    %201 = arith.addf %197, %200 : vector<24x128xf32>
    %202 = vector.extract_strided_slice %176 {offsets = [0, 6], sizes = [24, 1], strides = [1, 1]} : vector<24x9xf32> to vector<24x1xf32>
    %203 = vector.broadcast %202 : vector<24x1xf32> to vector<24x128xf32>
    %204 = arith.mulf %178, %203 : vector<24x128xf32>
    %205 = vector.extract_strided_slice %176 {offsets = [0, 7], sizes = [24, 1], strides = [1, 1]} : vector<24x9xf32> to vector<24x1xf32>
    %206 = vector.broadcast %205 : vector<24x1xf32> to vector<24x128xf32>
    %207 = arith.mulf %175, %206 : vector<24x128xf32>
    %208 = arith.addf %204, %207 : vector<24x128xf32>
    %209 = vector.extract_strided_slice %176 {offsets = [0, 8], sizes = [24, 1], strides = [1, 1]} : vector<24x9xf32> to vector<24x1xf32>
    %210 = vector.broadcast %209 : vector<24x1xf32> to vector<24x128xf32>
    %211 = arith.mulf %179, %210 : vector<24x128xf32>
    %212 = arith.addf %208, %211 : vector<24x128xf32>
    %c10_i32 = arith.constant 10 : i32
    %213 = tpu.dynamic_rotate %190 by %c10_i32 dim 1 : vector<24x128xf32>, i32 -> vector<24x128xf32>
    %214 = arith.addf %201, %213 : vector<24x128xf32>
    %c118_i32 = arith.constant 118 : i32
    %215 = tpu.dynamic_rotate %212 by %c118_i32 dim 1 : vector<24x128xf32>, i32 -> vector<24x128xf32>
    %216 = arith.addf %214, %215 : vector<24x128xf32>
    %217 = vector.broadcast %177 : vector<24x1xf32> to vector<24x128xf32>
    %218 = arith.addf %216, %217 : vector<24x128xf32>
    %cst_75 = arith.constant 0.000000e+00 : f32
    %219 = vector.broadcast %cst_75 : f32 to vector<24x128xf32>
    %220 = arith.subf %219, %218 : vector<24x128xf32>
    %221 = math.exp %220 : vector<24x128xf32>
    %cst_76 = arith.constant 1.000000e+00 : f32
    %222 = vector.broadcast %cst_76 : f32 to vector<24x128xf32>
    %223 = arith.addf %222, %221 : vector<24x128xf32>
    %224 = tpu.reciprocal %223 {approx = true} : vector<24x128xf32> -> vector<24x128xf32>
    %225 = arith.mulf %218, %224 : vector<24x128xf32>
    %c0_77 = arith.constant 0 : index
    %c0_78 = arith.constant 0 : index
    %226 = vector.load %arg25[%c0_77, %c0_78] : memref<16x24xbf16, #tpu.memory_space<vmem>>, vector<16x24xbf16>
    %c0_79 = arith.constant 0 : index
    %c0_80 = arith.constant 0 : index
    %227 = vector.load %arg26[%c0_79, %c0_80] : memref<16x1xf32, #tpu.memory_space<vmem>>, vector<16x1xf32>
    %c0_81 = arith.constant 0 : index
    %c0_82 = arith.constant 0 : index
    %228 = vector.load %arg27[%c0_81, %c0_82] : memref<128x128xbf16, #tpu.memory_space<vmem>>, vector<128x128xbf16>
    %229 = arith.truncf %225 : vector<24x128xf32> to vector<24x128xbf16>
    %cst_83 = arith.constant dense<0.000000e+00> : vector<24x128xf32>
    %230 = tpu.matmul %229, %228, %cst_83 {dimension_numbers = #tpu.dot_dimension_numbers<[1], [0], [0], [1], [0, 0, 1, 1], [], []>} : vector<24x128xbf16>, vector<128x128xbf16>, vector<24x128xf32> -> vector<24x128xf32>
    %231 = arith.truncf %230 : vector<24x128xf32> to vector<24x128xbf16>
    %cst_84 = arith.constant dense<0.000000e+00> : vector<16x128xf32>
    %232 = tpu.matmul %226, %231, %cst_84 {dimension_numbers = #tpu.dot_dimension_numbers<[1], [0], [0], [1], [0, 0, 1, 1], [], []>} : vector<16x24xbf16>, vector<24x128xbf16>, vector<16x128xf32> -> vector<16x128xf32>
    %233 = vector.broadcast %227 : vector<16x1xf32> to vector<16x128xf32>
    %234 = arith.addf %232, %233 : vector<16x128xf32>
    %c0_85 = arith.constant 0 : index
    %c0_86 = arith.constant 0 : index
    %c0_87 = arith.constant 0 : index
    %235 = vector.load %arg57[%c0_85, %c0_86, %c0_87] : memref<1x16x128xf32, #tpu.memory_space<vmem>>, vector<1x16x128xf32>
    %236 = vector.shape_cast %235 : vector<1x16x128xf32> to vector<16x128xf32>
    %237 = vector.shape_cast %234 : vector<16x128xf32> to vector<1x16x128xf32>
    tpu.vector_store %arg57[%c0_85, %c0_86, %c0_87], %237 {strides = array<i32>} : memref<1x16x128xf32, #tpu.memory_space<vmem>>, vector<1x16x128xf32>,
    %c0_88 = arith.constant 0 : index
    %c0_89 = arith.constant 0 : index
    %238 = vector.load %arg28[%c0_88, %c0_89] : memref<32x16xbf16, #tpu.memory_space<vmem>>, vector<32x16xbf16>
    %c0_90 = arith.constant 0 : index
    %c0_91 = arith.constant 0 : index
    %239 = vector.load %arg29[%c0_90, %c0_91] : memref<32x1xf32, #tpu.memory_space<vmem>>, vector<32x1xf32>
    %240 = arith.truncf %234 : vector<16x128xf32> to vector<16x128xbf16>
    %cst_92 = arith.constant dense<0.000000e+00> : vector<32x128xf32>
    %241 = tpu.matmul %238, %240, %cst_92 {dimension_numbers = #tpu.dot_dimension_numbers<[1], [0], [0], [1], [0, 0, 1, 1], [], []>} : vector<32x16xbf16>, vector<16x128xbf16>, vector<32x128xf32> -> vector<32x128xf32>
    %242 = vector.broadcast %239 : vector<32x1xf32> to vector<32x128xf32>
    %243 = arith.addf %241, %242 : vector<32x128xf32>
    %cst_93 = arith.constant 0.000000e+00 : f32
    %244 = vector.broadcast %cst_93 : f32 to vector<32x128xf32>
    %245 = arith.subf %244, %243 : vector<32x128xf32>
    %246 = math.exp %245 : vector<32x128xf32>
    %cst_94 = arith.constant 1.000000e+00 : f32
    %247 = vector.broadcast %cst_94 : f32 to vector<32x128xf32>
    %248 = arith.addf %247, %246 : vector<32x128xf32>
    %249 = tpu.reciprocal %248 {approx = true} : vector<32x128xf32> -> vector<32x128xf32>
    %250 = arith.mulf %243, %249 : vector<32x128xf32>
    %251 = vector.broadcast %7 : vector<1x128xf32> to vector<32x128xf32>
    %252 = arith.mulf %250, %251 : vector<32x128xf32>
    %c0_95 = arith.constant 0 : index
    %c0_96 = arith.constant 0 : index
    %253 = vector.load %arg30[%c0_95, %c0_96] : memref<32x9xf32, #tpu.memory_space<vmem>>, vector<32x9xf32>
    %c0_97 = arith.constant 0 : index
    %c0_98 = arith.constant 0 : index
    %254 = vector.load %arg31[%c0_97, %c0_98] : memref<32x1xf32, #tpu.memory_space<vmem>>, vector<32x1xf32>
    %c1_i32_99 = arith.constant 1 : i32
    %255 = tpu.dynamic_rotate %252 by %c1_i32_99 dim 1 : vector<32x128xf32>, i32 -> vector<32x128xf32>
    %c127_i32_100 = arith.constant 127 : i32
    %256 = tpu.dynamic_rotate %252 by %c127_i32_100 dim 1 : vector<32x128xf32>, i32 -> vector<32x128xf32>
    %257 = vector.extract_strided_slice %253 {offsets = [0, 0], sizes = [32, 1], strides = [1, 1]} : vector<32x9xf32> to vector<32x1xf32>
    %258 = vector.broadcast %257 : vector<32x1xf32> to vector<32x128xf32>
    %259 = arith.mulf %255, %258 : vector<32x128xf32>
    %260 = vector.extract_strided_slice %253 {offsets = [0, 1], sizes = [32, 1], strides = [1, 1]} : vector<32x9xf32> to vector<32x1xf32>
    %261 = vector.broadcast %260 : vector<32x1xf32> to vector<32x128xf32>
    %262 = arith.mulf %252, %261 : vector<32x128xf32>
    %263 = arith.addf %259, %262 : vector<32x128xf32>
    %264 = vector.extract_strided_slice %253 {offsets = [0, 2], sizes = [32, 1], strides = [1, 1]} : vector<32x9xf32> to vector<32x1xf32>
    %265 = vector.broadcast %264 : vector<32x1xf32> to vector<32x128xf32>
    %266 = arith.mulf %256, %265 : vector<32x128xf32>
    %267 = arith.addf %263, %266 : vector<32x128xf32>
    %268 = vector.extract_strided_slice %253 {offsets = [0, 3], sizes = [32, 1], strides = [1, 1]} : vector<32x9xf32> to vector<32x1xf32>
    %269 = vector.broadcast %268 : vector<32x1xf32> to vector<32x128xf32>
    %270 = arith.mulf %255, %269 : vector<32x128xf32>
    %271 = vector.extract_strided_slice %253 {offsets = [0, 4], sizes = [32, 1], strides = [1, 1]} : vector<32x9xf32> to vector<32x1xf32>
    %272 = vector.broadcast %271 : vector<32x1xf32> to vector<32x128xf32>
    %273 = arith.mulf %252, %272 : vector<32x128xf32>
    %274 = arith.addf %270, %273 : vector<32x128xf32>
    %275 = vector.extract_strided_slice %253 {offsets = [0, 5], sizes = [32, 1], strides = [1, 1]} : vector<32x9xf32> to vector<32x1xf32>
    %276 = vector.broadcast %275 : vector<32x1xf32> to vector<32x128xf32>
    %277 = arith.mulf %256, %276 : vector<32x128xf32>
    %278 = arith.addf %274, %277 : vector<32x128xf32>
    %279 = vector.extract_strided_slice %253 {offsets = [0, 6], sizes = [32, 1], strides = [1, 1]} : vector<32x9xf32> to vector<32x1xf32>
    %280 = vector.broadcast %279 : vector<32x1xf32> to vector<32x128xf32>
    %281 = arith.mulf %255, %280 : vector<32x128xf32>
    %282 = vector.extract_strided_slice %253 {offsets = [0, 7], sizes = [32, 1], strides = [1, 1]} : vector<32x9xf32> to vector<32x1xf32>
    %283 = vector.broadcast %282 : vector<32x1xf32> to vector<32x128xf32>
    %284 = arith.mulf %252, %283 : vector<32x128xf32>
    %285 = arith.addf %281, %284 : vector<32x128xf32>
    %286 = vector.extract_strided_slice %253 {offsets = [0, 8], sizes = [32, 1], strides = [1, 1]} : vector<32x9xf32> to vector<32x1xf32>
    %287 = vector.broadcast %286 : vector<32x1xf32> to vector<32x128xf32>
    %288 = arith.mulf %256, %287 : vector<32x128xf32>
    %289 = arith.addf %285, %288 : vector<32x128xf32>
    %c6_i32 = arith.constant 6 : i32
    %290 = tpu.dynamic_rotate %267 by %c6_i32 dim 1 : vector<32x128xf32>, i32 -> vector<32x128xf32>
    %291 = arith.addf %278, %290 : vector<32x128xf32>
    %c122_i32 = arith.constant 122 : i32
    %292 = tpu.dynamic_rotate %289 by %c122_i32 dim 1 : vector<32x128xf32>, i32 -> vector<32x128xf32>
    %293 = arith.addf %291, %292 : vector<32x128xf32>
    %294 = vector.broadcast %254 : vector<32x1xf32> to vector<32x128xf32>
    %295 = arith.addf %293, %294 : vector<32x128xf32>
    %cst_101 = arith.constant 0.000000e+00 : f32
    %296 = vector.broadcast %cst_101 : f32 to vector<32x128xf32>
    %297 = arith.subf %296, %295 : vector<32x128xf32>
    %298 = math.exp %297 : vector<32x128xf32>
    %cst_102 = arith.constant 1.000000e+00 : f32
    %299 = vector.broadcast %cst_102 : f32 to vector<32x128xf32>
    %300 = arith.addf %299, %298 : vector<32x128xf32>
    %301 = tpu.reciprocal %300 {approx = true} : vector<32x128xf32> -> vector<32x128xf32>
    %302 = arith.mulf %295, %301 : vector<32x128xf32>
    %c0_103 = arith.constant 0 : index
    %c0_104 = arith.constant 0 : index
    %303 = vector.load %arg32[%c0_103, %c0_104] : memref<24x32xbf16, #tpu.memory_space<vmem>>, vector<24x32xbf16>
    %c0_105 = arith.constant 0 : index
    %c0_106 = arith.constant 0 : index
    %304 = vector.load %arg33[%c0_105, %c0_106] : memref<24x1xf32, #tpu.memory_space<vmem>>, vector<24x1xf32>
    %c0_107 = arith.constant 0 : index
    %c0_108 = arith.constant 0 : index
    %305 = vector.load %arg34[%c0_107, %c0_108] : memref<128x128xbf16, #tpu.memory_space<vmem>>, vector<128x128xbf16>
    %306 = arith.truncf %302 : vector<32x128xf32> to vector<32x128xbf16>
    %cst_109 = arith.constant dense<0.000000e+00> : vector<32x128xf32>
    %307 = tpu.matmul %306, %305, %cst_109 {dimension_numbers = #tpu.dot_dimension_numbers<[1], [0], [0], [1], [0, 0, 1, 1], [], []>} : vector<32x128xbf16>, vector<128x128xbf16>, vector<32x128xf32> -> vector<32x128xf32>
    %308 = arith.truncf %307 : vector<32x128xf32> to vector<32x128xbf16>
    %cst_110 = arith.constant dense<0.000000e+00> : vector<24x128xf32>
    %309 = tpu.matmul %303, %308, %cst_110 {dimension_numbers = #tpu.dot_dimension_numbers<[1], [0], [0], [1], [0, 0, 1, 1], [], []>} : vector<24x32xbf16>, vector<32x128xbf16>, vector<24x128xf32> -> vector<24x128xf32>
    %310 = vector.broadcast %304 : vector<24x1xf32> to vector<24x128xf32>
    %311 = arith.addf %309, %310 : vector<24x128xf32>
    %c0_111 = arith.constant 0 : index
    %c0_112 = arith.constant 0 : index
    %312 = vector.load %arg35[%c0_111, %c0_112] : memref<48x24xbf16, #tpu.memory_space<vmem>>, vector<48x24xbf16>
    %c0_113 = arith.constant 0 : index
    %c0_114 = arith.constant 0 : index
    %313 = vector.load %arg36[%c0_113, %c0_114] : memref<48x1xf32, #tpu.memory_space<vmem>>, vector<48x1xf32>
    %314 = arith.truncf %311 : vector<24x128xf32> to vector<24x128xbf16>
    %cst_115 = arith.constant dense<0.000000e+00> : vector<48x128xf32>
    %315 = tpu.matmul %312, %314, %cst_115 {dimension_numbers = #tpu.dot_dimension_numbers<[1], [0], [0], [1], [0, 0, 1, 1], [], []>} : vector<48x24xbf16>, vector<24x128xbf16>, vector<48x128xf32> -> vector<48x128xf32>
    %316 = vector.broadcast %313 : vector<48x1xf32> to vector<48x128xf32>
    %317 = arith.addf %315, %316 : vector<48x128xf32>
    %cst_116 = arith.constant 0.000000e+00 : f32
    %318 = vector.broadcast %cst_116 : f32 to vector<48x128xf32>
    %319 = arith.subf %318, %317 : vector<48x128xf32>
    %320 = math.exp %319 : vector<48x128xf32>
    %cst_117 = arith.constant 1.000000e+00 : f32
    %321 = vector.broadcast %cst_117 : f32 to vector<48x128xf32>
    %322 = arith.addf %321, %320 : vector<48x128xf32>
    %323 = tpu.reciprocal %322 {approx = true} : vector<48x128xf32> -> vector<48x128xf32>
    %324 = arith.mulf %317, %323 : vector<48x128xf32>
    %325 = vector.broadcast %8 : vector<1x128xf32> to vector<48x128xf32>
    %326 = arith.mulf %324, %325 : vector<48x128xf32>
    %c0_118 = arith.constant 0 : index
    %c0_119 = arith.constant 0 : index
    %327 = vector.load %arg37[%c0_118, %c0_119] : memref<48x9xf32, #tpu.memory_space<vmem>>, vector<48x9xf32>
    %c0_120 = arith.constant 0 : index
    %c0_121 = arith.constant 0 : index
    %328 = vector.load %arg38[%c0_120, %c0_121] : memref<48x1xf32, #tpu.memory_space<vmem>>, vector<48x1xf32>
    %c1_i32_122 = arith.constant 1 : i32
    %329 = tpu.dynamic_rotate %326 by %c1_i32_122 dim 1 : vector<48x128xf32>, i32 -> vector<48x128xf32>
    %c127_i32_123 = arith.constant 127 : i32
    %330 = tpu.dynamic_rotate %326 by %c127_i32_123 dim 1 : vector<48x128xf32>, i32 -> vector<48x128xf32>
    %331 = vector.extract_strided_slice %327 {offsets = [0, 0], sizes = [48, 1], strides = [1, 1]} : vector<48x9xf32> to vector<48x1xf32>
    %332 = vector.broadcast %331 : vector<48x1xf32> to vector<48x128xf32>
    %333 = arith.mulf %329, %332 : vector<48x128xf32>
    %334 = vector.extract_strided_slice %327 {offsets = [0, 1], sizes = [48, 1], strides = [1, 1]} : vector<48x9xf32> to vector<48x1xf32>
    %335 = vector.broadcast %334 : vector<48x1xf32> to vector<48x128xf32>
    %336 = arith.mulf %326, %335 : vector<48x128xf32>
    %337 = arith.addf %333, %336 : vector<48x128xf32>
    %338 = vector.extract_strided_slice %327 {offsets = [0, 2], sizes = [48, 1], strides = [1, 1]} : vector<48x9xf32> to vector<48x1xf32>
    %339 = vector.broadcast %338 : vector<48x1xf32> to vector<48x128xf32>
    %340 = arith.mulf %330, %339 : vector<48x128xf32>
    %341 = arith.addf %337, %340 : vector<48x128xf32>
    %342 = vector.extract_strided_slice %327 {offsets = [0, 3], sizes = [48, 1], strides = [1, 1]} : vector<48x9xf32> to vector<48x1xf32>
    %343 = vector.broadcast %342 : vector<48x1xf32> to vector<48x128xf32>
    %344 = arith.mulf %329, %343 : vector<48x128xf32>
    %345 = vector.extract_strided_slice %327 {offsets = [0, 4], sizes = [48, 1], strides = [1, 1]} : vector<48x9xf32> to vector<48x1xf32>
    %346 = vector.broadcast %345 : vector<48x1xf32> to vector<48x128xf32>
    %347 = arith.mulf %326, %346 : vector<48x128xf32>
    %348 = arith.addf %344, %347 : vector<48x128xf32>
    %349 = vector.extract_strided_slice %327 {offsets = [0, 5], sizes = [48, 1], strides = [1, 1]} : vector<48x9xf32> to vector<48x1xf32>
    %350 = vector.broadcast %349 : vector<48x1xf32> to vector<48x128xf32>
    %351 = arith.mulf %330, %350 : vector<48x128xf32>
    %352 = arith.addf %348, %351 : vector<48x128xf32>
    %353 = vector.extract_strided_slice %327 {offsets = [0, 6], sizes = [48, 1], strides = [1, 1]} : vector<48x9xf32> to vector<48x1xf32>
    %354 = vector.broadcast %353 : vector<48x1xf32> to vector<48x128xf32>
    %355 = arith.mulf %329, %354 : vector<48x128xf32>
    %356 = vector.extract_strided_slice %327 {offsets = [0, 7], sizes = [48, 1], strides = [1, 1]} : vector<48x9xf32> to vector<48x1xf32>
    %357 = vector.broadcast %356 : vector<48x1xf32> to vector<48x128xf32>
    %358 = arith.mulf %326, %357 : vector<48x128xf32>
    %359 = arith.addf %355, %358 : vector<48x128xf32>
    %360 = vector.extract_strided_slice %327 {offsets = [0, 8], sizes = [48, 1], strides = [1, 1]} : vector<48x9xf32> to vector<48x1xf32>
    %361 = vector.broadcast %360 : vector<48x1xf32> to vector<48x128xf32>
    %362 = arith.mulf %330, %361 : vector<48x128xf32>
    %363 = arith.addf %359, %362 : vector<48x128xf32>
    %c4_i32 = arith.constant 4 : i32
    %364 = tpu.dynamic_rotate %341 by %c4_i32 dim 1 : vector<48x128xf32>, i32 -> vector<48x128xf32>
    %365 = arith.addf %352, %364 : vector<48x128xf32>
    %c124_i32 = arith.constant 124 : i32
    %366 = tpu.dynamic_rotate %363 by %c124_i32 dim 1 : vector<48x128xf32>, i32 -> vector<48x128xf32>
    %367 = arith.addf %365, %366 : vector<48x128xf32>
    %368 = vector.broadcast %328 : vector<48x1xf32> to vector<48x128xf32>
    %369 = arith.addf %367, %368 : vector<48x128xf32>
    %cst_124 = arith.constant 0.000000e+00 : f32
    %370 = vector.broadcast %cst_124 : f32 to vector<48x128xf32>
    %371 = arith.subf %370, %369 : vector<48x128xf32>
    %372 = math.exp %371 : vector<48x128xf32>
    %cst_125 = arith.constant 1.000000e+00 : f32
    %373 = vector.broadcast %cst_125 : f32 to vector<48x128xf32>
    %374 = arith.addf %373, %372 : vector<48x128xf32>
    %375 = tpu.reciprocal %374 {approx = true} : vector<48x128xf32> -> vector<48x128xf32>
    %376 = arith.mulf %369, %375 : vector<48x128xf32>
    %c0_126 = arith.constant 0 : index
    %c0_127 = arith.constant 0 : index
    %377 = vector.load %arg39[%c0_126, %c0_127] : memref<32x48xbf16, #tpu.memory_space<vmem>>, vector<32x48xbf16>
    %c0_128 = arith.constant 0 : index
    %c0_129 = arith.constant 0 : index
    %378 = vector.load %arg40[%c0_128, %c0_129] : memref<32x1xf32, #tpu.memory_space<vmem>>, vector<32x1xf32>
    %379 = arith.truncf %376 : vector<48x128xf32> to vector<48x128xbf16>
    %cst_130 = arith.constant dense<0.000000e+00> : vector<32x128xf32>
    %380 = tpu.matmul %377, %379, %cst_130 {dimension_numbers = #tpu.dot_dimension_numbers<[1], [0], [0], [1], [0, 0, 1, 1], [], []>} : vector<32x48xbf16>, vector<48x128xbf16>, vector<32x128xf32> -> vector<32x128xf32>
    %381 = vector.broadcast %378 : vector<32x1xf32> to vector<32x128xf32>
    %382 = arith.addf %380, %381 : vector<32x128xf32>
    %c0_131 = arith.constant 0 : index
    %c0_132 = arith.constant 0 : index
    %c0_133 = arith.constant 0 : index
    %383 = vector.load %arg58[%c0_131, %c0_132, %c0_133] : memref<1x32x128xf32, #tpu.memory_space<vmem>>, vector<1x32x128xf32>
    %384 = vector.shape_cast %383 : vector<1x32x128xf32> to vector<32x128xf32>
    %385 = vector.shape_cast %382 : vector<32x128xf32> to vector<1x32x128xf32>
    tpu.vector_store %arg58[%c0_131, %c0_132, %c0_133], %385 {strides = array<i32>} : memref<1x32x128xf32, #tpu.memory_space<vmem>>, vector<1x32x128xf32>,
    %c0_134 = arith.constant 0 : index
    %c0_135 = arith.constant 0 : index
    %386 = vector.load %arg41[%c0_134, %c0_135] : memref<64x32xbf16, #tpu.memory_space<vmem>>, vector<64x32xbf16>
    %c0_136 = arith.constant 0 : index
    %c0_137 = arith.constant 0 : index
    %387 = vector.load %arg42[%c0_136, %c0_137] : memref<64x1xf32, #tpu.memory_space<vmem>>, vector<64x1xf32>
    %388 = arith.truncf %382 : vector<32x128xf32> to vector<32x128xbf16>
    %cst_138 = arith.constant dense<0.000000e+00> : vector<64x128xf32>
    %389 = tpu.matmul %386, %388, %cst_138 {dimension_numbers = #tpu.dot_dimension_numbers<[1], [0], [0], [1], [0, 0, 1, 1], [], []>} : vector<64x32xbf16>, vector<32x128xbf16>, vector<64x128xf32> -> vector<64x128xf32>
    %390 = vector.broadcast %387 : vector<64x1xf32> to vector<64x128xf32>
    %391 = arith.addf %389, %390 : vector<64x128xf32>
    %cst_139 = arith.constant 0.000000e+00 : f32
    %392 = vector.broadcast %cst_139 : f32 to vector<64x128xf32>
    %393 = arith.subf %392, %391 : vector<64x128xf32>
    %394 = math.exp %393 : vector<64x128xf32>
    %cst_140 = arith.constant 1.000000e+00 : f32
    %395 = vector.broadcast %cst_140 : f32 to vector<64x128xf32>
    %396 = arith.addf %395, %394 : vector<64x128xf32>
    %397 = tpu.reciprocal %396 {approx = true} : vector<64x128xf32> -> vector<64x128xf32>
    %398 = arith.mulf %391, %397 : vector<64x128xf32>
    %399 = vector.broadcast %8 : vector<1x128xf32> to vector<64x128xf32>
    %400 = arith.mulf %398, %399 : vector<64x128xf32>
    %c0_141 = arith.constant 0 : index
    %c0_142 = arith.constant 0 : index
    %401 = vector.load %arg43[%c0_141, %c0_142] : memref<64x9xf32, #tpu.memory_space<vmem>>, vector<64x9xf32>
    %c0_143 = arith.constant 0 : index
    %c0_144 = arith.constant 0 : index
    %402 = vector.load %arg44[%c0_143, %c0_144] : memref<64x1xf32, #tpu.memory_space<vmem>>, vector<64x1xf32>
    %c1_i32_145 = arith.constant 1 : i32
    %403 = tpu.dynamic_rotate %400 by %c1_i32_145 dim 1 : vector<64x128xf32>, i32 -> vector<64x128xf32>
    %c127_i32_146 = arith.constant 127 : i32
    %404 = tpu.dynamic_rotate %400 by %c127_i32_146 dim 1 : vector<64x128xf32>, i32 -> vector<64x128xf32>
    %405 = vector.extract_strided_slice %401 {offsets = [0, 0], sizes = [64, 1], strides = [1, 1]} : vector<64x9xf32> to vector<64x1xf32>
    %406 = vector.broadcast %405 : vector<64x1xf32> to vector<64x128xf32>
    %407 = arith.mulf %403, %406 : vector<64x128xf32>
    %408 = vector.extract_strided_slice %401 {offsets = [0, 1], sizes = [64, 1], strides = [1, 1]} : vector<64x9xf32> to vector<64x1xf32>
    %409 = vector.broadcast %408 : vector<64x1xf32> to vector<64x128xf32>
    %410 = arith.mulf %400, %409 : vector<64x128xf32>
    %411 = arith.addf %407, %410 : vector<64x128xf32>
    %412 = vector.extract_strided_slice %401 {offsets = [0, 2], sizes = [64, 1], strides = [1, 1]} : vector<64x9xf32> to vector<64x1xf32>
    %413 = vector.broadcast %412 : vector<64x1xf32> to vector<64x128xf32>
    %414 = arith.mulf %404, %413 : vector<64x128xf32>
    %415 = arith.addf %411, %414 : vector<64x128xf32>
    %416 = vector.extract_strided_slice %401 {offsets = [0, 3], sizes = [64, 1], strides = [1, 1]} : vector<64x9xf32> to vector<64x1xf32>
    %417 = vector.broadcast %416 : vector<64x1xf32> to vector<64x128xf32>
    %418 = arith.mulf %403, %417 : vector<64x128xf32>
    %419 = vector.extract_strided_slice %401 {offsets = [0, 4], sizes = [64, 1], strides = [1, 1]} : vector<64x9xf32> to vector<64x1xf32>
    %420 = vector.broadcast %419 : vector<64x1xf32> to vector<64x128xf32>
    %421 = arith.mulf %400, %420 : vector<64x128xf32>
    %422 = arith.addf %418, %421 : vector<64x128xf32>
    %423 = vector.extract_strided_slice %401 {offsets = [0, 5], sizes = [64, 1], strides = [1, 1]} : vector<64x9xf32> to vector<64x1xf32>
    %424 = vector.broadcast %423 : vector<64x1xf32> to vector<64x128xf32>
    %425 = arith.mulf %404, %424 : vector<64x128xf32>
    %426 = arith.addf %422, %425 : vector<64x128xf32>
    %427 = vector.extract_strided_slice %401 {offsets = [0, 6], sizes = [64, 1], strides = [1, 1]} : vector<64x9xf32> to vector<64x1xf32>
    %428 = vector.broadcast %427 : vector<64x1xf32> to vector<64x128xf32>
    %429 = arith.mulf %403, %428 : vector<64x128xf32>
    %430 = vector.extract_strided_slice %401 {offsets = [0, 7], sizes = [64, 1], strides = [1, 1]} : vector<64x9xf32> to vector<64x1xf32>
    %431 = vector.broadcast %430 : vector<64x1xf32> to vector<64x128xf32>
    %432 = arith.mulf %400, %431 : vector<64x128xf32>
    %433 = arith.addf %429, %432 : vector<64x128xf32>
    %434 = vector.extract_strided_slice %401 {offsets = [0, 8], sizes = [64, 1], strides = [1, 1]} : vector<64x9xf32> to vector<64x1xf32>
    %435 = vector.broadcast %434 : vector<64x1xf32> to vector<64x128xf32>
    %436 = arith.mulf %404, %435 : vector<64x128xf32>
    %437 = arith.addf %433, %436 : vector<64x128xf32>
    %c4_i32_147 = arith.constant 4 : i32
    %438 = tpu.dynamic_rotate %415 by %c4_i32_147 dim 1 : vector<64x128xf32>, i32 -> vector<64x128xf32>
    %439 = arith.addf %426, %438 : vector<64x128xf32>
    %c124_i32_148 = arith.constant 124 : i32
    %440 = tpu.dynamic_rotate %437 by %c124_i32_148 dim 1 : vector<64x128xf32>, i32 -> vector<64x128xf32>
    %441 = arith.addf %439, %440 : vector<64x128xf32>
    %442 = vector.broadcast %402 : vector<64x1xf32> to vector<64x128xf32>
    %443 = arith.addf %441, %442 : vector<64x128xf32>
    %cst_149 = arith.constant 0.000000e+00 : f32
    %444 = vector.broadcast %cst_149 : f32 to vector<64x128xf32>
    %445 = arith.subf %444, %443 : vector<64x128xf32>
    %446 = math.exp %445 : vector<64x128xf32>
    %cst_150 = arith.constant 1.000000e+00 : f32
    %447 = vector.broadcast %cst_150 : f32 to vector<64x128xf32>
    %448 = arith.addf %447, %446 : vector<64x128xf32>
    %449 = tpu.reciprocal %448 {approx = true} : vector<64x128xf32> -> vector<64x128xf32>
    %450 = arith.mulf %443, %449 : vector<64x128xf32>
    %c0_151 = arith.constant 0 : index
    %c0_152 = arith.constant 0 : index
    %451 = vector.load %arg45[%c0_151, %c0_152] : memref<40x64xbf16, #tpu.memory_space<vmem>>, vector<40x64xbf16>
    %c0_153 = arith.constant 0 : index
    %c0_154 = arith.constant 0 : index
    %452 = vector.load %arg46[%c0_153, %c0_154] : memref<40x1xf32, #tpu.memory_space<vmem>>, vector<40x1xf32>
    %c0_155 = arith.constant 0 : index
    %c0_156 = arith.constant 0 : index
    %453 = vector.load %arg47[%c0_155, %c0_156] : memref<128x128xbf16, #tpu.memory_space<vmem>>, vector<128x128xbf16>
    %454 = arith.truncf %450 : vector<64x128xf32> to vector<64x128xbf16>
    %cst_157 = arith.constant dense<0.000000e+00> : vector<64x128xf32>
    %455 = tpu.matmul %454, %453, %cst_157 {dimension_numbers = #tpu.dot_dimension_numbers<[1], [0], [0], [1], [0, 0, 1, 1], [], []>} : vector<64x128xbf16>, vector<128x128xbf16>, vector<64x128xf32> -> vector<64x128xf32>
    %456 = arith.truncf %455 : vector<64x128xf32> to vector<64x128xbf16>
    %cst_158 = arith.constant dense<0.000000e+00> : vector<40x128xf32>
    %457 = tpu.matmul %451, %456, %cst_158 {dimension_numbers = #tpu.dot_dimension_numbers<[1], [0], [0], [1], [0, 0, 1, 1], [], []>} : vector<40x64xbf16>, vector<64x128xbf16>, vector<40x128xf32> -> vector<40x128xf32>
    %458 = vector.broadcast %452 : vector<40x1xf32> to vector<40x128xf32>
    %459 = arith.addf %457, %458 : vector<40x128xf32>
    %c0_159 = arith.constant 0 : index
    %c0_160 = arith.constant 0 : index
    %460 = vector.load %arg48[%c0_159, %c0_160] : memref<80x40xbf16, #tpu.memory_space<vmem>>, vector<80x40xbf16>
    %c0_161 = arith.constant 0 : index
    %c0_162 = arith.constant 0 : index
    %461 = vector.load %arg49[%c0_161, %c0_162] : memref<80x1xf32, #tpu.memory_space<vmem>>, vector<80x1xf32>
    %462 = arith.truncf %459 : vector<40x128xf32> to vector<40x128xbf16>
    %cst_163 = arith.constant dense<0.000000e+00> : vector<80x128xf32>
    %463 = tpu.matmul %460, %462, %cst_163 {dimension_numbers = #tpu.dot_dimension_numbers<[1], [0], [0], [1], [0, 0, 1, 1], [], []>} : vector<80x40xbf16>, vector<40x128xbf16>, vector<80x128xf32> -> vector<80x128xf32>
    %464 = vector.broadcast %461 : vector<80x1xf32> to vector<80x128xf32>
    %465 = arith.addf %463, %464 : vector<80x128xf32>
    %cst_164 = arith.constant 0.000000e+00 : f32
    %466 = vector.broadcast %cst_164 : f32 to vector<80x128xf32>
    %467 = arith.subf %466, %465 : vector<80x128xf32>
    %468 = math.exp %467 : vector<80x128xf32>
    %cst_165 = arith.constant 1.000000e+00 : f32
    %469 = vector.broadcast %cst_165 : f32 to vector<80x128xf32>
    %470 = arith.addf %469, %468 : vector<80x128xf32>
    %471 = tpu.reciprocal %470 {approx = true} : vector<80x128xf32> -> vector<80x128xf32>
    %472 = arith.mulf %465, %471 : vector<80x128xf32>
    %473 = vector.broadcast %9 : vector<1x128xf32> to vector<80x128xf32>
    %474 = arith.mulf %472, %473 : vector<80x128xf32>
    %c0_166 = arith.constant 0 : index
    %c0_167 = arith.constant 0 : index
    %475 = vector.load %arg50[%c0_166, %c0_167] : memref<80x9xf32, #tpu.memory_space<vmem>>, vector<80x9xf32>
    %c0_168 = arith.constant 0 : index
    %c0_169 = arith.constant 0 : index
    %476 = vector.load %arg51[%c0_168, %c0_169] : memref<80x1xf32, #tpu.memory_space<vmem>>, vector<80x1xf32>
    %c1_i32_170 = arith.constant 1 : i32
    %477 = tpu.dynamic_rotate %474 by %c1_i32_170 dim 1 : vector<80x128xf32>, i32 -> vector<80x128xf32>
    %c127_i32_171 = arith.constant 127 : i32
    %478 = tpu.dynamic_rotate %474 by %c127_i32_171 dim 1 : vector<80x128xf32>, i32 -> vector<80x128xf32>
    %479 = vector.extract_strided_slice %475 {offsets = [0, 0], sizes = [80, 1], strides = [1, 1]} : vector<80x9xf32> to vector<80x1xf32>
    %480 = vector.broadcast %479 : vector<80x1xf32> to vector<80x128xf32>
    %481 = arith.mulf %477, %480 : vector<80x128xf32>
    %482 = vector.extract_strided_slice %475 {offsets = [0, 1], sizes = [80, 1], strides = [1, 1]} : vector<80x9xf32> to vector<80x1xf32>
    %483 = vector.broadcast %482 : vector<80x1xf32> to vector<80x128xf32>
    %484 = arith.mulf %474, %483 : vector<80x128xf32>
    %485 = arith.addf %481, %484 : vector<80x128xf32>
    %486 = vector.extract_strided_slice %475 {offsets = [0, 2], sizes = [80, 1], strides = [1, 1]} : vector<80x9xf32> to vector<80x1xf32>
    %487 = vector.broadcast %486 : vector<80x1xf32> to vector<80x128xf32>
    %488 = arith.mulf %478, %487 : vector<80x128xf32>
    %489 = arith.addf %485, %488 : vector<80x128xf32>
    %490 = vector.extract_strided_slice %475 {offsets = [0, 3], sizes = [80, 1], strides = [1, 1]} : vector<80x9xf32> to vector<80x1xf32>
    %491 = vector.broadcast %490 : vector<80x1xf32> to vector<80x128xf32>
    %492 = arith.mulf %477, %491 : vector<80x128xf32>
    %493 = vector.extract_strided_slice %475 {offsets = [0, 4], sizes = [80, 1], strides = [1, 1]} : vector<80x9xf32> to vector<80x1xf32>
    %494 = vector.broadcast %493 : vector<80x1xf32> to vector<80x128xf32>
    %495 = arith.mulf %474, %494 : vector<80x128xf32>
    %496 = arith.addf %492, %495 : vector<80x128xf32>
    %497 = vector.extract_strided_slice %475 {offsets = [0, 5], sizes = [80, 1], strides = [1, 1]} : vector<80x9xf32> to vector<80x1xf32>
    %498 = vector.broadcast %497 : vector<80x1xf32> to vector<80x128xf32>
    %499 = arith.mulf %478, %498 : vector<80x128xf32>
    %500 = arith.addf %496, %499 : vector<80x128xf32>
    %501 = vector.extract_strided_slice %475 {offsets = [0, 6], sizes = [80, 1], strides = [1, 1]} : vector<80x9xf32> to vector<80x1xf32>
    %502 = vector.broadcast %501 : vector<80x1xf32> to vector<80x128xf32>
    %503 = arith.mulf %477, %502 : vector<80x128xf32>
    %504 = vector.extract_strided_slice %475 {offsets = [0, 7], sizes = [80, 1], strides = [1, 1]} : vector<80x9xf32> to vector<80x1xf32>
    %505 = vector.broadcast %504 : vector<80x1xf32> to vector<80x128xf32>
    %506 = arith.mulf %474, %505 : vector<80x128xf32>
    %507 = arith.addf %503, %506 : vector<80x128xf32>
    %508 = vector.extract_strided_slice %475 {offsets = [0, 8], sizes = [80, 1], strides = [1, 1]} : vector<80x9xf32> to vector<80x1xf32>
    %509 = vector.broadcast %508 : vector<80x1xf32> to vector<80x128xf32>
    %510 = arith.mulf %478, %509 : vector<80x128xf32>
    %511 = arith.addf %507, %510 : vector<80x128xf32>
    %c3_i32 = arith.constant 3 : i32
    %512 = tpu.dynamic_rotate %489 by %c3_i32 dim 1 : vector<80x128xf32>, i32 -> vector<80x128xf32>
    %513 = arith.addf %500, %512 : vector<80x128xf32>
    %c125_i32 = arith.constant 125 : i32
    %514 = tpu.dynamic_rotate %511 by %c125_i32 dim 1 : vector<80x128xf32>, i32 -> vector<80x128xf32>
    %515 = arith.addf %513, %514 : vector<80x128xf32>
    %516 = vector.broadcast %476 : vector<80x1xf32> to vector<80x128xf32>
    %517 = arith.addf %515, %516 : vector<80x128xf32>
    %cst_172 = arith.constant 0.000000e+00 : f32
    %518 = vector.broadcast %cst_172 : f32 to vector<80x128xf32>
    %519 = arith.subf %518, %517 : vector<80x128xf32>
    %520 = math.exp %519 : vector<80x128xf32>
    %cst_173 = arith.constant 1.000000e+00 : f32
    %521 = vector.broadcast %cst_173 : f32 to vector<80x128xf32>
    %522 = arith.addf %521, %520 : vector<80x128xf32>
    %523 = tpu.reciprocal %522 {approx = true} : vector<80x128xf32> -> vector<80x128xf32>
    %524 = arith.mulf %517, %523 : vector<80x128xf32>
    %c0_174 = arith.constant 0 : index
    %c0_175 = arith.constant 0 : index
    %525 = vector.load %arg52[%c0_174, %c0_175] : memref<48x80xbf16, #tpu.memory_space<vmem>>, vector<48x80xbf16>
    %c0_176 = arith.constant 0 : index
    %c0_177 = arith.constant 0 : index
    %526 = vector.load %arg53[%c0_176, %c0_177] : memref<48x1xf32, #tpu.memory_space<vmem>>, vector<48x1xf32>
    %527 = arith.truncf %524 : vector<80x128xf32> to vector<80x128xbf16>
    %cst_178 = arith.constant dense<0.000000e+00> : vector<48x128xf32>
    %528 = tpu.matmul %525, %527, %cst_178 {dimension_numbers = #tpu.dot_dimension_numbers<[1], [0], [0], [1], [0, 0, 1, 1], [], []>} : vector<48x80xbf16>, vector<80x128xbf16>, vector<48x128xf32> -> vector<48x128xf32>
    %529 = vector.broadcast %526 : vector<48x1xf32> to vector<48x128xf32>
    %530 = arith.addf %528, %529 : vector<48x128xf32>
    %c0_179 = arith.constant 0 : index
    %c0_180 = arith.constant 0 : index
    %531 = vector.load %arg54[%c0_179, %c0_180] : memref<64x48xbf16, #tpu.memory_space<vmem>>, vector<64x48xbf16>
    %532 = arith.truncf %530 : vector<48x128xf32> to vector<48x128xbf16>
    %cst_181 = arith.constant dense<0.000000e+00> : vector<64x128xf32>
    %533 = tpu.matmul %531, %532, %cst_181 {dimension_numbers = #tpu.dot_dimension_numbers<[1], [0], [0], [1], [0, 0, 1, 1], [], []>} : vector<64x48xbf16>, vector<48x128xbf16>, vector<64x128xf32> -> vector<64x128xf32>
    %c0_182 = arith.constant 0 : index
    %c0_183 = arith.constant 0 : index
    %c0_184 = arith.constant 0 : index
    %534 = vector.load %arg59[%c0_182, %c0_183, %c0_184] : memref<1x64x128xf32, #tpu.memory_space<vmem>>, vector<1x64x128xf32>
    %535 = vector.shape_cast %534 : vector<1x64x128xf32> to vector<64x128xf32>
    %536 = vector.shape_cast %533 : vector<64x128xf32> to vector<1x64x128xf32>
    tpu.vector_store %arg59[%c0_182, %c0_183, %c0_184], %536 {strides = array<i32>} : memref<1x64x128xf32, #tpu.memory_space<vmem>>, vector<1x64x128xf32>,
    return
  }
  func.func @transform_0(%arg0: i32) -> (i32, i32, i32) {
    %c0_i32 = arith.constant 0 : i32
    %c0_i32_0 = arith.constant 0 : i32
    %c0_i32_1 = arith.constant 0 : i32
    return %arg0, %c0_i32, %c0_i32_0 : i32, i32, i32
  }
  func.func @transform_1(%arg0: i32) -> (i32, i32) {
    %c0_i32 = arith.constant 0 : i32
    %c0_i32_0 = arith.constant 0 : i32
    %c0_i32_1 = arith.constant 0 : i32
    return %c0_i32, %c0_i32_0 : i32, i32
  }
  func.func @transform_2(%arg0: i32) -> (i32, i32) {
    %c0_i32 = arith.constant 0 : i32
    %c0_i32_0 = arith.constant 0 : i32
    %c0_i32_1 = arith.constant 0 : i32
    return %c0_i32, %c0_i32_0 : i32, i32
  }
  func.func @transform_3(%arg0: i32) -> (i32, i32) {
    %c0_i32 = arith.constant 0 : i32
    %c0_i32_0 = arith.constant 0 : i32
    %c0_i32_1 = arith.constant 0 : i32
    return %c0_i32, %c0_i32_0 : i32, i32
  }
  func.func @transform_4(%arg0: i32) -> (i32, i32) {
    %c0_i32 = arith.constant 0 : i32
    %c0_i32_0 = arith.constant 0 : i32
    %c0_i32_1 = arith.constant 0 : i32
    return %c0_i32, %c0_i32_0 : i32, i32
  }
  func.func @transform_5(%arg0: i32) -> (i32, i32) {
    %c0_i32 = arith.constant 0 : i32
    %c0_i32_0 = arith.constant 0 : i32
    %c0_i32_1 = arith.constant 0 : i32
    return %c0_i32, %c0_i32_0 : i32, i32
  }
  func.func @transform_6(%arg0: i32) -> (i32, i32) {
    %c0_i32 = arith.constant 0 : i32
    %c0_i32_0 = arith.constant 0 : i32
    %c0_i32_1 = arith.constant 0 : i32
    return %c0_i32, %c0_i32_0 : i32, i32
  }
  func.func @transform_7(%arg0: i32) -> (i32, i32) {
    %c0_i32 = arith.constant 0 : i32
    %c0_i32_0 = arith.constant 0 : i32
    %c0_i32_1 = arith.constant 0 : i32
    return %c0_i32, %c0_i32_0 : i32, i32
  }
  func.func @transform_8(%arg0: i32) -> (i32, i32) {
    %c0_i32 = arith.constant 0 : i32
    %c0_i32_0 = arith.constant 0 : i32
    %c0_i32_1 = arith.constant 0 : i32
    return %c0_i32, %c0_i32_0 : i32, i32
  }
  func.func @transform_9(%arg0: i32) -> (i32, i32) {
    %c0_i32 = arith.constant 0 : i32
    %c0_i32_0 = arith.constant 0 : i32
    %c0_i32_1 = arith.constant 0 : i32
    return %c0_i32, %c0_i32_0 : i32, i32
  }
  func.func @transform_10(%arg0: i32) -> (i32, i32) {
    %c0_i32 = arith.constant 0 : i32
    %c0_i32_0 = arith.constant 0 : i32
    %c0_i32_1 = arith.constant 0 : i32
    return %c0_i32, %c0_i32_0 : i32, i32
  }
  func.func @transform_11(%arg0: i32) -> (i32, i32) {
    %c0_i32 = arith.constant 0 : i32
    %c0_i32_0 = arith.constant 0 : i32
    %c0_i32_1 = arith.constant 0 : i32
    return %c0_i32, %c0_i32_0 : i32, i32
  }
  func.func @transform_12(%arg0: i32) -> (i32, i32) {
    %c0_i32 = arith.constant 0 : i32
    %c0_i32_0 = arith.constant 0 : i32
    %c0_i32_1 = arith.constant 0 : i32
    return %c0_i32, %c0_i32_0 : i32, i32
  }
  func.func @transform_13(%arg0: i32) -> (i32, i32) {
    %c0_i32 = arith.constant 0 : i32
    %c0_i32_0 = arith.constant 0 : i32
    %c0_i32_1 = arith.constant 0 : i32
    return %c0_i32, %c0_i32_0 : i32, i32
  }
  func.func @transform_14(%arg0: i32) -> (i32, i32) {
    %c0_i32 = arith.constant 0 : i32
    %c0_i32_0 = arith.constant 0 : i32
    %c0_i32_1 = arith.constant 0 : i32
    return %c0_i32, %c0_i32_0 : i32, i32
  }
  func.func @transform_15(%arg0: i32) -> (i32, i32) {
    %c0_i32 = arith.constant 0 : i32
    %c0_i32_0 = arith.constant 0 : i32
    %c0_i32_1 = arith.constant 0 : i32
    return %c0_i32, %c0_i32_0 : i32, i32
  }
  func.func @transform_16(%arg0: i32) -> (i32, i32) {
    %c0_i32 = arith.constant 0 : i32
    %c0_i32_0 = arith.constant 0 : i32
    %c0_i32_1 = arith.constant 0 : i32
    return %c0_i32, %c0_i32_0 : i32, i32
  }
  func.func @transform_17(%arg0: i32) -> (i32, i32) {
    %c0_i32 = arith.constant 0 : i32
    %c0_i32_0 = arith.constant 0 : i32
    %c0_i32_1 = arith.constant 0 : i32
    return %c0_i32, %c0_i32_0 : i32, i32
  }
  func.func @transform_18(%arg0: i32) -> (i32, i32) {
    %c0_i32 = arith.constant 0 : i32
    %c0_i32_0 = arith.constant 0 : i32
    %c0_i32_1 = arith.constant 0 : i32
    return %c0_i32, %c0_i32_0 : i32, i32
  }
  func.func @transform_19(%arg0: i32) -> (i32, i32) {
    %c0_i32 = arith.constant 0 : i32
    %c0_i32_0 = arith.constant 0 : i32
    %c0_i32_1 = arith.constant 0 : i32
    return %c0_i32, %c0_i32_0 : i32, i32
  }
  func.func @transform_20(%arg0: i32) -> (i32, i32) {
    %c0_i32 = arith.constant 0 : i32
    %c0_i32_0 = arith.constant 0 : i32
    %c0_i32_1 = arith.constant 0 : i32
    return %c0_i32, %c0_i32_0 : i32, i32
  }
  func.func @transform_21(%arg0: i32) -> (i32, i32) {
    %c0_i32 = arith.constant 0 : i32
    %c0_i32_0 = arith.constant 0 : i32
    %c0_i32_1 = arith.constant 0 : i32
    return %c0_i32, %c0_i32_0 : i32, i32
  }
  func.func @transform_22(%arg0: i32) -> (i32, i32) {
    %c0_i32 = arith.constant 0 : i32
    %c0_i32_0 = arith.constant 0 : i32
    %c0_i32_1 = arith.constant 0 : i32
    return %c0_i32, %c0_i32_0 : i32, i32
  }
  func.func @transform_23(%arg0: i32) -> (i32, i32) {
    %c0_i32 = arith.constant 0 : i32
    %c0_i32_0 = arith.constant 0 : i32
    %c0_i32_1 = arith.constant 0 : i32
    return %c0_i32, %c0_i32_0 : i32, i32
  }
  func.func @transform_24(%arg0: i32) -> (i32, i32) {
    %c0_i32 = arith.constant 0 : i32
    %c0_i32_0 = arith.constant 0 : i32
    %c0_i32_1 = arith.constant 0 : i32
    return %c0_i32, %c0_i32_0 : i32, i32
  }
  func.func @transform_25(%arg0: i32) -> (i32, i32) {
    %c0_i32 = arith.constant 0 : i32
    %c0_i32_0 = arith.constant 0 : i32
    %c0_i32_1 = arith.constant 0 : i32
    return %c0_i32, %c0_i32_0 : i32, i32
  }
  func.func @transform_26(%arg0: i32) -> (i32, i32) {
    %c0_i32 = arith.constant 0 : i32
    %c0_i32_0 = arith.constant 0 : i32
    %c0_i32_1 = arith.constant 0 : i32
    return %c0_i32, %c0_i32_0 : i32, i32
  }
  func.func @transform_27(%arg0: i32) -> (i32, i32) {
    %c0_i32 = arith.constant 0 : i32
    %c0_i32_0 = arith.constant 0 : i32
    %c0_i32_1 = arith.constant 0 : i32
    return %c0_i32, %c0_i32_0 : i32, i32
  }
  func.func @transform_28(%arg0: i32) -> (i32, i32) {
    %c0_i32 = arith.constant 0 : i32
    %c0_i32_0 = arith.constant 0 : i32
    %c0_i32_1 = arith.constant 0 : i32
    return %c0_i32, %c0_i32_0 : i32, i32
  }
  func.func @transform_29(%arg0: i32) -> (i32, i32) {
    %c0_i32 = arith.constant 0 : i32
    %c0_i32_0 = arith.constant 0 : i32
    %c0_i32_1 = arith.constant 0 : i32
    return %c0_i32, %c0_i32_0 : i32, i32
  }
  func.func @transform_30(%arg0: i32) -> (i32, i32) {
    %c0_i32 = arith.constant 0 : i32
    %c0_i32_0 = arith.constant 0 : i32
    %c0_i32_1 = arith.constant 0 : i32
    return %c0_i32, %c0_i32_0 : i32, i32
  }
  func.func @transform_31(%arg0: i32) -> (i32, i32) {
    %c0_i32 = arith.constant 0 : i32
    %c0_i32_0 = arith.constant 0 : i32
    %c0_i32_1 = arith.constant 0 : i32
    return %c0_i32, %c0_i32_0 : i32, i32
  }
  func.func @transform_32(%arg0: i32) -> (i32, i32) {
    %c0_i32 = arith.constant 0 : i32
    %c0_i32_0 = arith.constant 0 : i32
    %c0_i32_1 = arith.constant 0 : i32
    return %c0_i32, %c0_i32_0 : i32, i32
  }
  func.func @transform_33(%arg0: i32) -> (i32, i32) {
    %c0_i32 = arith.constant 0 : i32
    %c0_i32_0 = arith.constant 0 : i32
    %c0_i32_1 = arith.constant 0 : i32
    return %c0_i32, %c0_i32_0 : i32, i32
  }
  func.func @transform_34(%arg0: i32) -> (i32, i32) {
    %c0_i32 = arith.constant 0 : i32
    %c0_i32_0 = arith.constant 0 : i32
    %c0_i32_1 = arith.constant 0 : i32
    return %c0_i32, %c0_i32_0 : i32, i32
  }
  func.func @transform_35(%arg0: i32) -> (i32, i32) {
    %c0_i32 = arith.constant 0 : i32
    %c0_i32_0 = arith.constant 0 : i32
    %c0_i32_1 = arith.constant 0 : i32
    return %c0_i32, %c0_i32_0 : i32, i32
  }
  func.func @transform_36(%arg0: i32) -> (i32, i32) {
    %c0_i32 = arith.constant 0 : i32
    %c0_i32_0 = arith.constant 0 : i32
    %c0_i32_1 = arith.constant 0 : i32
    return %c0_i32, %c0_i32_0 : i32, i32
  }
  func.func @transform_37(%arg0: i32) -> (i32, i32) {
    %c0_i32 = arith.constant 0 : i32
    %c0_i32_0 = arith.constant 0 : i32
    %c0_i32_1 = arith.constant 0 : i32
    return %c0_i32, %c0_i32_0 : i32, i32
  }
  func.func @transform_38(%arg0: i32) -> (i32, i32) {
    %c0_i32 = arith.constant 0 : i32
    %c0_i32_0 = arith.constant 0 : i32
    %c0_i32_1 = arith.constant 0 : i32
    return %c0_i32, %c0_i32_0 : i32, i32
  }
  func.func @transform_39(%arg0: i32) -> (i32, i32) {
    %c0_i32 = arith.constant 0 : i32
    %c0_i32_0 = arith.constant 0 : i32
    %c0_i32_1 = arith.constant 0 : i32
    return %c0_i32, %c0_i32_0 : i32, i32
  }
  func.func @transform_40(%arg0: i32) -> (i32, i32) {
    %c0_i32 = arith.constant 0 : i32
    %c0_i32_0 = arith.constant 0 : i32
    %c0_i32_1 = arith.constant 0 : i32
    return %c0_i32, %c0_i32_0 : i32, i32
  }
  func.func @transform_41(%arg0: i32) -> (i32, i32) {
    %c0_i32 = arith.constant 0 : i32
    %c0_i32_0 = arith.constant 0 : i32
    %c0_i32_1 = arith.constant 0 : i32
    return %c0_i32, %c0_i32_0 : i32, i32
  }
  func.func @transform_42(%arg0: i32) -> (i32, i32) {
    %c0_i32 = arith.constant 0 : i32
    %c0_i32_0 = arith.constant 0 : i32
    %c0_i32_1 = arith.constant 0 : i32
    return %c0_i32, %c0_i32_0 : i32, i32
  }
  func.func @transform_43(%arg0: i32) -> (i32, i32) {
    %c0_i32 = arith.constant 0 : i32
    %c0_i32_0 = arith.constant 0 : i32
    %c0_i32_1 = arith.constant 0 : i32
    return %c0_i32, %c0_i32_0 : i32, i32
  }
  func.func @transform_44(%arg0: i32) -> (i32, i32) {
    %c0_i32 = arith.constant 0 : i32
    %c0_i32_0 = arith.constant 0 : i32
    %c0_i32_1 = arith.constant 0 : i32
    return %c0_i32, %c0_i32_0 : i32, i32
  }
  func.func @transform_45(%arg0: i32) -> (i32, i32) {
    %c0_i32 = arith.constant 0 : i32
    %c0_i32_0 = arith.constant 0 : i32
    %c0_i32_1 = arith.constant 0 : i32
    return %c0_i32, %c0_i32_0 : i32, i32
  }
  func.func @transform_46(%arg0: i32) -> (i32, i32) {
    %c0_i32 = arith.constant 0 : i32
    %c0_i32_0 = arith.constant 0 : i32
    %c0_i32_1 = arith.constant 0 : i32
    return %c0_i32, %c0_i32_0 : i32, i32
  }
  func.func @transform_47(%arg0: i32) -> (i32, i32) {
    %c0_i32 = arith.constant 0 : i32
    %c0_i32_0 = arith.constant 0 : i32
    %c0_i32_1 = arith.constant 0 : i32
    return %c0_i32, %c0_i32_0 : i32, i32
  }
  func.func @transform_48(%arg0: i32) -> (i32, i32) {
    %c0_i32 = arith.constant 0 : i32
    %c0_i32_0 = arith.constant 0 : i32
    %c0_i32_1 = arith.constant 0 : i32
    return %c0_i32, %c0_i32_0 : i32, i32
  }
  func.func @transform_49(%arg0: i32) -> (i32, i32) {
    %c0_i32 = arith.constant 0 : i32
    %c0_i32_0 = arith.constant 0 : i32
    %c0_i32_1 = arith.constant 0 : i32
    return %c0_i32, %c0_i32_0 : i32, i32
  }
  func.func @transform_50(%arg0: i32) -> (i32, i32) {
    %c0_i32 = arith.constant 0 : i32
    %c0_i32_0 = arith.constant 0 : i32
    %c0_i32_1 = arith.constant 0 : i32
    return %c0_i32, %c0_i32_0 : i32, i32
  }
  func.func @transform_51(%arg0: i32) -> (i32, i32) {
    %c0_i32 = arith.constant 0 : i32
    %c0_i32_0 = arith.constant 0 : i32
    %c0_i32_1 = arith.constant 0 : i32
    return %c0_i32, %c0_i32_0 : i32, i32
  }
  func.func @transform_52(%arg0: i32) -> (i32, i32) {
    %c0_i32 = arith.constant 0 : i32
    %c0_i32_0 = arith.constant 0 : i32
    %c0_i32_1 = arith.constant 0 : i32
    return %c0_i32, %c0_i32_0 : i32, i32
  }
  func.func @transform_53(%arg0: i32) -> (i32, i32) {
    %c0_i32 = arith.constant 0 : i32
    %c0_i32_0 = arith.constant 0 : i32
    %c0_i32_1 = arith.constant 0 : i32
    return %c0_i32, %c0_i32_0 : i32, i32
  }
  func.func @transform_54(%arg0: i32) -> (i32, i32, i32) {
    %c0_i32 = arith.constant 0 : i32
    %c0_i32_0 = arith.constant 0 : i32
    %c0_i32_1 = arith.constant 0 : i32
    return %arg0, %c0_i32, %c0_i32_0 : i32, i32, i32
  }
  func.func @transform_55(%arg0: i32) -> (i32, i32, i32) {
    %c0_i32 = arith.constant 0 : i32
    %c0_i32_0 = arith.constant 0 : i32
    %c0_i32_1 = arith.constant 0 : i32
    return %arg0, %c0_i32, %c0_i32_0 : i32, i32, i32
  }
  func.func @transform_56(%arg0: i32) -> (i32, i32, i32) {
    %c0_i32 = arith.constant 0 : i32
    %c0_i32_0 = arith.constant 0 : i32
    %c0_i32_1 = arith.constant 0 : i32
    return %arg0, %c0_i32, %c0_i32_0 : i32, i32, i32
  }
  func.func @transform_57(%arg0: i32) -> (i32, i32, i32) {
    %c0_i32 = arith.constant 0 : i32
    %c0_i32_0 = arith.constant 0 : i32
    %c0_i32_1 = arith.constant 0 : i32
    return %arg0, %c0_i32, %c0_i32_0 : i32, i32, i32
  }
  func.func @transform_58(%arg0: i32) -> (i32, i32, i32) {
    %c0_i32 = arith.constant 0 : i32
    %c0_i32_0 = arith.constant 0 : i32
    %c0_i32_1 = arith.constant 0 : i32
    return %arg0, %c0_i32, %c0_i32_0 : i32, i32, i32
  }
}

</mosaic_0001>

<bundles_post_ra>
// kernel: encoder_forward.1
= control target key start
LH: loop header
LB: loop body
LE: loop exit
PB: predicated region body
PF: predicated region fallthrough
CT: control target
= control target key end

     0   :  { %s11782_s6 = smov 1   ;;  %s11783_s10 = smov 2   ;;  %s15125_s0 = inlined_call_operand.smem [shape: u32[59], index: -1, kind: input, shape index: {}] }
   0x1   :  { %s11872_s5 = sld [smem:[%s15125_s0]]   ;;  %s11784_s14 = smov 3  }
   0x2   :  { %s11877_s9 = sld [smem:[%s15125_s0 + %s11782_s6]]   ;;  %s11785_s18 = smov 4  }
   0x3   :  { %s11882_s13 = sld [smem:[%s15125_s0 + %s11783_s10]]   ;;  %s11786_s22 = smov 5  }
   0x4   :  { %s11887_s17 = sld [smem:[%s15125_s0 + %s11784_s14]]   ;;  %s11787_s26 = smov 6  }
   0x5   :  { %s11892_s21 = sld [smem:[%s15125_s0 + %s11785_s18]]   ;;  %s11788_s30 = smov 7  }
   0x6   :  { %s11897_s25 = sld [smem:[%s15125_s0 + %s11786_s22]]   ;;  %s11789_s4 = smov 8  }
   0x7   :  { %15230 = sst [smem:[#allocation2_spill]] %s11872_s5  ;;  %s11790_s10 = smov 9  }
   0x8   :  { %s11902_s29 = sld [smem:[%s15125_s0 + %s11787_s26]]   ;;  %s11791_s15 = smov 10  }
   0x9   :  { %s11907_s3 = sld [smem:[%s15125_s0 + %s11788_s30]]   ;;  %s11792_s20 = smov 11  }
   0xa   :  { %s11912_s8 = sld [smem:[%s15125_s0 + %s11789_s4]]   ;;  %s11793_s26 = smov 12  }
   0xb   :  { %s11917_s14 = sld [smem:[%s15125_s0 + %s11790_s10]]   ;;  %s11794_s1 = smov 13  }
   0xc   :  { %15231 = sst [smem:[#allocation3_spill]] %s11897_s25  ;;  %s11795_s7 = smov 14  }
   0xd   :  { %s11922_s19 = sld [smem:[%s15125_s0 + %s11791_s15]]   ;;  %s11796_s15 = smov 15  }
   0xe   :  { %15232 = sst [smem:[#allocation4_spill]] %s11902_s29  ;;  %s11797_s22 = smov 16  }
   0xf   :  { %15233 = sst [smem:[#allocation5_spill]] %s11907_s3  ;;  %s11798_s28 = smov 17  }
  0x10   :  { %15234 = sst [smem:[#allocation6_spill]] %s11912_s8 }
  0x11   :  { %s11927_s24 = sld [smem:[%s15125_s0 + %s11792_s20]]  }
  0x12   :  { %s11932_s30 = sld [smem:[%s15125_s0 + %s11793_s26]]  }
  0x13   :  { %s11937_s6 = sld [smem:[%s15125_s0 + %s11794_s1]]  }
  0x14   :  { %s11942_s12 = sld [smem:[%s15125_s0 + %s11795_s7]]   ;;  %s11799_s7 = smov 18  }
  0x15   :  { %s11947_s20 = sld [smem:[%s15125_s0 + %s11796_s15]]   ;;  %s11800_s15 = smov 19  }
  0x16   :  { %s11952_s27 = sld [smem:[%s15125_s0 + %s11797_s22]]   ;;  %s11801_s22 = smov 20  }
  0x17   :  { %s11957_s4 = sld [smem:[%s15125_s0 + %s11798_s28]]   ;;  %s11802_s28 = smov 21  }
  0x18   :  { %s11962_s8 = sld [smem:[%s15125_s0 + %s11799_s7]]   ;;  %s11803_s7 = smov 22  }
  0x19   :  { %15235 = sst [smem:[#allocation7_spill]] %s11937_s6 }
  0x1a   :  { %s11967_s3 = sld [smem:[%s15125_s0 + %s11800_s15]]   ;;  %s11804_s15 = smov 23  }
  0x1b   :  { %s11972_s29 = sld [smem:[%s15125_s0 + %s11801_s22]]   ;;  %s11805_s22 = smov 24  }
  0x1c   :  { %s11977_s25 = sld [smem:[%s15125_s0 + %s11802_s28]]   ;;  %s11806_s28 = smov 25  }
  0x1d   :  { %15236 = sst [smem:[#allocation8_spill]] %s11957_s4 }
  0x1e   :  { %15237 = sst [smem:[#allocation9_spill]] %s11962_s8 }
  0x1f   :  { %s11982_s4 = sld [smem:[%s15125_s0 + %s11803_s7]]   ;;  %s11807_s7 = smov 26  }
  0x20   :  { %15238 = sst [smem:[#allocation10_spill]] %s11967_s3 }
  0x21   :  { %15239 = sst [smem:[#allocation11_spill]] %s11972_s29 }
  0x22   :  { %15240 = sst [smem:[#allocation12_spill]] %s11977_s25 }
  0x23   :  { %s11987_s8 = sld [smem:[%s15125_s0 + %s11804_s15]]   ;;  %s11808_s15 = smov 27  }
  0x24   :  { %s11992_s29 = sld [smem:[%s15125_s0 + %s11805_s22]]   ;;  %s11809_s22 = smov 28  }
  0x25   :  { %15241 = sst [smem:[#allocation13_spill]] %s11982_s4 }
  0x26   :  { %s11997_s25 = sld [smem:[%s15125_s0 + %s11806_s28]]   ;;  %s11810_s28 = smov 29  }
  0x27   :  { %s12002_s4 = sld [smem:[%s15125_s0 + %s11807_s7]]   ;;  %s11811_s7 = smov 30  }
  0x29   :  { %15242 = sst [smem:[#allocation14_spill]] %s11987_s8 }
  0x2a   :  { %15243 = sst [smem:[#allocation15_spill]] %s11992_s29 }
  0x2b   :  { %s12007_s8 = sld [smem:[%s15125_s0 + %s11808_s15]]   ;;  %s11812_s15 = smov 31  }
  0x2c   :  { %15244 = sst [smem:[#allocation16_spill]] %s11997_s25 }
  0x2d   :  { %15245 = sst [smem:[#allocation17_spill]] %s12002_s4 }
  0x2e   :  { %s12012_s29 = sld [smem:[%s15125_s0 + %s11809_s22]]   ;;  %s11813_s22 = smov 32  }
  0x2f   :  { %s12017_s25 = sld [smem:[%s15125_s0 + %s11810_s28]]   ;;  %s11814_s28 = smov 33  }
  0x30   :  { %s12022_s4 = sld [smem:[%s15125_s0 + %s11811_s7]]   ;;  %s11815_s7 = smov 34  }
  0x31   :  { %15246 = sst [smem:[#allocation18_spill]] %s12007_s8 }
  0x32   :  { %s12027_s8 = sld [smem:[%s15125_s0 + %s11812_s15]]   ;;  %s11816_s15 = smov 35  }
  0x34   :  { %15247 = sst [smem:[#allocation19_spill]] %s12012_s29 }
  0x35   :  { %15248 = sst [smem:[#allocation20_spill]] %s12017_s25 }
  0x36   :  { %15249 = sst [smem:[#allocation21_spill]] %s12022_s4 }
  0x37   :  { %s12032_s29 = sld [smem:[%s15125_s0 + %s11813_s22]]   ;;  %s11817_s22 = smov 36  }
  0x38   :  { %15250 = sst [smem:[#allocation22_spill]] %s12027_s8 }
  0x39   :  { %s12037_s25 = sld [smem:[%s15125_s0 + %s11814_s28]]   ;;  %s11818_s28 = smov 37  }
  0x3a   :  { %s12042_s4 = sld [smem:[%s15125_s0 + %s11815_s7]]   ;;  %s11819_s7 = smov 38  }
  0x3b   :  { %s12047_s8 = sld [smem:[%s15125_s0 + %s11816_s15]]   ;;  %s11820_s15 = smov 39  }
  0x3d   :  { %15251 = sst [smem:[#allocation23_spill]] %s12032_s29 }
  0x3e   :  { %s12052_s29 = sld [smem:[%s15125_s0 + %s11817_s22]]   ;;  %s11821_s22 = smov 40  }
  0x3f   :  { %15252 = sst [smem:[#allocation24_spill]] %s12037_s25 }
  0x40   :  { %15253 = sst [smem:[#allocation25_spill]] %s12042_s4 }
  0x41   :  { %15254 = sst [smem:[#allocation26_spill]] %s12047_s8 }
  0x42   :  { %s12057_s25 = sld [smem:[%s15125_s0 + %s11818_s28]]   ;;  %s11822_s28 = smov 41  }
  0x43   :  { %s12062_s4 = sld [smem:[%s15125_s0 + %s11819_s7]]   ;;  %s11823_s7 = smov 42  }
  0x44   :  { %15255 = sst [smem:[#allocation27_spill]] %s12052_s29 }
  0x45   :  { %s12067_s8 = sld [smem:[%s15125_s0 + %s11820_s15]]   ;;  %s11824_s15 = smov 43  }
  0x46   :  { %s12072_s29 = sld [smem:[%s15125_s0 + %s11821_s22]]   ;;  %s11825_s22 = smov 44  }
  0x48   :  { %15256 = sst [smem:[#allocation28_spill]] %s12057_s25 }
  0x49   :  { %15257 = sst [smem:[#allocation29_spill]] %s12062_s4 }
  0x4a   :  { %s12077_s25 = sld [smem:[%s15125_s0 + %s11822_s28]]   ;;  %s11826_s28 = smov 45  }
  0x4b   :  { %15258 = sst [smem:[#allocation30_spill]] %s12067_s8 }
  0x4c   :  { %15259 = sst [smem:[#allocation31_spill]] %s12072_s29 }
  0x4d   :  { %s12082_s4 = sld [smem:[%s15125_s0 + %s11823_s7]]   ;;  %s11827_s7 = smov 46  }
  0x4e   :  { %s12087_s8 = sld [smem:[%s15125_s0 + %s11824_s15]]   ;;  %s11828_s15 = smov 47  }
  0x4f   :  { %s12092_s29 = sld [smem:[%s15125_s0 + %s11825_s22]]   ;;  %s11829_s22 = smov 48  }
  0x50   :  { %15260 = sst [smem:[#allocation32_spill]] %s12077_s25 }
  0x51   :  { %s12097_s25 = sld [smem:[%s15125_s0 + %s11826_s28]]   ;;  %s11830_s28 = smov 49  }
  0x53   :  { %15261 = sst [smem:[#allocation33_spill]] %s12082_s4 }
  0x54   :  { %15262 = sst [smem:[#allocation34_spill]] %s12087_s8 }
  0x55   :  { %15263 = sst [smem:[#allocation35_spill]] %s12092_s29 }
  0x56   :  { %s12102_s4 = sld [smem:[%s15125_s0 + %s11827_s7]]   ;;  %s11831_s7 = smov 50  }
  0x57   :  { %15264 = sst [smem:[#allocation36_spill]] %s12097_s25 }
  0x58   :  { %s12107_s8 = sld [smem:[%s15125_s0 + %s11828_s15]]   ;;  %s11832_s15 = smov 51  }
  0x59   :  { %s12112_s29 = sld [smem:[%s15125_s0 + %s11829_s22]]   ;;  %s11833_s22 = smov 52  }
  0x5a   :  { %s12117_s25 = sld [smem:[%s15125_s0 + %s11830_s28]]   ;;  %s11834_s28 = smov 53  }
  0x5c   :  { %15265 = sst [smem:[#allocation37_spill]] %s12102_s4 }
  0x5d   :  { %s12122_s4 = sld [smem:[%s15125_s0 + %s11831_s7]]   ;;  %s11835_s7 = smov 54  }
  0x5e   :  { %15266 = sst [smem:[#allocation38_spill]] %s12107_s8 }
  0x5f   :  { %15267 = sst [smem:[#allocation39_spill]] %s12112_s29 }
  0x60   :  { %15268 = sst [smem:[#allocation40_spill]] %s12117_s25 }
  0x61   :  { %s12127_s8 = sld [smem:[%s15125_s0 + %s11832_s15]]   ;;  %s11836_s15 = smov 55  }
  0x62   :  { %s12132_s29 = sld [smem:[%s15125_s0 + %s11833_s22]]   ;;  %s11837_s22 = smov 56  }
  0x63   :  { %15269 = sst [smem:[#allocation41_spill]] %s12122_s4 }
  0x64   :  { %s12137_s25 = sld [smem:[%s15125_s0 + %s11834_s28]]   ;;  %s11838_s28 = smov 57  }
  0x65   :  { %s12142_s4 = sld [smem:[%s15125_s0 + %s11835_s7]]   ;;  %s11839_s7 = smov 58  }
  0x66   :  { %s12162_s3 = sld [smem:[%s15125_s0 + %s11839_s7]]  }
  0x67   :  { %15270 = sst [smem:[#allocation42_spill]] %s12127_s8 }
  0x68   :  { %15271 = sst [smem:[#allocation43_spill]] %s12132_s29 }
  0x69   :  { %s12147_s8 = sld [smem:[%s15125_s0 + %s11836_s15]]   ;;  %s12164_s15 = smov 0  }
  0x6a   :  { %15272 = sst [smem:[#allocation44_spill]] %s12137_s25 }
  0x6b   :  { %15273 = sst [smem:[#allocation45_spill]] %s12142_s4 }
  0x6c   :  { %s12152_s29 = sld [smem:[%s15125_s0 + %s11837_s22]]  }
  0x6d   :  { %s12157_s25 = sld [smem:[%s15125_s0 + %s11838_s28]]  }
  0x6f   :  { %15274 = sst [smem:[#allocation46_spill]] %s12147_s8 }
  0x70 LB: > { %s9781_s16 = sadd.s32 4294967295, %s11780_s15   ;;  %p9785_p0 = scmp.ge.s32.totalorder %s11780_s15, 1  ;;  %s11780_s15 = sphi %s12164_s15, %s128_s15  }
  0x71   : > { %p1580_p1 = scmp.lt.s32.totalorder %s11780_s15, 3 }
  0x73   : > { %p1581_p2 = pnand %p9785_p0, %p1580_p1 }
  0x75   : > { %1584 = sbr.rel (%p1581_p2) target bundleno = 7229 (0x1c3d), region = 236 }
  0x7c   : > { %p1734_p3 = scmp.lt.s32.totalorder %s9781_s16, 1  ;;  %s15275_s5 = sld [smem:[#allocation2_spill]]  ;;  %v1786_v0 = vld [vmem:[%s11882_s13] sm:$0xff]  ;;  %v15211_v1 = vmov 0   ;;  %vm2211_vm0 = vcmask 1044480   ;;  %vm2212_vm1 = vcmask 1045504  }
  0x7d   : > { %2277 = vmatprep.mubr.bf16.mxu0 %v15211_v1  ;;  %2318 = vmatprep.mubr.bf16.mxu1 %v15211_v1  ;;  %v4224_v2 = vld [vmem:[%s11917_s14] sm:$0xff]  ;;  %v11841_v3 = vmov 65535   ;;  %vm2207_vm2 = vcmask 220160   ;;  %v11028_v37 = vld [vmem:[%s11887_s17 + $0x1c] ss:$12 sps:$4 sm:$0xff]   ;;  %s15164_s22 = smov 1  }
  0x7e   : > { %s15477_s16 = smov (!%p1734_p3, %s9781_s16), 1  ;;  %10787 = vset.pattern.permute.xlu0 %v15211_v1  ;;  %v2213_v4 = vsel %vm2211_vm0, 4294967295, %v11841_v3  ;;  %v1785_v19 = vld [vmem:[%s11877_s9] sm:$0xf]  ;;  %v11025_v31 = vld [vmem:[%s11887_s17 + $0x4] ss:$12 sps:$4 sm:$0xff]  }
  0x7f   : > { %2114 = vperm.xlu0 %10787, %v1786_v0   ;;  %s10695_s0 = smul.u32 160, %s15477_s16  ;;  %v12188_v9 = vsel %vm2212_vm1, %v2213_v4, 0  ;;  %v11023_v34 = vld [vmem:[%s11887_s17] ss:$12 sps:$4 sm:$0xff]   ;;  %v11026_v39 = vld [vmem:[%s11887_s17 + $0x18] ss:$12 sps:$4 sm:$0xff]  }
  0x80   : > { %v11031_v41 = vld [vmem:[%s11887_s17 + $0x34] ss:$12 sps:$4 sm:$0xff]   ;;  %v11029_v42 = vld [vmem:[%s11887_s17 + $0x30] ss:$12 sps:$4 sm:$0xff]   ;;  %v11034_v43 = vld [vmem:[%s11887_s17 + $0x4c] ss:$12 sps:$4 sm:$0xff]  }
  0x81   : > { %v11032_v44 = vld [vmem:[%s11887_s17 + $0x48] ss:$12 sps:$4 sm:$0xff]   ;;  %v11037_v45 = vld [vmem:[%s11887_s17 + $0x64] ss:$12 sps:$4 sm:$0xff]   ;;  %v11035_v46 = vld [vmem:[%s11887_s17 + $0x60] ss:$12 sps:$4 sm:$0xff]  }
  0x82   : > { %s12181_s18 = scalar_lea.vmem %s15275_s5, %s10695_s0  ;;  %v11040_v47 = vld [vmem:[%s11887_s17 + $0x7c] ss:$12 sps:$4 sm:$0xff]   ;;  %v11038_v48 = vld [vmem:[%s11887_s17 + $0x78] ss:$12 sps:$4 sm:$0xff]   ;;  %v11043_v49 = vld [vmem:[%s11887_s17 + $0x94] ss:$12 sps:$4 sm:$0xff]  }
  0x83   : > { %v10993_v5 = vld [vmem:[%s12181_s18 + $0x4] ss:$40 sps:$4 sm:$0xff]   ;;  %4250 = vperm.xlu0 %10787, %v4224_v2   ;;  %v10997_v7 = vld [vmem:[%s12181_s18] ss:$40 sps:$4 sm:$0xff]   ;;  %v11007_v16 = vld [vmem:[%s12181_s18 + $0x14] ss:$40 sps:$4 sm:$0xff]  }
  0x84   : > { %v10995_v6 = vld [vmem:[%s12181_s18 + $0xc] ss:$40 sps:$4 sm:$0xff]   ;;  %2245 = vmatprep.subr.bf16.mxu0 %v10993_v5  ;;  %v10998_v8 = vld [vmem:[%s12181_s18 + $0x8] ss:$40 sps:$4 sm:$0xff]   ;;  %v11008_v21 = vld [vmem:[%s12181_s18 + $0x18] ss:$40 sps:$4 sm:$0xff]  }
  0x85   : > { %2286 = vmatprep.subr.bf16.mxu1 %v10995_v6  ;;  %v10999_v10 = vld [vmem:[%s12181_s18 + $0x54] ss:$40 sps:$4 sm:$0x3f]   ;;  %2246 = vmatpush1.bf16.msra.mxu0 %v10997_v7  ;;  %v11003_v13 = vld [vmem:[%s12181_s18 + $0x50] ss:$40 sps:$4 sm:$0x3f]  }
  0x86   : > { %2287 = vmatpush1.bf16.msra.mxu1 %v10998_v8  ;;  %v11001_v11 = vld [vmem:[%s12181_s18 + $0x5c] ss:$40 sps:$4 sm:$0x3f]   ;;  %v2219_v12 = vand.u32 %v10999_v10, %v12188_v9  ;;  %v11004_v14 = vld [vmem:[%s12181_s18 + $0x58] ss:$40 sps:$4 sm:$0x3f]   ;;  %v2216_v17 = vand.u32 %v11003_v13, %v12188_v9 }
  0x87   : > { %v2225_v15 = vand.u32 %v11001_v11, %v12188_v9  ;;  %v2222_v18 = vand.u32 %v11004_v14, %v12188_v9  ;;  %v11005_v20 = vld [vmem:[%s12181_s18 + $0x10] ss:$40 sps:$4 sm:$0xff]   ;;  %v11010_v22 = vld [vmem:[%s12181_s18 + $0x1c] ss:$40 sps:$4 sm:$0xff]   ;;  %v11017_v35 = vld [vmem:[%s12181_s18 + $0x20] ss:$40 sps:$4 sm:$0xff]  }
  0x88   : > { %2247 = vmatprep.subr.bf16.mxu0 %v2219_v12  ;;  %v11011_v23 = vld [vmem:[%s12181_s18 + $0x60] ss:$40 sps:$4 sm:$0x3f]   ;;  %v11013_v24 = vld [vmem:[%s12181_s18 + $0x64] ss:$40 sps:$4 sm:$0x3f]  }
  0x89   : > { %2288 = vmatprep.subr.bf16.mxu1 %v2225_v15  ;;  %2248 = vmatpush1.bf16.msra.mxu0 %v2216_v17  ;;  %v11014_v25 = vld [vmem:[%s12181_s18 + $0x68] ss:$40 sps:$4 sm:$0x3f]   ;;  %v2231_v26 = vand.u32 %v11013_v24, %v12188_v9  ;;  %v11016_v27 = vld [vmem:[%s12181_s18 + $0x6c] ss:$40 sps:$4 sm:$0x3f]   ;;  %v2228_v29 = vand.u32 %v11011_v23, %v12188_v9 }
  0x8a   : > { %2289 = vmatpush1.bf16.msra.mxu1 %v2222_v18  ;;  %2327 = vmatprep.subr.bf16.mxu0 %v11007_v16  ;;  %v2237_v28 = vand.u32 %v11016_v27, %v12188_v9  ;;  %v2234_v30 = vand.u32 %v11014_v25, %v12188_v9  ;;  %v11019_v32 = vld [vmem:[%s12181_s18 + $0x24] ss:$40 sps:$4 sm:$0xff]   ;;  %v11022_v33 = vld [vmem:[%s12181_s18 + $0x74] ss:$40 sps:$4 sm:$0x3f]   ;;  %s15162_s23 = smov 127  }
  0x8b   : > { %2368 = vmatprep.subr.bf16.mxu1 %v11010_v22  ;;  %v11020_v36 = vld [vmem:[%s12181_s18 + $0x70] ss:$40 sps:$4 sm:$0x3f]   ;;  %v2243_v38 = vand.u32 %v11022_v33, %v12188_v9  ;;  %v11044_v52 = vld [vmem:[%s11887_s17 + $0xa8] ss:$12 sps:$4 sm:$0xff]   ;;  %s11852_s26 = smov 18  }
  0x8c   : > { %9816 = vmatmul.mubr.msk.bf16.vlgmr.msra.gmra.mrb[0].mxu0 %vm2207_vm2, %v1785_v19  ;;  %v2240_v40 = vand.u32 %v11020_v36, %v12188_v9  ;;  %v11041_v50 = vld [vmem:[%s11887_s17 + $0x90] ss:$12 sps:$4 sm:$0xff]   ;;  %v11046_v51 = vld [vmem:[%s11887_s17 + $0xac] ss:$12 sps:$4 sm:$0xff]   ;;  %v11050_v54 = vld [vmem:[%s11887_s17 + $0xc8] ss:$12 sps:$4 sm:$0xff]  }
  0x8d   : > { %9817 = vmatmul.mubr.msk.bf16.vlgmr.msra.gmra.mrb[0].mxu1 %vm2207_vm2, %v1785_v19  ;;  %2328 = vmatpush1.bf16.msra.mxu0 %v11005_v20  ;;  %v11049_v53 = vld [vmem:[%s11887_s17 + $0xc4] ss:$12 sps:$4 sm:$0xff]   ;;  %v11047_v55 = vld [vmem:[%s11887_s17 + $0xc0] ss:$12 sps:$4 sm:$0xff]   ;;  %v11051_v56 = vld [vmem:[%s11887_s17 + $0x8] ss:$12 sps:$4 sm:$0xff]  }
  0x8e   : > { %2369 = vmatpush1.bf16.msra.mxu1 %v11008_v21  ;;  %2329 = vmatprep.subr.bf16.mxu0 %v2231_v26  ;;  %v11054_v57 = vld [vmem:[%s11887_s17 + $0xdc] ss:$12 sps:$4 sm:$0xff]   ;;  %v11055_v58 = vld [vmem:[%s11887_s17 + $0xe0] ss:$12 sps:$4 sm:$0xff]   ;;  %v11052_v59 = vld [vmem:[%s11887_s17 + $0xd8] ss:$12 sps:$4 sm:$0xff]  }
  0x8f   : > { %2359 = vmatprep.mubr.bf16.mxu0 %v15211_v1  ;;  %2370 = vmatprep.subr.bf16.mxu1 %v2237_v28  ;;  %v11056_v60 = vld [vmem:[%s11887_s17 + $0x20] ss:$12 sps:$4 sm:$0xff]   ;;  %v11060_v62 = vld [vmem:[%s11887_s17 + $0xf8] ss:$12 sps:$4 sm:$0xff]   ;;  %v11057_v63 = vld [vmem:[%s11887_s17 + $0xf0] ss:$12 sps:$4 sm:$0xff]  }
  0x90   : > { %2400 = vmatprep.mubr.bf16.mxu1 %v15211_v1  ;;  %v11059_v61 = vld [vmem:[%s11887_s17 + $0xf4] ss:$12 sps:$4 sm:$0xff]   ;;  %v11061_v0 = vld [vmem:[%s11887_s17 + $0x38] ss:$12 sps:$4 sm:$0xff]   ;;  %v11065_v3 = vld [vmem:[%s11887_s17 + $0x110] ss:$12 sps:$4 sm:$0xff]  }
  0x91   : > { %2330 = vmatpush1.bf16.msra.mxu0 %v2228_v29  ;;  %v11064_v2 = vld [vmem:[%s11887_s17 + $0x10c] ss:$12 sps:$4 sm:$0xff]   ;;  %v11062_v4 = vld [vmem:[%s11887_s17 + $0x108] ss:$12 sps:$4 sm:$0xff]   ;;  %v11066_v5 = vld [vmem:[%s11887_s17 + $0x50] ss:$12 sps:$4 sm:$0xff]  }
  0x92   : > { %2371 = vmatpush1.bf16.msra.mxu1 %v2234_v30  ;;  %2409 = vmatprep.subr.bf16.mxu0 %v11019_v32  ;;  %v11069_v6 = vld [vmem:[%s11887_s17 + $0x124] ss:$12 sps:$4 sm:$0xff]   ;;  %v11070_v7 = vld [vmem:[%s11887_s17 + $0x128] ss:$12 sps:$4 sm:$0xff]   ;;  %v11067_v8 = vld [vmem:[%s11887_s17 + $0x120] ss:$12 sps:$4 sm:$0xff]  }
  0x93   : > { %3800 = vmatprep.subr.bf16.mxu1 %v11025_v31  ;;  %v11071_v9 = vld [vmem:[%s11887_s17 + $0x68] ss:$12 sps:$4 sm:$0xff]   ;;  %v11075_v11 = vld [vmem:[%s11887_s17 + $0x140] ss:$12 sps:$4 sm:$0xff]   ;;  %v11072_v12 = vld [vmem:[%s11887_s17 + $0x138] ss:$12 sps:$4 sm:$0xff]  }
  0x94   : > { %9818 = vmatmul.mubr.msk.bf16.vlgmr.msra.gmra.mrb[4].mxu0 %vm2207_vm2, %v1785_v19  ;;  %v11074_v10 = vld [vmem:[%s11887_s17 + $0x13c] ss:$12 sps:$4 sm:$0xff]   ;;  %v11076_v13 = vld [vmem:[%s11887_s17 + $0x80] ss:$12 sps:$4 sm:$0xff]   ;;  %v11080_v15 = vld [vmem:[%s11887_s17 + $0x158] ss:$12 sps:$4 sm:$0xff]  }
  0x95   : > { %9819 = vmatmul.mubr.msk.bf16.vlgmr.msra.gmra.mrb[4].mxu1 %vm2207_vm2, %v1785_v19  ;;  %2410 = vmatpush1.bf16.msra.mxu0 %v11017_v35  ;;  %v11079_v14 = vld [vmem:[%s11887_s17 + $0x154] ss:$12 sps:$4 sm:$0xff]   ;;  %v11077_v16 = vld [vmem:[%s11887_s17 + $0x150] ss:$12 sps:$4 sm:$0xff]   ;;  %v11081_v17 = vld [vmem:[%s11887_s17 + $0x98] ss:$12 sps:$4 sm:$0xff]  }
  0x96   : > { %2441 = vmatprep.mubr.bf16.mxu0 %v15211_v1  ;;  %2411 = vmatprep.subr.bf16.mxu0 %v2243_v38  ;;  %v11084_v18 = vld [vmem:[%s11887_s17 + $0x16c] ss:$12 sps:$4 sm:$0xff]   ;;  %v11082_v20 = vld [vmem:[%s11887_s17 + $0x168] ss:$12 sps:$4 sm:$0xff]   ;;  %v11086_v21 = vld [vmem:[%s11887_s17 + $0xb0] ss:$12 sps:$4 sm:$0xff]  }
  0x97   : > { %3801 = vmatpush1.bf16.msra.mxu1 %v11023_v34  ;;  %v11089_v22 = vld [vmem:[%s11887_s17 + $0x184] ss:$12 sps:$4 sm:$0xff]   ;;  %v11090_v23 = vld [vmem:[%s11887_s17 + $0x248] ss:$12 sps:$4 sm:$0xff]   ;;  %s11853_s28 = smov 110   ;;  %vm4396_vm7 = vcmask 1043456  }
  0x98   : > { %3802 = vmatprep.subr.bf16.mxu1 %v11028_v37  ;;  %vm4392_vm8 = vcmask 64512   ;;  %vm11855_vm9 = vmmov 0   ;;  %s15276_s4 = sld [smem:[#allocation45_spill]]  ;;  %s10696_s1 = smul.u32 24, %s15477_s16  ;;  %vm5254_vm10 = vcmask 130048   ;;  %vm5331_vm11 = vcmask 97280  }
  0x99   : > { %2412 = vmatpush1.bf16.msra.mxu0 %v2240_v40  ;;  %s15277_s6 = sld [smem:[#allocation7_spill]]  ;;  %s15278_s7 = sld [smem:[#allocation10_spill]]  ;;  %vm5779_vm12 = vcmask 195584   ;;  %vm6407_vm13 = vcmask 261120   ;;  %vm7135_vm14 = vcmask 392192   ;;  %vm8199_vm15 = vcmask 523264  }
  0x9a   : > { %10190 = vmatprep.subr.bf16.mxu0 %v11050_v54  ;;  %s15279_s10 = sld [smem:[#allocation9_spill]]  ;;  %s15280_s11 = sld [smem:[#allocation12_spill]]  ;;  %vm8363_vm0 = vcmask 326656  }
  0x9b   : > { %3803 = vmatpush1.bf16.msra.mxu1 %v11026_v39  ;;  %s15281_s0 = sld [smem:[#allocation13_spill]]  ;;  %s15282_s18 = sld [smem:[#allocation8_spill]] }
  0x9c   : > { %3804 = vmatprep.subr.bf16.mxu1 %v11031_v41  ;;  %9820 = vmatmul.mubr.msk.bf16.vlgmr.msra.gmra.mrb[8].mxu0 %vm2207_vm2, %v1785_v19  ;;  %v11085_v19 = vld [vmem:[%s11887_s17 + $0x170] ss:$12 sps:$4 sm:$0xff]   ;;  %s15284_s8 = sld [smem:[#allocation46_spill]]  ;;  %s11859_s5 = smov 122  }
  0x9d   : > { %10191 = vmatpush3.bf16.msra.mxu0 %v11051_v56 }
  0x9e   : > { %10192 = vmatprep.subr.bf16.mxu0 %v11055_v58  ;;  %s1743_s2 = scalar_lea.vmem %s15276_s4, %s10696_s1  ;;  %s15299_s4 = sld [smem:[#allocation23_spill]] }
  0x9f   : > { %3805 = vmatpush1.bf16.msra.mxu1 %v11029_v42 }
  0xa0   : > { %3806 = vmatprep.subr.bf16.mxu1 %v11034_v43 }
  0xa1   : > { %10193 = vmatpush3.bf16.msra.mxu0 %v11056_v60 }
  0xa2   : > { %10194 = vmatprep.subr.bf16.mxu0 %v11060_v62 }
  0xa3   : > { %3807 = vmatpush1.bf16.msra.mxu1 %v11032_v44 }
  0xa4   : > { %3808 = vmatprep.subr.bf16.mxu1 %v11037_v45 }
  0xa5   : > { %10195 = vmatpush3.bf16.msra.mxu0 %v11061_v0 }
  0xa6   : > { %10196 = vmatprep.subr.bf16.mxu0 %v11065_v3 }
  0xa7   : > { %3809 = vmatpush1.bf16.msra.mxu1 %v11035_v46 }
  0xa8   : > { %3810 = vmatprep.subr.bf16.mxu1 %v11040_v47 }
  0xa9   : > { %10197 = vmatpush3.bf16.msra.mxu0 %v11066_v5 }
  0xaa   : > { %10198 = vmatprep.subr.bf16.mxu0 %v11070_v7 }
  0xab   : > { %3811 = vmatpush1.bf16.msra.mxu1 %v11038_v48 }
  0xac   : > { %3812 = vmatprep.subr.bf16.mxu1 %v11043_v49 }
  0xad   : > { %10199 = vmatpush3.bf16.msra.mxu0 %v11071_v9 }
  0xae   : > { %10200 = vmatprep.subr.bf16.mxu0 %v11075_v11  ;;  %v11091_v11 = vld [vmem:[%s11887_s17 + $0x188] ss:$12 sps:$4 sm:$0xff]  }
  0xaf   : > { %3813 = vmatpush1.bf16.msra.mxu1 %v11041_v50 }
  0xb0   : > { %3814 = vmatprep.subr.bf16.mxu1 %v11046_v51 }
  0xb1   : > { %10201 = vmatpush3.bf16.msra.mxu0 %v11076_v13  ;;  %v11094_v13 = vld [vmem:[%s11887_s17 + $0x19c] ss:$12 sps:$4 sm:$0xff]  }
  0xb2   : > { %10202 = vmatprep.subr.bf16.mxu0 %v11080_v15 }
  0xb3   : > { %3815 = vmatpush1.bf16.msra.mxu1 %v11044_v52 }
  0xb4   : > { %3816 = vmatprep.subr.bf16.mxu1 %v11049_v53 }
  0xb5   : > { %10203 = vmatpush3.bf16.msra.mxu0 %v11081_v17  ;;  %v11096_v17 = vld [vmem:[%s11887_s17 + $0x1a0] ss:$12 sps:$4 sm:$0xff]  }
  0xb6   : > { %10204 = vmatprep.subr.bf16.mxu0 %v11085_v19  ;;  %v11100_v19 = vld [vmem:[%s11887_s17 + $0x278] ss:$12 sps:$4 sm:$0xff]  }
  0xb7   : > { %3817 = vmatpush1.bf16.msra.mxu1 %v11047_v55 }
  0xb8   : > { %3818 = vmatprep.subr.bf16.mxu1 %v11054_v57 }
  0xb9   : > { %10205 = vmatpush3.bf16.msra.mxu0 %v11086_v21  ;;  %v11101_v21 = vld [vmem:[%s11887_s17 + $0x1b8] ss:$12 sps:$4 sm:$0xff]  }
  0xba   : > { %10212 = vmatprep.subr.bf16.mxu0 %v11090_v23  ;;  %v11104_v23 = vld [vmem:[%s11887_s17 + $0x1cc] ss:$12 sps:$4 sm:$0xff]  }
  0xbb   : > { %3819 = vmatpush1.bf16.msra.mxu1 %v11052_v59 }
  0xbc   : > { %3820 = vmatprep.subr.bf16.mxu1 %v11059_v61 }
  0xbf   : > { %3821 = vmatpush1.bf16.msra.mxu1 %v11057_v63 }
  0xc0   : > { %3822 = vmatprep.subr.bf16.mxu1 %v11064_v2 }
  0xc3   : > { %3823 = vmatpush1.bf16.msra.mxu1 %v11062_v4 }
  0xc4   : > { %3824 = vmatprep.subr.bf16.mxu1 %v11069_v6 }
  0xc7   : > { %3825 = vmatpush1.bf16.msra.mxu1 %v11067_v8 }
  0xc8   : > { %3826 = vmatprep.subr.bf16.mxu1 %v11074_v10  ;;  %v11087_v10 = vld [vmem:[%s11887_s17 + $0x180] ss:$12 sps:$4 sm:$0xff]  }
  0xcb   : > { %3827 = vmatpush1.bf16.msra.mxu1 %v11072_v12 }
  0xcc   : > { %3828 = vmatprep.subr.bf16.mxu1 %v11079_v14  ;;  %v11095_v14 = vld [vmem:[%s11887_s17 + $0x260] ss:$12 sps:$4 sm:$0xff]  }
  0xcf   : > { %3829 = vmatpush1.bf16.msra.mxu1 %v11077_v16  ;;  %v11092_v16 = vld [vmem:[%s11887_s17 + $0x198] ss:$12 sps:$4 sm:$0xff]  }
  0xd0   : > { %3830 = vmatprep.subr.bf16.mxu1 %v11084_v18  ;;  %v11099_v18 = vld [vmem:[%s11887_s17 + $0x1b4] ss:$12 sps:$4 sm:$0xff]  }
  0xd3   : > { %3831 = vmatpush1.bf16.msra.mxu1 %v11082_v20  ;;  %v11097_v20 = vld [vmem:[%s11887_s17 + $0x1b0] ss:$12 sps:$4 sm:$0xff]  }
  0xd4   : > { %3841 = vmatprep.subr.bf16.mxu1 %v11089_v22 }
  0xfe   : > { %v12275_v24 = vpop.permute.xlu0 %2114 }
 0x15f   : > { %v2279_v25 = vpop.f32.mrb[0].mxu0 }
 0x160   : > { %v2320_v26 = vpop.f32.mrb[0].mxu1  ;;  %v2280_v27 = vadd.f32 %v2279_v25, %v12275_v24  ;;  %v2281_v28 = vpop.f32.mrb[1].mxu0  ;;  %v11105_v25 = vld [vmem:[%s11887_s17 + $0x290] ss:$12 sps:$4 sm:$0xff]  }
 0x161   : > { %v2322_v29 = vpop.f32.mrb[1].mxu1  ;;  %v2282_v30 = vadd.f32 %v2281_v28, %v12275_v24  ;;  %v2283_v32 = vpop.f32.mrb[2].mxu0  ;;  %v12291_v60 = vadd.f32 %v2320_v26, %v12275_v24  ;;  %v11102_v28 = vld [vmem:[%s11887_s17 + $0x1c8] ss:$12 sps:$4 sm:$0xff]  }
 0x162   : > { %v2323_v31 = vadd.f32 %v2322_v29, %v12275_v24  ;;  %v2324_v33 = vpop.f32.mrb[2].mxu1  ;;  %v2450_v34 = vsub.f32 0.0, %v2280_v27  ;;  %v2284_v35 = vpop.f32.mrb[3].mxu0  ;;  %v11106_v29 = vld [vmem:[%s11887_s17 + $0x1d0] ss:$12 sps:$4 sm:$0xff]  }
 0x163   : > { %v2325_v36 = vpop.f32.mrb[3].mxu1  ;;  %v2451_v37 = vsub.f32 0.0, %v2282_v30  ;;  %v2452_v62 = vsub.f32 0.0, %v12291_v60  ;;  %v11107_v33 = vld [vmem:[%s11887_s17 + $0x1e0] ss:$12 sps:$4 sm:$0xff]  }
 0x164   : > { %v2453_v38 = vsub.f32 0.0, %v2323_v31  ;;  %v2460_v39 = vmul.f32 1.442695, %v2450_v34  ;;  %v11111_v34 = vld [vmem:[%s11887_s17 + $0x1e8] ss:$12 sps:$4 sm:$0xff]  }
 0x165   : > { %v2462_v40 = vmul.f32 1.442695, %v2451_v37  ;;  %v2464_v2 = vmul.f32 1.442695, %v2452_v62  ;;  %v11114_v35 = vld [vmem:[%s11887_s17 + $0x1fc] ss:$12 sps:$4 sm:$0xff]  }
 0x166   : > { %v2466_v41 = vmul.f32 1.442695, %v2453_v38  ;;  %11424 = vpow2.f32 %v2460_v39  ;;  %v11115_v36 = vld [vmem:[%s11887_s17 + $0x2c0] ss:$12 sps:$4 sm:$0xff]   ;;  %v11112_v38 = vld [vmem:[%s11887_s17 + $0x1f8] ss:$12 sps:$4 sm:$0xff]  }
 0x167   : > { %v12280_v42 = vpop.f32.mrb[4].mxu0  ;;  %11426 = vpow2.f32 %v2462_v40  ;;  %v11116_v39 = vld [vmem:[%s11887_s17 + $0x200] ss:$12 sps:$4 sm:$0xff]   ;;  %v11130_v62 = vld [vmem:[%s11887_s17 + $0x3c8] ss:$12 sps:$4 sm:$0xff]  }
 0x168   : > { %v12282_v43 = vpop.f32.mrb[4].mxu1  ;;  %v2363_v44 = vpop.f32.mrb[5].mxu0  ;;  %11428 = vpow2.f32 %v2466_v41  ;;  %v12320_v37 = vadd.f32 %v12280_v42, %v12275_v24  ;;  %v11119_v41 = vld [vmem:[%s11887_s17 + $0x214] ss:$12 sps:$4 sm:$0xff]   ;;  %v11117_v42 = vld [vmem:[%s11887_s17 + $0x210] ss:$12 sps:$4 sm:$0xff]  }
 0x169   : > { %v12284_v45 = vpop.f32.mrb[5].mxu1  ;;  %v2365_v46 = vpop.f32.mrb[6].mxu0  ;;  %v12294_v61 = vadd.f32 %v2363_v44, %v12275_v24  ;;  %v11120_v44 = vld [vmem:[%s11887_s17 + $0x2d8] ss:$12 sps:$4 sm:$0xff]  }
 0x16a   : > { %v2406_v47 = vpop.f32.mrb[6].mxu1  ;;  %v2366_v48 = vpop.f32.mrb[7].mxu0  ;;  %v12326_v40 = vadd.f32 %v12284_v45, %v12275_v24  ;;  %v2454_v46 = vsub.f32 0.0, %v12320_v37  ;;  %v11124_v45 = vld [vmem:[%s11887_s17 + $0x22c] ss:$12 sps:$4 sm:$0xff]  }
 0x16b   : > { %v2407_v49 = vpop.f32.mrb[7].mxu1  ;;  %v2455_v63 = vsub.f32 0.0, %v12294_v61  ;;  %v11121_v47 = vld [vmem:[%s11887_s17 + $0x218] ss:$12 sps:$4 sm:$0xff]  }
 0x16c   : > { %v2457_v48 = vsub.f32 0.0, %v12326_v40  ;;  %v11125_v49 = vld [vmem:[%s11887_s17 + $0x2f0] ss:$12 sps:$4 sm:$0xff]  }
 0x16d   : > { %v2470_v5 = vmul.f32 1.442695, %v2455_v63 }
 0x16f   : > { %v12286_v50 = vpop.f32.mrb[8].mxu0 }
 0x170   : > { %v11425_v51 = vpop.eup %11424  ;;  %v12288_v52 = vpop.f32.mrb[9].mxu0 }
 0x171   : > { %v2480_v53 = vadd.f32 1.0, %v11425_v51  ;;  %v2447_v54 = vpop.f32.mrb[10].mxu0  ;;  %v11427_v55 = vpop.eup %11426 }
 0x172   : > { %v2448_v56 = vpop.f32.mrb[11].mxu0  ;;  %v11429_v57 = vpop.eup %11428  ;;  %v2481_v58 = vadd.f32 1.0, %v11427_v55  ;;  %v11122_v55 = vld [vmem:[%s11887_s17 + $0x228] ss:$12 sps:$4 sm:$0xff]  }
 0x173   : > { %11430 = vrcp.f32 %v2480_v53  ;;  %v2483_v59 = vadd.f32 1.0, %v11429_v57  ;;  %v2468_v53 = vmul.f32 1.442695, %v2454_v46  ;;  %v11126_v56 = vld [vmem:[%s11887_s17 + $0x230] ss:$12 sps:$4 sm:$0xff]  }
 0x174   : > { %11432 = vrcp.f32 %v2481_v58  ;;  %v2474_v58 = vmul.f32 1.442695, %v2457_v48  ;;  %v11170_v48 = vld [vmem:[%s11887_s17 + $0x548] ss:$12 sps:$4 sm:$0xff]  }
 0x175   : > { %11434 = vrcp.f32 %v2483_v59  ;;  %v11129_v59 = vld [vmem:[%s11887_s17 + $0x244] ss:$12 sps:$4 sm:$0xff]  }
 0x176   : > { %11436 = vpow2.f32 %v2464_v2  ;;  %v11131_v2 = vld [vmem:[%s11887_s17 + $0x308] ss:$12 sps:$4 sm:$0xff]  }
 0x177   : > { %11438 = vpow2.f32 %v2470_v5 }
 0x17d   : > { %v11431_v0 = vpop.eup %11430 }
 0x17e   : > { %v11433_v3 = vpop.eup %11432  ;;  %v2500_v4 = vmul.f32 %v11431_v0, %v2280_v27  ;;  %v11127_v0 = vld [vmem:[%s11887_s17 + $0x240] ss:$12 sps:$4 sm:$0xff]  }
 0x17f   : > { %v11435_v6 = vpop.eup %11434  ;;  %v2501_v7 = vmul.f32 %v11433_v3, %v2282_v30  ;;  %v11109_v30 = vld [vmem:[%s11887_s17 + $0x1e4] ss:$12 sps:$4 sm:$0xff]  }
 0x180   : > { %v2503_v8 = vmul.f32 %v11435_v6, %v2323_v31  ;;  %v2510_v12 = vpack.c.bf16 %v2500_v4, %v2500_v4  ;;  %v11437_v22 = vpop.eup %11436  ;;  %v11110_v31 = vld [vmem:[%s11887_s17 + $0x2a8] ss:$12 sps:$4 sm:$0xff]   ;;  %v11135_v4 = vld [vmem:[%s11887_s17 + $0x3e0] ss:$12 sps:$4 sm:$0xff]  }
 0x181   : > { %v2511_v9 = vpack.c.bf16 %v2501_v7, %v2501_v7  ;;  %v11439_v26 = vpop.eup %11438  ;;  %v2482_v27 = vadd.f32 1.0, %v11437_v22  ;;  %v11136_v6 = vld [vmem:[%s11887_s17 + $0x320] ss:$12 sps:$4 sm:$0xff]   ;;  %v11151_v22 = vld [vmem:[%s11887_s17 + $0x368] ss:$12 sps:$4 sm:$0xff]  }
 0x182   : > { %v2513_v15 = vpack.c.bf16 %v2503_v8, %v2503_v8  ;;  %v2485_v32 = vadd.f32 1.0, %v11439_v26  ;;  %v11139_v7 = vld [vmem:[%s11887_s17 + $0x274] ss:$12 sps:$4 sm:$0xff]   ;;  %v11140_v8 = vld [vmem:[%s11887_s17 + $0x3f8] ss:$12 sps:$4 sm:$0xff]   ;;  %v12370_v26 = vadd.f32 %v12282_v43, %v12275_v24 }
 0x183   : > { %3832 = vmatprep.mubr.bf16.mxu1 %v2511_v9  ;;  %4037 = vmatprep.mubr.bf16.mxu0 %v2511_v9  ;;  %11440 = vrcp.f32 %v2482_v27  ;;  %v11137_v9 = vld [vmem:[%s11887_s17 + $0x270] ss:$12 sps:$4 sm:$0xff]   ;;  %v11152_v27 = vld [vmem:[%s11887_s17 + $0x2b8] ss:$12 sps:$4 sm:$0xff]  }
 0x184   : > { %3833 = vmatmul.mubr.bf16.vlgmr.msra.gmra.mrb[8].mxu1 %v2510_v12  ;;  %4038 = vmatmul.mubr.bf16.vlgmr.msra.gmra.mrb[12].mxu0 %v2510_v12  ;;  %11442 = vrcp.f32 %v2485_v32  ;;  %v11144_v12 = vld [vmem:[%s11887_s17 + $0x28c] ss:$12 sps:$4 sm:$0xff]   ;;  %v2456_v32 = vsub.f32 0.0, %v12370_v26  ;;  %v11157_v43 = vld [vmem:[%s11887_s17 + $0x2d0] ss:$12 sps:$4 sm:$0xff]  }
 0x185   : > { %3842 = vmatpush1.bf16.msra.mxu1 %v11087_v10  ;;  %10213 = vmatpush3.bf16.msra.mxu0 %v11091_v11  ;;  %11444 = vpow2.f32 %v2468_v53  ;;  %v11141_v10 = vld [vmem:[%s11887_s17 + $0x338] ss:$12 sps:$4 sm:$0xff]   ;;  %v11174_v53 = vld [vmem:[%s11887_s17 + $0x31c] ss:$12 sps:$4 sm:$0xff]  }
 0x186   : > { %3873 = vmatprep.mubr.bf16.mxu1 %v2513_v15  ;;  %4077 = vmatprep.mubr.bf16.mxu0 %v2513_v15  ;;  %11446 = vpow2.f32 %v2474_v58  ;;  %v11180_v58 = vld [vmem:[%s11887_s17 + $0x578] ss:$12 sps:$4 sm:$0xff]  }
 0x187   : > { %3843 = vmatprep.subr.bf16.mxu1 %v11094_v13  ;;  %10214 = vmatprep.subr.bf16.mxu0 %v11095_v14  ;;  %v11145_v13 = vld [vmem:[%s11887_s17 + $0x410] ss:$12 sps:$4 sm:$0xff]  }
 0x189   : > { %3844 = vmatpush1.bf16.msra.mxu1 %v11092_v16  ;;  %10215 = vmatpush3.bf16.msra.mxu0 %v11096_v17  ;;  %v11142_v16 = vld [vmem:[%s11887_s17 + $0x288] ss:$12 sps:$4 sm:$0xff]   ;;  %v11146_v17 = vld [vmem:[%s11887_s17 + $0x350] ss:$12 sps:$4 sm:$0xff]  }
 0x18a   : > { %3845 = vmatprep.subr.bf16.mxu1 %v11099_v18  ;;  %10216 = vmatprep.subr.bf16.mxu0 %v11100_v19  ;;  %v11149_v18 = vld [vmem:[%s11887_s17 + $0x2a4] ss:$12 sps:$4 sm:$0xff]   ;;  %v11150_v19 = vld [vmem:[%s11887_s17 + $0x428] ss:$12 sps:$4 sm:$0xff]  }
 0x18d   : > { %3846 = vmatpush1.bf16.msra.mxu1 %v11097_v20  ;;  %10217 = vmatpush3.bf16.msra.mxu0 %v11101_v21  ;;  %v11441_v51 = vpop.eup %11440  ;;  %v11147_v21 = vld [vmem:[%s11887_s17 + $0x2a0] ss:$12 sps:$4 sm:$0xff]  }
 0x18e   : > { %3847 = vmatprep.subr.bf16.mxu1 %v11104_v23  ;;  %10218 = vmatprep.subr.bf16.mxu0 %v11105_v25  ;;  %v11443_v54 = vpop.eup %11442  ;;  %v2502_v57 = vmul.f32 %v11441_v51, %v12291_v60  ;;  %v11134_v60 = vld [vmem:[%s11887_s17 + $0x25c] ss:$12 sps:$4 sm:$0xff]   ;;  %v11155_v25 = vld [vmem:[%s11887_s17 + $0x440] ss:$12 sps:$4 sm:$0xff]  }
 0x18f   : > { %v2505_v63 = vmul.f32 %v11443_v54, %v12294_v61  ;;  %v11132_v61 = vld [vmem:[%s11887_s17 + $0x258] ss:$12 sps:$4 sm:$0xff]   ;;  %v11445_v11 = vpop.eup %11444  ;;  %v11154_v23 = vld [vmem:[%s11887_s17 + $0x2bc] ss:$12 sps:$4 sm:$0xff]   ;;  %v11175_v54 = vld [vmem:[%s11887_s17 + $0x560] ss:$12 sps:$4 sm:$0xff]  }
 0x190   : > { %v12344_v3 = vpack.c.bf16 %v2502_v57, %v2502_v57  ;;  %v11447_v14 = vpop.eup %11446  ;;  %v2484_v15 = vadd.f32 1.0, %v11445_v11  ;;  %v11179_v57 = vld [vmem:[%s11887_s17 + $0x334] ss:$12 sps:$4 sm:$0xff]  }
 0x191   : > { %3848 = vmatpush1.bf16.msra.mxu1 %v11102_v28  ;;  %10219 = vmatpush3.bf16.msra.mxu0 %v11106_v29  ;;  %v12348_v5 = vpack.c.bf16 %v2505_v63, %v2505_v63  ;;  %v2487_v20 = vadd.f32 1.0, %v11447_v14  ;;  %v11156_v28 = vld [vmem:[%s11887_s17 + $0x380] ss:$12 sps:$4 sm:$0xff]   ;;  %v12376_v29 = vadd.f32 %v12288_v52, %v12275_v24  ;;  %v12427_v14 = vadd.f32 %v12286_v50, %v12275_v24  ;;  %v11197_v24 = vld [vmem:[%s11887_s17 + $0x390] ss:$12 sps:$4 sm:$0xff]  }
 0x192   : > { %3849 = vmatprep.subr.bf16.mxu1 %v11109_v30  ;;  %10220 = vmatprep.subr.bf16.mxu0 %v11110_v31  ;;  %11448 = vrcp.f32 %v2484_v15  ;;  %v11159_v30 = vld [vmem:[%s11887_s17 + $0x2d4] ss:$12 sps:$4 sm:$0xff]   ;;  %v11160_v31 = vld [vmem:[%s11887_s17 + $0x458] ss:$12 sps:$4 sm:$0xff]  }
 0x193   : > { %11450 = vrcp.f32 %v2487_v20  ;;  %v11164_v52 = vld [vmem:[%s11887_s17 + $0x2ec] ss:$12 sps:$4 sm:$0xff]   ;;  %v2458_v20 = vsub.f32 0.0, %v12427_v14 }
 0x194   : > { %v11184_v63 = vld [vmem:[%s11887_s17 + $0x34c] ss:$12 sps:$4 sm:$0xff]  }
 0x195   : > { %3850 = vmatpush1.bf16.msra.mxu1 %v11107_v33  ;;  %10221 = vmatpush3.bf16.msra.mxu0 %v11111_v34  ;;  %v11161_v33 = vld [vmem:[%s11887_s17 + $0x398] ss:$12 sps:$4 sm:$0xff]   ;;  %v2459_v34 = vsub.f32 0.0, %v12376_v29  ;;  %v11195_v11 = vld [vmem:[%s11887_s17 + $0x5c0] ss:$12 sps:$4 sm:$0xff]  }
 0x196   : > { %3851 = vmatprep.subr.bf16.mxu1 %v11114_v35  ;;  %10222 = vmatprep.subr.bf16.mxu0 %v11115_v36  ;;  %v11165_v35 = vld [vmem:[%s11887_s17 + $0x470] ss:$12 sps:$4 sm:$0xff]   ;;  %v11192_v15 = vld [vmem:[%s11887_s17 + $0x378] ss:$12 sps:$4 sm:$0xff]  }
 0x197   : > { %v11201_v50 = vld [vmem:[%s11887_s17 + $0x518] ss:$12 sps:$4 sm:$0xff]  }
 0x199   : > { %3852 = vmatpush1.bf16.msra.mxu1 %v11112_v38  ;;  %10223 = vmatpush3.bf16.msra.mxu0 %v11116_v39  ;;  %v2472_v39 = vmul.f32 1.442695, %v2456_v32 }
 0x19a   : > { %3853 = vmatprep.subr.bf16.mxu1 %v11119_v41  ;;  %10224 = vmatprep.subr.bf16.mxu0 %v11120_v44  ;;  %v11162_v41 = vld [vmem:[%s11887_s17 + $0x2e8] ss:$12 sps:$4 sm:$0xff]   ;;  %v11166_v44 = vld [vmem:[%s11887_s17 + $0x3b0] ss:$12 sps:$4 sm:$0xff]  }
 0x19b   : > { %11452 = vpow2.f32 %v2472_v39 }
 0x19c   : > { %v11449_v36 = vpop.eup %11448 }
 0x19d   : > { %3854 = vmatpush1.bf16.msra.mxu1 %v11117_v42  ;;  %10225 = vmatpush3.bf16.msra.mxu0 %v11121_v47  ;;  %v11451_v38 = vpop.eup %11450  ;;  %v2504_v46 = vmul.f32 %v11449_v36, %v12320_v37  ;;  %v2478_v42 = vmul.f32 1.442695, %v2459_v34  ;;  %v11169_v47 = vld [vmem:[%s11887_s17 + $0x304] ss:$12 sps:$4 sm:$0xff]   ;;  %v11171_v37 = vld [vmem:[%s11887_s17 + $0x488] ss:$12 sps:$4 sm:$0xff]  }
 0x19e   : > { %3855 = vmatprep.subr.bf16.mxu1 %v11124_v45  ;;  %10226 = vmatprep.subr.bf16.mxu0 %v11125_v49  ;;  %v2507_v45 = vmul.f32 %v11451_v38, %v12326_v40  ;;  %v11167_v49 = vld [vmem:[%s11887_s17 + $0x300] ss:$12 sps:$4 sm:$0xff]   ;;  %v11172_v40 = vld [vmem:[%s11887_s17 + $0x318] ss:$12 sps:$4 sm:$0xff]   ;;  %v11214_v36 = vld [vmem:[%s11887_s17 + $0x3dc] ss:$12 sps:$4 sm:$0xff]  }
 0x19f   : > { %v12393_v51 = vpack.c.bf16 %v2504_v46, %v2504_v46  ;;  %11454 = vpow2.f32 %v2478_v42  ;;  %v11215_v38 = vld [vmem:[%s11887_s17 + $0x6e0] ss:$12 sps:$4 sm:$0xff]   ;;  %v11220_v46 = vld [vmem:[%s11887_s17 + $0x6f8] ss:$12 sps:$4 sm:$0xff]   ;;  %v11217_v42 = vld [vmem:[%s11887_s17 + $0x3f0] ss:$12 sps:$4 sm:$0xff]  }
 0x1a1   : > { %3856 = vmatpush1.bf16.msra.mxu1 %v11122_v55  ;;  %10227 = vmatpush3.bf16.msra.mxu0 %v11126_v56  ;;  %v12398_v55 = vpack.c.bf16 %v2507_v45, %v2507_v45  ;;  %v11176_v56 = vld [vmem:[%s11887_s17 + $0x4a0] ss:$12 sps:$4 sm:$0xff]  }
 0x1a2   : > { %3857 = vmatprep.subr.bf16.mxu1 %v11129_v59  ;;  %10234 = vmatprep.subr.bf16.mxu0 %v11130_v62  ;;  %v11177_v59 = vld [vmem:[%s11887_s17 + $0x330] ss:$12 sps:$4 sm:$0xff]   ;;  %v11181_v62 = vld [vmem:[%s11887_s17 + $0x4b8] ss:$12 sps:$4 sm:$0xff]  }
 0x1a4   : > { %4078 = vmatmul.mubr.bf16.vlgmr.msra.gmra.mrb[16].mxu0 %v12344_v3 }
 0x1a5   : > { %3858 = vmatpush1.bf16.msra.mxu1 %v11127_v0  ;;  %10235 = vmatpush3.bf16.msra.mxu0 %v11131_v2  ;;  %v11453_v0 = vpop.eup %11452  ;;  %v11185_v2 = vld [vmem:[%s11887_s17 + $0x590] ss:$12 sps:$4 sm:$0xff]  }
 0x1a6   : > { %4117 = vmatprep.mubr.bf16.mxu0 %v12348_v5  ;;  %3859 = vmatprep.subr.bf16.mxu1 %v11134_v60  ;;  %v11182_v60 = vld [vmem:[%s11887_s17 + $0x348] ss:$12 sps:$4 sm:$0xff]  }
 0x1a7   : > { %10236 = vmatprep.subr.bf16.mxu0 %v11135_v4  ;;  %v2486_v4 = vadd.f32 1.0, %v11453_v0  ;;  %v11236_v0 = vld [vmem:[%s11887_s17 + $0x680] ss:$12 sps:$4 sm:$0xff]  }
 0x1a9   : > { %3860 = vmatpush1.bf16.msra.mxu1 %v11132_v61  ;;  %10237 = vmatpush3.bf16.msra.mxu0 %v11136_v6  ;;  %v11189_v61 = vld [vmem:[%s11887_s17 + $0x364] ss:$12 sps:$4 sm:$0xff]   ;;  %11456 = vrcp.f32 %v2486_v4 }
 0x1aa   : > { %3861 = vmatprep.subr.bf16.mxu1 %v11139_v7  ;;  %10238 = vmatprep.subr.bf16.mxu0 %v11140_v8  ;;  %v11190_v7 = vld [vmem:[%s11887_s17 + $0x5a8] ss:$12 sps:$4 sm:$0xff]   ;;  %v11187_v8 = vld [vmem:[%s11887_s17 + $0x360] ss:$12 sps:$4 sm:$0xff]   ;;  %v11241_v4 = vld [vmem:[%s11887_s17 + $0x698] ss:$12 sps:$4 sm:$0xff]  }
 0x1ad   : > { %3862 = vmatpush1.bf16.msra.mxu1 %v11137_v9  ;;  %10239 = vmatpush3.bf16.msra.mxu0 %v11141_v10  ;;  %v11191_v9 = vld [vmem:[%s11887_s17 + $0x4e8] ss:$12 sps:$4 sm:$0xff]  }
 0x1ae   : > { %3863 = vmatprep.subr.bf16.mxu1 %v11144_v12  ;;  %10240 = vmatprep.subr.bf16.mxu0 %v11145_v13  ;;  %v11194_v10 = vld [vmem:[%s11887_s17 + $0x37c] ss:$12 sps:$4 sm:$0xff]   ;;  %v15203_v12 = vmov 1   ;;  %v12422_v13 = vld [vmem:[%s11917_s14] sm:$0xff] }
 0x1af   : > { %10788 = vset.pattern.permute.xlu1 %v15203_v12 }
 0x1b0   : > { %4257 = vperm.xlu1 %10788, %v12422_v13  }
 0x1b1   : > { %3864 = vmatpush1.bf16.msra.mxu1 %v11142_v16  ;;  %10241 = vmatpush3.bf16.msra.mxu0 %v11146_v17  ;;  %v11196_v16 = vld [vmem:[%s11887_s17 + $0x500] ss:$12 sps:$4 sm:$0xff]  }
 0x1b2   : > { %3865 = vmatprep.subr.bf16.mxu1 %v11149_v18  ;;  %10242 = vmatprep.subr.bf16.mxu0 %v11150_v19  ;;  %v11199_v17 = vld [vmem:[%s11887_s17 + $0x394] ss:$12 sps:$4 sm:$0xff]   ;;  %v11200_v18 = vld [vmem:[%s11887_s17 + $0x5d8] ss:$12 sps:$4 sm:$0xff]   ;;  %v15201_v19 = vmov 2  }
 0x1b4   : > { %10789 = vset.pattern.permute.xlu1 %v15201_v19 }
 0x1b5   : > { %3866 = vmatpush1.bf16.msra.mxu1 %v11147_v21  ;;  %10243 = vmatpush3.bf16.msra.mxu0 %v11151_v22  ;;  %v11204_v21 = vld [vmem:[%s11887_s17 + $0x3ac] ss:$12 sps:$4 sm:$0xff]   ;;  %v11205_v22 = vld [vmem:[%s11887_s17 + $0x5f0] ss:$12 sps:$4 sm:$0xff]  }
 0x1b6   : > { %3867 = vmatprep.subr.bf16.mxu1 %v11154_v23  ;;  %10244 = vmatprep.subr.bf16.mxu0 %v11155_v25 }
 0x1b7   : > { %4267 = vperm.xlu1 %10789, %v12422_v13  }
 0x1b9   : > { %3868 = vmatpush1.bf16.msra.mxu1 %v11152_v27  ;;  %10245 = vmatpush3.bf16.msra.mxu0 %v11156_v28  ;;  %v2476_v27 = vmul.f32 1.442695, %v2458_v20  ;;  %v11202_v28 = vld [vmem:[%s11887_s17 + $0x3a8] ss:$12 sps:$4 sm:$0xff]   ;;  %v11258_v20 = vld [vmem:[%s11887_s17 + $0x4cc] ss:$12 sps:$4 sm:$0xff]  }
 0x1ba   : > { %3869 = vmatprep.subr.bf16.mxu1 %v11159_v30  ;;  %10246 = vmatprep.subr.bf16.mxu0 %v11160_v31  ;;  %v11206_v30 = vld [vmem:[%s11887_s17 + $0x530] ss:$12 sps:$4 sm:$0xff]  }
 0x1bb   : > { %v11209_v31 = vld [vmem:[%s11887_s17 + $0x3c4] ss:$12 sps:$4 sm:$0xff]  }
 0x1bd   : > { %3870 = vmatpush1.bf16.msra.mxu1 %v11157_v43  ;;  %10247 = vmatpush3.bf16.msra.mxu0 %v11161_v33  ;;  %v11210_v43 = vld [vmem:[%s11887_s17 + $0x6c8] ss:$12 sps:$4 sm:$0xff]   ;;  %v15185_v33 = vmov 7  }
 0x1be   : > { %3871 = vmatprep.subr.bf16.mxu1 %v11164_v52  ;;  %10248 = vmatprep.subr.bf16.mxu0 %v11165_v35  ;;  %v11207_v52 = vld [vmem:[%s11887_s17 + $0x3c0] ss:$12 sps:$4 sm:$0xff]  }
 0x1bf   : > { %10791 = vset.pattern.permute.xlu1 %v15185_v33 }
 0x1c0   : > { %4311 = vperm.xlu1 %10791, %v12422_v13  }
 0x1c1   : > { %3872 = vmatpush1.bf16.msra.mxu1 %v11162_v41  ;;  %10249 = vmatpush3.bf16.msra.mxu0 %v11166_v44  ;;  %v11216_v41 = vld [vmem:[%s11887_s17 + $0x620] ss:$12 sps:$4 sm:$0xff]  }
 0x1c2   : > { %3882 = vmatprep.subr.bf16.mxu1 %v11169_v47  ;;  %10256 = vmatprep.subr.bf16.mxu0 %v11170_v48  ;;  %v11219_v44 = vld [vmem:[%s11887_s17 + $0x3f4] ss:$12 sps:$4 sm:$0xff]   ;;  %v11221_v47 = vld [vmem:[%s11887_s17 + $0x638] ss:$12 sps:$4 sm:$0xff]  }
 0x1c3   : > { %v11224_v48 = vld [vmem:[%s11887_s17 + $0x40c] ss:$12 sps:$4 sm:$0xff]  }
 0x1c4   : > { %3874 = vmatmul.mubr.bf16.vlgmr.msra.gmra.mrb[8].mxu1 %v12344_v3  ;;  %4118 = vmatmul.mubr.bf16.vlgmr.msra.gmra.mrb[20].mxu0 %v12393_v51  ;;  %v11455_v3 = vpop.eup %11454 }
 0x1c5   : > { %3883 = vmatpush1.bf16.msra.mxu1 %v11167_v49  ;;  %3914 = vmatprep.mubr.bf16.mxu1 %v12348_v5  ;;  %v11186_v5 = vld [vmem:[%s11887_s17 + $0x4d0] ss:$12 sps:$4 sm:$0xff]   ;;  %v2489_v6 = vadd.f32 1.0, %v11455_v3  ;;  %v11457_v23 = vpop.eup %11456  ;;  %v11240_v3 = vld [vmem:[%s11887_s17 + $0x758] ss:$12 sps:$4 sm:$0xff]  }
 0x1c6   : > { %10257 = vmatpush3.bf16.msra.mxu0 %v11171_v37  ;;  %4157 = vmatprep.mubr.bf16.mxu0 %v12398_v55  ;;  %v2506_v32 = vmul.f32 %v11457_v23, %v12370_v26  ;;  %v11211_v26 = vld [vmem:[%s11887_s17 + $0x608] ss:$12 sps:$4 sm:$0xff]   ;;  %v11225_v49 = vld [vmem:[%s11887_s17 + $0x710] ss:$12 sps:$4 sm:$0xff]  }
 0x1c7   : > { %3884 = vmatprep.subr.bf16.mxu1 %v11174_v53  ;;  %10258 = vmatprep.subr.bf16.mxu0 %v11175_v54  ;;  %11458 = vrcp.f32 %v2489_v6  ;;  %v11222_v37 = vld [vmem:[%s11887_s17 + $0x408] ss:$12 sps:$4 sm:$0xff]   ;;  %v11226_v54 = vld [vmem:[%s11887_s17 + $0x650] ss:$12 sps:$4 sm:$0xff]  }
 0x1c8   : > { %11460 = vpow2.f32 %v2476_v27  ;;  %v12450_v35 = vpack.c.bf16 %v2506_v32, %v2506_v32  ;;  %v11265_v23 = vld [vmem:[%s11887_s17 + $0x510] ss:$12 sps:$4 sm:$0xff]   ;;  %v11268_v27 = vld [vmem:[%s11887_s17 + $0x528] ss:$12 sps:$4 sm:$0xff]   ;;  %v11274_v32 = vld [vmem:[%s11887_s17 + $0x558] ss:$12 sps:$4 sm:$0xff]  }
 0x1c9   : > { %3885 = vmatpush1.bf16.msra.mxu1 %v11172_v40  ;;  %v11229_v40 = vld [vmem:[%s11887_s17 + $0x424] ss:$12 sps:$4 sm:$0xff]  }
 0x1ca   : > { %10259 = vmatpush3.bf16.msra.mxu0 %v11176_v56  ;;  %3886 = vmatprep.subr.bf16.mxu1 %v11179_v57  ;;  %v11230_v56 = vld [vmem:[%s11887_s17 + $0x728] ss:$12 sps:$4 sm:$0xff]   ;;  %v11227_v57 = vld [vmem:[%s11887_s17 + $0x420] ss:$12 sps:$4 sm:$0xff]  }
 0x1cb   : > { %10260 = vmatprep.subr.bf16.mxu0 %v11180_v58  ;;  %v11231_v58 = vld [vmem:[%s11887_s17 + $0x668] ss:$12 sps:$4 sm:$0xff]  }
 0x1cd   : > { %3887 = vmatpush1.bf16.msra.mxu1 %v11177_v59  ;;  %v11234_v59 = vld [vmem:[%s11887_s17 + $0x43c] ss:$12 sps:$4 sm:$0xff]  }
 0x1ce   : > { %10261 = vmatpush3.bf16.msra.mxu0 %v11181_v62  ;;  %3888 = vmatprep.subr.bf16.mxu1 %v11184_v63  ;;  %v11235_v62 = vld [vmem:[%s11887_s17 + $0x740] ss:$12 sps:$4 sm:$0xff]   ;;  %v11232_v63 = vld [vmem:[%s11887_s17 + $0x438] ss:$12 sps:$4 sm:$0xff]  }
 0x1cf   : > { %10262 = vmatprep.subr.bf16.mxu0 %v11185_v2  ;;  %v11239_v2 = vld [vmem:[%s11887_s17 + $0x454] ss:$12 sps:$4 sm:$0xff]  }
 0x1d1   : > { %3889 = vmatpush1.bf16.msra.mxu1 %v11182_v60  ;;  %v11459_v25 = vpop.eup %11458  ;;  %v11237_v60 = vld [vmem:[%s11887_s17 + $0x450] ss:$12 sps:$4 sm:$0xff]  }
 0x1d2   : > { %10263 = vmatpush3.bf16.msra.mxu0 %v11186_v5  ;;  %3890 = vmatprep.subr.bf16.mxu1 %v11189_v61  ;;  %v2509_v34 = vmul.f32 %v11459_v25, %v12376_v29  ;;  %v11212_v29 = vld [vmem:[%s11887_s17 + $0x3d8] ss:$12 sps:$4 sm:$0xff]   ;;  %v11461_v45 = vpop.eup %11460  ;;  %v11245_v61 = vld [vmem:[%s11887_s17 + $0x770] ss:$12 sps:$4 sm:$0xff]  }
 0x1d3   : > { %10264 = vmatprep.subr.bf16.mxu0 %v11190_v7  ;;  %v2488_v53 = vadd.f32 1.0, %v11461_v45  ;;  %v11244_v5 = vld [vmem:[%s11887_s17 + $0x46c] ss:$12 sps:$4 sm:$0xff]   ;;  %v11242_v7 = vld [vmem:[%s11887_s17 + $0x468] ss:$12 sps:$4 sm:$0xff]  }
 0x1d4   : > { %v12454_v39 = vpack.c.bf16 %v2509_v34, %v2509_v34  ;;  %v11270_v25 = vld [vmem:[%s11887_s17 + $0x52c] ss:$12 sps:$4 sm:$0xff]   ;;  %v11277_v34 = vld [vmem:[%s11887_s17 + $0x570] ss:$12 sps:$4 sm:$0xff]  }
 0x1d5   : > { %3891 = vmatpush1.bf16.msra.mxu1 %v11187_v8  ;;  %11462 = vrcp.f32 %v2488_v53  ;;  %v11246_v8 = vld [vmem:[%s11887_s17 + $0x6b0] ss:$12 sps:$4 sm:$0xff]   ;;  %v11298_v53 = vld [vmem:[%s11887_s17 + $0x618] ss:$12 sps:$4 sm:$0xff]  }
 0x1d6   : > { %10265 = vmatpush3.bf16.msra.mxu0 %v11191_v9  ;;  %3892 = vmatprep.subr.bf16.mxu1 %v11194_v10  ;;  %v11249_v9 = vld [vmem:[%s11887_s17 + $0x484] ss:$12 sps:$4 sm:$0xff]  }
 0x1d7   : > { %10266 = vmatprep.subr.bf16.mxu0 %v11195_v11  ;;  %v11247_v11 = vld [vmem:[%s11887_s17 + $0x480] ss:$12 sps:$4 sm:$0xff]   ;;  %v11297_v45 = vld [vmem:[%s11887_s17 + $0x604] ss:$12 sps:$4 sm:$0xff]  }
 0x1d9   : > { %3893 = vmatpush1.bf16.msra.mxu1 %v11192_v15  ;;  %v11252_v15 = vld [vmem:[%s11887_s17 + $0x49c] ss:$12 sps:$4 sm:$0xff]  }
 0x1da   : > { %10267 = vmatpush3.bf16.msra.mxu0 %v11196_v16  ;;  %3894 = vmatprep.subr.bf16.mxu1 %v11199_v17  ;;  %v11250_v17 = vld [vmem:[%s11887_s17 + $0x498] ss:$12 sps:$4 sm:$0xff]  }
 0x1db   : > { %10268 = vmatprep.subr.bf16.mxu0 %v11200_v18  ;;  %v11253_v18 = vld [vmem:[%s11887_s17 + $0x4b0] ss:$12 sps:$4 sm:$0xff]  }
 0x1dd   : > { %3895 = vmatpush1.bf16.msra.mxu1 %v11197_v24  ;;  %v11261_v24 = vld [vmem:[%s11887_s17 + $0x4e4] ss:$12 sps:$4 sm:$0xff]  }
 0x1de   : > { %10269 = vmatpush3.bf16.msra.mxu0 %v11201_v50  ;;  %3896 = vmatprep.subr.bf16.mxu1 %v11204_v21  ;;  %v11264_v50 = vld [vmem:[%s11887_s17 + $0x4fc] ss:$12 sps:$4 sm:$0xff]   ;;  %v11262_v21 = vld [vmem:[%s11887_s17 + $0x4f8] ss:$12 sps:$4 sm:$0xff]  }
 0x1df   : > { %10270 = vmatprep.subr.bf16.mxu0 %v11205_v22  ;;  %v11463_v6 = vpop.eup %11462  ;;  %v11267_v22 = vld [vmem:[%s11887_s17 + $0x514] ss:$12 sps:$4 sm:$0xff]  }
 0x1e0   : > { %v2508_v10 = vmul.f32 %v11463_v6, %v12427_v14  ;;  %v11255_v14 = vld [vmem:[%s11887_s17 + $0x4b4] ss:$12 sps:$4 sm:$0xff]   ;;  %v11321_v6 = vld [vmem:[%s11887_s17 + $0x6c4] ss:$12 sps:$4 sm:$0xff]  }
 0x1e1   : > { %3897 = vmatpush1.bf16.msra.mxu1 %v11202_v28  ;;  %v11273_v28 = vld [vmem:[%s11887_s17 + $0x544] ss:$12 sps:$4 sm:$0xff]  }
 0x1e2   : > { %10271 = vmatpush3.bf16.msra.mxu0 %v11206_v30  ;;  %3898 = vmatprep.subr.bf16.mxu1 %v11209_v31  ;;  %v12488_v16 = vpack.c.bf16 %v2508_v10, %v2508_v10  ;;  %v11271_v30 = vld [vmem:[%s11887_s17 + $0x540] ss:$12 sps:$4 sm:$0xff]   ;;  %v11276_v31 = vld [vmem:[%s11887_s17 + $0x55c] ss:$12 sps:$4 sm:$0xff]   ;;  %v11322_v10 = vld [vmem:[%s11887_s17 + $0x6d8] ss:$12 sps:$4 sm:$0xff]  }
 0x1e3   : > { %10278 = vmatprep.subr.bf16.mxu0 %v11210_v43  ;;  %v11279_v43 = vld [vmem:[%s11887_s17 + $0x574] ss:$12 sps:$4 sm:$0xff]  }
 0x1e5   : > { %4158 = vmatmul.mubr.bf16.vlgmr.msra.gmra.mrb[24].mxu0 %v12450_v35  ;;  %3899 = vmatpush1.bf16.msra.mxu1 %v11207_v52  ;;  %v11282_v52 = vld [vmem:[%s11887_s17 + $0x58c] ss:$12 sps:$4 sm:$0xff]  }
 0x1e6   : > { %10279 = vmatpush3.bf16.msra.mxu0 %v11211_v26  ;;  %4197 = vmatprep.mubr.bf16.mxu0 %v12454_v39  ;;  %v11280_v26 = vld [vmem:[%s11887_s17 + $0x588] ss:$12 sps:$4 sm:$0xff]  }
 0x1e7   : > { %3900 = vmatprep.subr.bf16.mxu1 %v11214_v36  ;;  %10280 = vmatprep.subr.bf16.mxu0 %v11215_v38  ;;  %v11285_v36 = vld [vmem:[%s11887_s17 + $0x5a4] ss:$12 sps:$4 sm:$0xff]   ;;  %v11283_v38 = vld [vmem:[%s11887_s17 + $0x5a0] ss:$12 sps:$4 sm:$0xff]  }
 0x1e9   : > { %3901 = vmatpush1.bf16.msra.mxu1 %v11212_v29  ;;  %v11288_v29 = vld [vmem:[%s11887_s17 + $0x5bc] ss:$12 sps:$4 sm:$0xff]  }
 0x1ea   : > { %10281 = vmatpush3.bf16.msra.mxu0 %v11216_v41  ;;  %3902 = vmatprep.subr.bf16.mxu1 %v11219_v44  ;;  %v11286_v41 = vld [vmem:[%s11887_s17 + $0x5b8] ss:$12 sps:$4 sm:$0xff]   ;;  %v11291_v44 = vld [vmem:[%s11887_s17 + $0x5d4] ss:$12 sps:$4 sm:$0xff]  }
 0x1eb   : > { %10282 = vmatprep.subr.bf16.mxu0 %v11220_v46  ;;  %v11289_v46 = vld [vmem:[%s11887_s17 + $0x5d0] ss:$12 sps:$4 sm:$0xff]  }
 0x1ed   : > { %3903 = vmatpush1.bf16.msra.mxu1 %v11217_v42  ;;  %v11294_v42 = vld [vmem:[%s11887_s17 + $0x5ec] ss:$12 sps:$4 sm:$0xff]  }
 0x1ee   : > { %10283 = vmatpush3.bf16.msra.mxu0 %v11221_v47  ;;  %3904 = vmatprep.subr.bf16.mxu1 %v11224_v48  ;;  %v11292_v47 = vld [vmem:[%s11887_s17 + $0x5e8] ss:$12 sps:$4 sm:$0xff]   ;;  %v15199_v48 = vmov 6  }
 0x1ef   : > { %10284 = vmatprep.subr.bf16.mxu0 %v11225_v49  ;;  %10790 = vset.pattern.permute.xlu0 %v15199_v48  ;;  %v11295_v49 = vld [vmem:[%s11887_s17 + $0x600] ss:$12 sps:$4 sm:$0xff]  }
 0x1f0   : > { %4304 = vperm.xlu0 %10790, %v12422_v13  }
 0x1f1   : > { %3905 = vmatpush1.bf16.msra.mxu1 %v11222_v37  ;;  %v11300_v37 = vld [vmem:[%s11887_s17 + $0x61c] ss:$12 sps:$4 sm:$0xff]  }
 0x1f2   : > { %10285 = vmatpush3.bf16.msra.mxu0 %v11226_v54  ;;  %3906 = vmatprep.subr.bf16.mxu1 %v11229_v40  ;;  %v11303_v54 = vld [vmem:[%s11887_s17 + $0x634] ss:$12 sps:$4 sm:$0xff]   ;;  %v11301_v40 = vld [vmem:[%s11887_s17 + $0x630] ss:$12 sps:$4 sm:$0xff]  }
 0x1f3   : > { %10286 = vmatprep.subr.bf16.mxu0 %v11230_v56  ;;  %v11306_v56 = vld [vmem:[%s11887_s17 + $0x64c] ss:$12 sps:$4 sm:$0xff]  }
 0x1f5   : > { %3907 = vmatpush1.bf16.msra.mxu1 %v11227_v57  ;;  %v11304_v57 = vld [vmem:[%s11887_s17 + $0x648] ss:$12 sps:$4 sm:$0xff]  }
 0x1f6   : > { %10287 = vmatpush3.bf16.msra.mxu0 %v11231_v58  ;;  %3908 = vmatprep.subr.bf16.mxu1 %v11234_v59  ;;  %v11309_v58 = vld [vmem:[%s11887_s17 + $0x664] ss:$12 sps:$4 sm:$0xff]  }
 0x1f7   : > { %10288 = vmatprep.subr.bf16.mxu0 %v11235_v62  ;;  %v11310_v59 = vld [vmem:[%s11887_s17 + $0x678] ss:$12 sps:$4 sm:$0xff]   ;;  %v11315_v62 = vld [vmem:[%s11887_s17 + $0x694] ss:$12 sps:$4 sm:$0xff]  }
 0x1f9   : > { %3909 = vmatpush1.bf16.msra.mxu1 %v11232_v63 }
 0x1fa   : > { %10289 = vmatpush3.bf16.msra.mxu0 %v11236_v0  ;;  %3910 = vmatprep.subr.bf16.mxu1 %v11239_v2 }
 0x1fb   : > { %10290 = vmatprep.subr.bf16.mxu0 %v11240_v3 }
 0x1fd   : > { %3911 = vmatpush1.bf16.msra.mxu1 %v11237_v60  ;;  %v11313_v60 = vld [vmem:[%s11887_s17 + $0x690] ss:$12 sps:$4 sm:$0xff]  }
 0x1fe   : > { %10291 = vmatpush3.bf16.msra.mxu0 %v11241_v4  ;;  %3912 = vmatprep.subr.bf16.mxu1 %v11244_v5  ;;  %v11318_v5 = vld [vmem:[%s11887_s17 + $0x6ac] ss:$12 sps:$4 sm:$0xff]  }
 0x1ff   : > { %10292 = vmatprep.subr.bf16.mxu0 %v11245_v61  ;;  %v11316_v61 = vld [vmem:[%s11887_s17 + $0x6a8] ss:$12 sps:$4 sm:$0xff]  }
 0x201   : > { %3913 = vmatpush1.bf16.msra.mxu1 %v11242_v7  ;;  %v11319_v7 = vld [vmem:[%s11887_s17 + $0x6c0] ss:$12 sps:$4 sm:$0xff]  }
 0x202   : > { %10293 = vmatpush3.bf16.msra.mxu0 %v11246_v8  ;;  %3923 = vmatprep.subr.bf16.mxu1 %v11249_v9  ;;  %v15183_v8 = vmov 8   ;;  %v11324_v9 = vld [vmem:[%s11887_s17 + $0x6dc] ss:$12 sps:$4 sm:$0xff]  }
 0x203   : > { %10792 = vset.pattern.permute.xlu1 %v15183_v8 }
 0x204   : > { %3915 = vmatmul.mubr.bf16.vlgmr.msra.gmra.mrb[8].mxu1 %v12393_v51  ;;  %v11256_v51 = vld [vmem:[%s11887_s17 + $0x4c8] ss:$12 sps:$4 sm:$0xff]   ;;  %4321 = vperm.xlu1 %10792, %v12422_v13  }
 0x205   : > { %4198 = vmatmul.mubr.bf16.vlgmr.msra.gmra.mrb[28].mxu0 %v12488_v16  ;;  %3924 = vmatpush1.bf16.msra.mxu1 %v11247_v11  ;;  %v11327_v11 = vld [vmem:[%s11887_s17 + $0x6f4] ss:$12 sps:$4 sm:$0xff]  }
 0x206   : > { %3955 = vmatprep.mubr.bf16.mxu1 %v12398_v55  ;;  %3925 = vmatprep.subr.bf16.mxu1 %v11252_v15  ;;  %v11259_v55 = vld [vmem:[%s11887_s17 + $0x4e0] ss:$12 sps:$4 sm:$0xff]   ;;  %v11325_v15 = vld [vmem:[%s11887_s17 + $0x6f0] ss:$12 sps:$4 sm:$0xff]  }
 0x207   : > { %4438 = vmatprep.mubr.bf16.mxu0 %v15211_v1 }
 0x209   : > { %3926 = vmatpush1.bf16.msra.mxu1 %v11250_v17  ;;  %v11330_v17 = vld [vmem:[%s11887_s17 + $0x70c] ss:$12 sps:$4 sm:$0xff]  }
 0x20a   : > { %3927 = vmatprep.subr.bf16.mxu1 %v11255_v14  ;;  %v11328_v14 = vld [vmem:[%s11887_s17 + $0x708] ss:$12 sps:$4 sm:$0xff]  }
 0x20d   : > { %3928 = vmatpush1.bf16.msra.mxu1 %v11253_v18  ;;  %v11333_v18 = vld [vmem:[%s11887_s17 + $0x724] ss:$12 sps:$4 sm:$0xff]  }
 0x20e   : > { %3929 = vmatprep.subr.bf16.mxu1 %v11258_v20  ;;  %v11331_v20 = vld [vmem:[%s11887_s17 + $0x720] ss:$12 sps:$4 sm:$0xff]  }
 0x211   : > { %3930 = vmatpush1.bf16.msra.mxu1 %v11256_v51  ;;  %v11336_v51 = vld [vmem:[%s11887_s17 + $0x73c] ss:$12 sps:$4 sm:$0xff]  }
 0x212   : > { %3931 = vmatprep.subr.bf16.mxu1 %v11261_v24  ;;  %v11334_v24 = vld [vmem:[%s11887_s17 + $0x738] ss:$12 sps:$4 sm:$0xff]  }
 0x215   : > { %3932 = vmatpush1.bf16.msra.mxu1 %v11259_v55  ;;  %v11339_v55 = vld [vmem:[%s11887_s17 + $0x754] ss:$12 sps:$4 sm:$0xff]  }
 0x216   : > { %3933 = vmatprep.subr.bf16.mxu1 %v11264_v50 }
 0x219   : > { %3934 = vmatpush1.bf16.msra.mxu1 %v11262_v21 }
 0x21a   : > { %3935 = vmatprep.subr.bf16.mxu1 %v11267_v22 }
 0x21d   : > { %3936 = vmatpush1.bf16.msra.mxu1 %v11265_v23 }
 0x21e   : > { %3937 = vmatprep.subr.bf16.mxu1 %v11270_v25  ;;  %v11337_v25 = vld [vmem:[%s11887_s17 + $0x750] ss:$12 sps:$4 sm:$0xff]  }
 0x221   : > { %3938 = vmatpush1.bf16.msra.mxu1 %v11268_v27 }
 0x222   : > { %3939 = vmatprep.subr.bf16.mxu1 %v11273_v28  ;;  %v11342_v28 = vld [vmem:[%s11887_s17 + $0x76c] ss:$12 sps:$4 sm:$0xff]  }
 0x225   : > { %3940 = vmatpush1.bf16.msra.mxu1 %v11271_v30 }
 0x226   : > { %3941 = vmatprep.subr.bf16.mxu1 %v11276_v31  ;;  %v11340_v31 = vld [vmem:[%s11887_s17 + $0x768] ss:$12 sps:$4 sm:$0xff]  }
 0x229   : > { %3942 = vmatpush1.bf16.msra.mxu1 %v11274_v32 }
 0x22a   : > { %3943 = vmatprep.subr.bf16.mxu1 %v11279_v43 }
 0x22d   : > { %3944 = vmatpush1.bf16.msra.mxu1 %v11277_v34 }
 0x22e   : > { %3945 = vmatprep.subr.bf16.mxu1 %v11282_v52 }
 0x231   : > { %3946 = vmatpush1.bf16.msra.mxu1 %v11280_v26 }
 0x232   : > { %3947 = vmatprep.subr.bf16.mxu1 %v11285_v36 }
 0x235   : > { %3948 = vmatpush1.bf16.msra.mxu1 %v11283_v38 }
 0x236   : > { %3949 = vmatprep.subr.bf16.mxu1 %v11288_v29 }
 0x239   : > { %3950 = vmatpush1.bf16.msra.mxu1 %v11286_v41 }
 0x23a   : > { %3951 = vmatprep.subr.bf16.mxu1 %v11291_v44 }
 0x23d   : > { %3952 = vmatpush1.bf16.msra.mxu1 %v11289_v46 }
 0x23e   : > { %3953 = vmatprep.subr.bf16.mxu1 %v11294_v42 }
 0x241   : > { %3954 = vmatpush1.bf16.msra.mxu1 %v11292_v47  ;;  %v4206_v47 = vlaneseq }
 0x242   : > { %3964 = vmatprep.subr.bf16.mxu1 %v11297_v45 }
 0x243   : > { %v4207_v45 = vshrl.u32 %v4206_v47, 7 }
 0x244   : > { %3956 = vmatmul.mubr.bf16.vlgmr.msra.gmra.mrb[8].mxu1 %v12450_v35  ;;  %v11307_v35 = vld [vmem:[%s11887_s17 + $0x660] ss:$12 sps:$4 sm:$0xff]  }
 0x245   : > { %3965 = vmatpush1.bf16.msra.mxu1 %v11295_v49  ;;  %3996 = vmatprep.mubr.bf16.mxu1 %v12454_v39  ;;  %v11312_v39 = vld [vmem:[%s11887_s17 + $0x67c] ss:$12 sps:$4 sm:$0xff]   ;;  %v4216_v49 = vsub.s32 2, %v4207_v45 }
 0x246   : > { %3966 = vmatprep.subr.bf16.mxu1 %v11300_v37  ;;  %v2107_v37 = vld [vmem:[%s11892_s21] sm:$0x7] }
 0x249   : > { %3967 = vmatpush1.bf16.msra.mxu1 %v11298_v53 }
 0x24a   : > { %3968 = vmatprep.subr.bf16.mxu1 %v11303_v54 }
 0x24d   : > { %3969 = vmatpush1.bf16.msra.mxu1 %v11301_v40  ;;  %v12563_v40 = vrot.slane %v2107_v37, %v4216_v49 }
 0x24e   : > { %3970 = vmatprep.subr.bf16.mxu1 %v11306_v56 }
 0x251   : > { %3971 = vmatpush1.bf16.msra.mxu1 %v11304_v57 }
 0x252   : > { %3972 = vmatprep.subr.bf16.mxu1 %v11309_v58 }
 0x255   : > { %3973 = vmatpush1.bf16.msra.mxu1 %v11307_v35 }
 0x256   : > { %3974 = vmatprep.subr.bf16.mxu1 %v11312_v39  ;;  %v15181_v39 = vmov 3  }
 0x257   : > { %v10206_v63 = vpop.f32.mrb[12].mxu0  ;;  %10793 = vset.pattern.permute.xlu0 %v15181_v39 }
 0x258   : > { %v10207_v0 = vpop.f32.mrb[13].mxu0 }
 0x259   : > { %3975 = vmatpush1.bf16.msra.mxu1 %v11310_v59  ;;  %v10208_v2 = vadd.f32 %v10207_v0, %v10206_v63  ;;  %v10209_v3 = vpop.f32.mrb[14].mxu0  ;;  %v15179_v59 = vmov 4   ;;  %v4212_v0 = vsub.s32 1, %v4207_v45 }
 0x25a   : > { %v10210_v4 = vpop.f32.mrb[15].mxu0  ;;  %3976 = vmatprep.subr.bf16.mxu1 %v11315_v62  ;;  %10794 = vset.pattern.permute.xlu1 %v15179_v59  ;;  %v4208_v62 = vsub.s32 0, %v4207_v45 }
 0x25b   : > { %v12585_v4 = vrot.slane %v2107_v37, %v4212_v0 }
 0x25c   : > { %v12575_v63 = vrot.slane %v2107_v37, %v4208_v62 }
 0x25d   : > { %3977 = vmatpush1.bf16.msra.mxu1 %v11313_v60 }
 0x25e   : > { %3978 = vmatprep.subr.bf16.mxu1 %v11318_v5 }
 0x261   : > { %3979 = vmatpush1.bf16.msra.mxu1 %v11316_v61 }
 0x262   : > { %3980 = vmatprep.subr.bf16.mxu1 %v11321_v6 }
 0x265   : > { %3981 = vmatpush1.bf16.msra.mxu1 %v11319_v7  ;;  %v4225_v7 = vld [vmem:[%s11922_s19] sm:$0xff] }
 0x266   : > { %3982 = vmatprep.subr.bf16.mxu1 %v11324_v9  ;;  %v15177_v9 = vmov 5  }
 0x269   : > { %3983 = vmatpush1.bf16.msra.mxu1 %v11322_v10  ;;  %v4258_v10 = vpop.permute.xlu1 %4257 }
 0x26a   : > { %3984 = vmatprep.subr.bf16.mxu1 %v11327_v11 }
 0x26d   : > { %3985 = vmatpush1.bf16.msra.mxu1 %v11325_v15  ;;  %v4268_v11 = vpop.permute.xlu1 %4267  ;;  %v4251_v15 = vpop.permute.xlu0 %4250 }
 0x26e   : > { %3986 = vmatprep.subr.bf16.mxu1 %v11330_v17 }
 0x271   : > { %3987 = vmatpush1.bf16.msra.mxu1 %v11328_v14  ;;  %v4312_v17 = vpop.permute.xlu1 %4311  ;;  %v4305_v14 = vpop.permute.xlu0 %4304 }
 0x272   : > { %3988 = vmatprep.subr.bf16.mxu1 %v11333_v18  ;;  %v12608_v18 = vand.u32 127, %v4206_v47 }
 0x274   : > { %vm4234_vm3 = vcmp.lt.s32.totalorder %v12608_v18, 1  ;;  %vm4244_vm4 = vcmp.lt.s32.totalorder %v12608_v18, 127  ;;  %vm4336_vm5 = vcmp.lt.s32.totalorder %v12608_v18, 18  ;;  %vm4349_vm6 = vcmp.lt.s32.totalorder %v12608_v18, 110 }
 0x275   : > { %3989 = vmatpush1.bf16.msra.mxu1 %v11331_v20 }
 0x276   : > { %3990 = vmatprep.subr.bf16.mxu1 %v11336_v51 }
 0x277   : > { %v10228_v50 = vpop.f32.mrb[16].mxu0 }
 0x278   : > { %v10229_v21 = vpop.f32.mrb[17].mxu0 }
 0x279   : > { %v10230_v22 = vadd.f32 %v10229_v21, %v10228_v50  ;;  %3991 = vmatpush1.bf16.msra.mxu1 %v11334_v24  ;;  %v10231_v23 = vpop.f32.mrb[18].mxu0 }
 0x27a   : > { %v10232_v27 = vpop.f32.mrb[19].mxu0  ;;  %3992 = vmatprep.subr.bf16.mxu1 %v11339_v55 }
 0x27b   : > { %v4080_v30 = vadd.f32 %v10230_v22, %v10208_v2 }
 0x27d   : > { %3993 = vmatpush1.bf16.msra.mxu1 %v11337_v25 }
 0x27e   : > { %3994 = vmatprep.subr.bf16.mxu1 %v11342_v28 }
 0x281   : > { %3995 = vmatpush1.bf16.msra.mxu1 %v11340_v31 }
 0x283   : > { %v4322_v20 = vpop.permute.xlu1 %4321 }
 0x284   : > { %3997 = vmatmul.mubr.bf16.vlgmr.msra.gmra.mrb[8].mxu1 %v12488_v16 }
 0x297   : > { %v10250_v32 = vpop.f32.mrb[20].mxu0 }
 0x298   : > { %v10251_v43 = vpop.f32.mrb[21].mxu0 }
 0x299   : > { %v10252_v34 = vadd.f32 %v10251_v43, %v10250_v32  ;;  %v10253_v52 = vpop.f32.mrb[22].mxu0 }
 0x29a   : > { %v10254_v26 = vpop.f32.mrb[23].mxu0 }
 0x29b   : > { %v4120_v36 = vadd.f32 %v10252_v34, %v4080_v30 }
 0x2b8   : > { %v10272_v38 = vpop.f32.mrb[24].mxu0 }
 0x2b9   : > { %v10273_v29 = vpop.f32.mrb[25].mxu0 }
 0x2ba   : > { %v10274_v41 = vadd.f32 %v10273_v29, %v10272_v38  ;;  %v10275_v44 = vpop.f32.mrb[26].mxu0 }
 0x2bb   : > { %v10276_v46 = vpop.f32.mrb[27].mxu0 }
 0x2bc   : > { %v4160_v42 = vadd.f32 %v10274_v41, %v4120_v36 }
 0x2d8   : > { %v10294_v53 = vpop.f32.mrb[28].mxu0 }
 0x2d9   : > { %v10295_v54 = vpop.f32.mrb[29].mxu0 }
 0x2da   : > { %v10296_v16 = vadd.f32 %v10295_v54, %v10294_v53  ;;  %v10297_v56 = vpop.f32.mrb[30].mxu0 }
 0x2db   : > { %v10298_v57 = vpop.f32.mrb[31].mxu0 }
 0x2dc   : > { %v12565_v58 = vadd.f32 %v10296_v16, %v4160_v42 }
 0x2de   : > { %v12569_v35 = vmul.f32 %v12563_v40, %v12565_v58 }
 0x2e0   : > { %4230 = vrot.lane.b32.xlu0 %v12569_v35, %s15164_s22  ;;  %v4262_v38 = vmul.f32 %v4258_v10, %v12569_v35 }
 0x352   : > { %v4231_v51 = vpop.permute.xlu0 %4230 }
 0x357   : > { %v12577_v2 = vpop.f32.mrb[8].mxu1 }
 0x358   : > { %v12581_v3 = vmul.f32 %v12575_v63, %v12577_v2  ;;  %v12583_v60 = vpop.f32.mrb[9].mxu1 }
 0x359   : > { %v4002_v5 = vpop.f32.mrb[10].mxu1  ;;  %v12593_v6 = vmul.f32 %v12585_v4, %v12583_v60 }
 0x35a   : > { %4238 = vrot.lane.b32.xlu1 %v12581_v3, %s15162_s23  ;;  %4226 = vrot.lane.b32.xlu0 %v12581_v3, %s15164_s22  ;;  %v4003_v61 = vpop.f32.mrb[11].mxu1  ;;  %v4260_v23 = vmul.f32 %v4258_v10, %v12581_v3  ;;  %v4314_v34 = vmul.f32 %v4312_v17, %v12581_v3  ;;  %v4316_v5 = vmul.f32 %v4312_v17, %v12569_v35 }
 0x35b   : > { %v4315_v49 = vmul.f32 %v4312_v17, %v12593_v6  ;;  %v4261_v37 = vmul.f32 %v4258_v10, %v12593_v6 }
 0x35e   : > { %4240 = vrot.lane.b32.xlu0 %v12593_v6, %s15162_s23  ;;  %4228 = vrot.lane.b32.xlu1 %v12593_v6, %s15164_s22 }
 0x362   : > { %4277 = vperm.xlu0 %10793, %v12422_v13   ;;  %4242 = vrot.lane.b32.xlu1 %v12569_v35, %s15162_s23 }
 0x366   : > { %4284 = vperm.xlu1 %10794, %v12422_v13   ;;  %10796 = vset.pattern.permute.xlu0 %v15211_v1 }
 0x367   : > { %4358 = vperm.xlu0 %10796, %v4225_v7  }
 0x36a   : > { %10795 = vset.pattern.permute.xlu1 %v15177_v9 }
 0x36b   : > { %4294 = vperm.xlu1 %10795, %v12422_v13  }
 0x36f   : > { %10797 = vset.pattern.permute.xlu1 %v15211_v1 }
 0x3cc   : > { %v4239_v24 = vpop.permute.xlu1 %4238  ;;  %v4227_v55 = vpop.permute.xlu0 %4226 }
 0x3cd   : > { %v4237_v50 = vsel %vm4234_vm3, %v4231_v51, %v4227_v55 }
 0x3ce   : > { %v4253_v21 = vmul.f32 %v4251_v15, %v4237_v50  ;;  %v4307_v25 = vmul.f32 %v4305_v14, %v4237_v50 }
 0x3d0   : > { %v4241_v13 = vpop.permute.xlu0 %4240  ;;  %v4229_v22 = vpop.permute.xlu1 %4228  ;;  %v4263_v32 = vadd.f32 %v4260_v23, %v4253_v21  ;;  %v4317_v44 = vadd.f32 %v4314_v34, %v4307_v25 }
 0x3d1   : > { %v4246_v27 = vsel %vm4244_vm4, %v4239_v24, %v4241_v13  ;;  %v4235_v28 = vsel %vm4234_vm3, %v4229_v22, %v4231_v51  ;;  %v4236_v43 = vsel %vm4234_vm3, %v4227_v55, %v4229_v22  ;;  %v4496_v51 = vld [vmem:[%s11942_s12 + $0x8] sm:$0xff] }
 0x3d2   : > { %v4270_v30 = vmul.f32 %v4268_v11, %v4246_v27  ;;  %v4255_v31 = vmul.f32 %v4251_v15, %v4235_v28  ;;  %v4324_v52 = vmul.f32 %v4322_v20, %v4246_v27  ;;  %v4254_v46 = vmul.f32 %v4251_v15, %v4236_v43  ;;  %v4383_v15 = vld [vmem:[%s11932_s30] sm:$0xff] }
 0x3d3   : > { %v4308_v42 = vmul.f32 %v4305_v14, %v4236_v43  ;;  %v4309_v57 = vmul.f32 %v4305_v14, %v4235_v28 }
 0x3d4   : > { %v4243_v26 = vpop.permute.xlu1 %4242  ;;  %v4273_v36 = vadd.f32 %v4270_v30, %v4263_v32  ;;  %v4265_v45 = vadd.f32 %v4262_v38, %v4255_v31  ;;  %v4327_v16 = vadd.f32 %v4324_v52, %v4317_v44  ;;  %v4264_v0 = vadd.f32 %v4261_v37, %v4254_v46 }
 0x3d5   : > { %v4245_v29 = vsel %vm4244_vm4, %v4241_v13, %v4243_v26  ;;  %v4247_v41 = vsel %vm4244_vm4, %v4243_v26, %v4239_v24  ;;  %v4318_v62 = vadd.f32 %v4315_v49, %v4308_v42  ;;  %v12642_v13 = vld [vmem:[%s11947_s20 + $0x8] sm:$0xff] }
 0x3d6   : > { %v4272_v47 = vmul.f32 %v4268_v11, %v4247_v41  ;;  %4330 = vrot.lane.b32.xlu1 %v4273_v36, %s11852_s26  ;;  %v4271_v53 = vmul.f32 %v4268_v11, %v4245_v29  ;;  %v4325_v54 = vmul.f32 %v4322_v20, %v4245_v29  ;;  %v4326_v61 = vmul.f32 %v4322_v20, %v4247_v41 }
 0x3d7   : > { %v4319_v11 = vadd.f32 %v4316_v5, %v4309_v57 }
 0x3d8   : > { %v4275_v56 = vadd.f32 %v4272_v47, %v4265_v45  ;;  %v4328_v7 = vadd.f32 %v4325_v54, %v4318_v62  ;;  %v4274_v10 = vadd.f32 %v4271_v53, %v4264_v0 }
 0x3d9   : > { %v4329_v14 = vadd.f32 %v4326_v61, %v4319_v11 }
 0x3da   : > { %4343 = vrot.lane.b32.xlu1 %v4327_v16, %s11853_s28  ;;  %4334 = vrot.lane.b32.xlu0 %v4275_v56, %s11852_s26 }
 0x3de   : > { %4345 = vrot.lane.b32.xlu0 %v4328_v7, %s11853_s28  ;;  %4332 = vrot.lane.b32.xlu1 %v4274_v10, %s11852_s26 }
 0x3e1   : > { %v4278_v24 = vpop.permute.xlu0 %4277 }
 0x3e2   : > { %4389 = vperm.xlu0 %10796, %v4383_v15   ;;  %4347 = vrot.lane.b32.xlu1 %v4329_v14, %s11853_s28  ;;  %v4280_v22 = vmul.f32 %v4278_v24, %v4237_v50  ;;  %v4281_v23 = vmul.f32 %v4278_v24, %v4236_v43  ;;  %v4282_v25 = vmul.f32 %v4278_v24, %v4235_v28 }
 0x3e5   : > { %v4285_v55 = vpop.permute.xlu1 %4284 }
 0x3e6   : > { %v4287_v21 = vmul.f32 %v4285_v55, %v12581_v3  ;;  %v4288_v17 = vmul.f32 %v4285_v55, %v12593_v6  ;;  %4507 = vperm.xlu0 %10796, %v4496_v51   ;;  %v4289_v20 = vmul.f32 %v4285_v55, %v12569_v35  ;;  %v4359_v35 = vpop.permute.xlu0 %4358 }
 0x3e8   : > { %v4290_v30 = vadd.f32 %v4287_v21, %v4280_v22  ;;  %v4291_v31 = vadd.f32 %v4288_v17, %v4281_v23  ;;  %v4292_v34 = vadd.f32 %v4289_v20, %v4282_v25 }
 0x3ea   : > { %v4295_v32 = vpop.permute.xlu1 %4294  ;;  %4700 = vperm.xlu0 %10796, %v12642_v13  }
 0x3eb   : > { %v4297_v52 = vmul.f32 %v4295_v32, %v4246_v27  ;;  %v4298_v26 = vmul.f32 %v4295_v32, %v4245_v29  ;;  %v4299_v36 = vmul.f32 %v4295_v32, %v4247_v41 }
 0x3ed   : > { %v4300_v3 = vadd.f32 %v4297_v52, %v4290_v30  ;;  %v4301_v38 = vadd.f32 %v4298_v26, %v4291_v31  ;;  %v4302_v6 = vadd.f32 %v4299_v36, %v4292_v34 }
 0x3ee   : > { %10799 = vset.pattern.permute.xlu0 %v15203_v12 }
 0x3ef   : > { %4714 = vperm.xlu0 %10799, %v12642_v13  }
 0x3f3   : > { %10801 = vset.pattern.permute.xlu0 %v15199_v48 }
 0x448   : > { %v4331_v50 = vpop.permute.xlu1 %4330 }
 0x44c   : > { %v4335_v28 = vpop.permute.xlu0 %4334  ;;  %v4344_v43 = vpop.permute.xlu1 %4343 }
 0x44d   : > { %v4339_v27 = vsel %vm4336_vm5, %v4335_v28, %v4331_v50 }
 0x44e   : > { %v4340_v29 = vadd.f32 %v4339_v27, %v4300_v3  ;;  %v4382_v3 = vld [vmem:[%s11927_s24] sm:$0xf] }
 0x450   : > { %v4346_v41 = vpop.permute.xlu0 %4345  ;;  %v4333_v44 = vpop.permute.xlu1 %4332 }
 0x451   : > { %v4351_v46 = vsel %vm4349_vm6, %v4344_v43, %v4346_v41  ;;  %v4337_v42 = vsel %vm4336_vm5, %v4333_v44, %v4335_v28  ;;  %v4338_v47 = vsel %vm4336_vm5, %v4331_v50, %v4333_v44  ;;  %v12674_v50 = vld [vmem:[%s11947_s20] sm:$0xff] }
 0x452   : > { %v4353_v45 = vadd.f32 %v4351_v46, %v4340_v29  ;;  %v4341_v37 = vadd.f32 %v4338_v47, %v4301_v38  ;;  %v4342_v53 = vadd.f32 %v4337_v42, %v4302_v6  ;;  %v15175_v38 = vmov 0.0   ;;  %4804 = vperm.xlu0 %10801, %v12674_v50  }
 0x454   : > { %v4361_v49 = vadd.f32 %v4359_v35, %v4353_v45  ;;  %v4348_v54 = vpop.permute.xlu1 %4347 }
 0x455   : > { %v4350_v16 = vsel %vm4349_vm6, %v4346_v41, %v4348_v54  ;;  %v4352_v56 = vsel %vm4349_vm6, %v4348_v54, %v4344_v43  ;;  %v11343_v54 = vld [vmem:[%s15277_s6] sm:$0xff]   ;;  %s15300_s6 = sld [smem:[#allocation26_spill]] }
 0x456   : > { %v4364_v57 = vsub.f32 0.0, %v4361_v49  ;;  %v4354_v62 = vadd.f32 %v4350_v16, %v4341_v37  ;;  %v4355_v0 = vadd.f32 %v4352_v56, %v4342_v53  ;;  %10804 = vset.pattern.permute.xlu0 %v15185_v33 }
 0x457   : > { %4822 = vperm.xlu0 %10804, %v12642_v13  }
 0x458   : > { %v4367_v5 = vmul.f32 1.442695, %v4364_v57  ;;  %v4362_v61 = vadd.f32 %v4359_v35, %v4354_v62  ;;  %v4363_v7 = vadd.f32 %v4359_v35, %v4355_v0  ;;  %v4495_v35 = vld [vmem:[%s11942_s12] sm:$0xff] }
 0x459   : > { %4502 = vperm.xlu1 %10797, %v4495_v35  }
 0x45a   : > { %11464 = vpow2.f32 %v4367_v5  ;;  %v4365_v10 = vsub.f32 0.0, %v4362_v61  ;;  %v4366_v11 = vsub.f32 0.0, %v4363_v7 }
 0x45b   : > { %10806 = vset.pattern.permute.xlu0 %v15181_v39 }
 0x45c   : > { %v4369_v15 = vmul.f32 1.442695, %v4365_v10  ;;  %v4371_v14 = vmul.f32 1.442695, %v4366_v11 }
 0x45d   : > { %4695 = vperm.xlu1 %10797, %v12674_v50  }
 0x45e   : > { %11466 = vpow2.f32 %v4369_v15 }
 0x45f   : > { %11468 = vpow2.f32 %v4371_v14 }
 0x461   : > { %10798 = vset.pattern.permute.xlu1 %v15203_v12  ;;  %v4390_v28 = vpop.permute.xlu0 %4389 }
 0x462   : > { %4710 = vperm.xlu1 %10798, %v12674_v50  }
 0x464   : > { %v11465_v51 = vpop.eup %11464 }
 0x465   : > { %v4373_v24 = vadd.f32 1.0, %v11465_v51  ;;  %v4508_v11 = vpop.permute.xlu0 %4507 }
 0x466   : > { %10800 = vset.pattern.permute.xlu1 %v15201_v19 }
 0x467   : > { %11470 = vrcp.f32 %v4373_v24  ;;  %4730 = vperm.xlu1 %10800, %v12674_v50  }
 0x468   : > { %v11467_v55 = vpop.eup %11466 }
 0x469   : > { %v11469_v21 = vpop.eup %11468  ;;  %v4374_v17 = vadd.f32 1.0, %v11467_v55 }
 0x46a   : > { %v4375_v20 = vadd.f32 1.0, %v11469_v21 }
 0x46b   : > { %11472 = vrcp.f32 %v4374_v17  ;;  %4734 = vperm.xlu1 %10800, %v12642_v13  }
 0x46c   : > { %11474 = vrcp.f32 %v4375_v20 }
 0x46f   : > { %10802 = vset.pattern.permute.xlu1 %v15199_v48 }
 0x470   : > { %4808 = vperm.xlu1 %10802, %v12642_v13  }
 0x471   : > { %v11471_v22 = vpop.eup %11470 }
 0x472   : > { %v4379_v23 = vmul.f32 %v11471_v22, %v4361_v49 }
 0x474   : > { %v4384_v32 = vpack.c.bf16 %v4379_v23, %v4379_v23  ;;  %10803 = vset.pattern.permute.xlu1 %v15185_v33 }
 0x475   : > { %v11473_v25 = vpop.eup %11472  ;;  %4818 = vperm.xlu1 %10803, %v12674_v50  }
 0x476   : > { %v11475_v30 = vpop.eup %11474  ;;  %v4380_v31 = vmul.f32 %v11473_v25, %v4362_v61  ;;  %v4398_v26 = vsel %vm4396_vm7, %v4384_v32, 0 }
 0x477   : > { %v4381_v34 = vmul.f32 %v11475_v30, %v4363_v7 }
 0x478   : > { %v4385_v52 = vpack.c.bf16 %v4380_v31, %v4380_v31 }
 0x479   : > { %v4386_v36 = vpack.c.bf16 %v4381_v34, %v4381_v34  ;;  %10805 = vset.pattern.permute.xlu1 %v15183_v8 }
 0x47a   : > { %10061 = vmatprep.subr.msk.bf16.mxu0 %vm4396_vm7, %v4385_v52  ;;  %4838 = vperm.xlu1 %10805, %v12674_v50  }
 0x47b   : > { %4407 = vmatpush1.bf16.msra.mxu0 %v4398_v26  ;;  %v4404_v6 = vsel %vm4396_vm7, %v4386_v36, 0 }
 0x47c   : > { %10428 = vmatprep.subr.bf16.mxu0 %v15175_v38 }
 0x47e   : > { %10062 = vmatmul.mubr.msk.bf16.vlgmr.msra.gmra.mrb[32].mxu0 %vm4392_vm8, %v4382_v3  ;;  %4842 = vperm.xlu1 %10805, %v12642_v13  }
 0x47f   : > { %10429 = vmatpush3.bf16.msra.mxu0 %v4404_v6  ;;  %10430 = vmatprep.mubr.msk.bf16.mxu0 %vm11855_vm9, %v15175_v38 }
 0x482   : > { %10807 = vset.pattern.permute.xlu1 %v15181_v39 }
 0x486   : > { %10431 = vmatmul.mubr.msk.bf16.vlgmr.msra.gmra.mrb[36].mxu0 %vm4392_vm8, %v4382_v3 }
 0x487   : > { %4559 = vmatprep.mubr.bf16.mxu0 %v15211_v1 }
 0x4d8   : > { %v4503_v5 = vpop.permute.xlu1 %4502 }
 0x551   : > { %v4440_v43 = vpop.f32.mrb[32].mxu0 }
 0x552   : > { %v4441_v27 = vadd.f32 %v4440_v43, %v4390_v28  ;;  %v4442_v29 = vpop.f32.mrb[33].mxu0 }
 0x553   : > { %v4443_v41 = vadd.f32 %v4442_v29, %v4390_v28  ;;  %v4444_v44 = vpop.f32.mrb[34].mxu0 }
 0x554   : > { %v4487_v46 = vadd.f32 %v4441_v27, %v12577_v2  ;;  %v4445_v42 = vpop.f32.mrb[35].mxu0 }
 0x555   : > { %v4488_v47 = vadd.f32 %v4443_v41, %v12583_v60 }
 0x556   : > { %4490 = vst [vmem:[%s1743_s2] sm:$0xff] %v4487_v46  ;;  %v4497_v45 = vpack.c.bf16 %v4487_v46, %v4487_v46 }
 0x557   : > { %4491 = vst [vmem:[%s1743_s2 + $0x8] sm:$0xff] %v4488_v47  ;;  %v4498_v49 = vpack.c.bf16 %v4488_v47, %v4488_v47 }
 0x558   : > { %v4519_v37 = vsel %vm4396_vm7, %v4497_v45, 0 }
 0x559   : > { %v4481_v53 = vpop.f32.mrb[36].mxu0  ;;  %10065 = vmatprep.subr.msk.bf16.mxu0 %vm4396_vm7, %v4498_v49 }
 0x55a   : > { %v4482_v16 = vadd.f32 %v4481_v53, %v4390_v28  ;;  %4528 = vmatpush1.bf16.msra.mxu0 %v4519_v37  ;;  %v10432_v56 = vpop.f32.mrb[37].mxu0 }
 0x55b   : > { %10434 = vmatprep.subr.bf16.mxu0 %v15175_v38  ;;  %v4484_v57 = vpop.f32.mrb[38].mxu0 }
 0x55c   : > { %v4489_v2 = vadd.f32 %v4482_v16, %v12565_v58  ;;  %v10433_v62 = vpop.f32.mrb[39].mxu0 }
 0x55d   : > { %10066 = vmatmul.mubr.msk.bf16.vlgmr.msra.gmra.mrb[40].mxu0 %vm4392_vm8, %v11343_v54 }
 0x55e   : > { %4492 = vst [vmem:[%s1743_s2 + $0x10] sm:$0xff] %v4489_v2  ;;  %v4499_v60 = vpack.c.bf16 %v4489_v2, %v4489_v2  ;;  %10436 = vmatprep.mubr.msk.bf16.mxu0 %vm11855_vm9, %v15175_v38  ;;  %s15285_s2 = sld [smem:[#allocation3_spill]] }
 0x560   : > { %v4525_v0 = vsel %vm4396_vm7, %v4499_v60, 0 }
 0x561   : > { %10435 = vmatpush3.bf16.msra.mxu0 %v4525_v0 }
 0x565   : > { %10437 = vmatmul.mubr.msk.bf16.vlgmr.msra.gmra.mrb[44].mxu0 %vm4392_vm8, %v11343_v54 }
 0x630   : > { %v4561_v61 = vpop.f32.mrb[40].mxu0 }
 0x631   : > { %v4562_v7 = vadd.f32 %v4561_v61, %v4503_v5  ;;  %v4563_v10 = vpop.f32.mrb[41].mxu0 }
 0x632   : > { %v4564_v15 = vadd.f32 %v4563_v10, %v4503_v5  ;;  %v4565_v58 = vpop.f32.mrb[42].mxu0 }
 0x633   : > { %v4611_v14 = vsub.f32 0.0, %v4562_v7  ;;  %v4566_v51 = vadd.f32 %v4565_v58, %v4508_v11  ;;  %v4567_v24 = vpop.f32.mrb[43].mxu0 }
 0x634   : > { %v4612_v55 = vsub.f32 0.0, %v4564_v15  ;;  %v4568_v21 = vadd.f32 %v4567_v24, %v4508_v11  ;;  %v12763_v24 = vpop.permute.xlu1 %4695 }
 0x635   : > { %v4617_v17 = vmul.f32 1.442695, %v4611_v14  ;;  %v4614_v20 = vsub.f32 0.0, %v4566_v51 }
 0x636   : > { %v4619_v22 = vmul.f32 1.442695, %v4612_v55  ;;  %v4615_v23 = vsub.f32 0.0, %v4568_v21 }
 0x637   : > { %11476 = vpow2.f32 %v4617_v17  ;;  %v4623_v25 = vmul.f32 1.442695, %v4614_v20  ;;  %v12771_v20 = vpop.permute.xlu0 %4700 }
 0x638   : > { %11478 = vpow2.f32 %v4619_v22  ;;  %v4625_v30 = vmul.f32 1.442695, %v4615_v23  ;;  %v4604_v31 = vpop.f32.mrb[44].mxu0  ;;  %v12765_v55 = vpop.permute.xlu1 %4710 }
 0x639   : > { %11480 = vpow2.f32 %v4623_v25  ;;  %v4605_v32 = vadd.f32 %v4604_v31, %v4503_v5  ;;  %v10438_v34 = vpop.f32.mrb[45].mxu0 }
 0x63a   : > { %11482 = vpow2.f32 %v4625_v30  ;;  %v4607_v52 = vpop.f32.mrb[46].mxu0 }
 0x63b   : > { %v4613_v26 = vsub.f32 0.0, %v4605_v32  ;;  %v4608_v36 = vadd.f32 %v4607_v52, %v4508_v11  ;;  %v10439_v3 = vpop.f32.mrb[47].mxu0  ;;  %v12775_v23 = vpop.permute.xlu0 %4714 }
 0x63d   : > { %v4621_v6 = vmul.f32 1.442695, %v4613_v26  ;;  %v4616_v35 = vsub.f32 0.0, %v4608_v36 }
 0x63f   : > { %11484 = vpow2.f32 %v4621_v6  ;;  %v4627_v28 = vmul.f32 1.442695, %v4616_v35 }
 0x641   : > { %v11477_v43 = vpop.eup %11476  ;;  %11486 = vpow2.f32 %v4627_v28 }
 0x642   : > { %v11479_v27 = vpop.eup %11478  ;;  %v4629_v29 = vadd.f32 1.0, %v11477_v43 }
 0x643   : > { %v11481_v41 = vpop.eup %11480  ;;  %v4630_v46 = vadd.f32 1.0, %v11479_v27 }
 0x644   : > { %v11483_v44 = vpop.eup %11482  ;;  %11488 = vrcp.f32 %v4629_v29  ;;  %v4632_v42 = vadd.f32 1.0, %v11481_v41 }
 0x645   : > { %v4633_v47 = vadd.f32 1.0, %v11483_v44 }
 0x646   : > { %11490 = vrcp.f32 %v4632_v42 }
 0x647   : > { %11492 = vrcp.f32 %v4630_v46 }
 0x648   : > { %11494 = vrcp.f32 %v4633_v47 }
 0x649   : > { %v11485_v45 = vpop.eup %11484 }
 0x64a   : > { %v4631_v37 = vadd.f32 1.0, %v11485_v45 }
 0x64b   : > { %v11487_v49 = vpop.eup %11486 }
 0x64c   : > { %v4634_v54 = vadd.f32 1.0, %v11487_v49  ;;  %11496 = vrcp.f32 %v4631_v37 }
 0x64e   : > { %v11489_v53 = vpop.eup %11488  ;;  %11498 = vrcp.f32 %v4634_v54 }
 0x64f   : > { %v4641_v16 = vmul.f32 %v11489_v53, %v4562_v7 }
 0x650   : > { %v11491_v56 = vpop.eup %11490 }
 0x651   : > { %v12709_v57 = vmul.f32 %v4641_v16, %v12575_v63  ;;  %v4644_v2 = vmul.f32 %v11491_v56, %v4566_v51  ;;  %v11493_v62 = vpop.eup %11492  ;;  %v4656_v51 = vld [vmem:[%s11952_s27 + $0x8] sm:$0xff] }
 0x652   : > { %v11495_v0 = vpop.eup %11494  ;;  %v4642_v5 = vmul.f32 %v11493_v62, %v4564_v15 }
 0x653   : > { %v12712_v60 = vmul.f32 %v4644_v2, %v12575_v63  ;;  %4657 = vrot.lane.b32.xlu0 %v12709_v57, %s15164_s22  ;;  %v4645_v61 = vmul.f32 %v11495_v0, %v4568_v21  ;;  %v12767_v21 = vpop.permute.xlu1 %4730 }
 0x654   : > { %v12721_v7 = vmul.f32 %v4642_v5, %v12585_v4 }
 0x655   : > { %4659 = vrot.lane.b32.xlu1 %v12712_v60, %s15164_s22  ;;  %v12726_v10 = vmul.f32 %v4645_v61, %v12585_v4 }
 0x656   : > { %v11497_v63 = vpop.eup %11496  ;;  %v4718_v42 = vmul.f32 %v12765_v55, %v12721_v7 }
 0x657   : > { %4675 = vrot.lane.b32.xlu0 %v12709_v57, %s15162_s23  ;;  %v4643_v15 = vmul.f32 %v11497_v63, %v4605_v32  ;;  %v12769_v17 = vpop.permute.xlu1 %4734  ;;  %v4721_v45 = vmul.f32 %v12775_v23, %v12726_v10 }
 0x658   : > { %v11499_v11 = vpop.eup %11498 }
 0x659   : > { %4677 = vrot.lane.b32.xlu1 %v12712_v60, %s15162_s23  ;;  %v4646_v58 = vmul.f32 %v11499_v11, %v4608_v36  ;;  %v12735_v14 = vmul.f32 %v4643_v15, %v12563_v40 }
 0x65b   : > { %4661 = vrot.lane.b32.xlu0 %v12721_v7, %s15164_s22  ;;  %v12740_v4 = vmul.f32 %v4646_v58, %v12563_v40  ;;  %v4655_v40 = vld [vmem:[%s11952_s27] sm:$0xff]  ;;  %v12773_v22 = vpop.permute.xlu1 %4808 }
 0x65d   : > { %4663 = vrot.lane.b32.xlu1 %v12726_v10, %s15164_s22 }
 0x65f   : > { %4679 = vrot.lane.b32.xlu0 %v12721_v7, %s15162_s23 }
 0x661   : > { %4681 = vrot.lane.b32.xlu1 %v12726_v10, %s15162_s23 }
 0x663   : > { %4665 = vrot.lane.b32.xlu0 %v12735_v14, %s15164_s22 }
 0x665   : > { %4667 = vrot.lane.b32.xlu1 %v12740_v4, %s15164_s22 }
 0x667   : > { %4683 = vrot.lane.b32.xlu0 %v12735_v14, %s15162_s23 }
 0x669   : > { %4685 = vrot.lane.b32.xlu1 %v12740_v4, %s15162_s23 }
 0x66b   : > { %4750 = vperm.xlu0 %10806, %v12674_v50  }
 0x66d   : > { %4754 = vperm.xlu1 %10807, %v12642_v13  }
 0x66f   : > { %10809 = vset.pattern.permute.xlu0 %v15179_v59 }
 0x670   : > { %4768 = vperm.xlu0 %10809, %v12642_v13  }
 0x671   : > { %10808 = vset.pattern.permute.xlu1 %v15179_v59 }
 0x672   : > { %4764 = vperm.xlu1 %10808, %v12674_v50  }
 0x674   : > { %10811 = vset.pattern.permute.xlu0 %v15211_v1 }
 0x675   : > { %4907 = vperm.xlu0 %10811, %v4655_v40  }
 0x676   : > { %10810 = vset.pattern.permute.xlu1 %v15177_v9 }
 0x677   : > { %4784 = vperm.xlu1 %10810, %v12674_v50   ;;  %v12777_v50 = vpop.permute.xlu1 %4818 }
 0x678   : > { %v4826_v61 = vmul.f32 %v12777_v50, %v12721_v7 }
 0x67b   : > { %4788 = vperm.xlu1 %10810, %v12642_v13   ;;  %v12779_v13 = vpop.permute.xlu0 %4804  ;;  %v12781_v25 = vpop.permute.xlu1 %4838 }
 0x67f   : > { %10812 = vset.pattern.permute.xlu1 %v15211_v1  ;;  %v12783_v30 = vpop.permute.xlu0 %4822  ;;  %v12785_v31 = vpop.permute.xlu1 %4842 }
 0x680   : > { %4912 = vperm.xlu1 %10812, %v4656_v51   ;;  %v4829_v58 = vmul.f32 %v12783_v30, %v12726_v10 }
 0x6c5   : > { %v4658_v32 = vpop.permute.xlu0 %4657 }
 0x6c7   : > { %v4660_v34 = vpop.permute.xlu1 %4659 }
 0x6c9   : > { %v4676_v52 = vpop.permute.xlu0 %4675 }
 0x6cb   : > { %v4678_v26 = vpop.permute.xlu1 %4677 }
 0x6cd   : > { %v4662_v36 = vpop.permute.xlu0 %4661 }
 0x6ce   : > { %v12789_v28 = vsel %vm4234_vm3, %v4658_v32, %v4662_v36 }
 0x6cf   : > { %v4664_v3 = vpop.permute.xlu1 %4663  ;;  %v4704_v41 = vmul.f32 %v12763_v24, %v12789_v28  ;;  %v4812_v54 = vmul.f32 %v12779_v13, %v12789_v28 }
 0x6d0   : > { %v12793_v27 = vsel %vm4234_vm3, %v4660_v34, %v4664_v3 }
 0x6d1   : > { %v4680_v6 = vpop.permute.xlu0 %4679  ;;  %v4707_v44 = vmul.f32 %v12771_v20, %v12793_v27  ;;  %v4724_v2 = vadd.f32 %v4718_v42, %v4704_v41  ;;  %v4815_v62 = vmul.f32 %v12773_v22, %v12793_v27  ;;  %v4832_v41 = vadd.f32 %v4826_v61, %v4812_v54 }
 0x6d2   : > { %v12846_v42 = vsel %vm4244_vm4, %v4676_v52, %v4680_v6 }
 0x6d3   : > { %v4682_v35 = vpop.permute.xlu1 %4681  ;;  %v4727_v5 = vadd.f32 %v4721_v45, %v4707_v44  ;;  %v4720_v44 = vmul.f32 %v12775_v23, %v12712_v60 }
 0x6d5   : > { %v4666_v43 = vpop.permute.xlu0 %4665 }
 0x6d6   : > { %v12809_v49 = vsel %vm4234_vm3, %v4666_v43, %v4658_v32  ;;  %v12850_v45 = vsel %vm4234_vm3, %v4662_v36, %v4666_v43  ;;  %v4737_v43 = vmul.f32 %v12767_v21, %v12846_v42 }
 0x6d7   : > { %v4668_v29 = vpop.permute.xlu1 %4667  ;;  %v4703_v63 = vmul.f32 %v12763_v24, %v12809_v49 }
 0x6d8   : > { %v12817_v16 = vsel %vm4234_vm3, %v4668_v29, %v4660_v34  ;;  %v4717_v34 = vmul.f32 %v12765_v55, %v12709_v57  ;;  %v12859_v54 = vsel %vm4234_vm3, %v4664_v3, %v4668_v29  ;;  %v4719_v29 = vmul.f32 %v12765_v55, %v12735_v14 }
 0x6d9   : > { %v4684_v46 = vpop.permute.xlu0 %4683  ;;  %v4706_v40 = vmul.f32 %v12771_v20, %v12817_v16  ;;  %v4816_v55 = vmul.f32 %v12773_v22, %v12859_v54 }
 0x6da   : > { %v12803_v47 = vsel %vm4244_vm4, %v4680_v6, %v4684_v46  ;;  %v12863_v6 = vsel %vm4244_vm4, %v4684_v46, %v4676_v52  ;;  %v4708_v52 = vmul.f32 %v12771_v20, %v12859_v54 }
 0x6db   : > { %v4738_v37 = vmul.f32 %v12767_v21, %v12803_v47  ;;  %v4686_v53 = vpop.permute.xlu1 %4685  ;;  %v4846_v11 = vmul.f32 %v12781_v25, %v12803_v47  ;;  %v4726_v36 = vadd.f32 %v4720_v44, %v4706_v40  ;;  %v4830_v40 = vmul.f32 %v12783_v30, %v12740_v4 }
 0x6dc   : > { %v12821_v56 = vsel %vm4244_vm4, %v4682_v35, %v4686_v53 }
 0x6dd   : > { %v4741_v0 = vmul.f32 %v12769_v17, %v12821_v56  ;;  %v4744_v15 = vadd.f32 %v4738_v37, %v4724_v2  ;;  %v4849_v51 = vmul.f32 %v12785_v31, %v12821_v56  ;;  %v4835_v37 = vadd.f32 %v4829_v58, %v4815_v62 }
 0x6de   : > { %v12855_v2 = vsel %vm4244_vm4, %v4678_v26, %v4682_v35  ;;  %v4705_v62 = vmul.f32 %v12763_v24, %v12850_v45  ;;  %v12871_v35 = vsel %vm4244_vm4, %v4686_v53, %v4678_v26  ;;  %v4739_v24 = vmul.f32 %v12767_v21, %v12863_v6 }
 0x6df   : > { %v4747_v32 = vadd.f32 %v4741_v0, %v4727_v5  ;;  %4861 = vrot.lane.b32.xlu1 %v4744_v15, %s11852_s26  ;;  %v4852_v0 = vadd.f32 %v4846_v11, %v4832_v41  ;;  %v4723_v5 = vadd.f32 %v4717_v34, %v4703_v63  ;;  %v4855_v61 = vadd.f32 %v4849_v51, %v4835_v37 }
 0x6e0   : > { %v4740_v3 = vmul.f32 %v12769_v17, %v12855_v2  ;;  %v4722_v26 = vmul.f32 %v12775_v23, %v12740_v4  ;;  %v4742_v53 = vmul.f32 %v12769_v17, %v12871_v35  ;;  %v4813_v11 = vmul.f32 %v12779_v13, %v12850_v45 }
 0x6e1   : > { %4863 = vrot.lane.b32.xlu0 %v4747_v32, %s11852_s26  ;;  %v4743_v46 = vadd.f32 %v4737_v43, %v4723_v5  ;;  %v4725_v20 = vadd.f32 %v4719_v29, %v4705_v62  ;;  %v4827_v15 = vmul.f32 %v12777_v50, %v12735_v14  ;;  %v4811_v23 = vmul.f32 %v12779_v13, %v12809_v49 }
 0x6e2   : > { %v4746_v63 = vadd.f32 %v4740_v3, %v4726_v36  ;;  %v4728_v21 = vadd.f32 %v4722_v26, %v4708_v52  ;;  %v4847_v17 = vmul.f32 %v12781_v25, %v12863_v6  ;;  %v4814_v51 = vmul.f32 %v12773_v22, %v12817_v16 }
 0x6e3   : > { %4885 = vrot.lane.b32.xlu1 %v4852_v0, %s11853_s28  ;;  %v4745_v58 = vadd.f32 %v4739_v24, %v4725_v20  ;;  %v4850_v32 = vmul.f32 %v12785_v31, %v12871_v35  ;;  %v4825_v41 = vmul.f32 %v12777_v50, %v12709_v57  ;;  %v4833_v37 = vadd.f32 %v4827_v15, %v4813_v11  ;;  %v11346_v20 = vld [vmem:[%s15278_s7 + $0x48] sm:$0xff]  }
 0x6e4   : > { %v4748_v34 = vadd.f32 %v4742_v53, %v4728_v21  ;;  %v4828_v0 = vmul.f32 %v12783_v30, %v12712_v60  ;;  %v4836_v22 = vadd.f32 %v4830_v40, %v4816_v55  ;;  %v4845_v50 = vmul.f32 %v12781_v25, %v12846_v42  ;;  %v11344_v30 = vld [vmem:[%s15278_s7 + $0x40] sm:$0xff]  }
 0x6e5   : > { %4887 = vrot.lane.b32.xlu0 %v4855_v61, %s11853_s28  ;;  %v4853_v5 = vadd.f32 %v4847_v17, %v4833_v37  ;;  %v4831_v61 = vadd.f32 %v4825_v41, %v4811_v23  ;;  %v4848_v62 = vmul.f32 %v12785_v31, %v12855_v2  ;;  %10304 = vmatprep.subr.bf16.mxu0 %v11344_v30  ;;  %v11347_v23 = vld [vmem:[%s15278_s7 + $0x8] sm:$0xff]  }
 0x6e6   : > { %v4856_v36 = vadd.f32 %v4850_v32, %v4836_v22  ;;  %v4834_v43 = vadd.f32 %v4828_v0, %v4814_v51  ;;  %v5304_v51 = vld [vmem:[%s15280_s11] sm:$0xff]  ;;  %v5306_v22 = vld [vmem:[%s15280_s11 + $0x10] sm:$0xff]  ;;  %v11355_v30 = vld [vmem:[%s15278_s7 + $0x28] sm:$0xff]  }
 0x6e7   : > { %4857 = vrot.lane.b32.xlu1 %v4743_v46, %s11852_s26  ;;  %v4851_v24 = vadd.f32 %v4845_v50, %v4831_v61  ;;  %v11345_v46 = vld [vmem:[%s15278_s7] sm:$0xff]  }
 0x6e8   : > { %v4854_v53 = vadd.f32 %v4848_v62, %v4834_v43  ;;  %10305 = vmatpush3.bf16.msra.mxu0 %v11345_v46  ;;  %v11350_v43 = vld [vmem:[%s15278_s7 + $0x58] sm:$0xff]   ;;  %v12956_v50 = vld [vmem:[%s15281_s0] sm:$0xff] }
 0x6e9   : > { %4859 = vrot.lane.b32.xlu0 %v4746_v63, %s11852_s26  ;;  %10306 = vmatprep.subr.bf16.mxu0 %v11346_v20  ;;  %v11353_v62 = vld [vmem:[%s15278_s7 + $0x20] sm:$0xff]   ;;  %v11359_v46 = vld [vmem:[%s15278_s7 + $0x38] sm:$0xff]  }
 0x6ea   : > { %v4751_v44 = vpop.permute.xlu0 %4750 }
 0x6eb   : > { %4865 = vrot.lane.b32.xlu1 %v4745_v58, %s11852_s26  ;;  %v4757_v31 = vmul.f32 %v4751_v44, %v12809_v49  ;;  %v4758_v63 = vmul.f32 %v4751_v44, %v12789_v28  ;;  %v4759_v11 = vmul.f32 %v4751_v44, %v12850_v45  ;;  %v4960_v28 = vld [vmem:[%s15279_s10 + $0x8] sm:$0xf]  ;;  %v11349_v44 = vld [vmem:[%s15278_s7 + $0x10] sm:$0xff]  }
 0x6ec   : > { %v4755_v13 = vpop.permute.xlu1 %4754  ;;  %10307 = vmatpush3.bf16.msra.mxu0 %v11347_v23 }
 0x6ed   : > { %4867 = vrot.lane.b32.xlu0 %v4748_v34, %s11852_s26  ;;  %v4762_v40 = vmul.f32 %v4755_v13, %v12859_v54  ;;  %s15283_s26 = sld [smem:[#allocation11_spill]] }
 0x6ef   : > { %4889 = vrot.lane.b32.xlu1 %v4853_v5, %s11853_s28  ;;  %v4769_v52 = vpop.permute.xlu0 %4768 }
 0x6f0   : > { %v4776_v55 = vmul.f32 %v4769_v52, %v12740_v4  ;;  %v4761_v4 = vmul.f32 %v4755_v13, %v12793_v27  ;;  %v5305_v27 = vld [vmem:[%s15280_s11 + $0x8] sm:$0xff] }
 0x6f1   : > { %4891 = vrot.lane.b32.xlu0 %v4856_v36, %s11853_s28  ;;  %v4765_v3 = vpop.permute.xlu1 %4764 }
 0x6f2   : > { %v4771_v29 = vmul.f32 %v4765_v3, %v12709_v57  ;;  %v4772_v26 = vmul.f32 %v4765_v3, %v12721_v7  ;;  %v4773_v25 = vmul.f32 %v4765_v3, %v12735_v14  ;;  %v4774_v57 = vmul.f32 %v4769_v52, %v12712_v60  ;;  %v4959_v7 = vld [vmem:[%s15279_s10] sm:$0xff]  ;;  %v11354_v3 = vld [vmem:[%s15278_s7 + $0x68] sm:$0xff]  }
 0x6f3   : > { %4881 = vrot.lane.b32.xlu1 %v4851_v24, %s11853_s28  ;;  %v4775_v14 = vmul.f32 %v4769_v52, %v12726_v10  ;;  %v4760_v10 = vmul.f32 %v4755_v13, %v12817_v16  ;;  %v4782_v37 = vadd.f32 %v4776_v55, %v4762_v40  ;;  %v11356_v52 = vld [vmem:[%s15278_s7 + $0x70] sm:$0xff]   ;;  %v11358_v24 = vld [vmem:[%s15278_s7 + $0x78] sm:$0xff]  }
 0x6f4   : > { %v4777_v21 = vadd.f32 %v4771_v29, %v4757_v31  ;;  %v4778_v49 = vadd.f32 %v4772_v26, %v4758_v63  ;;  %v4779_v17 = vadd.f32 %v4773_v25, %v4759_v11  ;;  %v11357_v29 = vld [vmem:[%s15278_s7 + $0x30] sm:$0xff]   ;;  %v4908_v25 = vpop.permute.xlu0 %4907 }
 0x6f5   : > { %4883 = vrot.lane.b32.xlu0 %v4854_v53, %s11853_s28  ;;  %v4780_v34 = vadd.f32 %v4774_v57, %v4760_v10  ;;  %v4781_v41 = vadd.f32 %v4775_v14, %v4761_v4  ;;  %s15166_s28 = sshll.u32 %s15477_s16, 4 }
 0x6f6   : > { %v4785_v15 = vpop.permute.xlu1 %4784  ;;  %s1748_s1 = scalar_lea.vmem %s15284_s8, %s15166_s28  ;;  %s15289_s28 = sld [smem:[#allocation19_spill]] }
 0x6f7   : > { %v4791_v45 = vmul.f32 %v4785_v15, %v12846_v42  ;;  %v4792_v60 = vmul.f32 %v4785_v15, %v12803_v47  ;;  %v4793_v58 = vmul.f32 %v4785_v15, %v12863_v6  ;;  %5241 = vperm.xlu1 %10812, %v4959_v7   ;;  %v11348_v6 = vld [vmem:[%s15278_s7 + $0x50] sm:$0xff]   ;;  %s15311_s8 = sld [smem:[#allocation29_spill]] }
 0x6f8   : > { %10308 = vmatprep.subr.bf16.mxu0 %v11348_v6 }
 0x6f9   : > { %5246 = vperm.xlu0 %10811, %v4960_v28   ;;  %v12941_v32 = vadd.f32 %v4792_v60, %v4778_v49  ;;  %v12943_v42 = vadd.f32 %v4791_v45, %v4777_v21  ;;  %v12945_v47 = vadd.f32 %v4793_v58, %v4779_v17  ;;  %10309 = vmatpush3.bf16.msra.mxu0 %v11349_v44 }
 0x6fa   : > { %v4789_v16 = vpop.permute.xlu1 %4788  ;;  %10310 = vmatprep.subr.bf16.mxu0 %v11350_v43 }
 0x6fb   : > { %v4794_v54 = vmul.f32 %v4789_v16, %v12855_v2  ;;  %v4795_v13 = vmul.f32 %v4789_v16, %v12821_v56  ;;  %v4796_v0 = vmul.f32 %v4789_v16, %v12871_v35  ;;  %5310 = vperm.xlu1 %10812, %v5304_v51   ;;  %v11351_v2 = vld [vmem:[%s15278_s7 + $0x18] sm:$0xff]   ;;  %v12961_v56 = vld [vmem:[%s15281_s0 + $0x8] sm:$0xff]  ;;  %v11352_v35 = vld [vmem:[%s15278_s7 + $0x60] sm:$0xff]  }
 0x6fd   : > { %5315 = vperm.xlu0 %10811, %v5305_v27   ;;  %v4801_v5 = vadd.f32 %v4795_v13, %v4781_v41  ;;  %v4800_v61 = vadd.f32 %v4794_v54, %v4780_v34  ;;  %v4802_v36 = vadd.f32 %v4796_v0, %v4782_v37  ;;  %10311 = vmatpush3.bf16.msra.mxu0 %v11351_v2 }
 0x6fe   : > { %10312 = vmatprep.subr.bf16.mxu0 %v11352_v35 }
 0x6ff   : > { %5320 = vperm.xlu1 %10812, %v5306_v22   ;;  %v4913_v26 = vpop.permute.xlu1 %4912 }
 0x701   : > { %5436 = vperm.xlu0 %10811, %v12956_v50   ;;  %10313 = vmatpush3.bf16.msra.mxu0 %v11353_v62 }
 0x702   : > { %10314 = vmatprep.subr.bf16.mxu0 %v11354_v3 }
 0x703   : > { %5441 = vperm.xlu1 %10812, %v12961_v56  }
 0x705   : > { %10813 = vset.pattern.permute.xlu0 %v15203_v12  ;;  %10315 = vmatpush3.bf16.msra.mxu0 %v11355_v30 }
 0x706   : > { %5453 = vperm.xlu0 %10813, %v12956_v50   ;;  %10316 = vmatprep.subr.bf16.mxu0 %v11356_v52 }
 0x707   : > { %10814 = vset.pattern.permute.xlu1 %v15203_v12 }
 0x708   : > { %5457 = vperm.xlu1 %10814, %v12961_v56  }
 0x709   : > { %10317 = vmatpush3.bf16.msra.mxu0 %v11357_v29 }
 0x70a   : > { %10318 = vmatprep.subr.bf16.mxu0 %v11358_v24 }
 0x70c   : > { %10815 = vset.pattern.permute.xlu1 %v15211_v1 }
 0x70d   : > { %10319 = vmatpush3.bf16.msra.mxu0 %v11359_v46 }
 0x70e   : > { %10440 = vmatprep.subr.bf16.mxu0 %v15175_v38 }
 0x751   : > { %v4862_v53 = vpop.permute.xlu1 %4861 }
 0x753   : > { %v4864_v31 = vpop.permute.xlu0 %4863 }
 0x755   : > { %v4886_v63 = vpop.permute.xlu1 %4885 }
 0x757   : > { %v4888_v11 = vpop.permute.xlu0 %4887 }
 0x759   : > { %v4858_v57 = vpop.permute.xlu1 %4857 }
 0x75a   : > { %v4871_v14 = vsel %vm4336_vm5, %v4858_v57, %v4862_v53 }
 0x75b   : > { %v4860_v7 = vpop.permute.xlu0 %4859  ;;  %v4876_v49 = vadd.f32 %v4871_v14, %v12941_v32 }
 0x75c   : > { %v4872_v55 = vsel %vm4336_vm5, %v4860_v7, %v4864_v31 }
 0x75d   : > { %v4866_v20 = vpop.permute.xlu1 %4865  ;;  %v4879_v15 = vadd.f32 %v4872_v55, %v4801_v5 }
 0x75e   : > { %v4869_v23 = vsel %vm4336_vm5, %v4862_v53, %v4866_v20  ;;  %v4873_v17 = vsel %vm4336_vm5, %v4866_v20, %v4858_v57 }
 0x75f   : > { %v4868_v21 = vpop.permute.xlu0 %4867  ;;  %v4875_v32 = vadd.f32 %v4873_v17, %v12943_v42  ;;  %v4877_v6 = vadd.f32 %v4869_v23, %v12945_v47 }
 0x760   : > { %v4874_v45 = vsel %vm4336_vm5, %v4868_v21, %v4860_v7  ;;  %v4870_v10 = vsel %vm4336_vm5, %v4864_v31, %v4868_v21 }
 0x761   : > { %v4890_v28 = vpop.permute.xlu1 %4889  ;;  %v4878_v34 = vadd.f32 %v4874_v45, %v4800_v61  ;;  %v4880_v27 = vadd.f32 %v4870_v10, %v4802_v36 }
 0x762   : > { %v4893_v60 = vsel %vm4349_vm6, %v4886_v63, %v4890_v28 }
 0x763   : > { %v4892_v58 = vpop.permute.xlu0 %4891  ;;  %v4900_v4 = vadd.f32 %v4893_v60, %v4876_v49 }
 0x764   : > { %v4894_v40 = vsel %vm4349_vm6, %v4888_v11, %v4892_v58 }
 0x765   : > { %v4903_v51 = vadd.f32 %v4894_v40, %v4879_v15  ;;  %v4916_v41 = vadd.f32 %v4908_v25, %v4900_v4  ;;  %v4882_v16 = vpop.permute.xlu1 %4881 }
 0x766   : > { %v4895_v37 = vsel %vm4349_vm6, %v4882_v16, %v4886_v63  ;;  %v4897_v54 = vsel %vm4349_vm6, %v4890_v28, %v4882_v16 }
 0x767   : > { %v4919_v44 = vadd.f32 %v4913_v26, %v4903_v51  ;;  %v4884_v13 = vpop.permute.xlu0 %4883  ;;  %v4922_v0 = vsub.f32 0.0, %v4916_v41  ;;  %v4899_v22 = vadd.f32 %v4895_v37, %v4875_v32  ;;  %v4901_v5 = vadd.f32 %v4897_v54, %v4877_v6  ;;  %v11360_v37 = vld [vmem:[%s15278_s7 + $0x80] sm:$0xff]  }
 0x768   : > { %v4896_v42 = vsel %vm4349_vm6, %v4884_v13, %v4888_v11  ;;  %v4898_v47 = vsel %vm4349_vm6, %v4892_v58, %v4884_v13 }
 0x769   : > { %v4925_v43 = vsub.f32 0.0, %v4919_v44  ;;  %v4902_v61 = vadd.f32 %v4896_v42, %v4878_v34  ;;  %v4929_v36 = vmul.f32 1.442695, %v4922_v0  ;;  %v4915_v2 = vadd.f32 %v4908_v25, %v4899_v22  ;;  %v11363_v0 = vld [vmem:[%s15278_s7 + $0x98] sm:$0xff]   ;;  %v11364_v22 = vld [vmem:[%s15278_s7 + $0xa0] sm:$0xff]   ;;  %v11366_v42 = vld [vmem:[%s15278_s7 + $0xb0] sm:$0xff]  }
 0x76a   : > { %v4917_v35 = vadd.f32 %v4908_v25, %v4901_v5  ;;  %v4904_v62 = vadd.f32 %v4898_v47, %v4880_v27  ;;  %v11365_v5 = vld [vmem:[%s15278_s7 + $0xa8] sm:$0xff]  }
 0x76b   : > { %v4935_v3 = vmul.f32 1.442695, %v4925_v43  ;;  %v4918_v30 = vadd.f32 %v4913_v26, %v4902_v61  ;;  %11500 = vpow2.f32 %v4929_v36  ;;  %v4921_v52 = vsub.f32 0.0, %v4915_v2  ;;  %v11367_v43 = vld [vmem:[%s15278_s7 + $0xb8] sm:$0xff]  }
 0x76c   : > { %v4923_v29 = vsub.f32 0.0, %v4917_v35  ;;  %v4920_v24 = vadd.f32 %v4913_v26, %v4904_v62 }
 0x76d   : > { %11502 = vpow2.f32 %v4935_v3  ;;  %v4924_v46 = vsub.f32 0.0, %v4918_v30  ;;  %v4927_v53 = vmul.f32 1.442695, %v4921_v52 }
 0x76e   : > { %v4931_v31 = vmul.f32 1.442695, %v4923_v29  ;;  %v4926_v63 = vsub.f32 0.0, %v4920_v24 }
 0x76f   : > { %v4933_v11 = vmul.f32 1.442695, %v4924_v46  ;;  %11504 = vpow2.f32 %v4927_v53 }
 0x770   : > { %v4937_v18 = vmul.f32 1.442695, %v4926_v63  ;;  %11506 = vpow2.f32 %v4931_v31  ;;  %v11368_v31 = vld [vmem:[%s15282_s18] sm:$0x3f]   ;;  %s15286_s18 = sld [smem:[#allocation14_spill]] }
 0x771   : > { %11508 = vpow2.f32 %v4933_v11  ;;  %v11369_v63 = vld [vmem:[%s15283_s26] sm:$0xff]   ;;  %v13030_v11 = vld [vmem:[%s15281_s0 + $0x10] sm:$0xff]  ;;  %s15290_s0 = sld [smem:[#allocation20_spill]] }
 0x772   : > { %11510 = vpow2.f32 %v4937_v18  ;;  %5446 = vperm.xlu1 %10815, %v13030_v11   ;;  %5461 = vperm.xlu0 %10813, %v13030_v11  }
 0x775   : > { %v11501_v57 = vpop.eup %11500 }
 0x776   : > { %v4940_v7 = vadd.f32 1.0, %v11501_v57  ;;  %10816 = vset.pattern.permute.xlu1 %v15201_v19  ;;  %10817 = vset.pattern.permute.xlu0 %v15201_v19  ;;  %v5242_v18 = vpop.permute.xlu1 %5241 }
 0x777   : > { %v11503_v25 = vpop.eup %11502  ;;  %5471 = vperm.xlu1 %10816, %v12956_v50   ;;  %5475 = vperm.xlu0 %10817, %v12961_v56  }
 0x778   : > { %v4943_v20 = vadd.f32 1.0, %v11503_v25  ;;  %11512 = vrcp.f32 %v4940_v7 }
 0x779   : > { %v11505_v14 = vpop.eup %11504 }
 0x77a   : > { %11514 = vrcp.f32 %v4943_v20  ;;  %v11507_v55 = vpop.eup %11506  ;;  %v4939_v26 = vadd.f32 1.0, %v11505_v14  ;;  %v5247_v20 = vpop.permute.xlu0 %5246 }
 0x77b   : > { %v11509_v21 = vpop.eup %11508  ;;  %v4941_v49 = vadd.f32 1.0, %v11507_v55  ;;  %10818 = vset.pattern.permute.xlu1 %v15199_v48  ;;  %10819 = vset.pattern.permute.xlu0 %v15185_v33 }
 0x77c   : > { %v11511_v15 = vpop.eup %11510  ;;  %11516 = vrcp.f32 %v4939_v26  ;;  %v4942_v28 = vadd.f32 1.0, %v11509_v21  ;;  %5540 = vperm.xlu1 %10818, %v12956_v50   ;;  %5555 = vperm.xlu0 %10819, %v12956_v50  }
 0x77d   : > { %11518 = vrcp.f32 %v4941_v49  ;;  %v4944_v23 = vadd.f32 1.0, %v11511_v15  ;;  %v11370_v15 = vld [vmem:[%s15283_s26 + $0x8] ss:$0 sps:$4 sm:$0xff]  }
 0x77e   : > { %11520 = vrcp.f32 %v4942_v28  ;;  %v5311_v28 = vpop.permute.xlu1 %5310 }
 0x77f   : > { %11522 = vrcp.f32 %v4944_v23 }
 0x780   : > { %5544 = vperm.xlu1 %10818, %v12961_v56   ;;  %10822 = vset.pattern.permute.xlu0 %v15199_v48 }
 0x781   : > { %5548 = vperm.xlu0 %10822, %v13030_v11  }
 0x782   : > { %v11513_v17 = vpop.eup %11512  ;;  %v5321_v23 = vpop.permute.xlu1 %5320 }
 0x783   : > { %v4952_v60 = vmul.f32 %v11513_v17, %v4916_v41  ;;  %v11361_v41 = vld [vmem:[%s15278_s7 + $0x88] sm:$0xff]  }
 0x784   : > { %v11515_v45 = vpop.eup %11514  ;;  %10820 = vset.pattern.permute.xlu1 %v15185_v33 }
 0x785   : > { %v4955_v58 = vmul.f32 %v11515_v45, %v4919_v44  ;;  %v11362_v44 = vld [vmem:[%s15278_s7 + $0x90] sm:$0xff]   ;;  %5559 = vperm.xlu1 %10820, %v12961_v56   ;;  %10825 = vset.pattern.permute.xlu0 %v15183_v8  ;;  %s15310_s7 = smov 4  }
 0x786   : > { %v11517_v10 = vpop.eup %11516  ;;  %5577 = vperm.xlu0 %10825, %v12961_v56  }
 0x787   : > { %v5010_v4 = vpack.c.bf16 %v4955_v58, %v4952_v60  ;;  %v11519_v40 = vpop.eup %11518  ;;  %v4951_v6 = vmul.f32 %v11517_v10, %v4915_v2 }
 0x788   : > { %v11521_v51 = vpop.eup %11520  ;;  %v4953_v16 = vmul.f32 %v11519_v40, %v4917_v35 }
 0x789   : > { %5188 = vmatprep.mubr.bf16.mxu0 %v5010_v4  ;;  %v11523_v32 = vpop.eup %11522  ;;  %v4954_v34 = vmul.f32 %v11521_v51, %v4918_v30  ;;  %10821 = vset.pattern.permute.xlu1 %v15201_v19  ;;  %v5316_v4 = vpop.permute.xlu0 %5315 }
 0x78a   : > { %v4956_v27 = vmul.f32 %v11523_v32, %v4920_v24  ;;  %5479 = vperm.xlu1 %10821, %v13030_v11   ;;  %10827 = vset.pattern.permute.xlu0 %v15181_v39 }
 0x78b   : > { %v5009_v54 = vpack.c.bf16 %v4954_v34, %v4951_v6 }
 0x78c   : > { %v5011_v13 = vpack.c.bf16 %v4956_v27, %v4953_v16 }
 0x78d   : > { %5189 = vmatmul.mubr.bf16.vlgmr.msra.gmra.mrb[48].mxu0 %v5009_v54 }
 0x78e   : > { %10441 = vmatpush3.bf16.msra.mxu0 %v11360_v37  ;;  %10456 = vmatprep.mubr.msk.bf16.mxu0 %vm11855_vm9, %v15175_v38 }
 0x78f   : > { %10442 = vmatprep.subr.bf16.mxu0 %v15175_v38  ;;  %10823 = vset.pattern.permute.xlu1 %v15185_v33 }
 0x790   : > { %5563 = vperm.xlu1 %10823, %v13030_v11  }
 0x792   : > { %10443 = vmatpush3.bf16.msra.mxu0 %v11361_v41 }
 0x793   : > { %10444 = vmatprep.subr.bf16.mxu0 %v15175_v38 }
 0x794   : > { %10824 = vset.pattern.permute.xlu1 %v15183_v8 }
 0x795   : > { %5573 = vperm.xlu1 %10824, %v12956_v50  }
 0x796   : > { %10445 = vmatpush3.bf16.msra.mxu0 %v11362_v44 }
 0x797   : > { %10446 = vmatprep.subr.bf16.mxu0 %v15175_v38 }
 0x799   : > { %5581 = vperm.xlu1 %10824, %v13030_v11  }
 0x79a   : > { %10447 = vmatpush3.bf16.msra.mxu0 %v11363_v0 }
 0x79b   : > { %10448 = vmatprep.subr.bf16.mxu0 %v15175_v38 }
 0x79d   : > { %10826 = vset.pattern.permute.xlu1 %v15181_v39 }
 0x79e   : > { %10449 = vmatpush3.bf16.msra.mxu0 %v11364_v22 }
 0x79f   : > { %10450 = vmatprep.subr.bf16.mxu0 %v15175_v38 }
 0x7a2   : > { %10451 = vmatpush3.bf16.msra.mxu0 %v11365_v5 }
 0x7a3   : > { %10452 = vmatprep.subr.bf16.mxu0 %v15175_v38 }
 0x7a6   : > { %10453 = vmatpush3.bf16.msra.mxu0 %v11366_v42  ;;  %v10098_v42 = vld [vmem:[%s15285_s2] ss:$0 sm:$0xff]  ;;  %s15287_s2 = sld [smem:[#allocation17_spill]] }
 0x7a7   : > { %10454 = vmatprep.subr.bf16.mxu0 %v15175_v38 }
 0x7aa   : > { %10455 = vmatpush3.bf16.msra.mxu0 %v11367_v43 }
 0x7ab   : > { %10460 = vmatprep.subr.bf16.mxu0 %v15175_v38 }
 0x7ad   : > { %10457 = vmatmul.mubr.bf16.vlgmr.msra.gmra.mrb[52].mxu0 %v5011_v13 }
 0x7ae   : > { %10462 = vmatprep.mubr.msk.bf16.mxu0 %vm11855_vm9, %v15175_v38 }
 0x860   : > { %v10320_v47 = vpop.f32.mrb[48].mxu0 }
 0x861   : > { %v10321_v61 = vpop.f32.mrb[49].mxu0 }
 0x862   : > { %v10322_v36 = vadd.f32 %v10321_v61, %v10320_v47  ;;  %v10323_v2 = vpop.f32.mrb[50].mxu0 }
 0x863   : > { %v10324_v35 = vpop.f32.mrb[51].mxu0 }
 0x864   : > { %v10325_v62 = vadd.f32 %v10324_v35, %v10323_v2 }
 0x880   : > { %v5231_v3 = vpop.f32.mrb[52].mxu0 }
 0x881   : > { %v5232_v30 = vadd.f32 %v10322_v36, %v5231_v3  ;;  %v10458_v52 = vpop.f32.mrb[53].mxu0 }
 0x882   : > { %v5234_v29 = vpop.f32.mrb[54].mxu0  ;;  %v5420_v52 = vld [vmem:[%s15286_s18 + $0x8] sm:$0xff] }
 0x883   : > { %v5235_v24 = vadd.f32 %v10325_v62, %v5234_v29  ;;  %v10459_v46 = vpop.f32.mrb[55].mxu0  ;;  %v5421_v29 = vld [vmem:[%s15286_s18 + $0x10] sm:$0xff] }
 0x885   : > { %v5238_v53 = vpack.c.bf16 %v5235_v24, %v5232_v30  ;;  %v5419_v30 = vld [vmem:[%s15286_s18] sm:$0xff]  ;;  %v5442_v24 = vpop.permute.xlu1 %5441 }
 0x887   : > { %10461 = vmatpush3.bf16.msra.mxu0 %v5238_v53 }
 0x88a   : > { %10463 = vmatmul.mubr.msk.bf16.vlgmr.msra.gmra.mrb[56].mxu0 %vm5254_vm10, %v11368_v31 }
 0x88b   : > { %10468 = vmatprep.mubr.msk.bf16.mxu0 %vm5331_vm11, %v11369_v63  ;;  %v5437_v63 = vpop.permute.xlu0 %5436 }
 0x95d   : > { %v5292_v57 = vpop.f32.mrb[56].mxu0 }
 0x95e   : > { %v5293_v25 = vadd.f32 %v5292_v57, %v5242_v18  ;;  %v10464_v7 = vpop.f32.mrb[57].mxu0  ;;  %v5454_v57 = vpop.permute.xlu0 %5453 }
 0x95f   : > { %v5295_v14 = vpop.f32.mrb[58].mxu0 }
 0x960   : > { %5299 = vst [vmem:[%s1748_s1] sm:$0xff] %v5293_v25  ;;  %v5296_v55 = vadd.f32 %v5295_v14, %v5247_v20  ;;  %v10465_v26 = vpop.f32.mrb[59].mxu0 }
 0x962   : > { %5300 = vst [vmem:[%s1748_s1 + $0x8] sm:$0xf] %v5296_v55  ;;  %v5307_v21 = vpack.c.bf16 %v5296_v55, %v5293_v25  ;;  %v5462_v7 = vpop.permute.xlu0 %5461  ;;  %s11856_s1 = smov 118  }
 0x964   : > { %10694 = vmatprep.subr.msk.bf16.mxu0 %vm2212_vm1, %v5307_v21  ;;  %v5339_v49 = vsel %vm2212_vm1, %v5307_v21, 0  ;;  %vm9353_vm1 = vcmask 654336  }
 0x965   : > { %10467 = vmatpush3.bf16.msra.mxu0 %v5339_v49 }
 0x968   : > { %10469 = vmatmul.mubr.msk.bf16.vlgmr.msra.gmra.mrb[60].mxu0 %vm5331_vm11, %v11370_v15 }
 0xa3b   : > { %v10470_v17 = vpop.f32.mrb[60].mxu0 }
 0xa3c   : > { %v5384_v45 = vadd.f32 %v10470_v17, %v5321_v23  ;;  %v5375_v60 = vpop.f32.mrb[61].mxu0 }
 0xa3d   : > { %v5376_v58 = vadd.f32 %v5375_v60, %v5311_v28  ;;  %v10471_v10 = vpop.f32.mrb[62].mxu0 }
 0xa3e   : > { %v5391_v40 = vsub.f32 0.0, %v5384_v45  ;;  %v5378_v51 = vpop.f32.mrb[63].mxu0 }
 0xa3f   : > { %v5389_v32 = vsub.f32 0.0, %v5376_v58  ;;  %v5379_v6 = vadd.f32 %v5378_v51, %v5316_v4 }
 0xa40   : > { %v5396_v34 = vmul.f32 1.442695, %v5391_v40 }
 0xa41   : > { %v5392_v16 = vmul.f32 1.442695, %v5389_v32  ;;  %v5390_v27 = vsub.f32 0.0, %v5379_v6 }
 0xa42   : > { %11524 = vpow2.f32 %v5396_v34 }
 0xa43   : > { %11526 = vpow2.f32 %v5392_v16  ;;  %v5394_v37 = vmul.f32 1.442695, %v5390_v27 }
 0xa45   : > { %11528 = vpow2.f32 %v5394_v37 }
 0xa4c   : > { %v11525_v54 = vpop.eup %11524 }
 0xa4d   : > { %v11527_v13 = vpop.eup %11526  ;;  %v5400_v41 = vadd.f32 1.0, %v11525_v54 }
 0xa4e   : > { %v5398_v44 = vadd.f32 1.0, %v11527_v13 }
 0xa4f   : > { %v11529_v0 = vpop.eup %11528  ;;  %11530 = vrcp.f32 %v5400_v41 }
 0xa50   : > { %11532 = vrcp.f32 %v5398_v44  ;;  %v5399_v22 = vadd.f32 1.0, %v11529_v0 }
 0xa52   : > { %11534 = vrcp.f32 %v5399_v22 }
 0xa59   : > { %v11531_v5 = vpop.eup %11530 }
 0xa5a   : > { %v11533_v43 = vpop.eup %11532  ;;  %v5406_v47 = vmul.f32 %v11531_v5, %v5384_v45 }
 0xa5b   : > { %v5404_v61 = vmul.f32 %v11533_v43, %v5376_v58 }
 0xa5c   : > { %v11535_v36 = vpop.eup %11534  ;;  %v13067_v2 = vmul.f32 %v10098_v42, %v5406_v47 }
 0xa5d   : > { %v13069_v35 = vmul.f32 %v10098_v42, %v5404_v61  ;;  %v5405_v62 = vmul.f32 %v11535_v36, %v5379_v6 }
 0xa5e   : > { %5426 = vrot.lane.b32.xlu1 %v13067_v2, %s15164_s22  ;;  %v5466_v32 = vmul.f32 %v5462_v7, %v13067_v2  ;;  %v5833_v7 = vld [vmem:[%s15289_s28] sm:$0xff] }
 0xa5f   : > { %5428 = vrot.lane.b32.xlu0 %v13069_v35, %s15162_s23  ;;  %v13075_v3 = vmul.f32 %v10098_v42, %v5405_v62  ;;  %v5464_v13 = vmul.f32 %v5454_v57, %v13069_v35  ;;  %v5834_v57 = vld [vmem:[%s15289_s28 + $0x8] sm:$0xff] }
 0xa62   : > { %5422 = vrot.lane.b32.xlu1 %v13069_v35, %s15164_s22 }
 0xa63   : > { %5424 = vrot.lane.b32.xlu0 %v13075_v3, %s15164_s22  ;;  %s11857_s22 = smov 10  }
 0xa66   : > { %5430 = vrot.lane.b32.xlu1 %v13075_v3, %s15162_s23 }
 0xa67   : > { %5432 = vrot.lane.b32.xlu0 %v13067_v2, %s15162_s23  ;;  %s15288_s23 = sld [smem:[#allocation16_spill]] }
 0xa6a   : > { %5489 = vperm.xlu1 %10826, %v12956_v50  }
 0xa6b   : > { %5493 = vperm.xlu0 %10827, %v12961_v56  }
 0xa6e   : > { %10828 = vset.pattern.permute.xlu1 %v15179_v59 }
 0xa6f   : > { %5497 = vperm.xlu0 %10827, %v13030_v11   ;;  %5504 = vperm.xlu1 %10828, %v12956_v50  }
 0xa73   : > { %10829 = vset.pattern.permute.xlu0 %v15177_v9  ;;  %5508 = vperm.xlu1 %10828, %v12961_v56  }
 0xa74   : > { %5522 = vperm.xlu0 %10829, %v12956_v50   ;;  %v5458_v50 = vpop.permute.xlu1 %5457 }
 0xa75   : > { %v5465_v4 = vmul.f32 %v5458_v50, %v13075_v3 }
 0xa77   : > { %5512 = vperm.xlu1 %10828, %v13030_v11  }
 0xa78   : > { %10831 = vset.pattern.permute.xlu0 %v15211_v1  ;;  %v5447_v46 = vpop.permute.xlu1 %5446 }
 0xa79   : > { %5610 = vperm.xlu0 %10831, %v5419_v30  }
 0xa7b   : > { %10830 = vset.pattern.permute.xlu1 %v15177_v9 }
 0xa7c   : > { %5526 = vperm.xlu1 %10830, %v12961_v56   ;;  %v5472_v53 = vpop.permute.xlu1 %5471  ;;  %v5476_v56 = vpop.permute.xlu0 %5475 }
 0xa80   : > { %5530 = vperm.xlu1 %10830, %v13030_v11   ;;  %v5541_v31 = vpop.permute.xlu1 %5540  ;;  %v5556_v11 = vpop.permute.xlu0 %5555 }
 0xa81   : > { %v5566_v17 = vmul.f32 %v5556_v11, %v13069_v35  ;;  %v13143_v11 = vld [vmem:[%s15290_s0 + $0x8] sm:$0xff] }
 0xa84   : > { %10832 = vset.pattern.permute.xlu1 %v15211_v1  ;;  %v5545_v18 = vpop.permute.xlu1 %5544  ;;  %v5549_v26 = vpop.permute.xlu0 %5548 }
 0xa85   : > { %5615 = vperm.xlu1 %10832, %v5420_v52  }
 0xa88   : > { %v5560_v25 = vpop.permute.xlu1 %5559  ;;  %v5578_v49 = vpop.permute.xlu0 %5577 }
 0xa89   : > { %5620 = vperm.xlu1 %10832, %v5421_v29   ;;  %v5567_v36 = vmul.f32 %v5560_v25, %v13075_v3  ;;  %v11373_v25 = vld [vmem:[%s15287_s2 + $0x10] sm:$0xff]  }
 0xa8c   : > { %v5480_v20 = vpop.permute.xlu1 %5479 }
 0xa90   : > { %v5564_v14 = vpop.permute.xlu1 %5563 }
 0xa91   : > { %v5568_v43 = vmul.f32 %v5564_v14, %v13067_v2  ;;  %v5835_v14 = vld [vmem:[%s15289_s28 + $0x10] sm:$0xff] }
 0xa94   : > { %v5574_v55 = vpop.permute.xlu1 %5573 }
 0xa98   : > { %v5582_v21 = vpop.permute.xlu1 %5581 }
 0xad0   : > { %v13102_v15 = vpop.permute.xlu1 %5426 }
 0xad1   : > { %v13104_v28 = vpop.permute.xlu0 %5428  ;;  %v5451_v58 = vmul.f32 %v5447_v46, %v13102_v15  ;;  %v5553_v0 = vmul.f32 %v5549_v26, %v13102_v15  ;;  %v11371_v46 = vld [vmem:[%s15287_s2] sm:$0xff]   ;;  %v11376_v26 = vld [vmem:[%s15287_s2 + $0x28] sm:$0xff]  }
 0xad2   : > { %v5584_v40 = vmul.f32 %v5574_v55, %v13104_v28  ;;  %v5482_v62 = vmul.f32 %v5472_v53, %v13104_v28  ;;  %10472 = vmatprep.subr.bf16.mxu0 %v11371_v46  ;;  %v11375_v55 = vld [vmem:[%s15287_s2 + $0x20] sm:$0xff]  }
 0xad3   : > { %v5469_v44 = vadd.f32 %v5466_v32, %v5451_v58  ;;  %v5571_v30 = vadd.f32 %v5568_v43, %v5553_v0  ;;  %10473 = vmatpush3.bf16.msra.mxu0 %v11371_v46 }
 0xad4   : > { %v13106_v23 = vpop.permute.xlu1 %5422 }
 0xad5   : > { %v5551_v45 = vmul.f32 %v5541_v31, %v13106_v23  ;;  %v13110_v60 = vpop.permute.xlu0 %5424  ;;  %v5449_v6 = vmul.f32 %v5437_v63, %v13106_v23  ;;  %v5647_v31 = vld [vmem:[%s15288_s23 + $0x8] sm:$0xff] }
 0xad6   : > { %v5450_v10 = vmul.f32 %v5442_v24, %v13110_v60  ;;  %v5552_v22 = vmul.f32 %v5545_v18, %v13110_v60  ;;  %v11372_v63 = vld [vmem:[%s15287_s2 + $0x8] sm:$0xff]   ;;  %v5646_v18 = vld [vmem:[%s15288_s23] sm:$0xff] }
 0xad7   : > { %v5569_v51 = vadd.f32 %v5566_v17, %v5551_v45  ;;  %v5467_v42 = vadd.f32 %v5464_v13, %v5449_v6  ;;  %10474 = vmatprep.subr.bf16.mxu0 %v11372_v63 }
 0xad8   : > { %v13118_v34 = vpop.permute.xlu1 %5430  ;;  %v5468_v16 = vadd.f32 %v5465_v4, %v5450_v10  ;;  %v5570_v52 = vadd.f32 %v5567_v36, %v5552_v22  ;;  %10475 = vmatpush3.bf16.msra.mxu0 %v11372_v63 }
 0xad9   : > { %v5483_v27 = vmul.f32 %v5476_v56, %v13118_v34  ;;  %v13121_v37 = vpop.permute.xlu0 %5432  ;;  %v5587_v54 = vadd.f32 %v5584_v40, %v5569_v51  ;;  %v5585_v29 = vmul.f32 %v5578_v49, %v13118_v34  ;;  %v5485_v24 = vadd.f32 %v5482_v62, %v5467_v42  ;;  %10476 = vmatprep.subr.bf16.mxu0 %v11373_v25  ;;  %v11374_v56 = vld [vmem:[%s15287_s2 + $0x18] sm:$0xff]  }
 0xada   : > { %v5484_v41 = vmul.f32 %v5480_v20, %v13121_v37  ;;  %v5586_v47 = vmul.f32 %v5582_v21, %v13121_v37  ;;  %v5836_v20 = vld [vmem:[%s15289_s28 + $0x18] sm:$0xff]  ;;  %v11377_v21 = vld [vmem:[%s15287_s2 + $0x30] sm:$0xff]  }
 0xadb   : > { %5599 = vrot.lane.b32.xlu1 %v5587_v54, %s11856_s1  ;;  %v5486_v61 = vadd.f32 %v5483_v27, %v5468_v16  ;;  %v5588_v53 = vadd.f32 %v5585_v29, %v5570_v52  ;;  %v11378_v49 = vld [vmem:[%s15287_s2 + $0x38] sm:$0xff]   ;;  %s15298_s2 = sld [smem:[#allocation24_spill]] }
 0xadc   : > { %v5487_v5 = vadd.f32 %v5484_v41, %v5469_v44  ;;  %v5589_v50 = vadd.f32 %v5586_v47, %v5571_v30  ;;  %10477 = vmatpush3.bf16.msra.mxu0 %v11373_v25 }
 0xadd   : > { %10478 = vmatprep.subr.bf16.mxu0 %v11374_v56 }
 0xade   : > { %5594 = vrot.lane.b32.xlu0 %v5487_v5, %s11857_s22 }
 0xadf   : > { %5592 = vrot.lane.b32.xlu1 %v5486_v61, %s11857_s22 }
 0xae0   : > { %10479 = vmatpush3.bf16.msra.mxu0 %v11374_v56 }
 0xae1   : > { %10480 = vmatprep.subr.bf16.mxu0 %v11375_v55 }
 0xae2   : > { %5590 = vrot.lane.b32.xlu0 %v5485_v24, %s11857_s22  ;;  %s15291_s22 = sld [smem:[#allocation15_spill]] }
 0xae3   : > { %5603 = vrot.lane.b32.xlu1 %v5589_v50, %s11856_s1 }
 0xae4   : > { %10481 = vmatpush3.bf16.msra.mxu0 %v11375_v55 }
 0xae5   : > { %10482 = vmatprep.subr.bf16.mxu0 %v11376_v26 }
 0xae6   : > { %5601 = vrot.lane.b32.xlu0 %v5588_v53, %s11856_s1  ;;  %s15292_s1 = sld [smem:[#allocation18_spill]] }
 0xae7   : > { %5771 = vperm.xlu1 %10832, %v5647_v31  }
 0xae8   : > { %10483 = vmatpush3.bf16.msra.mxu0 %v11376_v26 }
 0xae9   : > { %10484 = vmatprep.subr.bf16.mxu0 %v11377_v21  ;;  %v5490_v17 = vpop.permute.xlu1 %5489 }
 0xaea   : > { %5766 = vperm.xlu0 %10831, %v5646_v18   ;;  %v5494_v40 = vpop.permute.xlu0 %5493  ;;  %v5500_v5 = vmul.f32 %v5490_v17, %v13106_v23 }
 0xaeb   : > { %5845 = vperm.xlu1 %10832, %v5834_v57   ;;  %v5501_v36 = vmul.f32 %v5494_v40, %v13110_v60 }
 0xaec   : > { %10485 = vmatpush3.bf16.msra.mxu0 %v11377_v21 }
 0xaed   : > { %10486 = vmatprep.subr.bf16.mxu0 %v11378_v49 }
 0xaee   : > { %5840 = vperm.xlu0 %10831, %v5833_v7   ;;  %v5505_v45 = vpop.permute.xlu1 %5504  ;;  %v5498_v32 = vpop.permute.xlu0 %5497 }
 0xaef   : > { %5855 = vperm.xlu1 %10832, %v5836_v20   ;;  %v5515_v41 = vmul.f32 %v5505_v45, %v13069_v35  ;;  %v5502_v0 = vmul.f32 %v5498_v32, %v13102_v15 }
 0xaf0   : > { %10487 = vmatpush3.bf16.msra.mxu0 %v11378_v49 }
 0xaf1   : > { %10492 = vmatprep.subr.bf16.mxu0 %v15175_v38  ;;  %v5518_v62 = vadd.f32 %v5515_v41, %v5500_v5  ;;  %v11380_v5 = vld [vmem:[%s15292_s1] sm:$0xff]  }
 0xaf2   : > { %5850 = vperm.xlu0 %10831, %v5835_v14   ;;  %v5509_v58 = vpop.permute.xlu1 %5508 }
 0xaf3   : > { %5988 = vperm.xlu1 %10832, %v13143_v11   ;;  %v5523_v16 = vpop.permute.xlu0 %5522  ;;  %v5516_v42 = vmul.f32 %v5509_v58, %v13075_v3 }
 0xaf4   : > { %v5533_v43 = vmul.f32 %v5523_v16, %v13104_v28 }
 0xaf5   : > { %v5519_v52 = vadd.f32 %v5516_v42, %v5501_v36  ;;  %v13173_v42 = vld [vmem:[%s15290_s0 + $0x10] sm:$0xff] }
 0xaf6   : > { %10833 = vset.pattern.permute.xlu0 %v15203_v12  ;;  %v5513_v10 = vpop.permute.xlu1 %5512  ;;  %v5536_v29 = vadd.f32 %v5533_v43, %v5518_v62  ;;  %v13176_v43 = vld [vmem:[%s15290_s0] sm:$0xff] }
 0xaf7   : > { %10835 = vset.pattern.permute.xlu1 %v15203_v12  ;;  %v5517_v13 = vmul.f32 %v5513_v10, %v13067_v2  ;;  %6006 = vperm.xlu0 %10833, %v13176_v43  }
 0xaf8   : > { %6010 = vperm.xlu1 %10835, %v13143_v11   ;;  %v5611_v54 = vpop.permute.xlu0 %5610 }
 0xaf9   : > { %v5520_v47 = vadd.f32 %v5517_v13, %v5502_v0 }
 0xafb   : > { %v5527_v4 = vpop.permute.xlu1 %5526  ;;  %10834 = vset.pattern.permute.xlu0 %v15211_v1 }
 0xafc   : > { %10836 = vset.pattern.permute.xlu1 %v15211_v1  ;;  %v5534_v2 = vmul.f32 %v5527_v4, %v13118_v34  ;;  %5983 = vperm.xlu0 %10834, %v13176_v43  }
 0xafd   : > { %5993 = vperm.xlu1 %10836, %v13173_v42  }
 0xaff   : > { %v5531_v51 = vpop.permute.xlu1 %5530 }
 0xb00   : > { %v5535_v22 = vmul.f32 %v5531_v51, %v13121_v37  ;;  %v5537_v37 = vadd.f32 %v5534_v2, %v5519_v52 }
 0xb01   : > { %10837 = vset.pattern.permute.xlu1 %v15203_v12 }
 0xb02   : > { %v5538_v35 = vadd.f32 %v5535_v22, %v5520_v47  ;;  %v11379_v22 = vld [vmem:[%s15291_s22] sm:$0xff]   ;;  %6014 = vperm.xlu1 %10837, %v13173_v42   ;;  %v13185_v47 = vld [vmem:[%s15290_s0 + $0x18] sm:$0xff]  ;;  %s15293_s22 = sshll.u32 %s15477_s16, 4 }
 0xb03   : > { %5998 = vperm.xlu0 %10834, %v13185_v47   ;;  %s1753_s0 = scalar_lea.vmem %s12152_s29, %s15293_s22  ;;  %s15295_s22 = smov 1  }
 0xb04   : > { %v5616_v6 = vpop.permute.xlu1 %5615 }
 0xb06   : > { %6018 = vperm.xlu1 %10837, %v13185_v47  }
 0xb07   : > { %10838 = vset.pattern.permute.xlu0 %v15201_v19 }
 0xb08   : > { %v5621_v27 = vpop.permute.xlu1 %5620  ;;  %6030 = vperm.xlu0 %10838, %v13176_v43  }
 0xb0a   : > { %10839 = vset.pattern.permute.xlu1 %v15201_v19 }
 0xb0b   : > { %6034 = vperm.xlu1 %10839, %v13143_v11  }
 0xb0c   : > { %6038 = vperm.xlu0 %10838, %v13173_v42  }
 0xb0f   : > { %10840 = vset.pattern.permute.xlu1 %v15199_v48 }
 0xb10   : > { %6122 = vperm.xlu1 %10840, %v13176_v43   ;;  %10842 = vset.pattern.permute.xlu0 %v15199_v48 }
 0xb11   : > { %6126 = vperm.xlu0 %10842, %v13143_v11  }
 0xb14   : > { %10841 = vset.pattern.permute.xlu1 %v15185_v33 }
 0xb15   : > { %6142 = vperm.xlu1 %10841, %v13176_v43   ;;  %6134 = vperm.xlu0 %10842, %v13185_v47  }
 0xb19   : > { %6146 = vperm.xlu1 %10841, %v13143_v11   ;;  %10846 = vset.pattern.permute.xlu0 %v15183_v8 }
 0xb1a   : > { %6166 = vperm.xlu0 %10846, %v13176_v43  }
 0xb1d   : > { %10843 = vset.pattern.permute.xlu1 %v15201_v19 }
 0xb1e   : > { %6042 = vperm.xlu1 %10843, %v13185_v47   ;;  %6178 = vperm.xlu0 %10846, %v13185_v47  }
 0xb22   : > { %10844 = vset.pattern.permute.xlu1 %v15199_v48  ;;  %10849 = vset.pattern.permute.xlu0 %v15181_v39 }
 0xb23   : > { %6130 = vperm.xlu1 %10844, %v13173_v42  }
 0xb27   : > { %10845 = vset.pattern.permute.xlu1 %v15185_v33 }
 0xb28   : > { %6150 = vperm.xlu1 %10845, %v13173_v42  }
 0xb2c   : > { %6154 = vperm.xlu1 %10845, %v13185_v47  }
 0xb30   : > { %10847 = vset.pattern.permute.xlu1 %v15183_v8 }
 0xb31   : > { %6170 = vperm.xlu1 %10847, %v13143_v11  }
 0xb35   : > { %6174 = vperm.xlu1 %10847, %v13173_v42  }
 0xb39   : > { %10848 = vset.pattern.permute.xlu1 %v15181_v39 }
 0xb4d   : > { %v5600_v44 = vpop.permute.xlu1 %5599 }
 0xb50   : > { %v5595_v61 = vpop.permute.xlu0 %5594 }
 0xb51   : > { %v5593_v30 = vpop.permute.xlu1 %5592  ;;  %v5598_v15 = vadd.f32 %v5595_v61, %v5538_v35 }
 0xb52   : > { %v5597_v3 = vadd.f32 %v5593_v30, %v5537_v37 }
 0xb54   : > { %v5591_v24 = vpop.permute.xlu0 %5590 }
 0xb55   : > { %v5596_v50 = vadd.f32 %v5591_v24, %v5536_v29  ;;  %v5604_v23 = vpop.permute.xlu1 %5603  ;;  %v11381_v24 = vld [vmem:[%s15292_s1 + $0x8] sm:$0xff]   ;;  %s15297_s1 = sld [smem:[#allocation21_spill]] }
 0xb56   : > { %v5607_v46 = vadd.f32 %v5604_v23, %v5598_v15 }
 0xb57   : > { %v5605_v53 = vadd.f32 %v5600_v44, %v5596_v50 }
 0xb58   : > { %v5625_v28 = vadd.f32 %v5621_v27, %v5607_v46  ;;  %v5602_v31 = vpop.permute.xlu0 %5601 }
 0xb59   : > { %v5623_v63 = vadd.f32 %v5611_v54, %v5605_v53  ;;  %v5606_v18 = vadd.f32 %v5602_v31, %v5597_v3 }
 0xb5a   : > { %v5628_v60 = vsub.f32 0.0, %v5625_v28 }
 0xb5b   : > { %v5626_v57 = vsub.f32 0.0, %v5623_v63  ;;  %v5624_v25 = vadd.f32 %v5616_v6, %v5606_v18 }
 0xb5c   : > { %v5633_v34 = vmul.f32 1.442695, %v5628_v60 }
 0xb5d   : > { %v5629_v7 = vmul.f32 1.442695, %v5626_v57  ;;  %v5627_v20 = vsub.f32 0.0, %v5624_v25 }
 0xb5e   : > { %11536 = vpow2.f32 %v5633_v34 }
 0xb5f   : > { %11538 = vpow2.f32 %v5629_v7  ;;  %v5631_v56 = vmul.f32 1.442695, %v5627_v20 }
 0xb61   : > { %11540 = vpow2.f32 %v5631_v56 }
 0xb66   : > { %v5772_v30 = vpop.permute.xlu1 %5771 }
 0xb68   : > { %v11537_v14 = vpop.eup %11536 }
 0xb69   : > { %v11539_v55 = vpop.eup %11538  ;;  %v5637_v26 = vadd.f32 1.0, %v11537_v14  ;;  %v5767_v61 = vpop.permute.xlu0 %5766 }
 0xb6a   : > { %v5635_v21 = vadd.f32 1.0, %v11539_v55  ;;  %v5846_v50 = vpop.permute.xlu1 %5845 }
 0xb6b   : > { %v11541_v49 = vpop.eup %11540  ;;  %11542 = vrcp.f32 %v5637_v26 }
 0xb6c   : > { %11544 = vrcp.f32 %v5635_v21  ;;  %v5636_v17 = vadd.f32 1.0, %v11541_v49 }
 0xb6d   : > { %v5841_v37 = vpop.permute.xlu0 %5840 }
 0xb6e   : > { %11546 = vrcp.f32 %v5636_v17 }
 0xb71   : > { %v5851_v23 = vpop.permute.xlu0 %5850 }
 0xb75   : > { %v11543_v45 = vpop.eup %11542 }
 0xb76   : > { %v11545_v58 = vpop.eup %11544  ;;  %v5643_v4 = vmul.f32 %v11543_v45, %v5625_v28  ;;  %v5856_v28 = vpop.permute.xlu1 %5855 }
 0xb77   : > { %v5641_v51 = vmul.f32 %v11545_v58, %v5623_v63 }
 0xb78   : > { %v11547_v10 = vpop.eup %11546  ;;  %v5665_v6 = vpack.c.bf16 %v5643_v4, %v5643_v4 }
 0xb79   : > { %v5642_v40 = vmul.f32 %v11547_v10, %v5624_v25 }
 0xb7b   : > { %v5664_v32 = vpack.c.bf16 %v5642_v40, %v5641_v51 }
 0xb7d   : > { %10488 = vmatprep.mubr.bf16.mxu0 %v5664_v32 }
 0xb7e   : > { %10489 = vmatmul.mubr.bf16.vlgmr.msra.gmra.mrb[64].mxu0 %v5665_v6 }
 0xb7f   : > { %10496 = vmatprep.mubr.msk.bf16.mxu0 %vm11855_vm9, %v15175_v38 }
 0xc51   : > { %v10490_v16 = vpop.f32.mrb[64].mxu0 }
 0xc52   : > { %v5748_v27 = vpop.f32.mrb[65].mxu0  ;;  %v5763_v44 = vpack.c.bf16 %v10490_v16, %v10490_v16 }
 0xc53   : > { %v10491_v54 = vpop.f32.mrb[66].mxu0 }
 0xc54   : > { %v5751_v13 = vpop.f32.mrb[67].mxu0  ;;  %v5784_v0 = vsel %vm4396_vm7, %v5763_v44, 0 }
 0xc55   : > { %v5762_v41 = vpack.c.bf16 %v5751_v13, %v5748_v27 }
 0xc57   : > { %10493 = vmatpush3.bf16.msra.mxu0 %v5762_v41 }
 0xc58   : > { %10494 = vmatprep.subr.bf16.mxu0 %v15175_v38 }
 0xc5b   : > { %10495 = vmatpush3.bf16.msra.mxu0 %v5784_v0 }
 0xc5e   : > { %10497 = vmatmul.mubr.msk.bf16.vlgmr.msra.gmra.mrb[68].mxu0 %vm5779_vm12, %v11379_v22 }
 0xc5f   : > { %10502 = vmatprep.mubr.msk.bf16.mxu0 %vm5254_vm10, %v11380_v5 }
 0xd31   : > { %v5820_v36 = vpop.f32.mrb[68].mxu0 }
 0xd32   : > { %v5821_v62 = vadd.f32 %v5820_v36, %v5767_v61  ;;  %v10498_v2 = vpop.f32.mrb[69].mxu0  ;;  %v5989_v36 = vpop.permute.xlu1 %5988 }
 0xd33   : > { %v5823_v35 = vpop.f32.mrb[70].mxu0  ;;  %v5961_v2 = vld [vmem:[%s15297_s1] sm:$0xff] }
 0xd34   : > { %5827 = vst [vmem:[%s1753_s0] sm:$0xff] %v5821_v62  ;;  %v5824_v52 = vadd.f32 %v5823_v35, %v5772_v30  ;;  %v10499_v29 = vpop.f32.mrb[71].mxu0  ;;  %v5964_v30 = vld [vmem:[%s15297_s1 + $0x18] sm:$0xff] }
 0xd36   : > { %5828 = vst [vmem:[%s1753_s0 + $0x8] sm:$0xff] %v5824_v52  ;;  %v5837_v15 = vpack.c.bf16 %v5824_v52, %v5821_v62  ;;  %s15294_s0 = sld [smem:[#allocation4_spill]]  ;;  %v6011_v62 = vpop.permute.xlu1 %6010  ;;  %v5962_v52 = vld [vmem:[%s15297_s1 + $0x8] sm:$0xff] }
 0xd38   : > { %10500 = vmatprep.subr.bf16.mxu0 %v5837_v15 }
 0xd39   : > { %10501 = vmatpush3.bf16.msra.mxu0 %v5837_v15  ;;  %v5963_v15 = vld [vmem:[%s15297_s1 + $0x10] sm:$0xff]  ;;  %s11858_s1 = smov 6  }
 0xd3a   : > { %v5994_v35 = vpop.permute.xlu1 %5993 }
 0xd3c   : > { %10503 = vmatmul.mubr.msk.bf16.vlgmr.msra.gmra.mrb[72].mxu0 %vm5254_vm10, %v11381_v24  ;;  %v10113_v32 = vld [vmem:[%s15294_s0] ss:$0 sm:$0xff]  ;;  %s15296_s0 = smov 127  }
 0xe0f   : > { %v10504_v46 = vpop.f32.mrb[72].mxu0 }
 0xe10   : > { %v5917_v3 = vadd.f32 %v10504_v46, %v5851_v23  ;;  %v5908_v53 = vpop.f32.mrb[73].mxu0 }
 0xe11   : > { %v5909_v31 = vadd.f32 %v5908_v53, %v5841_v37  ;;  %v10505_v63 = vpop.f32.mrb[74].mxu0 }
 0xe12   : > { %v5925_v18 = vsub.f32 0.0, %v5917_v3  ;;  %v5920_v60 = vadd.f32 %v10505_v63, %v5856_v28  ;;  %v5911_v57 = vpop.f32.mrb[75].mxu0 }
 0xe13   : > { %v5923_v25 = vsub.f32 0.0, %v5909_v31  ;;  %v5912_v34 = vadd.f32 %v5911_v57, %v5846_v50  ;;  %v6007_v50 = vpop.permute.xlu0 %6006 }
 0xe14   : > { %v5931_v7 = vmul.f32 1.442695, %v5925_v18  ;;  %v5926_v20 = vsub.f32 0.0, %v5920_v60 }
 0xe15   : > { %v5927_v56 = vmul.f32 1.442695, %v5923_v25  ;;  %v5924_v14 = vsub.f32 0.0, %v5912_v34 }
 0xe16   : > { %11548 = vpow2.f32 %v5931_v7  ;;  %v5933_v55 = vmul.f32 1.442695, %v5926_v20 }
 0xe17   : > { %11550 = vpow2.f32 %v5927_v56  ;;  %v5929_v26 = vmul.f32 1.442695, %v5924_v14  ;;  %v5984_v46 = vpop.permute.xlu0 %5983 }
 0xe18   : > { %11552 = vpow2.f32 %v5933_v55 }
 0xe19   : > { %11554 = vpow2.f32 %v5929_v26 }
 0xe20   : > { %v11549_v21 = vpop.eup %11548 }
 0xe21   : > { %v11551_v49 = vpop.eup %11550  ;;  %v5937_v17 = vadd.f32 1.0, %v11549_v21 }
 0xe22   : > { %v11553_v45 = vpop.eup %11552  ;;  %v5935_v58 = vadd.f32 1.0, %v11551_v49 }
 0xe23   : > { %v11555_v10 = vpop.eup %11554  ;;  %11556 = vrcp.f32 %v5937_v17  ;;  %v5938_v4 = vadd.f32 1.0, %v11553_v45 }
 0xe24   : > { %11558 = vrcp.f32 %v5935_v58  ;;  %v5936_v40 = vadd.f32 1.0, %v11555_v10 }
 0xe25   : > { %11560 = vrcp.f32 %v5938_v4 }
 0xe26   : > { %11562 = vrcp.f32 %v5936_v40 }
 0xe2d   : > { %v11557_v51 = vpop.eup %11556 }
 0xe2e   : > { %v11559_v6 = vpop.eup %11558  ;;  %v5945_v16 = vmul.f32 %v11557_v51, %v5917_v3 }
 0xe2f   : > { %v11561_v27 = vpop.eup %11560  ;;  %v5943_v41 = vmul.f32 %v11559_v6, %v5909_v31 }
 0xe30   : > { %v11563_v54 = vpop.eup %11562  ;;  %v13223_v13 = vmul.f32 %v10113_v32, %v5945_v16  ;;  %v5946_v44 = vmul.f32 %v11561_v27, %v5920_v60 }
 0xe31   : > { %v5944_v22 = vmul.f32 %v11563_v54, %v5912_v34  ;;  %v13229_v5 = vmul.f32 %v10113_v32, %v5943_v41 }
 0xe32   : > { %v13225_v0 = vmul.f32 %v10113_v32, %v5946_v44  ;;  %5969 = vrot.lane.b32.xlu1 %v13223_v13, %s15295_s22 }
 0xe33   : > { %v13233_v61 = vmul.f32 %v10113_v32, %v5944_v22  ;;  %v6021_v32 = vmul.f32 %v6007_v50, %v13229_v5 }
 0xe34   : > { %5971 = vrot.lane.b32.xlu0 %v13225_v0, %s15295_s22 }
 0xe35   : > { %v6022_v22 = vmul.f32 %v6011_v62, %v13233_v61 }
 0xe36   : > { %5965 = vrot.lane.b32.xlu1 %v13229_v5, %s15295_s22 }
 0xe38   : > { %5967 = vrot.lane.b32.xlu0 %v13233_v61, %s15295_s22 }
 0xe3a   : > { %5973 = vrot.lane.b32.xlu1 %v13229_v5, %s15296_s0 }
 0xe3c   : > { %5975 = vrot.lane.b32.xlu0 %v13233_v61, %s15296_s0 }
 0xe3e   : > { %5977 = vrot.lane.b32.xlu1 %v13223_v13, %s15296_s0 }
 0xe40   : > { %5979 = vrot.lane.b32.xlu0 %v13225_v0, %s15296_s0 }
 0xe42   : > { %6054 = vperm.xlu1 %10848, %v13176_v43  }
 0xe44   : > { %6058 = vperm.xlu0 %10849, %v13143_v11  }
 0xe46   : > { %10850 = vset.pattern.permute.xlu1 %v15179_v59 }
 0xe47   : > { %6074 = vperm.xlu1 %10850, %v13176_v43  }
 0xe48   : > { %6062 = vperm.xlu0 %10849, %v13173_v42  }
 0xe4b   : > { %6078 = vperm.xlu1 %10850, %v13143_v11  }
 0xe4c   : > { %10852 = vset.pattern.permute.xlu0 %v15179_v59 }
 0xe4d   : > { %6082 = vperm.xlu0 %10852, %v13173_v42  }
 0xe4f   : > { %10851 = vset.pattern.permute.xlu1 %v15181_v39 }
 0xe50   : > { %6066 = vperm.xlu1 %10851, %v13185_v47  }
 0xe51   : > { %10855 = vset.pattern.permute.xlu0 %v15177_v9 }
 0xe52   : > { %6102 = vperm.xlu0 %10855, %v13143_v11   ;;  %v6015_v11 = vpop.permute.xlu1 %6014 }
 0xe53   : > { %v6023_v45 = vmul.f32 %v6015_v11, %v13223_v13 }
 0xe54   : > { %10853 = vset.pattern.permute.xlu1 %v15179_v59 }
 0xe55   : > { %6086 = vperm.xlu1 %10853, %v13185_v47  }
 0xe56   : > { %10856 = vset.pattern.permute.xlu0 %v15211_v1  ;;  %v6019_v29 = vpop.permute.xlu1 %6018 }
 0xe57   : > { %6215 = vperm.xlu0 %10856, %v5961_v2   ;;  %v6024_v58 = vmul.f32 %v6019_v29, %v13225_v0 }
 0xe59   : > { %10854 = vset.pattern.permute.xlu1 %v15177_v9 }
 0xe5a   : > { %6098 = vperm.xlu1 %10854, %v13176_v43   ;;  %v6035_v24 = vpop.permute.xlu1 %6034  ;;  %v5999_v43 = vpop.permute.xlu0 %5998 }
 0xe5b   : > { %6230 = vperm.xlu0 %10856, %v5964_v30  }
 0xe5e   : > { %6106 = vperm.xlu1 %10854, %v13173_v42   ;;  %v6123_v37 = vpop.permute.xlu1 %6122  ;;  %v6031_v28 = vpop.permute.xlu0 %6030 }
 0xe62   : > { %6110 = vperm.xlu1 %10854, %v13185_v47   ;;  %v6143_v23 = vpop.permute.xlu1 %6142  ;;  %v6039_v31 = vpop.permute.xlu0 %6038 }
 0xe66   : > { %10857 = vset.pattern.permute.xlu1 %v15211_v1  ;;  %v6147_v3 = vpop.permute.xlu1 %6146  ;;  %v6127_v47 = vpop.permute.xlu0 %6126 }
 0xe67   : > { %6220 = vperm.xlu1 %10857, %v5962_v52   ;;  %v6157_v52 = vmul.f32 %v6143_v23, %v13229_v5 }
 0xe6a   : > { %v6043_v53 = vpop.permute.xlu1 %6042  ;;  %v6135_v60 = vpop.permute.xlu0 %6134 }
 0xe6b   : > { %6225 = vperm.xlu1 %10857, %v5963_v15  }
 0xe6e   : > { %v6131_v42 = vpop.permute.xlu1 %6130  ;;  %v6167_v25 = vpop.permute.xlu0 %6166 }
 0xe72   : > { %v6151_v63 = vpop.permute.xlu1 %6150  ;;  %v6179_v7 = vpop.permute.xlu0 %6178 }
 0xe76   : > { %v6155_v18 = vpop.permute.xlu1 %6154 }
 0xe7a   : > { %v6171_v57 = vpop.permute.xlu1 %6170 }
 0xe7e   : > { %v6175_v34 = vpop.permute.xlu1 %6174 }
 0xea4   : > { %v13271_v20 = vpop.permute.xlu1 %5969 }
 0xea5   : > { %v6003_v21 = vmul.f32 %v5994_v35, %v13271_v20  ;;  %v6139_v62 = vmul.f32 %v6131_v42, %v13271_v20 }
 0xea6   : > { %v13273_v56 = vpop.permute.xlu0 %5971 }
 0xea7   : > { %v6004_v49 = vmul.f32 %v5999_v43, %v13273_v56  ;;  %v6027_v4 = vadd.f32 %v6023_v45, %v6003_v21  ;;  %v6140_v23 = vmul.f32 %v6135_v60, %v13273_v56  ;;  %v11384_v45 = vld [vmem:[%s15298_s2 + $0x10] sm:$0xff]  }
 0xea8   : > { %v13275_v14 = vpop.permute.xlu1 %5965 }
 0xea9   : > { %v6001_v40 = vmul.f32 %v5984_v46, %v13275_v14  ;;  %v6028_v6 = vadd.f32 %v6024_v58, %v6004_v49  ;;  %v6137_v30 = vmul.f32 %v6123_v37, %v13275_v14  ;;  %v6158_v46 = vmul.f32 %v6147_v3, %v13233_v61  ;;  %v6264_v49 = vld [vmem:[%s15299_s4] sm:$0xff]  ;;  %v6266_v58 = vld [vmem:[%s15299_s4 + $0x10] sm:$0xff] }
 0xeaa   : > { %v13277_v55 = vpop.permute.xlu0 %5967  ;;  %v6160_v3 = vmul.f32 %v6155_v18, %v13225_v0  ;;  %v11383_v18 = vld [vmem:[%s15298_s2 + $0x8] sm:$0xff]  }
 0xeab   : > { %v6002_v27 = vmul.f32 %v5989_v36, %v13277_v55  ;;  %v6025_v2 = vadd.f32 %v6021_v32, %v6001_v40  ;;  %v6138_v36 = vmul.f32 %v6127_v47, %v13277_v55  ;;  %v6161_v43 = vadd.f32 %v6157_v52, %v6137_v30  ;;  %v11385_v40 = vld [vmem:[%s15298_s2 + $0x18] sm:$0xff]   ;;  %v6470_v32 = vld [vmem:[%s15300_s6 + $0x10] sm:$0xff] }
 0xeac   : > { %v13279_v26 = vpop.permute.xlu1 %5973  ;;  %v6164_v60 = vadd.f32 %v6160_v3, %v6140_v23  ;;  %v11389_v30 = vld [vmem:[%s15298_s2 + $0x38] sm:$0xff]  }
 0xead   : > { %v6045_v54 = vmul.f32 %v6031_v28, %v13279_v26  ;;  %v6026_v29 = vadd.f32 %v6022_v22, %v6002_v27  ;;  %v6181_v15 = vmul.f32 %v6167_v25, %v13279_v26  ;;  %v6162_v28 = vadd.f32 %v6158_v46, %v6138_v36  ;;  %v6471_v27 = vld [vmem:[%s15300_s6 + $0x18] sm:$0xff]  ;;  %v11388_v22 = vld [vmem:[%s15298_s2 + $0x30] sm:$0xff]  }
 0xeae   : > { %v13283_v17 = vpop.permute.xlu0 %5975 }
 0xeaf   : > { %v6046_v35 = vmul.f32 %v6035_v24, %v13283_v17  ;;  %v6049_v50 = vadd.f32 %v6045_v54, %v6025_v2  ;;  %v6182_v24 = vmul.f32 %v6171_v57, %v13283_v17  ;;  %v6185_v47 = vadd.f32 %v6181_v15, %v6161_v43  ;;  %v6472_v54 = vld [vmem:[%s15300_s6 + $0x20] sm:$0xff] }
 0xeb0   : > { %v13287_v10 = vpop.permute.xlu1 %5977 }
 0xeb1   : > { %v6047_v51 = vmul.f32 %v6039_v31, %v13287_v10  ;;  %v6050_v37 = vadd.f32 %v6046_v35, %v6026_v29  ;;  %v6183_v31 = vmul.f32 %v6175_v34, %v13287_v10  ;;  %v6186_v57 = vadd.f32 %v6182_v24, %v6162_v28 }
 0xeb2   : > { %v13292_v16 = vpop.permute.xlu0 %5979 }
 0xeb3   : > { %v6048_v41 = vmul.f32 %v6043_v53, %v13292_v16  ;;  %v6051_v44 = vadd.f32 %v6047_v51, %v6027_v4  ;;  %v6159_v53 = vmul.f32 %v6151_v63, %v13223_v13  ;;  %v6184_v25 = vmul.f32 %v6179_v7, %v13292_v16  ;;  %v11382_v63 = vld [vmem:[%s15298_s2] sm:$0xff]   ;;  %v6265_v7 = vld [vmem:[%s15299_s4 + $0x8] sm:$0xff]  ;;  %s15189_s4 = smov 124  }
 0xeb4   : > { %10506 = vmatprep.subr.bf16.mxu1 %v11382_v63  ;;  %v6468_v4 = vld [vmem:[%s15300_s6] sm:$0xff]  ;;  %v6469_v51 = vld [vmem:[%s15300_s6 + $0x8] sm:$0xff] }
 0xeb5   : > { %6193 = vrot.lane.b32.xlu1 %v6051_v44, %s11858_s1  ;;  %v6052_v11 = vadd.f32 %v6048_v41, %v6028_v6  ;;  %v6163_v42 = vadd.f32 %v6159_v53, %v6139_v62  ;;  %10507 = vmatpush3.bf16.msra.mxu1 %v11382_v63  ;;  %v6188_v34 = vadd.f32 %v6184_v25, %v6164_v60  ;;  %v11386_v6 = vld [vmem:[%s15298_s2 + $0x20] sm:$0xff]   ;;  %v11387_v41 = vld [vmem:[%s15298_s2 + $0x28] sm:$0xff]   ;;  %s15305_s2 = sld [smem:[#allocation28_spill]] }
 0xeb6   : > { %10508 = vmatprep.subr.bf16.mxu1 %v11383_v18  ;;  %v6473_v44 = vld [vmem:[%s15300_s6 + $0x28] sm:$0xff]  ;;  %s15308_s6 = sld [smem:[#allocation32_spill]] }
 0xeb7   : > { %6195 = vrot.lane.b32.xlu0 %v6052_v11, %s11858_s1  ;;  %v6187_v21 = vadd.f32 %v6183_v31, %v6163_v42 }
 0xeb9   : > { %6189 = vrot.lane.b32.xlu1 %v6049_v50, %s11858_s1  ;;  %10509 = vmatpush3.bf16.msra.mxu1 %v11383_v18 }
 0xeba   : > { %10510 = vmatprep.subr.bf16.mxu1 %v11384_v45 }
 0xebb   : > { %6191 = vrot.lane.b32.xlu0 %v6050_v37, %s11858_s1  ;;  %s15302_s1 = sld [smem:[#allocation22_spill]] }
 0xebd   : > { %6201 = vrot.lane.b32.xlu1 %v6185_v47, %s11859_s5  ;;  %10511 = vmatpush3.bf16.msra.mxu1 %v11384_v45 }
 0xebe   : > { %10512 = vmatprep.subr.bf16.mxu1 %v11385_v40 }
 0xebf   : > { %6203 = vrot.lane.b32.xlu0 %v6186_v57, %s11859_s5 }
 0xec1   : > { %6205 = vrot.lane.b32.xlu1 %v6187_v21, %s11859_s5  ;;  %10513 = vmatpush3.bf16.msra.mxu1 %v11385_v40  ;;  %v6055_v35 = vpop.permute.xlu1 %6054 }
 0xec2   : > { %10514 = vmatprep.subr.bf16.mxu1 %v11386_v6  ;;  %v6069_v42 = vmul.f32 %v6055_v35, %v13275_v14 }
 0xec3   : > { %6207 = vrot.lane.b32.xlu0 %v6188_v34, %s11859_s5  ;;  %s15301_s5 = sld [smem:[#allocation27_spill]]  ;;  %v6059_v15 = vpop.permute.xlu0 %6058 }
 0xec4   : > { %v6070_v21 = vmul.f32 %v6059_v15, %v13277_v55 }
 0xec5   : > { %6386 = vperm.xlu1 %10857, %v6264_v49   ;;  %10515 = vmatpush3.bf16.msra.mxu1 %v11386_v6 }
 0xec6   : > { %10516 = vmatprep.subr.bf16.mxu1 %v11387_v41  ;;  %v6075_v11 = vpop.permute.xlu1 %6074 }
 0xec7   : > { %6391 = vperm.xlu0 %10856, %v6265_v7   ;;  %v6063_v46 = vpop.permute.xlu0 %6062  ;;  %v6089_v47 = vmul.f32 %v6075_v11, %v13229_v5 }
 0xec8   : > { %v6071_v49 = vmul.f32 %v6063_v46, %v13271_v20 }
 0xec9   : > { %6396 = vperm.xlu1 %10857, %v6266_v58   ;;  %10517 = vmatpush3.bf16.msra.mxu1 %v11387_v41  ;;  %v13328_v2 = vld [vmem:[%s15301_s5 + $0x8] sm:$0xff]  ;;  %v6093_v34 = vadd.f32 %v6089_v47, %v6069_v42 }
 0xeca   : > { %10518 = vmatprep.subr.bf16.mxu1 %v11388_v22  ;;  %v6079_v52 = vpop.permute.xlu1 %6078 }
 0xecb   : > { %6478 = vperm.xlu0 %10856, %v6468_v4   ;;  %v6090_v25 = vmul.f32 %v6079_v52, %v13233_v61 }
 0xecc   : > { %v6083_v43 = vpop.permute.xlu0 %6082 }
 0xecd   : > { %6483 = vperm.xlu1 %10857, %v6469_v51   ;;  %10519 = vmatpush3.bf16.msra.mxu1 %v11388_v22  ;;  %v6091_v63 = vmul.f32 %v6083_v43, %v13223_v13  ;;  %v6094_v45 = vadd.f32 %v6090_v25, %v6070_v21 }
 0xece   : > { %10520 = vmatprep.subr.bf16.mxu1 %v11389_v30 }
 0xecf   : > { %6488 = vperm.xlu0 %10856, %v6470_v32   ;;  %v6067_v29 = vpop.permute.xlu1 %6066  ;;  %v6095_v61 = vadd.f32 %v6091_v63, %v6071_v49 }
 0xed1   : > { %6493 = vperm.xlu1 %10857, %v6471_v27   ;;  %10521 = vmatpush3.bf16.msra.mxu1 %v11389_v30  ;;  %v6103_v37 = vpop.permute.xlu0 %6102 }
 0xed2   : > { %v6114_v18 = vmul.f32 %v6103_v37, %v13283_v17 }
 0xed3   : > { %6498 = vperm.xlu0 %10856, %v6472_v54  }
 0xed4   : > { %v6087_v36 = vpop.permute.xlu1 %6086  ;;  %v6118_v55 = vadd.f32 %v6114_v18, %v6094_v45 }
 0xed5   : > { %6503 = vperm.xlu1 %10857, %v6473_v44   ;;  %v6092_v5 = vmul.f32 %v6087_v36, %v13225_v0 }
 0xed6   : > { %v6216_v23 = vpop.permute.xlu0 %6215 }
 0xed7   : > { %10858 = vset.pattern.permute.xlu0 %v15203_v12 }
 0xed9   : > { %6681 = vperm.xlu1 %10857, %v13328_v2   ;;  %v6099_v50 = vpop.permute.xlu1 %6098 }
 0xeda   : > { %v6231_v31 = vpop.permute.xlu0 %6230  ;;  %v6113_v57 = vmul.f32 %v6099_v50, %v13279_v26  ;;  %v6072_v26 = vmul.f32 %v6067_v29, %v13273_v56 }
 0xedc   : > { %v6117_v58 = vadd.f32 %v6113_v57, %v6093_v34  ;;  %v6096_v32 = vadd.f32 %v6092_v5, %v6072_v26  ;;  %v11390_v5 = vld [vmem:[%s15302_s1] sm:$0xff]  }
 0xedd   : > { %10860 = vset.pattern.permute.xlu1 %v15203_v12  ;;  %v6107_v62 = vpop.permute.xlu1 %6106  ;;  %10530 = vmatprep.mubr.msk.bf16.mxu0 %vm6407_vm13, %v11390_v5 }
 0xede   : > { %6715 = vperm.xlu1 %10860, %v13328_v2   ;;  %v6115_v14 = vmul.f32 %v6107_v62, %v13287_v10 }
 0xee0   : > { %v6119_v17 = vadd.f32 %v6115_v14, %v6095_v61 }
 0xee1   : > { %v6111_v24 = vpop.permute.xlu1 %6110 }
 0xee2   : > { %10861 = vset.pattern.permute.xlu1 %v15201_v19  ;;  %v6116_v13 = vmul.f32 %v6111_v24, %v13292_v16 }
 0xee4   : > { %v6120_v41 = vadd.f32 %v6116_v13, %v6096_v32  ;;  %v13370_v32 = vld [vmem:[%s15301_s5 + $0x28] sm:$0xff] }
 0xee6   : > { %v6221_v53 = vpop.permute.xlu1 %6220 }
 0xeea   : > { %v6226_v28 = vpop.permute.xlu1 %6225 }
 0xf27   : > { %v6194_v3 = vpop.permute.xlu1 %6193 }
 0xf28   : > { %v6199_v54 = vadd.f32 %v6194_v3, %v6119_v17  ;;  %v13376_v17 = vld [vmem:[%s15301_s5 + $0x10] sm:$0xff] }
 0xf29   : > { %v6196_v60 = vpop.permute.xlu0 %6195 }
 0xf2a   : > { %v6200_v22 = vadd.f32 %v6196_v60, %v6120_v41 }
 0xf2b   : > { %v6190_v7 = vpop.permute.xlu1 %6189 }
 0xf2c   : > { %v6197_v40 = vadd.f32 %v6190_v7, %v6117_v58 }
 0xf2d   : > { %v6192_v4 = vpop.permute.xlu0 %6191 }
 0xf2e   : > { %v6198_v6 = vadd.f32 %v6192_v4, %v6118_v55  ;;  %v13356_v55 = vld [vmem:[%s15301_s5] sm:$0xff] }
 0xf2f   : > { %v6202_v51 = vpop.permute.xlu1 %6201  ;;  %6747 = vperm.xlu1 %10861, %v13356_v55   ;;  %6711 = vperm.xlu0 %10858, %v13356_v55  }
 0xf30   : > { %v6209_v20 = vadd.f32 %v6202_v51, %v6197_v40  ;;  %v11391_v40 = vld [vmem:[%s15302_s1 + $0x8] ss:$0 sps:$4 sm:$0xff]   ;;  %v13365_v51 = vld [vmem:[%s15301_s5 + $0x18] sm:$0xff]  ;;  %s15303_s1 = sld [smem:[#allocation25_spill]] }
 0xf31   : > { %v6204_v27 = vpop.permute.xlu0 %6203 }
 0xf32   : > { %v6233_v0 = vadd.f32 %v6216_v23, %v6209_v20  ;;  %v6210_v44 = vadd.f32 %v6204_v27, %v6198_v6  ;;  %v13395_v6 = vld [vmem:[%s15301_s5 + $0x20] sm:$0xff]  ;;  %s15307_s5 = smov 124  }
 0xf33   : > { %v6206_v10 = vpop.permute.xlu1 %6205  ;;  %10862 = vset.pattern.permute.xlu1 %v15199_v48  ;;  %10859 = vset.pattern.permute.xlu0 %v15211_v1 }
 0xf34   : > { %v6237_v30 = vsub.f32 0.0, %v6233_v0  ;;  %v6234_v35 = vadd.f32 %v6221_v53, %v6210_v44  ;;  %v6211_v11 = vadd.f32 %v6206_v10, %v6199_v54  ;;  %6885 = vperm.xlu1 %10862, %v13356_v55   ;;  %6676 = vperm.xlu0 %10859, %v13356_v55  }
 0xf35   : > { %v6208_v56 = vpop.permute.xlu0 %6207 }
 0xf36   : > { %v6241_v52 = vmul.f32 1.442695, %v6237_v30  ;;  %v6238_v16 = vsub.f32 0.0, %v6234_v35  ;;  %v6235_v29 = vadd.f32 %v6226_v28, %v6211_v11  ;;  %v6212_v36 = vadd.f32 %v6208_v56, %v6200_v22 }
 0xf38   : > { %11564 = vpow2.f32 %v6241_v52  ;;  %v6243_v15 = vmul.f32 1.442695, %v6238_v16  ;;  %v6239_v50 = vsub.f32 0.0, %v6235_v29  ;;  %v6236_v46 = vadd.f32 %v6231_v31, %v6212_v36  ;;  %6889 = vperm.xlu1 %10862, %v13328_v2   ;;  %6691 = vperm.xlu0 %10859, %v13365_v51   ;;  %v11392_v16 = vld [vmem:[%s15303_s1] sm:$0xff]   ;;  %v11394_v36 = vld [vmem:[%s15303_s1 + $0x10] sm:$0xff]  }
 0xf3a   : > { %11566 = vpow2.f32 %v6243_v15  ;;  %v6245_v62 = vmul.f32 1.442695, %v6239_v50  ;;  %v6240_v43 = vsub.f32 0.0, %v6236_v46 }
 0xf3c   : > { %11568 = vpow2.f32 %v6245_v62  ;;  %v6247_v24 = vmul.f32 1.442695, %v6240_v43  ;;  %10863 = vset.pattern.permute.xlu1 %v15185_v33  ;;  %6701 = vperm.xlu0 %10859, %v13370_v32  }
 0xf3d   : > { %6919 = vperm.xlu1 %10863, %v13328_v2  }
 0xf3e   : > { %11570 = vpow2.f32 %v6247_v24 }
 0xf40   : > { %10871 = vset.pattern.permute.xlu0 %v15201_v19 }
 0xf41   : > { %10864 = vset.pattern.permute.xlu1 %v15211_v1  ;;  %6751 = vperm.xlu0 %10871, %v13328_v2  }
 0xf42   : > { %v11565_v37 = vpop.eup %11564  ;;  %6686 = vperm.xlu1 %10864, %v13376_v17  }
 0xf43   : > { %v6249_v23 = vadd.f32 1.0, %v11565_v37 }
 0xf44   : > { %v11567_v47 = vpop.eup %11566  ;;  %v6387_v20 = vpop.permute.xlu1 %6386 }
 0xf45   : > { %11572 = vrcp.f32 %v6249_v23  ;;  %v6250_v53 = vadd.f32 1.0, %v11567_v47  ;;  %6759 = vperm.xlu0 %10871, %v13365_v51  }
 0xf46   : > { %v11569_v3 = vpop.eup %11568  ;;  %10865 = vset.pattern.permute.xlu1 %v15203_v12  ;;  %v6392_v44 = vpop.permute.xlu0 %6391 }
 0xf47   : > { %11574 = vrcp.f32 %v6250_v53  ;;  %v6251_v42 = vadd.f32 1.0, %v11569_v3  ;;  %6719 = vperm.xlu1 %10865, %v13376_v17  }
 0xf48   : > { %v11571_v28 = vpop.eup %11570  ;;  %v6397_v41 = vpop.permute.xlu1 %6396 }
 0xf49   : > { %11576 = vrcp.f32 %v6251_v42  ;;  %v6252_v25 = vadd.f32 1.0, %v11571_v28  ;;  %6767 = vperm.xlu0 %10871, %v13370_v32  }
 0xf4a   : > { %v6479_v24 = vpop.permute.xlu0 %6478 }
 0xf4b   : > { %11578 = vrcp.f32 %v6252_v25  ;;  %6723 = vperm.xlu1 %10865, %v13365_v51  }
 0xf4c   : > { %v6484_v15 = vpop.permute.xlu1 %6483 }
 0xf4d   : > { %10875 = vset.pattern.permute.xlu0 %v15185_v33 }
 0xf4e   : > { %6915 = vperm.xlu0 %10875, %v13356_v55  }
 0xf4f   : > { %v11573_v31 = vpop.eup %11572  ;;  %10866 = vset.pattern.permute.xlu1 %v15183_v8 }
 0xf50   : > { %v6257_v63 = vmul.f32 %v11573_v31, %v6233_v0  ;;  %6955 = vperm.xlu1 %10866, %v13328_v2   ;;  %v6494_v50 = vpop.permute.xlu1 %6493 }
 0xf51   : > { %v11575_v57 = vpop.eup %11574 }
 0xf52   : > { %v6258_v60 = vmul.f32 %v11575_v57, %v6234_v35  ;;  %6923 = vperm.xlu0 %10875, %v13376_v17  }
 0xf53   : > { %v11577_v21 = vpop.eup %11576 }
 0xf54   : > { %v6283_v34 = vpack.c.bf16 %v6258_v60, %v6257_v63  ;;  %v6259_v49 = vmul.f32 %v11577_v21, %v6235_v29  ;;  %10867 = vset.pattern.permute.xlu1 %v15201_v19  ;;  %v11393_v29 = vld [vmem:[%s15303_s1 + $0x8] sm:$0xff]   ;;  %v6489_v21 = vpop.permute.xlu0 %6488  ;;  %s15304_s1 = sld [smem:[#allocation5_spill]] }
 0xf55   : > { %v11579_v18 = vpop.eup %11578  ;;  %6755 = vperm.xlu1 %10867, %v13376_v17  }
 0xf56   : > { %v6260_v7 = vmul.f32 %v11579_v18, %v6236_v46  ;;  %10522 = vmatprep.mubr.bf16.mxu1 %v6283_v34  ;;  %6931 = vperm.xlu0 %10875, %v13395_v6   ;;  %v6504_v46 = vpop.permute.xlu1 %6503 }
 0xf58   : > { %v6284_v45 = vpack.c.bf16 %v6260_v7, %v6259_v49 }
 0xf59   : > { %10868 = vset.pattern.permute.xlu1 %v15199_v48 }
 0xf5a   : > { %10523 = vmatmul.mubr.bf16.vlgmr.msra.gmra.mrb[12].mxu1 %v6284_v45  ;;  %6893 = vperm.xlu1 %10868, %v13376_v17   ;;  %v13445_v62 = vpop.permute.xlu1 %6681 }
 0xf5b   : > { %10877 = vset.pattern.permute.xlu0 %v15183_v8 }
 0xf5c   : > { %6951 = vperm.xlu0 %10877, %v13356_v55  }
 0xf5e   : > { %6897 = vperm.xlu1 %10868, %v13365_v51   ;;  %v13447_v43 = vpop.permute.xlu1 %6715 }
 0xf60   : > { %6959 = vperm.xlu0 %10877, %v13376_v17  }
 0xf62   : > { %10869 = vset.pattern.permute.xlu1 %v15185_v33 }
 0xf63   : > { %6927 = vperm.xlu1 %10869, %v13365_v51  }
 0xf64   : > { %6971 = vperm.xlu0 %10877, %v13370_v32  }
 0xf67   : > { %10870 = vset.pattern.permute.xlu1 %v15211_v1 }
 0xf68   : > { %10880 = vset.pattern.permute.xlu0 %v15181_v39  ;;  %6696 = vperm.xlu1 %10870, %v13395_v6  }
 0xf69   : > { %6783 = vperm.xlu0 %10880, %v13356_v55  }
 0xf6c   : > { %10872 = vset.pattern.permute.xlu1 %v15203_v12 }
 0xf6d   : > { %6727 = vperm.xlu1 %10872, %v13395_v6  }
 0xf71   : > { %6731 = vperm.xlu1 %10872, %v13370_v32  }
 0xf75   : > { %10873 = vset.pattern.permute.xlu1 %v15183_v8 }
 0xf76   : > { %6963 = vperm.xlu1 %10873, %v13365_v51  }
 0xf7a   : > { %10874 = vset.pattern.permute.xlu1 %v15201_v19 }
 0xf7b   : > { %6763 = vperm.xlu1 %10874, %v13395_v6  }
 0xf7f   : > { %10876 = vset.pattern.permute.xlu1 %v15199_v48 }
 0xf80   : > { %6901 = vperm.xlu1 %10876, %v13395_v6  }
 0xf84   : > { %6905 = vperm.xlu1 %10876, %v13370_v32  }
 0xf88   : > { %10878 = vset.pattern.permute.xlu1 %v15185_v33 }
 0xf89   : > { %6935 = vperm.xlu1 %10878, %v13370_v32  }
 0xf8d   : > { %10879 = vset.pattern.permute.xlu1 %v15183_v8 }
 0xf8e   : > { %6967 = vperm.xlu1 %10879, %v13395_v6  }
 0xf92   : > { %10881 = vset.pattern.permute.xlu1 %v15181_v39 }
 0xf93   : > { %6787 = vperm.xlu1 %10881, %v13328_v2  }
 0xf97   : > { %10882 = vset.pattern.permute.xlu1 %v15179_v59 }
 0xf98   : > { %6813 = vperm.xlu1 %10882, %v13356_v55  }
 0xf9c   : > { %10883 = vset.pattern.permute.xlu1 %v15177_v9 }
 0xf9d   : > { %6849 = vperm.xlu1 %10883, %v13356_v55  }
 0xfa1   : > { %6853 = vperm.xlu1 %10883, %v13328_v2  }
 0xfa5   : > { %10884 = vset.pattern.permute.xlu1 %v15181_v39 }
 0xfae   : > { %v13449_v23 = vpop.permute.xlu1 %6747 }
 0xfb3   : > { %v13451_v63 = vpop.permute.xlu1 %6885 }
0x102d   : > { %v10524_v14 = vpop.f32.mrb[12].mxu1 }
0x102e   : > { %v6367_v58 = vpop.f32.mrb[13].mxu1 }
0x102f   : > { %v10525_v61 = vpop.f32.mrb[14].mxu1 }
0x1030   : > { %v6383_v4 = vpack.c.bf16 %v10525_v61, %v10524_v14  ;;  %v6370_v26 = vpop.f32.mrb[15].mxu1 }
0x1031   : > { %v6382_v13 = vpack.c.bf16 %v6370_v26, %v6367_v58  ;;  %v13453_v58 = vpop.permute.xlu1 %6889 }
0x1033   : > { %10526 = vmatprep.subr.bf16.mxu0 %v6382_v13 }
0x1034   : > { %10527 = vmatpush3.bf16.msra.mxu0 %v6382_v13  ;;  %v6499_v13 = vpop.permute.xlu0 %6498 }
0x1035   : > { %10528 = vmatprep.subr.bf16.mxu0 %v6383_v4 }
0x1038   : > { %10529 = vmatpush3.bf16.msra.mxu0 %v6383_v4 }
0x1039   : > { %10534 = vmatprep.subr.bf16.mxu0 %v15175_v38 }
0x103b   : > { %10531 = vmatmul.mubr.msk.bf16.vlgmr.msra.gmra.mrb[76].mxu0 %vm6407_vm13, %v11391_v40 }
0x103c   : > { %10538 = vmatprep.mubr.msk.bf16.mxu0 %vm11855_vm9, %v15175_v38 }
0x110e   : > { %v10532_v27 = vpop.f32.mrb[76].mxu0 }
0x110f   : > { %v6448_v54 = vpop.f32.mrb[77].mxu0  ;;  %v6457_v10 = vadd.f32 %v10532_v27, %v6397_v41 }
0x1110   : > { %v10533_v0 = vpop.f32.mrb[78].mxu0  ;;  %v6449_v30 = vadd.f32 %v6448_v54, %v6387_v20 }
0x1111   : > { %v6451_v22 = vpop.f32.mrb[79].mxu0  ;;  %v6475_v56 = vpack.c.bf16 %v6457_v10, %v6457_v10 }
0x1112   : > { %v6452_v35 = vadd.f32 %v6451_v22, %v6392_v44  ;;  %v13455_v44 = vpop.permute.xlu1 %6919 }
0x1113   : > { %v6531_v52 = vsel %vm4396_vm7, %v6475_v56, 0 }
0x1114   : > { %v6474_v11 = vpack.c.bf16 %v6452_v35, %v6449_v30 }
0x1116   : > { %10535 = vmatpush3.bf16.msra.mxu0 %v6474_v11 }
0x1117   : > { %10536 = vmatprep.subr.bf16.mxu0 %v15175_v38 }
0x111a   : > { %10537 = vmatpush3.bf16.msra.mxu0 %v6531_v52 }
0x111d   : > { %10539 = vmatmul.mubr.msk.bf16.vlgmr.msra.gmra.mrb[80].mxu0 %vm5779_vm12, %v11392_v16 }
0x111e   : > { %10542 = vmatprep.mubr.msk.bf16.mxu0 %vm11855_vm9, %v15175_v38 }
0x1125   : > { %10543 = vmatmul.mubr.msk.bf16.gmra.mrb[84].mxu0 %vm5779_vm12, %v11393_v29  ;;  %v13457_v29 = vpop.permute.xlu1 %6686 }
0x1126   : > { %10546 = vmatprep.mubr.msk.bf16.mxu0 %vm11855_vm9, %v15175_v38 }
0x112d   : > { %10547 = vmatmul.mubr.msk.bf16.gmra.mrb[88].mxu0 %vm5779_vm12, %v11394_v36 }
0x11f0   : > { %v6567_v37 = vpop.f32.mrb[80].mxu0 }
0x11f1   : > { %v6568_v47 = vadd.f32 %v6567_v37, %v6479_v24  ;;  %v10540_v53 = vpop.f32.mrb[81].mxu0  ;;  %v10132_v37 = vld [vmem:[%s15304_s1] ss:$0 sm:$0xff] }
0x11f2   : > { %v6570_v3 = vpop.f32.mrb[82].mxu0 }
0x11f3   : > { %v6590_v42 = vsub.f32 0.0, %v6568_v47  ;;  %v6571_v28 = vadd.f32 %v6570_v3, %v6484_v15  ;;  %v10541_v25 = vpop.f32.mrb[83].mxu0 }
0x11f5   : > { %v6596_v31 = vmul.f32 1.442695, %v6590_v42  ;;  %v6591_v57 = vsub.f32 0.0, %v6571_v28 }
0x11f7   : > { %11580 = vpow2.f32 %v6596_v31  ;;  %v6598_v60 = vmul.f32 1.442695, %v6591_v57 }
0x11f8   : > { %v6575_v34 = vpop.f32.mrb[84].mxu0 }
0x11f9   : > { %11582 = vpow2.f32 %v6598_v60  ;;  %v6576_v18 = vadd.f32 %v6575_v34, %v6489_v21  ;;  %v10544_v49 = vpop.f32.mrb[85].mxu0 }
0x11fa   : > { %v6578_v7 = vpop.f32.mrb[86].mxu0 }
0x11fb   : > { %v6592_v45 = vsub.f32 0.0, %v6576_v18  ;;  %v6579_v5 = vadd.f32 %v6578_v7, %v6494_v50  ;;  %v10545_v14 = vpop.f32.mrb[87].mxu0 }
0x11fd   : > { %v6600_v61 = vmul.f32 1.442695, %v6592_v45  ;;  %v6593_v4 = vsub.f32 0.0, %v6579_v5 }
0x11ff   : > { %11584 = vpow2.f32 %v6600_v61  ;;  %v6602_v26 = vmul.f32 1.442695, %v6593_v4 }
0x1200   : > { %v6583_v40 = vpop.f32.mrb[88].mxu0 }
0x1201   : > { %v11581_v55 = vpop.eup %11580  ;;  %11586 = vpow2.f32 %v6602_v26  ;;  %v6584_v20 = vadd.f32 %v6583_v40, %v6499_v13  ;;  %v10548_v27 = vpop.f32.mrb[89].mxu0 }
0x1202   : > { %v6608_v54 = vadd.f32 1.0, %v11581_v55  ;;  %v6586_v41 = vpop.f32.mrb[90].mxu0 }
0x1203   : > { %v11583_v0 = vpop.eup %11582  ;;  %v6594_v10 = vsub.f32 0.0, %v6584_v20  ;;  %v6587_v22 = vadd.f32 %v6586_v41, %v6504_v46  ;;  %v10549_v30 = vpop.f32.mrb[91].mxu0 }
0x1204   : > { %11588 = vrcp.f32 %v6608_v54  ;;  %v6609_v35 = vadd.f32 1.0, %v11583_v0  ;;  %v13460_v46 = vpop.permute.xlu1 %6719 }
0x1205   : > { %v6604_v11 = vmul.f32 1.442695, %v6594_v10  ;;  %v6595_v56 = vsub.f32 0.0, %v6587_v22  ;;  %v6712_v10 = vpop.permute.xlu0 %6711 }
0x1206   : > { %11590 = vrcp.f32 %v6609_v35 }
0x1207   : > { %11592 = vpow2.f32 %v6604_v11  ;;  %v6606_v52 = vmul.f32 1.442695, %v6595_v56 }
0x1208   : > { %v13468_v49 = vpop.permute.xlu1 %6723 }
0x1209   : > { %v11585_v16 = vpop.eup %11584  ;;  %11594 = vpow2.f32 %v6606_v52  ;;  %v6677_v35 = vpop.permute.xlu0 %6676 }
0x120a   : > { %v6610_v36 = vadd.f32 1.0, %v11585_v16 }
0x120b   : > { %v11587_v15 = vpop.eup %11586 }
0x120c   : > { %11596 = vrcp.f32 %v6610_v36  ;;  %v6611_v50 = vadd.f32 1.0, %v11587_v15  ;;  %v13478_v61 = vpop.permute.xlu1 %6955  ;;  %v6645_v15 = vld [vmem:[%s15305_s2 + $0x8] sm:$0xff] }
0x120d   : > { %v13533_v11 = vpop.permute.xlu0 %6691 }
0x120e   : > { %v11589_v24 = vpop.eup %11588  ;;  %11598 = vrcp.f32 %v6611_v50  ;;  %v6646_v50 = vld [vmem:[%s15305_s2 + $0x10] sm:$0xff] }
0x120f   : > { %v6620_v53 = vmul.f32 %v11589_v24, %v6568_v47 }
0x1210   : > { %v11591_v3 = vpop.eup %11590  ;;  %v13488_v13 = vpop.permute.xlu1 %6755 }
0x1211   : > { %v11593_v42 = vpop.eup %11592  ;;  %v13462_v25 = vmul.f32 %v10132_v37, %v6620_v53  ;;  %v6621_v31 = vmul.f32 %v11591_v3, %v6571_v28  ;;  %v13541_v52 = vpop.permute.xlu0 %6701  ;;  %v6648_v53 = vld [vmem:[%s15305_s2 + $0x20] sm:$0xff] }
0x1212   : > { %v6612_v57 = vadd.f32 1.0, %v11593_v42 }
0x1213   : > { %v11595_v60 = vpop.eup %11594  ;;  %v13464_v21 = vmul.f32 %v10132_v37, %v6621_v31  ;;  %6650 = vrot.lane.b32.xlu1 %v13462_v25, %s15295_s22 }
0x1214   : > { %11600 = vrcp.f32 %v6612_v57  ;;  %v6613_v34 = vadd.f32 1.0, %v11595_v60  ;;  %v13496_v27 = vpop.permute.xlu1 %6893 }
0x1215   : > { %6652 = vrot.lane.b32.xlu0 %v13464_v21, %s15295_s22  ;;  %v6752_v36 = vpop.permute.xlu0 %6751 }
0x1216   : > { %v11597_v47 = vpop.eup %11596  ;;  %11602 = vrcp.f32 %v6613_v34 }
0x1217   : > { %v6622_v7 = vmul.f32 %v11597_v47, %v6576_v18  ;;  %6662 = vrot.lane.b32.xlu1 %v13462_v25, %s15296_s0 }
0x1218   : > { %v11599_v28 = vpop.eup %11598  ;;  %v13507_v54 = vpop.permute.xlu1 %6897 }
0x1219   : > { %v13474_v45 = vmul.f32 %v10132_v37, %v6622_v7  ;;  %v6623_v14 = vmul.f32 %v11599_v28, %v6579_v5  ;;  %6664 = vrot.lane.b32.xlu0 %v13464_v21, %s15296_s0 }
0x121b   : > { %v13480_v4 = vmul.f32 %v10132_v37, %v6623_v14  ;;  %6654 = vrot.lane.b32.xlu1 %v13474_v45, %s15295_s22 }
0x121c   : > { %v13512_v41 = vpop.permute.xlu1 %6927 }
0x121d   : > { %6656 = vrot.lane.b32.xlu0 %v13480_v4, %s15295_s22 }
0x121e   : > { %v11601_v18 = vpop.eup %11600 }
0x121f   : > { %v6624_v26 = vmul.f32 %v11601_v18, %v6584_v20  ;;  %6666 = vrot.lane.b32.xlu1 %v13474_v45, %s15296_s0 }
0x1220   : > { %v11603_v40 = vpop.eup %11602  ;;  %v13520_v0 = vpop.permute.xlu1 %6696 }
0x1221   : > { %v13490_v5 = vmul.f32 %v10132_v37, %v6624_v26  ;;  %v6625_v55 = vmul.f32 %v11603_v40, %v6587_v22  ;;  %v6644_v22 = vld [vmem:[%s15305_s2] sm:$0xff] }
0x1223   : > { %6668 = vrot.lane.b32.xlu1 %v13480_v4, %s15296_s0  ;;  %6658 = vrot.lane.b32.xlu0 %v13490_v5, %s15295_s22  ;;  %v13501_v20 = vmul.f32 %v10132_v37, %v6625_v55  ;;  %v13552_v37 = vpop.permute.xlu0 %6759 }
0x1224   : > { %v13525_v30 = vpop.permute.xlu1 %6727 }
0x1227   : > { %6795 = vperm.xlu1 %10884, %v13365_v51   ;;  %6670 = vrot.lane.b32.xlu0 %v13490_v5, %s15296_s0 }
0x122b   : > { %6791 = vperm.xlu0 %10880, %v13376_v17   ;;  %6660 = vrot.lane.b32.xlu1 %v13501_v20, %s15295_s22 }
0x122c   : > { %10885 = vset.pattern.permute.xlu1 %v15179_v59 }
0x122f   : > { %6799 = vperm.xlu0 %10880, %v13395_v6   ;;  %6672 = vrot.lane.b32.xlu1 %v13501_v20, %s15296_s0 }
0x1233   : > { %10887 = vset.pattern.permute.xlu0 %v15179_v59  ;;  %6821 = vperm.xlu1 %10885, %v13376_v17  }
0x1234   : > { %6817 = vperm.xlu0 %10887, %v13328_v2   ;;  %v6647_v2 = vld [vmem:[%s15305_s2 + $0x18] sm:$0xff] }
0x1237   : > { %10886 = vset.pattern.permute.xlu1 %v15177_v9 }
0x1238   : > { %6825 = vperm.xlu0 %10887, %v13365_v51   ;;  %6857 = vperm.xlu1 %10886, %v13376_v17   ;;  %v13531_v17 = vpop.permute.xlu1 %6731 }
0x123c   : > { %6833 = vperm.xlu0 %10887, %v13370_v32   ;;  %6861 = vperm.xlu1 %10886, %v13365_v51   ;;  %v6649_v51 = vld [vmem:[%s15305_s2 + $0x28] sm:$0xff]  ;;  %v13539_v56 = vpop.permute.xlu1 %6963  ;;  %s15193_s2 = smov 4  }
0x1240   : > { %10888 = vset.pattern.permute.xlu1 %v15181_v39  ;;  %10891 = vset.pattern.permute.xlu0 %v15211_v1  ;;  %v13545_v16 = vpop.permute.xlu1 %6763 }
0x1241   : > { %6803 = vperm.xlu1 %10888, %v13370_v32   ;;  %7024 = vperm.xlu0 %10891, %v6644_v22  }
0x1244   : > { %v13550_v24 = vpop.permute.xlu1 %6901 }
0x1245   : > { %10889 = vset.pattern.permute.xlu1 %v15179_v59  ;;  %7039 = vperm.xlu0 %10891, %v6647_v2  }
0x1246   : > { %6829 = vperm.xlu1 %10889, %v13395_v6  }
0x1248   : > { %v13555_v3 = vpop.permute.xlu1 %6905 }
0x1249   : > { %7049 = vperm.xlu0 %10891, %v6649_v51   ;;  %v6734_v51 = vmul.f32 %v6712_v10, %v13462_v25 }
0x124a   : > { %10890 = vset.pattern.permute.xlu1 %v15177_v9  ;;  %v6735_v9 = vmul.f32 %v13447_v43, %v13464_v21 }
0x124b   : > { %6865 = vperm.xlu1 %10890, %v13395_v6   ;;  %v13557_v6 = vpop.permute.xlu0 %6767 }
0x124f   : > { %6869 = vperm.xlu1 %10890, %v13370_v32   ;;  %v13559_v32 = vpop.permute.xlu1 %6935  ;;  %v6916_v42 = vpop.permute.xlu0 %6915 }
0x1253   : > { %10892 = vset.pattern.permute.xlu1 %v15211_v1  ;;  %v6924_v31 = vpop.permute.xlu0 %6923  ;;  %v13561_v57 = vpop.permute.xlu1 %6967 }
0x1254   : > { %7029 = vperm.xlu1 %10892, %v6645_v15  }
0x1257   : > { %v13563_v60 = vpop.permute.xlu0 %6931  ;;  %v13565_v34 = vpop.permute.xlu1 %6787 }
0x1258   : > { %7034 = vperm.xlu1 %10892, %v6646_v50  }
0x125b   : > { %v6952_v47 = vpop.permute.xlu0 %6951  ;;  %v13567_v7 = vpop.permute.xlu1 %6813 }
0x125c   : > { %7044 = vperm.xlu1 %10892, %v6648_v53  }
0x125f   : > { %v6960_v28 = vpop.permute.xlu0 %6959  ;;  %v13569_v14 = vpop.permute.xlu1 %6849 }
0x1263   : > { %v13571_v18 = vpop.permute.xlu0 %6971  ;;  %v13573_v26 = vpop.permute.xlu1 %6853 }
0x1267   : > { %v13575_v40 = vpop.permute.xlu0 %6783 }
0x1285   : > { %v13577_v55 = vpop.permute.xlu1 %6650 }
0x1286   : > { %v6704_v22 = vmul.f32 %v6677_v35, %v13577_v55  ;;  %v6908_v38 = vmul.f32 %v13451_v63, %v13577_v55  ;;  %v6938_v35 = vmul.f32 %v6916_v42, %v13462_v25  ;;  %v6939_v63 = vmul.f32 %v13455_v44, %v13464_v21 }
0x1287   : > { %v13580_v2 = vpop.permute.xlu0 %6652 }
0x1288   : > { %v6705_v15 = vmul.f32 %v13445_v62, %v13580_v2  ;;  %v6740_v53 = vadd.f32 %v6734_v51, %v6704_v22  ;;  %v6909_v10 = vmul.f32 %v13453_v58, %v13580_v2  ;;  %v6944_v33 = vadd.f32 %v6938_v35, %v6908_v38 }
0x1289   : > { %v13585_v50 = vpop.permute.xlu1 %6662 }
0x128a   : > { %v6770_v59 = vmul.f32 %v13449_v23, %v13585_v50  ;;  %v6741_v62 = vadd.f32 %v6735_v9, %v6705_v15  ;;  %v6974_v8 = vmul.f32 %v6952_v47, %v13585_v50 }
0x128b   : > { %v13596_v39 = vpop.permute.xlu0 %6664 }
0x128c   : > { %v6771_v22 = vmul.f32 %v6752_v36, %v13596_v39  ;;  %v6776_v51 = vadd.f32 %v6770_v59, %v6740_v53  ;;  %v6975_v23 = vmul.f32 %v13478_v61, %v13596_v39  ;;  %v6945_v36 = vadd.f32 %v6939_v63, %v6909_v10 }
0x128d   : > { %v13602_v43 = vpop.permute.xlu1 %6654  ;;  %v6736_v59 = vmul.f32 %v13460_v46, %v13474_v45  ;;  %v6980_v44 = vadd.f32 %v6974_v8, %v6944_v33  ;;  %v6940_v46 = vmul.f32 %v6924_v31, %v13474_v45  ;;  %v6737_v33 = vmul.f32 %v13468_v49, %v13480_v4 }
0x128e   : > { %v6706_v58 = vmul.f32 %v13457_v29, %v13602_v43  ;;  %6986 = vrot.lane.b32.xlu1 %v6776_v51, %s15193_s2  ;;  %v6777_v9 = vadd.f32 %v6771_v22, %v6741_v62  ;;  %v6910_v38 = vmul.f32 %v13496_v27, %v13602_v43  ;;  %v6981_v53 = vadd.f32 %v6975_v23, %v6945_v36 }
0x128f   : > { %v13609_v42 = vpop.permute.xlu0 %6656  ;;  %v6738_v22 = vmul.f32 %v13525_v30, %v13490_v5  ;;  %v6942_v30 = vmul.f32 %v13563_v60, %v13490_v5 }
0x1290   : > { %6988 = vrot.lane.b32.xlu0 %v6777_v9, %s15193_s2  ;;  %v6742_v47 = vadd.f32 %v6736_v59, %v6706_v58  ;;  %v6707_v29 = vmul.f32 %v13533_v11, %v13609_v42  ;;  %v6911_v11 = vmul.f32 %v13507_v54, %v13609_v42  ;;  %v6946_v10 = vadd.f32 %v6940_v46, %v6910_v38 }
0x1291   : > { %v13616_v61 = vpop.permute.xlu1 %6666 }
0x1292   : > { %v6772_v15 = vmul.f32 %v13488_v13, %v13616_v61  ;;  %7004 = vrot.lane.b32.xlu1 %v6980_v44, %s15189_s4  ;;  %v6976_v8 = vmul.f32 %v6960_v28, %v13616_v61  ;;  %v6743_v62 = vadd.f32 %v6737_v33, %v6707_v29  ;;  %v6941_v28 = vmul.f32 %v13512_v41, %v13480_v4 }
0x1293   : > { %v6739_v29 = vmul.f32 %v13531_v17, %v13501_v20 }
0x1294   : > { %7006 = vrot.lane.b32.xlu0 %v6981_v53, %s15189_s4  ;;  %v6778_v27 = vadd.f32 %v6772_v15, %v6742_v47  ;;  %v6982_v63 = vadd.f32 %v6976_v8, %v6946_v10  ;;  %v6947_v23 = vadd.f32 %v6941_v28, %v6911_v11  ;;  %s15306_s4 = sld [smem:[#allocation30_spill]]  ;;  %v7203_v47 = vld [vmem:[%s15308_s6] sm:$0xff]  ;;  %v7205_v8 = vld [vmem:[%s15308_s6 + $0x10] sm:$0xff] }
0x1295   : > { %v13630_v35 = vpop.permute.xlu1 %6668  ;;  %v13632_v13 = vpop.permute.xlu0 %6658  ;;  %v7207_v10 = vld [vmem:[%s15308_s6 + $0x20] sm:$0xff] }
0x1296   : > { %v6773_v31 = vmul.f32 %v13552_v37, %v13630_v35  ;;  %v6708_v49 = vmul.f32 %v13520_v0, %v13632_v13  ;;  %6990 = vrot.lane.b32.xlu1 %v6778_v27, %s15193_s2  ;;  %v6977_v54 = vmul.f32 %v13539_v56, %v13630_v35  ;;  %v6912_v0 = vmul.f32 %v13550_v24, %v13632_v13  ;;  %v11395_v28 = vld [vmem:[%s15311_s8] sm:$0xff]  }
0x1297   : > { %10556 = vmatprep.mubr.msk.bf16.mxu1 %vm7135_vm14, %v11395_v28 }
0x1298   : > { %v6779_v51 = vadd.f32 %v6773_v31, %v6743_v62  ;;  %v6744_v37 = vadd.f32 %v6738_v22, %v6708_v49  ;;  %v6983_v9 = vadd.f32 %v6977_v54, %v6947_v23  ;;  %v6948_v59 = vadd.f32 %v6942_v30, %v6912_v0 }
0x1299   : > { %v13645_v58 = vpop.permute.xlu0 %6670 }
0x129a   : > { %v6774_v41 = vmul.f32 %v13545_v16, %v13645_v58  ;;  %6992 = vrot.lane.b32.xlu0 %v6779_v51, %s15193_s2  ;;  %7008 = vrot.lane.b32.xlu1 %v6982_v63, %s15307_s5  ;;  %v6978_v56 = vmul.f32 %v13561_v57, %v13645_v58  ;;  %v7098_v16 = vld [vmem:[%s15306_s4] sm:$0xff]  ;;  %v7100_v60 = vld [vmem:[%s15306_s4 + $0x10] sm:$0xff] }
0x129c   : > { %v6780_v36 = vadd.f32 %v6774_v41, %v6744_v37  ;;  %v6984_v24 = vadd.f32 %v6978_v56, %v6948_v59  ;;  %v15312_v59 = vmov 7  }
0x129e   : > { %7010 = vrot.lane.b32.xlu0 %v6983_v9, %s15307_s5  ;;  %6994 = vrot.lane.b32.xlu1 %v6780_v36, %s15193_s2  ;;  %s15309_s2 = sld [smem:[#allocation33_spill]] }
0x12a2   : > { %7012 = vrot.lane.b32.xlu1 %v6984_v24, %s15307_s5 }
0x12a4   : > { %v13701_v22 = vld [vmem:[%s15309_s2 + $0x10] sm:$0xff]  ;;  %v13704_v51 = vld [vmem:[%s15309_s2 + $0x8] sm:$0xff]  ;;  %v13709_v23 = vld [vmem:[%s15309_s2 + $0x18] sm:$0xff] }
0x12a6   : > { %v13661_v44 = vpop.permute.xlu1 %6795  ;;  %7107 = vperm.xlu1 %10892, %v7098_v16  }
0x12aa   : > { %7117 = vperm.xlu1 %10892, %v7100_v60   ;;  %v13664_v38 = vpop.permute.xlu1 %6660  ;;  %v6792_v63 = vpop.permute.xlu0 %6791 }
0x12ab   : > { %v6709_v57 = vmul.f32 %v13541_v52, %v13664_v38  ;;  %v6913_v46 = vmul.f32 %v13555_v3, %v13664_v38  ;;  %v6943_v52 = vmul.f32 %v13559_v32, %v13501_v20  ;;  %v7209_v3 = vld [vmem:[%s15308_s6 + $0x30] sm:$0xff]  ;;  %v13688_v32 = vld [vmem:[%s15309_s2] sm:$0xff] }
0x12ad   : > { %v6745_v53 = vadd.f32 %v6739_v29, %v6709_v57  ;;  %v6949_v11 = vadd.f32 %v6943_v52, %v6913_v46  ;;  %v6807_v52 = vmul.f32 %v13565_v34, %v13580_v2 }
0x12ae   : > { %7215 = vperm.xlu1 %10892, %v7203_v47   ;;  %v13671_v15 = vpop.permute.xlu1 %6672  ;;  %v13715_v0 = vpop.permute.xlu0 %6799 }
0x12af   : > { %v6775_v33 = vmul.f32 %v13557_v6, %v13671_v15  ;;  %v6979_v17 = vmul.f32 %v13571_v18, %v13671_v15  ;;  %v7099_v6 = vld [vmem:[%s15306_s4 + $0x8] sm:$0xff]  ;;  %v7101_v18 = vld [vmem:[%s15306_s4 + $0x18] sm:$0xff]  ;;  %s15314_s4 = sld [smem:[#allocation31_spill]] }
0x12b1   : > { %v6781_v27 = vadd.f32 %v6775_v33, %v6745_v53  ;;  %v6985_v62 = vadd.f32 %v6979_v17, %v6949_v11  ;;  %v6806_v53 = vmul.f32 %v13575_v40, %v13577_v55  ;;  %v6872_v17 = vmul.f32 %v13569_v14, %v13585_v50 }
0x12b2   : > { %7225 = vperm.xlu1 %10892, %v7205_v8   ;;  %v6822_v31 = vpop.permute.xlu1 %6821  ;;  %v6836_v8 = vmul.f32 %v13567_v7, %v13462_v25  ;;  %v6808_v14 = vmul.f32 %v6792_v63, %v13602_v43 }
0x12b3   : > { %6996 = vrot.lane.b32.xlu0 %v6781_v27, %s15310_s7  ;;  %v6818_v30 = vpop.permute.xlu0 %6817  ;;  %v6838_v25 = vmul.f32 %v6822_v31, %v13474_v45  ;;  %v6809_v45 = vmul.f32 %v13661_v44, %v13609_v42 }
0x12b4   : > { %v6837_v46 = vmul.f32 %v6818_v30, %v13464_v21  ;;  %v6842_v11 = vadd.f32 %v6836_v8, %v6806_v53  ;;  %v6873_v21 = vmul.f32 %v13573_v26, %v13596_v39 }
0x12b5   : > { %v6844_v28 = vadd.f32 %v6838_v25, %v6808_v14 }
0x12b6   : > { %7235 = vperm.xlu1 %10892, %v7207_v10   ;;  %v6843_v27 = vadd.f32 %v6837_v46, %v6807_v52  ;;  %v6878_v55 = vadd.f32 %v6872_v17, %v6842_v11 }
0x12b7   : > { %7014 = vrot.lane.b32.xlu0 %v6985_v62, %s15307_s5  ;;  %v6858_v49 = vpop.permute.xlu1 %6857  ;;  %v6826_v9 = vpop.permute.xlu0 %6825 }
0x12b8   : > { %v6879_v7 = vadd.f32 %v6873_v21, %v6843_v27  ;;  %v6874_v50 = vmul.f32 %v6858_v49, %v13616_v61  ;;  %v6839_v39 = vmul.f32 %v6826_v9, %v13480_v4 }
0x12ba   : > { %7245 = vperm.xlu1 %10892, %v7209_v3   ;;  %v6880_v63 = vadd.f32 %v6874_v50, %v6844_v28  ;;  %v6845_v53 = vadd.f32 %v6839_v39, %v6809_v45 }
0x12bb   : > { %7112 = vperm.xlu0 %10891, %v7099_v6   ;;  %v13698_v54 = vpop.permute.xlu1 %6861  ;;  %v13732_v24 = vpop.permute.xlu0 %6833 }
0x12bc   : > { %v6875_v43 = vmul.f32 %v13698_v54, %v13630_v35 }
0x12be   : > { %7456 = vperm.xlu1 %10892, %v13688_v32   ;;  %v6881_v17 = vadd.f32 %v6875_v43, %v6845_v53 }
0x12bf   : > { %7122 = vperm.xlu0 %10891, %v7101_v18   ;;  %v15313_v18 = vmov 8  }
0x12c0   : > { %v13713_v37 = vpop.permute.xlu1 %6803  ;;  %v7025_v60 = vpop.permute.xlu0 %7024 }
0x12c2   : > { %10893 = vset.pattern.permute.xlu1 %v15203_v12 }
0x12c3   : > { %7503 = vperm.xlu1 %10893, %v13688_v32   ;;  %10898 = vset.pattern.permute.xlu0 %v15199_v48 }
0x12c4   : > { %7739 = vperm.xlu0 %10898, %v13704_v51   ;;  %v7040_v47 = vpop.permute.xlu0 %7039 }
0x12c5   : > { %v13720_v41 = vpop.permute.xlu1 %6829 }
0x12c6   : > { %v6840_v11 = vmul.f32 %v13720_v41, %v13490_v5 }
0x12c7   : > { %10894 = vset.pattern.permute.xlu1 %v15211_v1 }
0x12c8   : > { %7466 = vperm.xlu1 %10894, %v13701_v22   ;;  %7747 = vperm.xlu0 %10898, %v13709_v23   ;;  %v13744_v33 = vpop.permute.xlu0 %7049 }
0x12ca   : > { %v13724_v56 = vpop.permute.xlu1 %6865 }
0x12cb   : > { %v6876_v25 = vmul.f32 %v13724_v56, %v13645_v58  ;;  %v6841_v56 = vmul.f32 %v13732_v24, %v13501_v20 }
0x12cc   : > { %7471 = vperm.xlu1 %10894, %v13709_v23   ;;  %10902 = vset.pattern.permute.xlu0 %v15211_v1 }
0x12ce   : > { %v13728_v36 = vpop.permute.xlu1 %6869 }
0x12cf   : > { %v6877_v28 = vmul.f32 %v13728_v36, %v13671_v15 }
0x12d0   : > { %10895 = vset.pattern.permute.xlu1 %v15203_v12 }
0x12d1   : > { %7515 = vperm.xlu1 %10895, %v13709_v23  }
0x12d3   : > { %v7030_v16 = vpop.permute.xlu1 %7029 }
0x12d5   : > { %10896 = vset.pattern.permute.xlu1 %v15201_v19 }
0x12d6   : > { %7555 = vperm.xlu1 %10896, %v13704_v51  }
0x12d7   : > { %v7035_v57 = vpop.permute.xlu1 %7034 }
0x12da   : > { %10897 = vset.pattern.permute.xlu1 %v15199_v48 }
0x12db   : > { %7735 = vperm.xlu1 %10897, %v13688_v32   ;;  %v13739_v29 = vpop.permute.xlu1 %7044 }
0x12df   : > { %10899 = vset.pattern.permute.xlu1 %v15312_v59 }
0x12e0   : > { %7775 = vperm.xlu1 %10899, %v13688_v32  }
0x12e4   : > { %7779 = vperm.xlu1 %10899, %v13704_v51  }
0x12e8   : > { %10900 = vset.pattern.permute.xlu1 %v15201_v19 }
0x12e9   : > { %7563 = vperm.xlu1 %10900, %v13709_v23  }
0x12ed   : > { %10901 = vset.pattern.permute.xlu1 %v15199_v48 }
0x12ee   : > { %7743 = vperm.xlu1 %10901, %v13701_v22  }
0x12f2   : > { %10903 = vset.pattern.permute.xlu1 %v15312_v59 }
0x12f3   : > { %7783 = vperm.xlu1 %10903, %v13701_v22  }
0x12f7   : > { %7787 = vperm.xlu1 %10903, %v13709_v23  }
0x12fb   : > { %10904 = vset.pattern.permute.xlu1 %v15313_v18 }
0x12fc   : > { %7827 = vperm.xlu1 %10904, %v13704_v51  }
0x1300   : > { %v6987_v40 = vpop.permute.xlu1 %6986  ;;  %7831 = vperm.xlu1 %10904, %v13701_v22  }
0x1301   : > { %v6998_v34 = vadd.f32 %v6987_v40, %v6878_v55 }
0x1302   : > { %v6989_v10 = vpop.permute.xlu0 %6988 }
0x1303   : > { %v6999_v62 = vadd.f32 %v6989_v10, %v6879_v7  ;;  %v6810_v10 = vmul.f32 %v13715_v0, %v13632_v13  ;;  %v6811_v13 = vmul.f32 %v13713_v37, %v13664_v38 }
0x1304   : > { %v7005_v2 = vpop.permute.xlu1 %7004  ;;  %10905 = vset.pattern.permute.xlu1 %v15211_v1 }
0x1305   : > { %v7016_v3 = vadd.f32 %v7005_v2, %v6998_v34  ;;  %v6847_v45 = vadd.f32 %v6841_v56, %v6811_v13 }
0x1306   : > { %v7007_v6 = vpop.permute.xlu0 %7006 }
0x1307   : > { %v13762_v26 = vadd.f32 %v7025_v60, %v7016_v3  ;;  %v7017_v30 = vadd.f32 %v7007_v6, %v6999_v62  ;;  %v6883_v53 = vadd.f32 %v6877_v28, %v6847_v45 }
0x1308   : > { %v6991_v31 = vpop.permute.xlu1 %6990 }
0x1309   : > { %v7058_v61 = vsub.f32 0.0, %v13762_v26  ;;  %v7053_v49 = vadd.f32 %v7030_v16, %v7017_v30  ;;  %v7000_v4 = vadd.f32 %v6991_v31, %v6880_v63 }
0x130b   : > { %v7064_v46 = vmul.f32 1.442695, %v7058_v61  ;;  %v7059_v8 = vsub.f32 0.0, %v7053_v49 }
0x130c   : > { %v6993_v9 = vpop.permute.xlu0 %6992  ;;  %v7009_v60 = vpop.permute.xlu1 %7008 }
0x130d   : > { %11604 = vpow2.f32 %v7064_v46  ;;  %v7066_v52 = vmul.f32 1.442695, %v7059_v8  ;;  %v7018_v42 = vadd.f32 %v7009_v60, %v7000_v4  ;;  %v7001_v44 = vadd.f32 %v6993_v9, %v6881_v17 }
0x130f   : > { %11606 = vpow2.f32 %v7066_v52  ;;  %v7054_v27 = vadd.f32 %v7035_v57, %v7018_v42  ;;  %v6846_v57 = vadd.f32 %v6840_v11, %v6810_v10  ;;  %v7204_v10 = vld [vmem:[%s15308_s6 + $0x8] sm:$0xff] }
0x1310   : > { %v7011_v35 = vpop.permute.xlu0 %7010  ;;  %v6995_v21 = vpop.permute.xlu1 %6994  ;;  %7220 = vperm.xlu0 %10902, %v7204_v10  }
0x1311   : > { %v7060_v54 = vsub.f32 0.0, %v7054_v27  ;;  %v7019_v16 = vadd.f32 %v7011_v35, %v7001_v44  ;;  %v6882_v50 = vadd.f32 %v6876_v25, %v6846_v57  ;;  %v7206_v25 = vld [vmem:[%s15308_s6 + $0x18] sm:$0xff]  ;;  %v13801_v57 = vld [vmem:[%s15309_s2 + $0x28] sm:$0xff] }
0x1313   : > { %v7068_v40 = vmul.f32 1.442695, %v7060_v54  ;;  %v7055_v55 = vadd.f32 %v7040_v47, %v7019_v16  ;;  %v7002_v41 = vadd.f32 %v6995_v21, %v6882_v50  ;;  %v13792_v21 = vld [vmem:[%s15309_s2 + $0x20] sm:$0xff]  ;;  %v15315_v50 = vmov 3  }
0x1314   : > { %v7013_v3 = vpop.permute.xlu1 %7012  ;;  %7476 = vperm.xlu1 %10905, %v13792_v21   ;;  %7230 = vperm.xlu0 %10902, %v7206_v25  }
0x1315   : > { %11608 = vpow2.f32 %v7068_v40  ;;  %v7061_v34 = vsub.f32 0.0, %v7055_v55  ;;  %v7020_v47 = vadd.f32 %v7013_v3, %v7002_v41  ;;  %v11396_v40 = vld [vmem:[%s15311_s8 + $0x8] sm:$0xff]  }
0x1317   : > { %v11605_v7 = vpop.eup %11604  ;;  %v7070_v2 = vmul.f32 1.442695, %v7061_v34  ;;  %v7056_v0 = vadd.f32 %v13739_v29, %v7020_v47  ;;  %v7208_v34 = vld [vmem:[%s15308_s6 + $0x28] sm:$0xff] }
0x1318   : > { %v7076_v14 = vadd.f32 1.0, %v11605_v7  ;;  %10906 = vset.pattern.permute.xlu1 %v15203_v12  ;;  %7240 = vperm.xlu0 %10902, %v7208_v34   ;;  %v7210_v7 = vld [vmem:[%s15308_s6 + $0x38] sm:$0xff] }
0x1319   : > { %v11607_v62 = vpop.eup %11606  ;;  %11610 = vpow2.f32 %v7070_v2  ;;  %v7062_v43 = vsub.f32 0.0, %v7056_v0  ;;  %7519 = vperm.xlu1 %10906, %v13792_v21   ;;  %v13806_v2 = vld [vmem:[%s15309_s2 + $0x38] sm:$0xff] }
0x131a   : > { %11612 = vrcp.f32 %v7076_v14  ;;  %v7077_v5 = vadd.f32 1.0, %v11607_v62  ;;  %v13815_v14 = vld [vmem:[%s15309_s2 + $0x30] sm:$0xff]  ;;  %v15316_v62 = vmov 4   ;;  %s10188_s2 = sshll.u32 %s15477_s16, 5 }
0x131b   : > { %v7072_v29 = vmul.f32 1.442695, %v7062_v43  ;;  %s1758_s6 = scalar_lea.vmem %s12157_s25, %s10188_s2  ;;  %v11399_v43 = vld [vmem:[%s15314_s4 + $0x10] sm:$0xff]   ;;  %s15339_s2 = sld [smem:[#allocation37_spill]] }
0x131c   : > { %11614 = vrcp.f32 %v7077_v5  ;;  %7250 = vperm.xlu0 %10902, %v7210_v7   ;;  %v15317_v5 = vmov 5  }
0x131d   : > { %7523 = vperm.xlu1 %10906, %v13801_v57  }
0x131f   : > { %v11609_v6 = vpop.eup %11608 }
0x1320   : > { %v7078_v58 = vadd.f32 1.0, %v11609_v6  ;;  %7461 = vperm.xlu0 %10902, %v13704_v51  }
0x1321   : > { %10908 = vset.pattern.permute.xlu1 %v15211_v1 }
0x1322   : > { %11616 = vrcp.f32 %v7078_v58  ;;  %7491 = vperm.xlu1 %10908, %v13806_v2  }
0x1323   : > { %v11611_v39 = vpop.eup %11610 }
0x1324   : > { %v11613_v30 = vpop.eup %11612  ;;  %v7079_v31 = vadd.f32 1.0, %v11611_v39  ;;  %7481 = vperm.xlu0 %10902, %v13801_v57  }
0x1325   : > { %v6997_v61 = vpop.permute.xlu0 %6996  ;;  %v7088_v38 = vmul.f32 %v11613_v30, %v13762_v26  ;;  %v7108_v3 = vpop.permute.xlu1 %7107 }
0x1326   : > { %v11615_v63 = vpop.eup %11614  ;;  %11618 = vrcp.f32 %v7079_v31  ;;  %v7003_v46 = vadd.f32 %v6997_v61, %v6883_v53  ;;  %10910 = vset.pattern.permute.xlu1 %v15203_v12  ;;  %v11398_v31 = vld [vmem:[%s15314_s4 + $0x8] sm:$0xff]   ;;  %v15318_v61 = vmov 0.0  }
0x1327   : > { %v7089_v37 = vmul.f32 %v11615_v63, %v7053_v49  ;;  %11620 = vpow2.f32 %v7072_v29  ;;  %7531 = vperm.xlu1 %10910, %v13806_v2   ;;  %v11400_v63 = vld [vmem:[%s15314_s4 + $0x18] sm:$0xff]  }
0x1328   : > { %7486 = vperm.xlu0 %10902, %v13815_v14  }
0x1329   : > { %v7015_v8 = vpop.permute.xlu0 %7014  ;;  %v7102_v20 = vpack.c.bf16 %v7089_v37, %v7088_v38  ;;  %v7118_v47 = vpop.permute.xlu1 %7117 }
0x132a   : > { %v7021_v24 = vadd.f32 %v7015_v8, %v7003_v46 }
0x132b   : > { %10550 = vmatprep.subr.bf16.mxu1 %v7102_v20  ;;  %10911 = vset.pattern.permute.xlu1 %v15201_v19 }
0x132c   : > { %v7057_v15 = vadd.f32 %v13744_v33, %v7021_v24  ;;  %10551 = vmatpush3.bf16.msra.mxu1 %v7102_v20  ;;  %v11617_v36 = vpop.eup %11616  ;;  %7567 = vperm.xlu1 %10911, %v13792_v21  }
0x132d   : > { %v7090_v52 = vmul.f32 %v11617_v36, %v7054_v27  ;;  %10907 = vset.pattern.permute.xlu0 %v15203_v12  ;;  %v7216_v53 = vpop.permute.xlu1 %7215 }
0x132e   : > { %v7063_v4 = vsub.f32 0.0, %v7057_v15  ;;  %7507 = vperm.xlu0 %10907, %v13704_v51  }
0x1330   : > { %v11619_v9 = vpop.eup %11618  ;;  %v7074_v60 = vmul.f32 1.442695, %v7063_v4  ;;  %10912 = vset.pattern.permute.xlu1 %v15199_v48 }
0x1331   : > { %v7091_v17 = vmul.f32 %v11619_v9, %v7055_v55  ;;  %v11621_v49 = vpop.eup %11620  ;;  %v11397_v55 = vld [vmem:[%s15314_s4] sm:$0xff]   ;;  %7751 = vperm.xlu1 %10912, %v13792_v21   ;;  %v7226_v38 = vpop.permute.xlu1 %7225 }
0x1332   : > { %11622 = vpow2.f32 %v7074_v60  ;;  %v7080_v42 = vadd.f32 1.0, %v11621_v49  ;;  %10564 = vmatprep.mubr.msk.bf16.mxu0 %vm6407_vm13, %v11397_v55  ;;  %7511 = vperm.xlu0 %10907, %v13701_v22  }
0x1333   : > { %v7103_v26 = vpack.c.bf16 %v7091_v17, %v7090_v52 }
0x1334   : > { %11624 = vrcp.f32 %v7080_v42 }
0x1335   : > { %10552 = vmatprep.subr.bf16.mxu1 %v7103_v26  ;;  %7755 = vperm.xlu1 %10912, %v13801_v57   ;;  %v7236_v37 = vpop.permute.xlu1 %7235 }
0x1336   : > { %10553 = vmatpush3.bf16.msra.mxu1 %v7103_v26  ;;  %7527 = vperm.xlu0 %10907, %v13815_v14  }
0x1339   : > { %10913 = vset.pattern.permute.xlu1 %v15312_v59  ;;  %v7246_v29 = vpop.permute.xlu1 %7245 }
0x133a   : > { %7795 = vperm.xlu1 %10913, %v13801_v57   ;;  %10909 = vset.pattern.permute.xlu0 %v15201_v19  ;;  %v7113_v41 = vpop.permute.xlu0 %7112 }
0x133b   : > { %7551 = vperm.xlu0 %10909, %v13688_v32  }
0x133c   : > { %v11623_v44 = vpop.eup %11622 }
0x133d   : > { %v7081_v33 = vadd.f32 1.0, %v11623_v44  ;;  %v13888_v46 = vpop.permute.xlu1 %7456 }
0x133e   : > { %v11625_v35 = vpop.eup %11624  ;;  %10914 = vset.pattern.permute.xlu1 %v15201_v19 }
0x133f   : > { %11626 = vrcp.f32 %v7081_v33  ;;  %v7092_v16 = vmul.f32 %v11625_v35, %v7056_v0  ;;  %7575 = vperm.xlu1 %10914, %v13815_v14   ;;  %7559 = vperm.xlu0 %10909, %v13701_v22   ;;  %v7123_v0 = vpop.permute.xlu0 %7122 }
0x1342   : > { %v13890_v8 = vpop.permute.xlu1 %7503 }
0x1343   : > { %10916 = vset.pattern.permute.xlu1 %v15199_v48  ;;  %7571 = vperm.xlu0 %10909, %v13801_v57   ;;  %v13914_v42 = vpop.permute.xlu0 %7739 }
0x1344   : > { %7759 = vperm.xlu1 %10916, %v13815_v14  }
0x1347   : > { %7579 = vperm.xlu0 %10909, %v13806_v2   ;;  %v13892_v20 = vpop.permute.xlu1 %7466  ;;  %v13918_v33 = vpop.permute.xlu0 %7747 }
0x1348   : > { %7763 = vperm.xlu1 %10916, %v13806_v2  }
0x1349   : > { %v11627_v54 = vpop.eup %11626 }
0x134a   : > { %v7093_v27 = vmul.f32 %v11627_v54, %v7057_v15 }
0x134b   : > { %10915 = vset.pattern.permute.xlu0 %v15312_v59  ;;  %v13894_v24 = vpop.permute.xlu1 %7471 }
0x134c   : > { %v7104_v11 = vpack.c.bf16 %v7093_v27, %v7092_v16  ;;  %10918 = vset.pattern.permute.xlu1 %v15312_v59  ;;  %7791 = vperm.xlu0 %10915, %v13792_v21  }
0x134d   : > { %7803 = vperm.xlu1 %10918, %v13806_v2  }
0x134e   : > { %10554 = vmatprep.subr.bf16.mxu1 %v7104_v11 }
0x134f   : > { %10555 = vmatpush3.bf16.msra.mxu1 %v7104_v11 }
0x1350   : > { %7799 = vperm.xlu0 %10915, %v13815_v14   ;;  %v13896_v15 = vpop.permute.xlu1 %7515 }
0x1351   : > { %10919 = vset.pattern.permute.xlu1 %v15313_v18 }
0x1352   : > { %10557 = vmatmul.mubr.msk.bf16.vlgmr.msra.gmra.mrb[16].mxu1 %vm7135_vm14, %v11396_v40  ;;  %7839 = vperm.xlu1 %10919, %v13792_v21  }
0x1354   : > { %10917 = vset.pattern.permute.xlu0 %v15313_v18 }
0x1355   : > { %7823 = vperm.xlu0 %10917, %v13688_v32   ;;  %v13898_v36 = vpop.permute.xlu1 %7555 }
0x1356   : > { %7847 = vperm.xlu1 %10919, %v13815_v14  }
0x1359   : > { %7835 = vperm.xlu0 %10917, %v13709_v23  }
0x135a   : > { %7851 = vperm.xlu1 %10919, %v13806_v2   ;;  %v13900_v4 = vpop.permute.xlu1 %7735 }
0x135d   : > { %7843 = vperm.xlu0 %10917, %v13801_v57  }
0x135e   : > { %10921 = vset.pattern.permute.xlu1 %v15315_v50 }
0x135f   : > { %7603 = vperm.xlu1 %10921, %v13704_v51   ;;  %v13902_v9 = vpop.permute.xlu1 %7775 }
0x1361   : > { %10920 = vset.pattern.permute.xlu0 %v15315_v50 }
0x1362   : > { %7599 = vperm.xlu0 %10920, %v13688_v32  }
0x1363   : > { %10922 = vset.pattern.permute.xlu1 %v15316_v62  ;;  %v13904_v60 = vpop.permute.xlu1 %7779 }
0x1364   : > { %7639 = vperm.xlu1 %10922, %v13688_v32  }
0x1366   : > { %7619 = vperm.xlu0 %10920, %v13801_v57  }
0x1368   : > { %10923 = vset.pattern.permute.xlu1 %v15315_v50  ;;  %v13906_v52 = vpop.permute.xlu1 %7563 }
0x1369   : > { %7607 = vperm.xlu1 %10923, %v13701_v22  }
0x136a   : > { %7623 = vperm.xlu0 %10920, %v13815_v14  }
0x136d   : > { %7611 = vperm.xlu1 %10923, %v13709_v23   ;;  %v13908_v17 = vpop.permute.xlu1 %7743 }
0x136e   : > { %10928 = vset.pattern.permute.xlu0 %v15316_v62 }
0x136f   : > { %7643 = vperm.xlu0 %10928, %v13704_v51  }
0x1371   : > { %10924 = vset.pattern.permute.xlu1 %v15316_v62 }
0x1372   : > { %7651 = vperm.xlu1 %10924, %v13709_v23   ;;  %v13910_v26 = vpop.permute.xlu1 %7783 }
0x1373   : > { %7647 = vperm.xlu0 %10928, %v13701_v22  }
0x1376   : > { %10925 = vset.pattern.permute.xlu1 %v15317_v5  ;;  %v13912_v49 = vpop.permute.xlu1 %7787 }
0x1377   : > { %7691 = vperm.xlu1 %10925, %v13704_v51  }
0x137b   : > { %7695 = vperm.xlu1 %10925, %v13701_v22   ;;  %v13916_v44 = vpop.permute.xlu1 %7827 }
0x137f   : > { %10926 = vset.pattern.permute.xlu1 %v15315_v50  ;;  %v13920_v35 = vpop.permute.xlu1 %7831 }
0x1380   : > { %7615 = vperm.xlu1 %10926, %v13792_v21  }
0x1384   : > { %10927 = vset.pattern.permute.xlu1 %v15316_v62 }
0x1385   : > { %7655 = vperm.xlu1 %10927, %v13792_v21  }
0x1389   : > { %7659 = vperm.xlu1 %10927, %v13801_v57  }
0x138d   : > { %10929 = vset.pattern.permute.xlu1 %v15315_v50 }
0x138f   : > { %v7221_v54 = vpop.permute.xlu0 %7220 }
0x1393   : > { %v13922_v16 = vpop.permute.xlu1 %7476  ;;  %v7231_v27 = vpop.permute.xlu0 %7230 }
0x1398   : > { %v13924_v40 = vpop.permute.xlu1 %7519 }
0x1425   : > { %v10558_v6 = vpop.f32.mrb[16].mxu1 }
0x1426   : > { %v7185_v13 = vadd.f32 %v10558_v6, %v7118_v47  ;;  %v7176_v58 = vpop.f32.mrb[17].mxu1  ;;  %v7241_v47 = vpop.permute.xlu0 %7240 }
0x1427   : > { %v7177_v56 = vadd.f32 %v7176_v58, %v7108_v3  ;;  %v10559_v28 = vpop.f32.mrb[18].mxu1 }
0x1428   : > { %7193 = vst [vmem:[%s1758_s6 + $0x10] sm:$0xff] %v7185_v13  ;;  %v7188_v39 = vadd.f32 %v10559_v28, %v7123_v0  ;;  %v7179_v30 = vpop.f32.mrb[19].mxu1 }
0x1429   : > { %7191 = vst [vmem:[%s1758_s6] sm:$0xff] %v7177_v56  ;;  %v7180_v45 = vadd.f32 %v7179_v30, %v7113_v41 }
0x142a   : > { %7194 = vst [vmem:[%s1758_s6 + $0x18] sm:$0xff] %v7188_v39  ;;  %v7212_v51 = vpack.c.bf16 %v7188_v39, %v7185_v13  ;;  %v13938_v39 = vpop.permute.xlu1 %7523 }
0x142b   : > { %7192 = vst [vmem:[%s1758_s6 + $0x8] sm:$0xff] %v7180_v45  ;;  %v7211_v22 = vpack.c.bf16 %v7180_v45, %v7177_v56  ;;  %s15319_s6 = sld [smem:[#allocation34_spill]] }
0x142d   : > { %10560 = vmatprep.subr.bf16.mxu0 %v7211_v22 }
0x142e   : > { %10561 = vmatpush3.bf16.msra.mxu0 %v7211_v22 }
0x142f   : > { %10562 = vmatprep.subr.bf16.mxu0 %v7212_v51 }
0x1431   : > { %v7414_v48 = vld [vmem:[%s15319_s6] sm:$0xff]  ;;  %v7417_v50 = vld [vmem:[%s15319_s6 + $0x18] sm:$0xff] }
0x1432   : > { %10563 = vmatpush3.bf16.msra.mxu0 %v7212_v51  ;;  %v7418_v18 = vld [vmem:[%s15319_s6 + $0x20] sm:$0xff] }
0x1433   : > { %10596 = vmatprep.subr.bf16.mxu0 %v15318_v61 }
0x1435   : > { %10565 = vmatmul.mubr.msk.bf16.vlgmr.msra.gmra.mrb[92].mxu0 %vm6407_vm13, %v11398_v31 }
0x1436   : > { %10568 = vmatprep.mubr.msk.bf16.mxu0 %vm6407_vm13, %v11399_v43  ;;  %v7251_v43 = vpop.permute.xlu0 %7250 }
0x143d   : > { %10569 = vmatmul.mubr.msk.bf16.gmra.mrb[96].mxu0 %vm6407_vm13, %v11400_v63 }
0x143e   : > { %10604 = vmatprep.mubr.msk.bf16.mxu0 %vm11855_vm9, %v15318_v61 }
0x1508   : > { %v10566_v11 = vpop.f32.mrb[92].mxu0 }
0x1509   : > { %v13926_v55 = vadd.f32 %v10566_v11, %v7226_v38  ;;  %v7319_v10 = vpop.f32.mrb[93].mxu0 }
0x150a   : > { %v13928_v25 = vadd.f32 %v7319_v10, %v7216_v53  ;;  %v10567_v34 = vpop.f32.mrb[94].mxu0  ;;  %v13949_v10 = vpop.permute.xlu1 %7491 }
0x150b   : > { %v7352_v7 = vsub.f32 0.0, %v13926_v55  ;;  %v13931_v3 = vadd.f32 %v10567_v34, %v7231_v27  ;;  %v7322_v41 = vpop.f32.mrb[95].mxu0 }
0x150c   : > { %v7350_v6 = vsub.f32 0.0, %v13928_v25  ;;  %v13934_v13 = vadd.f32 %v7322_v41, %v7221_v54 }
0x150d   : > { %v7362_v58 = vmul.f32 1.442695, %v7352_v7  ;;  %v7353_v0 = vsub.f32 0.0, %v13931_v3 }
0x150e   : > { %v7358_v56 = vmul.f32 1.442695, %v7350_v6  ;;  %v7351_v28 = vsub.f32 0.0, %v13934_v13 }
0x150f   : > { %11628 = vpow2.f32 %v7362_v58  ;;  %v7364_v30 = vmul.f32 1.442695, %v7353_v0 }
0x1510   : > { %11630 = vpow2.f32 %v7358_v56  ;;  %v7360_v45 = vmul.f32 1.442695, %v7351_v28  ;;  %v10570_v51 = vpop.f32.mrb[96].mxu0 }
0x1511   : > { %11632 = vpow2.f32 %v7364_v30  ;;  %v13940_v22 = vadd.f32 %v10570_v51, %v7246_v29  ;;  %v7335_v31 = vpop.f32.mrb[97].mxu0 }
0x1512   : > { %v10571_v63 = vpop.f32.mrb[98].mxu0  ;;  %11634 = vpow2.f32 %v7360_v45  ;;  %v13945_v27 = vadd.f32 %v7335_v31, %v7236_v37  ;;  %v13954_v37 = vpop.permute.xlu1 %7531 }
0x1513   : > { %v7356_v53 = vsub.f32 0.0, %v13940_v22  ;;  %v13943_v38 = vadd.f32 %v10571_v63, %v7251_v43  ;;  %v7338_v54 = vpop.f32.mrb[99].mxu0 }
0x1514   : > { %v13947_v11 = vadd.f32 %v7338_v54, %v7241_v47  ;;  %v7354_v6 = vsub.f32 0.0, %v13945_v27 }
0x1515   : > { %v7370_v34 = vmul.f32 1.442695, %v7356_v53  ;;  %v7357_v7 = vsub.f32 0.0, %v13943_v38 }
0x1516   : > { %v7355_v41 = vsub.f32 0.0, %v13947_v11  ;;  %v7366_v51 = vmul.f32 1.442695, %v7354_v6  ;;  %v13956_v63 = vpop.permute.xlu1 %7567 }
0x1517   : > { %v7372_v29 = vmul.f32 1.442695, %v7357_v7  ;;  %11636 = vpow2.f32 %v7370_v34 }
0x1518   : > { %v7368_v30 = vmul.f32 1.442695, %v7355_v41 }
0x1519   : > { %v11629_v58 = vpop.eup %11628  ;;  %11638 = vpow2.f32 %v7372_v29 }
0x151a   : > { %v11631_v0 = vpop.eup %11630  ;;  %v7376_v56 = vadd.f32 1.0, %v11629_v58  ;;  %v13958_v41 = vpop.permute.xlu1 %7751 }
0x151b   : > { %v11633_v28 = vpop.eup %11632  ;;  %v7374_v47 = vadd.f32 1.0, %v11631_v0 }
0x151c   : > { %11640 = vrcp.f32 %v7376_v56  ;;  %v7377_v45 = vadd.f32 1.0, %v11633_v28  ;;  %v11635_v31 = vpop.eup %11634  ;;  %v13961_v56 = vpop.permute.xlu0 %7461 }
0x151d   : > { %11642 = vrcp.f32 %v7374_v47  ;;  %v7375_v43 = vadd.f32 1.0, %v11635_v31 }
0x151e   : > { %11644 = vrcp.f32 %v7377_v45 }
0x151f   : > { %11646 = vpow2.f32 %v7368_v30  ;;  %v11773_v30 = vld [vmem:[%s15304_s1] ss:$0 sm:$0xff]  ;;  %s15343_s1 = sld [smem:[#allocation36_spill]] }
0x1520   : > { %11648 = vpow2.f32 %v7366_v51 }
0x1521   : > { %v11637_v53 = vpop.eup %11636  ;;  %11650 = vrcp.f32 %v7375_v43 }
0x1522   : > { %v7380_v7 = vadd.f32 1.0, %v11637_v53  ;;  %v13974_v53 = vpop.permute.xlu1 %7755 }
0x1523   : > { %v11639_v54 = vpop.eup %11638 }
0x1524   : > { %v7381_v34 = vadd.f32 1.0, %v11639_v54 }
0x1526   : > { %v11641_v29 = vpop.eup %11640  ;;  %11652 = vrcp.f32 %v7381_v34  ;;  %v13976_v34 = vpop.permute.xlu0 %7481 }
0x1527   : > { %v11643_v58 = vpop.eup %11642  ;;  %v7392_v6 = vmul.f32 %v11641_v29, %v13926_v55  ;;  %11654 = vrcp.f32 %v7380_v7 }
0x1528   : > { %v11645_v0 = vpop.eup %11644  ;;  %v7390_v28 = vmul.f32 %v11643_v58, %v13928_v25 }
0x1529   : > { %v11647_v47 = vpop.eup %11646  ;;  %v13965_v45 = vmul.f32 %v11773_v30, %v7392_v6  ;;  %v7393_v43 = vmul.f32 %v11645_v0, %v13931_v3  ;;  %v13985_v6 = vpop.permute.xlu1 %7795 }
0x152a   : > { %v11649_v51 = vpop.eup %11648  ;;  %v13967_v31 = vmul.f32 %v11773_v30, %v7390_v28  ;;  %v7379_v55 = vadd.f32 1.0, %v11647_v47  ;;  %v13989_v0 = vpop.permute.xlu0 %7486 }
0x152b   : > { %7426 = vrot.lane.b32.xlu1 %v13965_v45, %s15295_s22  ;;  %v7378_v25 = vadd.f32 1.0, %v11649_v51  ;;  %v11651_v54 = vpop.eup %11650  ;;  %v13978_v29 = vmul.f32 %v11773_v30, %v7393_v43 }
0x152c   : > { %7438 = vrot.lane.b32.xlu0 %v13967_v31, %s15296_s0  ;;  %11656 = vrcp.f32 %v7379_v55  ;;  %v7391_v3 = vmul.f32 %v11651_v54, %v13934_v13 }
0x152d   : > { %11658 = vrcp.f32 %v7378_v25  ;;  %v14001_v13 = vpop.permute.xlu1 %7575 }
0x152e   : > { %v13993_v28 = vmul.f32 %v11773_v30, %v7391_v3  ;;  %v14005_v25 = vpop.permute.xlu0 %7507 }
0x152f   : > { %7442 = vrot.lane.b32.xlu1 %v13965_v45, %s15296_s0 }
0x1530   : > { %7428 = vrot.lane.b32.xlu0 %v13978_v29, %s15295_s22  ;;  %v11653_v7 = vpop.eup %11652 }
0x1531   : > { %v11655_v58 = vpop.eup %11654  ;;  %v7397_v47 = vmul.f32 %v11653_v7, %v13943_v38  ;;  %v14015_v7 = vpop.permute.xlu1 %7759 }
0x1532   : > { %v7396_v51 = vmul.f32 %v11655_v58, %v13940_v22  ;;  %v14019_v58 = vpop.permute.xlu0 %7511 }
0x1533   : > { %7422 = vrot.lane.b32.xlu1 %v13967_v31, %s15295_s22  ;;  %v14003_v43 = vmul.f32 %v11773_v30, %v7397_v47 }
0x1534   : > { %7444 = vrot.lane.b32.xlu0 %v13978_v29, %s15296_s0  ;;  %v14007_v54 = vmul.f32 %v11773_v30, %v7396_v51 }
0x1536   : > { %v11657_v55 = vpop.eup %11656 }
0x1537   : > { %7440 = vrot.lane.b32.xlu1 %v13993_v28, %s15296_s0  ;;  %v11659_v3 = vpop.eup %11658  ;;  %v7395_v22 = vmul.f32 %v11657_v55, %v13947_v11  ;;  %v14033_v11 = vpop.permute.xlu0 %7527 }
0x1538   : > { %7424 = vrot.lane.b32.xlu0 %v13993_v28, %s15295_s22  ;;  %v7394_v38 = vmul.f32 %v11659_v3, %v13945_v27  ;;  %v14031_v27 = vpop.permute.xlu1 %7763 }
0x1539   : > { %v14023_v47 = vmul.f32 %v11773_v30, %v7395_v22 }
0x153a   : > { %v14025_v51 = vmul.f32 %v11773_v30, %v7394_v38 }
0x153b   : > { %7436 = vrot.lane.b32.xlu1 %v14003_v43, %s15295_s22  ;;  %v14042_v30 = vpop.permute.xlu0 %7551 }
0x153c   : > { %7434 = vrot.lane.b32.xlu0 %v14007_v54, %s15295_s22  ;;  %v14039_v55 = vpop.permute.xlu1 %7803 }
0x153f   : > { %7452 = vrot.lane.b32.xlu1 %v14003_v43, %s15296_s0  ;;  %v7560_v22 = vpop.permute.xlu0 %7559 }
0x1540   : > { %7450 = vrot.lane.b32.xlu0 %v14007_v54, %s15296_s0  ;;  %v14048_v3 = vpop.permute.xlu1 %7839 }
0x1543   : > { %7432 = vrot.lane.b32.xlu1 %v14023_v47, %s15295_s22  ;;  %v14057_v19 = vpop.permute.xlu0 %7571 }
0x1544   : > { %7430 = vrot.lane.b32.xlu0 %v14025_v51, %s15295_s22  ;;  %v14054_v38 = vpop.permute.xlu1 %7847 }
0x1545   : > { %15320 = vst [vmem:[#allocation47_spill] sm:$0xff] %v14054_v38 }
0x1547   : > { %7448 = vrot.lane.b32.xlu1 %v14023_v47, %s15296_s0 }
0x1548   : > { %7446 = vrot.lane.b32.xlu0 %v14025_v51, %s15296_s0  ;;  %v14062_v12 = vpop.permute.xlu1 %7851 }
0x1549   : > { %15321 = vst [vmem:[#allocation48_spill] sm:$0xff] %v14062_v12 }
0x154b   : > { %7627 = vperm.xlu1 %10929, %v13806_v2  }
0x154c   : > { %7663 = vperm.xlu0 %10928, %v13815_v14  }
0x154f   : > { %10931 = vset.pattern.permute.xlu1 %v15316_v62 }
0x1550   : > { %10930 = vset.pattern.permute.xlu0 %v15317_v5  ;;  %7667 = vperm.xlu1 %10931, %v13806_v2  }
0x1551   : > { %7687 = vperm.xlu0 %10930, %v13688_v32   ;;  %v7415_v32 = vld [vmem:[%s15319_s6 + $0x8] sm:$0xff] }
0x1554   : > { %10932 = vset.pattern.permute.xlu1 %v15317_v5 }
0x1555   : > { %7699 = vperm.xlu0 %10930, %v13709_v23   ;;  %7703 = vperm.xlu1 %10932, %v13792_v21   ;;  %v14065_v23 = vpop.permute.xlu0 %7579  ;;  %v7416_v21 = vld [vmem:[%s15319_s6 + $0x10] sm:$0xff] }
0x1559   : > { %7707 = vperm.xlu0 %10930, %v13801_v57   ;;  %10933 = vset.pattern.permute.xlu1 %v15211_v1  ;;  %v14070_v57 = vpop.permute.xlu1 %7603  ;;  %v14074_v62 = vpop.permute.xlu0 %7791 }
0x155a   : > { %7920 = vperm.xlu1 %10933, %v7414_v48   ;;  %15322 = vst [vmem:[#allocation49_spill] sm:$0xff] %v14070_v57  ;;  %v7419_v48 = vld [vmem:[%s15319_s6 + $0x28] sm:$0xff] }
0x155d   : > { %7711 = vperm.xlu0 %10930, %v13815_v14   ;;  %v7421_v14 = vld [vmem:[%s15319_s6 + $0x38] sm:$0xff]  ;;  %v14082_v59 = vpop.permute.xlu0 %7799 }
0x155e   : > { %7925 = vperm.xlu1 %10933, %v7415_v32   ;;  %v14079_v32 = vpop.permute.xlu1 %7639  ;;  %15324 = vst [vmem:[#allocation51_spill] sm:$0xff] %v14082_v59 }
0x155f   : > { %15323 = vst [vmem:[#allocation50_spill] sm:$0xff] %v14079_v32 }
0x1561   : > { %10935 = vset.pattern.permute.xlu0 %v15211_v1 }
0x1562   : > { %10934 = vset.pattern.permute.xlu1 %v15317_v5  ;;  %7930 = vperm.xlu0 %10935, %v7416_v21   ;;  %v7420_v21 = vld [vmem:[%s15319_s6 + $0x30] sm:$0xff]  ;;  %v14085_v5 = vpop.permute.xlu1 %7607 }
0x1563   : > { %7715 = vperm.xlu1 %10934, %v13806_v2   ;;  %15325 = vst [vmem:[#allocation52_spill] sm:$0xff] %v14085_v5  ;;  %v7824_v2 = vpop.permute.xlu0 %7823 }
0x1566   : > { %7945 = vperm.xlu0 %10935, %v7419_v48   ;;  %v14087_v57 = vpop.permute.xlu1 %7611 }
0x1567   : > { %10936 = vset.pattern.permute.xlu1 %v15211_v1  ;;  %15326 = vst [vmem:[#allocation53_spill] sm:$0xff] %v14087_v57  ;;  %v7836_v61 = vpop.permute.xlu0 %7835 }
0x1568   : > { %7935 = vperm.xlu1 %10936, %v7417_v50  }
0x156a   : > { %7955 = vperm.xlu0 %10935, %v7421_v14   ;;  %v14089_v48 = vpop.permute.xlu1 %7651 }
0x156b   : > { %15327 = vst [vmem:[#allocation54_spill] sm:$0xff] %v14089_v48  ;;  %v14091_v1 = vpop.permute.xlu0 %7843 }
0x156c   : > { %7940 = vperm.xlu1 %10936, %v7418_v18  }
0x156e   : > { %v14093_v50 = vpop.permute.xlu1 %7691 }
0x156f   : > { %15328 = vst [vmem:[#allocation55_spill] sm:$0xff] %v14093_v50  ;;  %v14095_v32 = vpop.permute.xlu0 %7599 }
0x1570   : > { %7950 = vperm.xlu1 %10936, %v7420_v21   ;;  %15329 = vst [vmem:[#allocation56_spill] sm:$0xff] %v14095_v32 }
0x1572   : > { %v14097_v38 = vpop.permute.xlu1 %7695 }
0x1573   : > { %15330 = vst [vmem:[#allocation57_spill] sm:$0xff] %v14097_v38  ;;  %v14099_v14 = vpop.permute.xlu0 %7619 }
0x1574   : > { %15331 = vst [vmem:[#allocation58_spill] sm:$0xff] %v14099_v14 }
0x1576   : > { %v14101_v18 = vpop.permute.xlu1 %7615 }
0x1577   : > { %15332 = vst [vmem:[#allocation59_spill] sm:$0xff] %v14101_v18  ;;  %v14103_v5 = vpop.permute.xlu0 %7623  ;;  %v7536_v18 = vmul.f32 %v14019_v58, %v13965_v45 }
0x1578   : > { %15333 = vst [vmem:[#allocation60_spill] sm:$0xff] %v14103_v5 }
0x157a   : > { %v14105_v21 = vpop.permute.xlu1 %7655 }
0x157b   : > { %15334 = vst [vmem:[#allocation61_spill] sm:$0xff] %v14105_v21  ;;  %v14107_v57 = vpop.permute.xlu0 %7643 }
0x157c   : > { %15335 = vst [vmem:[#allocation62_spill] sm:$0xff] %v14107_v57 }
0x157e   : > { %v14109_v12 = vpop.permute.xlu1 %7659 }
0x157f   : > { %15336 = vst [vmem:[#allocation63_spill] sm:$0xff] %v14109_v12  ;;  %v14111_v48 = vpop.permute.xlu0 %7647 }
0x1580   : > { %15337 = vst [vmem:[#allocation64_spill] sm:$0xff] %v14111_v48 }
0x159d   : > { %v14113_v59 = vpop.permute.xlu1 %7426 }
0x159e   : > { %15338 = vst [vmem:[#allocation65_spill] sm:$0xff] %v14113_v59  ;;  %v7496_v50 = vmul.f32 %v13892_v20, %v14113_v59  ;;  %v14117_v32 = vpop.permute.xlu0 %7438  ;;  %v7768_v21 = vmul.f32 %v13908_v17, %v14113_v59  ;;  %v7808_v20 = vmul.f32 %v13910_v26, %v13965_v45  ;;  %v7534_v59 = vmul.f32 %v13890_v8, %v13967_v31 }
0x15a0   : > { %v7544_v5 = vadd.f32 %v7536_v18, %v7496_v50  ;;  %v7537_v50 = vmul.f32 %v13896_v15, %v13978_v29  ;;  %v7816_v17 = vadd.f32 %v7808_v20, %v7768_v21 }
0x15a1   : > { %v14121_v14 = vpop.permute.xlu1 %7442 }
0x15a2   : > { %v7584_v12 = vmul.f32 %v7560_v22, %v14121_v14  ;;  %v14126_v57 = vpop.permute.xlu0 %7428  ;;  %v7856_v48 = vmul.f32 %v13920_v35, %v14121_v14 }
0x15a3   : > { %v7497_v38 = vmul.f32 %v13894_v24, %v14126_v57 }
0x15a4   : > { %v7592_v58 = vadd.f32 %v7584_v12, %v7544_v5  ;;  %v7769_v12 = vmul.f32 %v13918_v33, %v14126_v57  ;;  %v7864_v21 = vadd.f32 %v7856_v48, %v7816_v17  ;;  %v7806_v33 = vmul.f32 %v13902_v9, %v13967_v31 }
0x15a5   : > { %v14136_v18 = vpop.permute.xlu1 %7422  ;;  %v7545_v26 = vadd.f32 %v7537_v50, %v7497_v38  ;;  %v7582_v38 = vmul.f32 %v14042_v30, %v14117_v32 }
0x15a6   : > { %v7494_v22 = vmul.f32 %v13888_v46, %v14136_v18  ;;  %v14142_v24 = vpop.permute.xlu0 %7444  ;;  %7874 = vrot.lane.b32.xlu1 %v7592_v58, %s15310_s7  ;;  %v7766_v35 = vmul.f32 %v13900_v4, %v14136_v18  ;;  %v7809_v46 = vmul.f32 %v13912_v49, %v13978_v29  ;;  %v7535_v4 = vmul.f32 %v14005_v25, %v13993_v28 }
0x15a7   : > { %v7585_v5 = vmul.f32 %v13906_v52, %v14142_v24  ;;  %v7857_v8 = vmul.f32 %v7836_v61, %v14142_v24  ;;  %v7807_v25 = vmul.f32 %v13904_v60, %v13993_v28 }
0x15a8   : > { %v7542_v15 = vadd.f32 %v7534_v59, %v7494_v22  ;;  %v7817_v59 = vadd.f32 %v7809_v46, %v7769_v12  ;;  %v7814_v49 = vadd.f32 %v7806_v33, %v7766_v35  ;;  %v7854_v22 = vmul.f32 %v7824_v2, %v14117_v32 }
0x15a9   : > { %v14154_v20 = vpop.permute.xlu1 %7440  ;;  %v7593_v58 = vadd.f32 %v7585_v5, %v7545_v26  ;;  %v7540_v2 = vmul.f32 %v14033_v11, %v14007_v54  ;;  %v7541_v11 = vmul.f32 %v13954_v37, %v14003_v43  ;;  %v7539_v37 = vmul.f32 %v13938_v39, %v14023_v47 }
0x15aa   : > { %v14160_v52 = vpop.permute.xlu0 %7424  ;;  %7898 = vrot.lane.b32.xlu1 %v7864_v21, %s15307_s5  ;;  %v7590_v48 = vadd.f32 %v7582_v38, %v7542_v15  ;;  %v7865_v17 = vadd.f32 %v7857_v8, %v7817_v59  ;;  %v7855_v60 = vmul.f32 %v13916_v44, %v14154_v20 }
0x15ab   : > { %v7495_v61 = vmul.f32 %v13961_v56, %v14160_v52  ;;  %7876 = vrot.lane.b32.xlu0 %v7593_v58, %s15310_s7  ;;  %v7767_v30 = vmul.f32 %v13914_v42, %v14160_v52  ;;  %v7583_v56 = vmul.f32 %v13898_v36, %v14154_v20  ;;  %v7862_v42 = vadd.f32 %v7854_v22, %v7814_v49  ;;  %v11401_v36 = vld [vmem:[%s15339_s2] sm:$0xff]  }
0x15ac   : > { %10572 = vmatprep.subr.bf16.mxu1 %v11401_v36 }
0x15ad   : > { %v7543_v50 = vadd.f32 %v7535_v4, %v7495_v61  ;;  %v14170_v9 = vpop.permute.xlu1 %7436  ;;  %v7815_v5 = vadd.f32 %v7807_v25, %v7767_v30  ;;  %10573 = vmatpush3.bf16.msra.mxu1 %v11401_v36  ;;  %v11403_v30 = vld [vmem:[%s15339_s2 + $0x10] sm:$0xff]   ;;  %v7811_v25 = vmul.f32 %v13985_v6, %v14023_v47  ;;  %v15340_v6 = vld [vmem:[#allocation51_spill] sm:$0xff] }
0x15ae   : > { %v14173_v26 = vpop.permute.xlu0 %7434  ;;  %7870 = vrot.lane.b32.xlu1 %v7590_v48, %s15310_s7  ;;  %v15342_v36 = vld [vmem:[#allocation47_spill] sm:$0xff] }
0x15af   : > { %v7500_v12 = vmul.f32 %v13989_v0, %v14173_v26  ;;  %7900 = vrot.lane.b32.xlu0 %v7865_v17, %s15307_s5  ;;  %v7591_v35 = vadd.f32 %v7583_v56, %v7543_v50  ;;  %v7501_v0 = vmul.f32 %v13949_v10, %v14170_v9  ;;  %v7863_v33 = vadd.f32 %v7855_v60, %v7815_v5 }
0x15b0   : > { %v7810_v56 = vmul.f32 %v14074_v62, %v14025_v51  ;;  %v7772_v62 = vmul.f32 %v14015_v7, %v14173_v26 }
0x15b1   : > { %v14185_v15 = vpop.permute.xlu1 %7452  ;;  %v7548_v46 = vadd.f32 %v7540_v2, %v7500_v12  ;;  %v7549_v4 = vadd.f32 %v7541_v11, %v7501_v0 }
0x15b2   : > { %v14187_v21 = vpop.permute.xlu0 %7450  ;;  %7894 = vrot.lane.b32.xlu1 %v7862_v42, %s15307_s5  ;;  %v7589_v58 = vmul.f32 %v14065_v23, %v14185_v15  ;;  %v7538_v23 = vmul.f32 %v13924_v40, %v14025_v51  ;;  %v11404_v42 = vld [vmem:[%s15339_s2 + $0x18] sm:$0xff]  }
0x15b3   : > { %v7588_v8 = vmul.f32 %v14001_v13, %v14187_v21  ;;  %7872 = vrot.lane.b32.xlu0 %v7591_v35, %s15310_s7  ;;  %v11402_v13 = vld [vmem:[%s15339_s2 + $0x8] sm:$0xff]   ;;  %v7860_v7 = vmul.f32 %v15342_v36, %v14187_v21 }
0x15b4   : > { %10574 = vmatprep.subr.bf16.mxu1 %v11402_v13  ;;  %v7597_v49 = vadd.f32 %v7589_v58, %v7549_v4  ;;  %v8022_v4 = vld [vmem:[%s15343_s1 + $0x18] sm:$0xff]  ;;  %v15350_v36 = vld [vmem:[#allocation52_spill] sm:$0xff] }
0x15b5   : > { %v14202_v38 = vpop.permute.xlu1 %7432  ;;  %v7596_v44 = vadd.f32 %v7588_v8, %v7548_v46  ;;  %10575 = vmatpush3.bf16.msra.mxu1 %v11402_v13  ;;  %v11405_v46 = vld [vmem:[%s15339_s2 + $0x20] sm:$0xff]   ;;  %v11407_v13 = vld [vmem:[%s15339_s2 + $0x30] sm:$0xff]  }
0x15b6   : > { %v7499_v10 = vmul.f32 %v13976_v34, %v14202_v38  ;;  %v14206_v59 = vpop.permute.xlu0 %7430  ;;  %v7771_v17 = vmul.f32 %v13974_v53, %v14202_v38  ;;  %10576 = vmatprep.subr.bf16.mxu1 %v11403_v30 }
0x15b7   : > { %v7498_v61 = vmul.f32 %v13922_v16, %v14206_v59  ;;  %7896 = vrot.lane.b32.xlu0 %v7863_v33, %s15307_s5  ;;  %7882 = vrot.lane.b32.xlu1 %v7596_v44, %s15310_s7  ;;  %v7770_v22 = vmul.f32 %v13958_v41, %v14206_v59  ;;  %v11406_v33 = vld [vmem:[%s15339_s2 + $0x28] sm:$0xff]  }
0x15b8   : > { %v7547_v48 = vadd.f32 %v7539_v37, %v7499_v10  ;;  %v7819_v5 = vadd.f32 %v7811_v25, %v7771_v17  ;;  %v8020_v44 = vld [vmem:[%s15343_s1 + $0x8] sm:$0xff]  ;;  %v8019_v10 = vld [vmem:[%s15343_s1] sm:$0xff]  ;;  %v11408_v37 = vld [vmem:[%s15339_s2 + $0x38] sm:$0xff]   ;;  %s15374_s2 = sld [smem:[#allocation38_spill]] }
0x15b9   : > { %v14217_v34 = vpop.permute.xlu1 %7448  ;;  %v7546_v39 = vadd.f32 %v7538_v23, %v7498_v61  ;;  %10577 = vmatpush3.bf16.msra.mxu1 %v11403_v30  ;;  %v7818_v2 = vadd.f32 %v7810_v56, %v7770_v22  ;;  %v8021_v61 = vld [vmem:[%s15343_s1 + $0x10] sm:$0xff]  ;;  %v8023_v23 = vld [vmem:[%s15343_s1 + $0x20] sm:$0xff]  ;;  %s15369_s1 = sld [smem:[#allocation35_spill]] }
0x15ba   : > { %v7587_v50 = vmul.f32 %v14057_v19, %v14217_v34  ;;  %v14221_v16 = vpop.permute.xlu0 %7446  ;;  %v7859_v53 = vmul.f32 %v14091_v1, %v14217_v34  ;;  %v7813_v1 = vmul.f32 %v14039_v55, %v14003_v43  ;;  %10578 = vmatprep.subr.bf16.mxu1 %v11404_v42 }
0x15bb   : > { %v7586_v40 = vmul.f32 %v13956_v63, %v14221_v16  ;;  %7884 = vrot.lane.b32.xlu0 %v7597_v49, %s15310_s7  ;;  %v7858_v12 = vmul.f32 %v14048_v3, %v14221_v16  ;;  %v7773_v63 = vmul.f32 %v14031_v27, %v14170_v9  ;;  %v7812_v3 = vmul.f32 %v15340_v6, %v14007_v54  ;;  %v15341_v27 = vld [vmem:[#allocation48_spill] sm:$0xff] }
0x15bc   : > { %v7595_v19 = vadd.f32 %v7587_v50, %v7547_v48  ;;  %v7861_v35 = vmul.f32 %v15341_v27, %v14185_v15  ;;  %v7867_v60 = vadd.f32 %v7859_v53, %v7819_v5  ;;  %v15346_v49 = vmov 0.0  }
0x15bd   : > { %v7594_v41 = vadd.f32 %v7586_v40, %v7546_v39  ;;  %v7866_v0 = vadd.f32 %v7858_v12, %v7818_v2  ;;  %10579 = vmatpush3.bf16.msra.mxu1 %v11404_v42  ;;  %v7821_v8 = vadd.f32 %v7813_v1, %v7773_v63  ;;  %v7820_v55 = vadd.f32 %v7812_v3, %v7772_v62 }
0x15be   : > { %10580 = vmatprep.subr.bf16.mxu1 %v11405_v46  ;;  %v15347_v48 = vmov 1   ;;  %v15348_v12 = vmov 2  }
0x15bf   : > { %7880 = vrot.lane.b32.xlu0 %v7595_v19, %s15310_s7  ;;  %7878 = vrot.lane.b32.xlu1 %v7594_v41, %s15310_s7  ;;  %v7869_v11 = vadd.f32 %v7861_v35, %v7821_v8  ;;  %v7868_v58 = vadd.f32 %v7860_v7, %v7820_v55  ;;  %s15344_s7 = sld [smem:[#allocation39_spill]]  ;;  %v15349_v35 = vld [vmem:[#allocation65_spill] sm:$0xff] }
0x15c0   : > { %v7632_v7 = vmul.f32 %v15350_v36, %v15349_v35  ;;  %v15352_v55 = vld [vmem:[#allocation57_spill] sm:$0xff] }
0x15c1   : > { %10581 = vmatpush3.bf16.msra.mxu1 %v11405_v46  ;;  %v15351_v46 = vld [vmem:[#allocation64_spill] sm:$0xff] }
0x15c2   : > { %10582 = vmatprep.subr.bf16.mxu1 %v11406_v33  ;;  %v7672_v8 = vmul.f32 %v15351_v46, %v13965_v45 }
0x15c3   : > { %7904 = vrot.lane.b32.xlu0 %v7867_v60, %s15307_s5  ;;  %7902 = vrot.lane.b32.xlu1 %v7866_v0, %s15307_s5 }
0x15c5   : > { %10583 = vmatpush3.bf16.msra.mxu1 %v11406_v33  ;;  %v8276_v50 = vld [vmem:[%s15344_s7 + $0x8] sm:$0xff]  ;;  %v8278_v30 = vld [vmem:[%s15344_s7 + $0x18] sm:$0xff]  ;;  %v15353_v33 = vld [vmem:[#allocation53_spill] sm:$0xff] }
0x15c6   : > { %10584 = vmatprep.subr.bf16.mxu1 %v11407_v13  ;;  %v8280_v17 = vld [vmem:[%s15344_s7 + $0x28] sm:$0xff]  ;;  %v8282_v39 = vld [vmem:[%s15344_s7 + $0x38] sm:$0xff] }
0x15c7   : > { %7908 = vrot.lane.b32.xlu0 %v7869_v11, %s15307_s5  ;;  %7906 = vrot.lane.b32.xlu1 %v7868_v58, %s15307_s5  ;;  %s15345_s5 = sld [smem:[#allocation40_spill]]  ;;  %v8284_v22 = vld [vmem:[%s15344_s7 + $0x48] sm:$0xff]  ;;  %v7720_v11 = vmul.f32 %v15352_v55, %v14121_v14  ;;  %v7680_v58 = vadd.f32 %v7672_v8, %v7632_v7  ;;  %v15356_v14 = vld [vmem:[#allocation50_spill] sm:$0xff]  ;;  %v15357_v7 = vld [vmem:[#allocation49_spill] sm:$0xff] }
0x15c8   : > { %v7631_v46 = vmul.f32 %v15357_v7, %v14160_v52 }
0x15c9   : > { %10585 = vmatpush3.bf16.msra.mxu1 %v11407_v13  ;;  %v7728_v13 = vadd.f32 %v7720_v11, %v7680_v58 }
0x15ca   : > { %10586 = vmatprep.subr.bf16.mxu1 %v11408_v37  ;;  %v14274_v40 = vpop.permute.xlu1 %7627 }
0x15cb   : > { %8168 = vperm.xlu0 %10935, %v8020_v44   ;;  %8163 = vperm.xlu1 %10936, %v8019_v10   ;;  %v14284_v25 = vpop.permute.xlu0 %7663  ;;  %v7633_v44 = vmul.f32 %v15353_v33, %v14126_v57 }
0x15cd   : > { %10587 = vmatpush3.bf16.msra.mxu1 %v11408_v37  ;;  %v14277_v56 = vld [vmem:[%s15345_s5 + $0x8] sm:$0xff] }
0x15ce   : > { %10642 = vmatprep.subr.bf16.mxu1 %v15346_v49 }
0x15cf   : > { %8178 = vperm.xlu0 %10935, %v8022_v4   ;;  %8173 = vperm.xlu1 %10936, %v8021_v61   ;;  %v14280_v19 = vpop.permute.xlu1 %7667  ;;  %v15354_v61 = vld [vmem:[#allocation54_spill] sm:$0xff] }
0x15d0   : > { %v7688_v41 = vpop.permute.xlu0 %7687  ;;  %v7673_v37 = vmul.f32 %v15354_v61, %v13978_v29 }
0x15d1   : > { %v7718_v57 = vmul.f32 %v7688_v41, %v14117_v32 }
0x15d3   : > { %8183 = vperm.xlu1 %10936, %v8023_v23   ;;  %10937 = vset.pattern.permute.xlu0 %v15347_v48 }
0x15d4   : > { %v14286_v53 = vpop.permute.xlu1 %7703  ;;  %v7700_v42 = vpop.permute.xlu0 %7699 }
0x15d5   : > { %v7721_v23 = vmul.f32 %v7700_v42, %v14142_v24  ;;  %v15358_v42 = vld [vmem:[#allocation62_spill] sm:$0xff] }
0x15d7   : > { %8295 = vperm.xlu1 %10936, %v8276_v50   ;;  %v15355_v50 = vld [vmem:[#allocation56_spill] sm:$0xff] }
0x15d8   : > { %v14289_v5 = vpop.permute.xlu0 %7707 }
0x15d9   : > { %v7921_v63 = vpop.permute.xlu1 %7920 }
0x15db   : > { %8305 = vperm.xlu1 %10936, %v8278_v30   ;;  %v7630_v30 = vmul.f32 %v15355_v50, %v14136_v18  ;;  %v7671_v18 = vmul.f32 %v15358_v42, %v13993_v28  ;;  %v15363_v42 = vld [vmem:[#allocation63_spill] sm:$0xff] }
0x15dc   : > { %v14293_v6 = vpop.permute.xlu0 %7711 }
0x15dd   : > { %v7926_v62 = vpop.permute.xlu1 %7925  ;;  %v7679_v32 = vadd.f32 %v7671_v18, %v7631_v46  ;;  %v15362_v46 = vld [vmem:[#allocation61_spill] sm:$0xff]  ;;  %v7675_v18 = vmul.f32 %v15363_v42, %v14023_v47 }
0x15df   : > { %8315 = vperm.xlu1 %10936, %v8280_v17  }
0x15e1   : > { %v7931_v3 = vpop.permute.xlu0 %7930 }
0x15e2   : > { %v14291_v2 = vpop.permute.xlu1 %7715 }
0x15e3   : > { %8325 = vperm.xlu1 %10936, %v8282_v39   ;;  %v7681_v39 = vadd.f32 %v7673_v37, %v7633_v44 }
0x15e5   : > { %v14299_v60 = vpop.permute.xlu0 %7945  ;;  %v7729_v8 = vadd.f32 %v7721_v23, %v7681_v39 }
0x15e7   : > { %8335 = vperm.xlu1 %10936, %v8284_v22   ;;  %v7936_v1 = vpop.permute.xlu1 %7935  ;;  %v7670_v22 = vmul.f32 %v15356_v14, %v13967_v31 }
0x15e9   : > { %v14309_v4 = vpop.permute.xlu0 %7955  ;;  %v7678_v24 = vadd.f32 %v7670_v22, %v7630_v30 }
0x15eb   : > { %8598 = vperm.xlu1 %10936, %v14277_v56   ;;  %v14295_v27 = vpop.permute.xlu1 %7940  ;;  %v7726_v33 = vadd.f32 %v7718_v57, %v7678_v24  ;;  %v15360_v57 = vld [vmem:[#allocation58_spill] sm:$0xff] }
0x15ef   : > { %10939 = vset.pattern.permute.xlu1 %v15347_v48  ;;  %v14301_v0 = vpop.permute.xlu1 %7950 }
0x15f0   : > { %8656 = vperm.xlu1 %10939, %v14277_v56  }
0x15f4   : > { %10940 = vset.pattern.permute.xlu1 %v15348_v12 }
0x1618   : > { %v7875_v10 = vpop.permute.xlu1 %7874 }
0x1619   : > { %v7888_v45 = vadd.f32 %v7875_v10, %v7728_v13 }
0x161c   : > { %v7899_v17 = vpop.permute.xlu1 %7898 }
0x161d   : > { %v7912_v35 = vadd.f32 %v7899_v17, %v7888_v45  ;;  %v7877_v36 = vpop.permute.xlu0 %7876 }
0x161e   : > { %v7889_v55 = vadd.f32 %v7877_v36, %v7729_v8 }
0x161f   : > { %v14321_v29 = vadd.f32 %v7931_v3, %v7912_v35  ;;  %v15359_v3 = vld [vmem:[#allocation55_spill] sm:$0xff]  ;;  %v7635_v35 = vmul.f32 %v15360_v57, %v14202_v38  ;;  %v7723_v38 = vmul.f32 %v14289_v5, %v14217_v34  ;;  %v7725_v34 = vmul.f32 %v14291_v2, %v14185_v15 }
0x1620   : > { %v7871_v11 = vpop.permute.xlu1 %7870  ;;  %v7719_v61 = vmul.f32 %v15359_v3, %v14154_v20  ;;  %v15361_v20 = vld [vmem:[#allocation59_spill] sm:$0xff] }
0x1621   : > { %v7968_v58 = vsub.f32 0.0, %v14321_v29  ;;  %v7901_v31 = vpop.permute.xlu0 %7900  ;;  %v7886_v10 = vadd.f32 %v7871_v11, %v7726_v33  ;;  %v7634_v36 = vmul.f32 %v15361_v20, %v14206_v59 }
0x1622   : > { %v7913_v44 = vadd.f32 %v7901_v31, %v7889_v55  ;;  %v7727_v50 = vadd.f32 %v7719_v61, %v7679_v32  ;;  %v7722_v55 = vmul.f32 %v14286_v53, %v14221_v16  ;;  %v7676_v31 = vmul.f32 %v14284_v25, %v14007_v54 }
0x1623   : > { %v7978_v41 = vmul.f32 1.442695, %v7968_v58  ;;  %v7637_v16 = vmul.f32 %v14274_v40, %v14170_v9 }
0x1624   : > { %v14326_v13 = vadd.f32 %v7936_v1, %v7913_v44  ;;  %v7895_v52 = vpop.permute.xlu1 %7894 }
0x1625   : > { %11660 = vpow2.f32 %v7978_v41  ;;  %v7910_v37 = vadd.f32 %v7895_v52, %v7886_v10  ;;  %v7873_v23 = vpop.permute.xlu0 %7872  ;;  %v15364_v41 = vld [vmem:[#allocation60_spill] sm:$0xff] }
0x1626   : > { %v7969_v28 = vsub.f32 0.0, %v14326_v13  ;;  %v7887_v17 = vadd.f32 %v7873_v23, %v7727_v50 }
0x1627   : > { %v14331_v30 = vadd.f32 %v7921_v63, %v7910_v37  ;;  %v7674_v63 = vmul.f32 %v15362_v46, %v14025_v51  ;;  %v7683_v51 = vadd.f32 %v7675_v18, %v7635_v35 }
0x1628   : > { %v7980_v45 = vmul.f32 1.442695, %v7969_v28 }
0x1629   : > { %v7966_v39 = vsub.f32 0.0, %v14331_v30  ;;  %v7897_v14 = vpop.permute.xlu0 %7896  ;;  %v7883_v8 = vpop.permute.xlu1 %7882  ;;  %v7682_v33 = vadd.f32 %v7674_v63, %v7634_v36  ;;  %v7731_v53 = vadd.f32 %v7723_v38, %v7683_v51 }
0x162a   : > { %11662 = vpow2.f32 %v7980_v45  ;;  %v7911_v1 = vadd.f32 %v7897_v14, %v7887_v17 }
0x162b   : > { %v7974_v22 = vmul.f32 1.442695, %v7966_v39  ;;  %v7730_v5 = vadd.f32 %v7722_v55, %v7682_v33 }
0x162c   : > { %v14338_v7 = vadd.f32 %v7926_v62, %v7911_v1  ;;  %v7677_v62 = vmul.f32 %v14280_v19, %v14003_v43  ;;  %v7636_v43 = vmul.f32 %v15364_v41, %v14173_v26  ;;  %v7724_v19 = vmul.f32 %v14293_v6, %v14187_v21 }
0x162d   : > { %11664 = vpow2.f32 %v7974_v22  ;;  %v7885_v24 = vpop.permute.xlu0 %7884 }
0x162e   : > { %v7967_v11 = vsub.f32 0.0, %v14338_v7  ;;  %v7685_v54 = vadd.f32 %v7677_v62, %v7637_v16  ;;  %v7684_v3 = vadd.f32 %v7676_v31, %v7636_v43 }
0x162f   : > { %v11661_v59 = vpop.eup %11660 }
0x1630   : > { %v7976_v58 = vmul.f32 1.442695, %v7967_v11  ;;  %v7992_v44 = vadd.f32 1.0, %v11661_v59  ;;  %v7733_v37 = vadd.f32 %v7725_v34, %v7685_v54  ;;  %v7732_v28 = vadd.f32 %v7724_v19, %v7684_v3 }
0x1631   : > { %v7881_v47 = vpop.permute.xlu0 %7880  ;;  %v7879_v32 = vpop.permute.xlu1 %7878  ;;  %v15366_v3 = vmov 0  }
0x1632   : > { %11666 = vpow2.f32 %v7976_v58  ;;  %v7891_v25 = vadd.f32 %v7881_v47, %v7731_v53  ;;  %v7890_v52 = vadd.f32 %v7879_v32, %v7730_v5  ;;  %v7893_v26 = vadd.f32 %v7885_v24, %v7733_v37 }
0x1633   : > { %11668 = vrcp.f32 %v7992_v44  ;;  %v7892_v45 = vadd.f32 %v7883_v8, %v7732_v28  ;;  %v15368_v37 = vmov 8  }
0x1634   : > { %v11663_v10 = vpop.eup %11662 }
0x1635   : > { %v7993_v61 = vadd.f32 1.0, %v11663_v10  ;;  %v7905_v9 = vpop.permute.xlu0 %7904  ;;  %v7903_v40 = vpop.permute.xlu1 %7902 }
0x1636   : > { %v7915_v15 = vadd.f32 %v7905_v9, %v7891_v25  ;;  %v7914_v2 = vadd.f32 %v7903_v40, %v7890_v52  ;;  %v14372_v25 = vld [vmem:[%s15345_s5] sm:$0xff]  ;;  %v15365_v52 = vmov 6   ;;  %v14383_v9 = vld [vmem:[%s15345_s5 + $0x10] sm:$0xff]  ;;  %v14390_v40 = vld [vmem:[%s15345_s5 + $0x18] sm:$0xff] }
0x1637   : > { %v11665_v23 = vpop.eup %11664  ;;  %11670 = vrcp.f32 %v7993_v61  ;;  %8712 = vperm.xlu1 %10940, %v14372_v25   ;;  %8652 = vperm.xlu0 %10937, %v14372_v25   ;;  %v15367_v61 = vmov 7  }
0x1638   : > { %v7963_v50 = vadd.f32 %v14299_v60, %v7915_v15  ;;  %v7962_v21 = vadd.f32 %v14295_v27, %v7914_v2  ;;  %v7990_v6 = vadd.f32 1.0, %v11665_v23  ;;  %v14403_v15 = vld [vmem:[%s15345_s5 + $0x20] sm:$0xff]  ;;  %v14410_v2 = vld [vmem:[%s15345_s5 + $0x28] sm:$0xff] }
0x1639   : > { %v7909_v17 = vpop.permute.xlu0 %7908  ;;  %v7907_v39 = vpop.permute.xlu1 %7906 }
0x163a   : > { %v7971_v14 = vsub.f32 0.0, %v7963_v50  ;;  %v7970_v1 = vsub.f32 0.0, %v7962_v21  ;;  %v7917_v22 = vadd.f32 %v7909_v17, %v7893_v26  ;;  %v7916_v57 = vadd.f32 %v7907_v39, %v7892_v45 }
0x163b   : > { %11672 = vrcp.f32 %v7990_v6  ;;  %10941 = vset.pattern.permute.xlu1 %v15365_v52  ;;  %10938 = vset.pattern.permute.xlu0 %v15366_v3 }
0x163c   : > { %v7984_v35 = vmul.f32 1.442695, %v7971_v14  ;;  %v7982_v20 = vmul.f32 1.442695, %v7970_v1  ;;  %v7965_v36 = vadd.f32 %v14309_v4, %v7917_v22  ;;  %v11667_v46 = vpop.eup %11666  ;;  %v7964_v63 = vadd.f32 %v14301_v0, %v7916_v57  ;;  %8942 = vperm.xlu1 %10941, %v14372_v25   ;;  %v11409_v57 = vld [vmem:[%s15369_s1] sm:$0xff]  }
0x163d   : > { %v7991_v24 = vadd.f32 1.0, %v11667_v46  ;;  %v11669_v27 = vpop.eup %11668  ;;  %v14443_v46 = vld [vmem:[%s15345_s5 + $0x38] sm:$0xff] }
0x163e   : > { %11674 = vpow2.f32 %v7984_v35  ;;  %v7973_v60 = vsub.f32 0.0, %v7965_v36  ;;  %v7972_v8 = vsub.f32 0.0, %v7964_v63  ;;  %v8008_v38 = vmul.f32 %v11669_v27, %v14321_v29  ;;  %v11410_v35 = vld [vmem:[%s15369_s1 + $0x8] sm:$0xff]   ;;  %v8281_v27 = vld [vmem:[%s15344_s7 + $0x30] sm:$0xff] }
0x163f   : > { %11676 = vpow2.f32 %v7982_v20  ;;  %v11411_v20 = vld [vmem:[%s15369_s1 + $0x10] ss:$0 sps:$4 sm:$0xff]   ;;  %s15373_s1 = sld [smem:[#allocation41_spill]] }
0x1640   : > { %11678 = vrcp.f32 %v7991_v24  ;;  %v7988_v42 = vmul.f32 1.442695, %v7973_v60  ;;  %v7986_v55 = vmul.f32 1.442695, %v7972_v8  ;;  %8946 = vperm.xlu1 %10941, %v14277_v56   ;;  %v8277_v24 = vld [vmem:[%s15344_s7 + $0x10] sm:$0xff]  ;;  %v8279_v60 = vld [vmem:[%s15344_s7 + $0x20] sm:$0xff] }
0x1641   : > { %v11671_v18 = vpop.eup %11670  ;;  %v8283_v8 = vld [vmem:[%s15344_s7 + $0x40] sm:$0xff] }
0x1642   : > { %v8009_v11 = vmul.f32 %v11671_v18, %v14326_v13  ;;  %11680 = vpow2.f32 %v7988_v42  ;;  %v14461_v42 = vld [vmem:[%s15345_s5 + $0x40] sm:$0xff]  ;;  %v14471_v18 = vld [vmem:[%s15345_s5 + $0x48] sm:$0xff] }
0x1643   : > { %11682 = vpow2.f32 %v7986_v55  ;;  %v15370_v55 = vmov 3  }
0x1644   : > { %v8041_v4 = vpack.c.bf16 %v8009_v11, %v8008_v38  ;;  %10942 = vset.pattern.permute.xlu1 %v15367_v61  ;;  %v15371_v11 = vmov 4  }
0x1645   : > { %v11673_v59 = vpop.eup %11672  ;;  %8996 = vperm.xlu1 %10942, %v14277_v56  }
0x1646   : > { %v8006_v31 = vmul.f32 %v11673_v59, %v14331_v30  ;;  %v15372_v59 = vmov 5  }
0x1648   : > { %v11675_v62 = vpop.eup %11674 }
0x1649   : > { %v11677_v0 = vpop.eup %11676  ;;  %v7995_v58 = vadd.f32 1.0, %v11675_v62  ;;  %10943 = vset.pattern.permute.xlu1 %v15366_v3 }
0x164a   : > { %v11679_v51 = vpop.eup %11678  ;;  %v7994_v33 = vadd.f32 1.0, %v11677_v0  ;;  %8603 = vperm.xlu1 %10943, %v14383_v9  }
0x164b   : > { %v8007_v44 = vmul.f32 %v11679_v51, %v14338_v7  ;;  %11684 = vrcp.f32 %v7995_v58 }
0x164c   : > { %v11681_v47 = vpop.eup %11680  ;;  %11686 = vrcp.f32 %v7994_v33 }
0x164d   : > { %v11683_v32 = vpop.eup %11682  ;;  %v7997_v29 = vadd.f32 1.0, %v11681_v47  ;;  %v8040_v16 = vpack.c.bf16 %v8007_v44, %v8006_v31  ;;  %v8169_v44 = vpop.permute.xlu0 %8168 }
0x164e   : > { %v7996_v13 = vadd.f32 1.0, %v11683_v32  ;;  %10944 = vset.pattern.permute.xlu1 %v15347_v48 }
0x164f   : > { %11688 = vrcp.f32 %v7997_v29  ;;  %10588 = vmatprep.mubr.bf16.mxu1 %v8040_v16  ;;  %8660 = vperm.xlu1 %10944, %v14383_v9  }
0x1650   : > { %11690 = vrcp.f32 %v7996_v13  ;;  %10589 = vmatmul.mubr.bf16.vlgmr.msra.gmra.mrb[20].mxu1 %v8041_v4 }
0x1653   : > { %8664 = vperm.xlu1 %10944, %v14390_v40  }
0x1655   : > { %v11685_v34 = vpop.eup %11684 }
0x1656   : > { %v11687_v53 = vpop.eup %11686  ;;  %v8011_v5 = vmul.f32 %v11685_v34, %v7963_v50 }
0x1657   : > { %v8010_v41 = vmul.f32 %v11687_v53, %v7962_v21  ;;  %10945 = vset.pattern.permute.xlu1 %v15368_v37 }
0x1658   : > { %9056 = vperm.xlu1 %10945, %v14277_v56  }
0x1659   : > { %v11689_v43 = vpop.eup %11688  ;;  %v8042_v30 = vpack.c.bf16 %v8011_v5, %v8010_v41 }
0x165a   : > { %v11691_v19 = vpop.eup %11690  ;;  %v8013_v7 = vmul.f32 %v11689_v43, %v7965_v36  ;;  %v14437_v36 = vld [vmem:[%s15345_s5 + $0x30] sm:$0xff] }
0x165b   : > { %v8012_v10 = vmul.f32 %v11691_v19, %v7964_v63  ;;  %10592 = vmatprep.mubr.bf16.mxu1 %v8042_v30  ;;  %v8275_v63 = vld [vmem:[%s15344_s7] sm:$0xff]  ;;  %v8179_v30 = vpop.permute.xlu0 %8178 }
0x165c   : > { %10946 = vset.pattern.permute.xlu1 %v15348_v12  ;;  %8290 = vperm.xlu0 %10938, %v8275_v63  }
0x165d   : > { %v8043_v54 = vpack.c.bf16 %v8013_v7, %v8012_v10  ;;  %8720 = vperm.xlu1 %10946, %v14383_v9  }
0x165f   : > { %10593 = vmatmul.mubr.bf16.gmra.mrb[24].mxu1 %v8043_v54 }
0x1660   : > { %10652 = vmatprep.mubr.msk.bf16.mxu1 %vm11855_vm9, %v15346_v49  ;;  %8300 = vperm.xlu0 %10938, %v8277_v24  }
0x1661   : > { %10947 = vset.pattern.permute.xlu1 %v15365_v52 }
0x1662   : > { %8950 = vperm.xlu1 %10947, %v14383_v9  }
0x1664   : > { %8310 = vperm.xlu0 %10938, %v8279_v60  }
0x1666   : > { %8954 = vperm.xlu1 %10947, %v14390_v40  }
0x1668   : > { %8320 = vperm.xlu0 %10938, %v8281_v27  }
0x166a   : > { %10948 = vset.pattern.permute.xlu1 %v15367_v61 }
0x166b   : > { %9004 = vperm.xlu1 %10948, %v14390_v40  }
0x166c   : > { %8330 = vperm.xlu0 %10938, %v8283_v8  }
0x166f   : > { %10949 = vset.pattern.permute.xlu1 %v15366_v3 }
0x1670   : > { %8613 = vperm.xlu1 %10949, %v14403_v15   ;;  %8593 = vperm.xlu0 %10938, %v14372_v25  }
0x1674   : > { %10950 = vset.pattern.permute.xlu1 %v15347_v48  ;;  %8608 = vperm.xlu0 %10938, %v14390_v40  }
0x1675   : > { %8668 = vperm.xlu1 %10950, %v14403_v15  }
0x1678   : > { %8618 = vperm.xlu0 %10938, %v14410_v2  }
0x1679   : > { %8672 = vperm.xlu1 %10950, %v14410_v2  }
0x167c   : > { %8628 = vperm.xlu0 %10938, %v14443_v46  }
0x167d   : > { %10951 = vset.pattern.permute.xlu1 %v15368_v37 }
0x167e   : > { %9064 = vperm.xlu1 %10951, %v14390_v40  }
0x1680   : > { %8638 = vperm.xlu0 %10938, %v14471_v18  }
0x1682   : > { %10952 = vset.pattern.permute.xlu1 %v15348_v12 }
0x1683   : > { %8728 = vperm.xlu1 %10952, %v14403_v15  }
0x1684   : > { %10962 = vset.pattern.permute.xlu0 %v15348_v12 }
0x1685   : > { %8716 = vperm.xlu0 %10962, %v14277_v56  }
0x1687   : > { %10953 = vset.pattern.permute.xlu1 %v15365_v52 }
0x1688   : > { %8958 = vperm.xlu1 %10953, %v14403_v15  }
0x1689   : > { %8724 = vperm.xlu0 %10962, %v14390_v40  }
0x168c   : > { %8962 = vperm.xlu1 %10953, %v14410_v2  }
0x168d   : > { %8732 = vperm.xlu0 %10962, %v14410_v2  }
0x1690   : > { %10954 = vset.pattern.permute.xlu1 %v15367_v61 }
0x1691   : > { %9012 = vperm.xlu1 %10954, %v14410_v2   ;;  %8740 = vperm.xlu0 %10962, %v14443_v46  }
0x1695   : > { %10955 = vset.pattern.permute.xlu1 %v15366_v3  ;;  %8748 = vperm.xlu0 %10962, %v14471_v18  }
0x1696   : > { %8623 = vperm.xlu1 %10955, %v14437_v36  }
0x1699   : > { %10966 = vset.pattern.permute.xlu0 %v15367_v61 }
0x169a   : > { %10956 = vset.pattern.permute.xlu1 %v15347_v48  ;;  %8992 = vperm.xlu0 %10966, %v14372_v25  }
0x169b   : > { %8676 = vperm.xlu1 %10956, %v14437_v36  }
0x169e   : > { %9000 = vperm.xlu0 %10966, %v14383_v9  }
0x169f   : > { %8680 = vperm.xlu1 %10956, %v14443_v46  }
0x16a2   : > { %9008 = vperm.xlu0 %10966, %v14403_v15  }
0x16a3   : > { %10957 = vset.pattern.permute.xlu1 %v15368_v37 }
0x16a4   : > { %9072 = vperm.xlu1 %10957, %v14410_v2  }
0x16a6   : > { %9016 = vperm.xlu0 %10966, %v14437_v36  }
0x16a8   : > { %10958 = vset.pattern.permute.xlu1 %v15348_v12 }
0x16a9   : > { %8736 = vperm.xlu1 %10958, %v14437_v36  }
0x16aa   : > { %9024 = vperm.xlu0 %10966, %v14461_v42  }
0x16ad   : > { %10959 = vset.pattern.permute.xlu1 %v15365_v52 }
0x16ae   : > { %8966 = vperm.xlu1 %10959, %v14437_v36   ;;  %10968 = vset.pattern.permute.xlu0 %v15368_v37 }
0x16af   : > { %9052 = vperm.xlu0 %10968, %v14372_v25  }
0x16b2   : > { %8970 = vperm.xlu1 %10959, %v14443_v46  }
0x16b3   : > { %9060 = vperm.xlu0 %10968, %v14383_v9  }
0x16b6   : > { %10960 = vset.pattern.permute.xlu1 %v15367_v61 }
0x16b7   : > { %9020 = vperm.xlu1 %10960, %v14443_v46   ;;  %9068 = vperm.xlu0 %10968, %v14403_v15  }
0x16bb   : > { %10961 = vset.pattern.permute.xlu1 %v15366_v3  ;;  %9076 = vperm.xlu0 %10968, %v14437_v36  }
0x16bc   : > { %8633 = vperm.xlu1 %10961, %v14461_v42  }
0x16bf   : > { %9088 = vperm.xlu0 %10968, %v14471_v18  }
0x16c0   : > { %10963 = vset.pattern.permute.xlu1 %v15347_v48  ;;  %v8164_v48 = vpop.permute.xlu1 %8163 }
0x16c1   : > { %8684 = vperm.xlu1 %10963, %v14461_v42  }
0x16c3   : > { %10971 = vset.pattern.permute.xlu0 %v15370_v55 }
0x16c4   : > { %8772 = vperm.xlu0 %10971, %v14372_v25  }
0x16c5   : > { %8688 = vperm.xlu1 %10963, %v14471_v18  }
0x16c8   : > { %8780 = vperm.xlu0 %10971, %v14383_v9  }
0x16c9   : > { %10964 = vset.pattern.permute.xlu1 %v15368_v37 }
0x16ca   : > { %9080 = vperm.xlu1 %10964, %v14443_v46  }
0x16cc   : > { %8788 = vperm.xlu0 %10971, %v14403_v15  }
0x16ce   : > { %10965 = vset.pattern.permute.xlu1 %v15348_v12  ;;  %v8174_v12 = vpop.permute.xlu1 %8173 }
0x16cf   : > { %8744 = vperm.xlu1 %10965, %v14461_v42  }
0x16d0   : > { %8800 = vperm.xlu0 %10971, %v14443_v46  }
0x16d2   : > { %v14498_v38 = vpop.permute.xlu1 %8183 }
0x16d3   : > { %10967 = vset.pattern.permute.xlu1 %v15365_v52  ;;  %v8542_v52 = vld [vmem:[%s15373_s1 + $0x8] sm:$0xff] }
0x16d4   : > { %8974 = vperm.xlu1 %10967, %v14461_v42   ;;  %8804 = vperm.xlu0 %10971, %v14461_v42  }
0x16d6   : > { %v14503_v4 = vpop.permute.xlu1 %8295 }
0x16d8   : > { %8978 = vperm.xlu1 %10967, %v14471_v18   ;;  %10986 = vset.pattern.permute.xlu0 %v15371_v11 }
0x16d9   : > { %8826 = vperm.xlu0 %10986, %v14277_v56  }
0x16da   : > { %v14510_v62 = vpop.permute.xlu1 %8305 }
0x16dc   : > { %10969 = vset.pattern.permute.xlu1 %v15367_v61 }
0x16dd   : > { %9028 = vperm.xlu1 %10969, %v14471_v18   ;;  %8834 = vperm.xlu0 %10986, %v14390_v40  }
0x16de   : > { %v14516_v0 = vpop.permute.xlu1 %8315 }
0x16e1   : > { %10970 = vset.pattern.permute.xlu1 %v15368_v37  ;;  %8842 = vperm.xlu0 %10986, %v14410_v2  }
0x16e2   : > { %9084 = vperm.xlu1 %10970, %v14461_v42   ;;  %v14522_v58 = vpop.permute.xlu1 %8325 }
0x16e6   : > { %10972 = vset.pattern.permute.xlu1 %v15370_v55  ;;  %v14527_v51 = vpop.permute.xlu1 %8335 }
0x16e7   : > { %8776 = vperm.xlu1 %10972, %v14277_v56  }
0x16ea   : > { %v14534_v33 = vpop.permute.xlu1 %8598 }
0x16eb   : > { %10973 = vset.pattern.permute.xlu1 %v15371_v11 }
0x16ec   : > { %8822 = vperm.xlu1 %10973, %v14372_v25  }
0x16ee   : > { %v14538_v29 = vpop.permute.xlu1 %8656 }
0x16f0   : > { %10974 = vset.pattern.permute.xlu1 %v15372_v59 }
0x16f1   : > { %8882 = vperm.xlu1 %10974, %v14372_v25  }
0x16f2   : > { %v14546_v41 = vpop.permute.xlu1 %8712 }
0x16f5   : > { %8886 = vperm.xlu1 %10974, %v14277_v56  }
0x16f6   : > { %v14551_v61 = vpop.permute.xlu1 %8942 }
0x16f9   : > { %10975 = vset.pattern.permute.xlu1 %v15370_v55 }
0x16fa   : > { %8784 = vperm.xlu1 %10975, %v14390_v40  }
0x16fe   : > { %10976 = vset.pattern.permute.xlu1 %v15371_v11 }
0x16ff   : > { %8830 = vperm.xlu1 %10976, %v14383_v9  }
0x1703   : > { %10977 = vset.pattern.permute.xlu1 %v15372_v59 }
0x1704   : > { %8890 = vperm.xlu1 %10977, %v14383_v9  }
0x1708   : > { %8894 = vperm.xlu1 %10977, %v14390_v40   ;;  %v11414_v40 = vld [vmem:[%s15374_s2 + $0x10] sm:$0xff]  }
0x170c   : > { %10978 = vset.pattern.permute.xlu1 %v15370_v55 }
0x170d   : > { %8792 = vperm.xlu1 %10978, %v14410_v2  }
0x1711   : > { %10979 = vset.pattern.permute.xlu1 %v15371_v11 }
0x1712   : > { %8838 = vperm.xlu1 %10979, %v14403_v15  }
0x1716   : > { %10980 = vset.pattern.permute.xlu1 %v15372_v59 }
0x1717   : > { %8898 = vperm.xlu1 %10980, %v14403_v15  }
0x171b   : > { %8902 = vperm.xlu1 %10980, %v14410_v2  }
0x171f   : > { %10981 = vset.pattern.permute.xlu1 %v15366_v3 }
0x1720   : > { %9178 = vperm.xlu1 %10981, %v8542_v52  }
0x1723   : > { %v10590_v23 = vpop.f32.mrb[20].mxu1 }
0x1724   : > { %v8126_v28 = vpop.f32.mrb[21].mxu1  ;;  %10982 = vset.pattern.permute.xlu1 %v15370_v55 }
0x1725   : > { %v10591_v26 = vpop.f32.mrb[22].mxu1  ;;  %8796 = vperm.xlu1 %10982, %v14437_v36  }
0x1726   : > { %v8158_v50 = vpack.c.bf16 %v10591_v26, %v10590_v23  ;;  %v8129_v21 = vpop.f32.mrb[23].mxu1 }
0x1727   : > { %v8157_v6 = vpack.c.bf16 %v8129_v21, %v8126_v28 }
0x1729   : > { %10597 = vmatpush3.bf16.msra.mxu0 %v8157_v6  ;;  %v11412_v6 = vld [vmem:[%s15374_s2] sm:$0xff]   ;;  %10983 = vset.pattern.permute.xlu1 %v15371_v11 }
0x172a   : > { %10598 = vmatprep.subr.bf16.mxu0 %v15346_v49 }
0x172d   : > { %10599 = vmatpush3.bf16.msra.mxu0 %v8158_v50  ;;  %v14559_v50 = vpop.permute.xlu1 %8946  ;;  %8846 = vperm.xlu1 %10983, %v14437_v36  }
0x172e   : > { %10600 = vmatprep.subr.bf16.mxu0 %v15346_v49 }
0x1731   : > { %v14570_v56 = vpop.permute.xlu1 %8996  ;;  %8850 = vperm.xlu1 %10983, %v14443_v46  }
0x1732   : > { %v10594_v45 = vpop.f32.mrb[24].mxu1 }
0x1733   : > { %v8142_v17 = vpop.f32.mrb[25].mxu1 }
0x1734   : > { %v10595_v39 = vpop.f32.mrb[26].mxu1 }
0x1735   : > { %v8160_v14 = vpack.c.bf16 %v10595_v39, %v10594_v45  ;;  %v8145_v1 = vpop.f32.mrb[27].mxu1  ;;  %v11413_v45 = vld [vmem:[%s15374_s2 + $0x8] sm:$0xff]   ;;  %10984 = vset.pattern.permute.xlu1 %v15372_v59  ;;  %v8543_v39 = vld [vmem:[%s15373_s1 + $0x10] sm:$0xff] }
0x1736   : > { %v8159_v22 = vpack.c.bf16 %v8145_v1, %v8142_v17  ;;  %v14576_v17 = vpop.permute.xlu1 %8603  ;;  %8910 = vperm.xlu1 %10984, %v14443_v46   ;;  %v11415_v1 = vld [vmem:[%s15374_s2 + $0x18] sm:$0xff]  }
0x1738   : > { %10601 = vmatpush3.bf16.msra.mxu0 %v8159_v22 }
0x1739   : > { %10602 = vmatprep.subr.bf16.mxu0 %v15346_v49 }
0x173a   : > { %10985 = vset.pattern.permute.xlu1 %v15366_v3 }
0x173c   : > { %10603 = vmatpush3.bf16.msra.mxu0 %v8160_v14  ;;  %v14585_v14 = vpop.permute.xlu1 %8660  ;;  %9183 = vperm.xlu1 %10985, %v8543_v39  }
0x173d   : > { %10616 = vmatprep.subr.bf16.mxu0 %v15346_v49 }
0x173f   : > { %10605 = vmatmul.mubr.msk.bf16.vlgmr.msra.gmra.mrb[100].mxu0 %vm8199_vm15, %v11409_v57  ;;  %v11416_v57 = vld [vmem:[%s15374_s2 + $0x20] sm:$0xff]   ;;  %s15400_s2 = sld [smem:[#allocation6_spill]] }
0x1740   : > { %10608 = vmatprep.mubr.msk.bf16.mxu0 %vm11855_vm9, %v15346_v49  ;;  %v14591_v2 = vpop.permute.xlu1 %8664  ;;  %10987 = vset.pattern.permute.xlu1 %v15370_v55 }
0x1741   : > { %8808 = vperm.xlu1 %10987, %v14471_v18  }
0x1744   : > { %v14600_v22 = vpop.permute.xlu1 %9056 }
0x1745   : > { %10988 = vset.pattern.permute.xlu1 %v15371_v11 }
0x1746   : > { %8854 = vperm.xlu1 %10988, %v14461_v42  }
0x1747   : > { %10609 = vmatmul.mubr.msk.bf16.gmra.mrb[104].mxu0 %vm8199_vm15, %v11410_v35 }
0x1748   : > { %10612 = vmatprep.mubr.msk.bf16.mxu0 %vm11855_vm9, %v15346_v49  ;;  %v14606_v35 = vpop.permute.xlu1 %8720 }
0x174a   : > { %10991 = vset.pattern.permute.xlu1 %v15372_v59 }
0x174f   : > { %10613 = vmatmul.mubr.msk.bf16.gmra.mrb[108].mxu0 %vm8199_vm15, %v11411_v20  ;;  %v14608_v20 = vpop.permute.xlu1 %8950 }
0x1750   : > { %10622 = vmatprep.mubr.msk.bf16.mxu0 %vm11855_vm9, %v15346_v49 }
0x1753   : > { %v14610_v46 = vpop.permute.xlu1 %8954 }
0x1754   : > { %15375 = vst [vmem:[#allocation51_spill] sm:$0xff] %v14610_v46 }
0x1757   : > { %v14612_v63 = vpop.permute.xlu1 %9004 }
0x1758   : > { %15376 = vst [vmem:[#allocation48_spill] sm:$0xff] %v14612_v63 }
0x175b   : > { %v14614_v24 = vpop.permute.xlu1 %8613 }
0x175f   : > { %v14616_v60 = vpop.permute.xlu1 %8668 }
0x1763   : > { %v14618_v27 = vpop.permute.xlu1 %8672 }
0x1764   : > { %15377 = vst [vmem:[#allocation47_spill] sm:$0xff] %v14618_v27 }
0x1767   : > { %v14620_v8 = vpop.permute.xlu1 %9064 }
0x1768   : > { %15378 = vst [vmem:[#allocation65_spill] sm:$0xff] %v14620_v8 }
0x1812   : > { %v8243_v31 = vpop.f32.mrb[100].mxu0 }
0x1813   : > { %v10606_v47 = vpop.f32.mrb[101].mxu0  ;;  %v8244_v16 = vadd.f32 %v8243_v31, %v8164_v48  ;;  %v14622_v48 = vpop.permute.xlu1 %8728 }
0x1814   : > { %v8246_v32 = vpop.f32.mrb[102].mxu0 }
0x1815   : > { %v8247_v13 = vadd.f32 %v8246_v32, %v8169_v44  ;;  %v10607_v34 = vpop.f32.mrb[103].mxu0  ;;  %v14638_v32 = vpop.permute.xlu0 %8652 }
0x1817   : > { %v8285_v53 = vpack.c.bf16 %v8247_v13, %v8244_v16 }
0x1819   : > { %10617 = vmatpush3.bf16.msra.mxu0 %v8285_v53  ;;  %v8291_v13 = vpop.permute.xlu0 %8290 }
0x181a   : > { %v8251_v5 = vpop.f32.mrb[104].mxu0  ;;  %10618 = vmatprep.subr.bf16.mxu0 %v15346_v49 }
0x181b   : > { %v10610_v43 = vpop.f32.mrb[105].mxu0  ;;  %v8252_v7 = vadd.f32 %v8251_v5, %v8174_v12  ;;  %v14624_v12 = vpop.permute.xlu1 %8958 }
0x181c   : > { %v8254_v19 = vpop.f32.mrb[106].mxu0 }
0x181d   : > { %v8255_v10 = vadd.f32 %v8254_v19, %v8179_v30  ;;  %v10611_v54 = vpop.f32.mrb[107].mxu0  ;;  %v8301_v53 = vpop.permute.xlu0 %8300 }
0x181f   : > { %v8286_v25 = vpack.c.bf16 %v8255_v10, %v8252_v7  ;;  %v14626_v55 = vpop.permute.xlu1 %8962 }
0x1820   : > { %15379 = vst [vmem:[#allocation52_spill] sm:$0xff] %v14626_v55  ;;  %v8541_v55 = vld [vmem:[%s15373_s1] sm:$0xff] }
0x1821   : > { %10619 = vmatpush3.bf16.msra.mxu0 %v8286_v25  ;;  %v8311_v43 = vpop.permute.xlu0 %8310 }
0x1822   : > { %v8259_v9 = vpop.f32.mrb[108].mxu0  ;;  %10620 = vmatprep.subr.bf16.mxu0 %v15346_v49 }
0x1823   : > { %v8260_v37 = vadd.f32 %v8259_v9, %v14498_v38  ;;  %v10614_v15 = vpop.f32.mrb[109].mxu0  ;;  %v14628_v38 = vpop.permute.xlu1 %9012 }
0x1824   : > { %v8262_v23 = vpop.f32.mrb[110].mxu0  ;;  %15380 = vst [vmem:[#allocation64_spill] sm:$0xff] %v14628_v38 }
0x1825   : > { %v8287_v28 = vpack.c.bf16 %v8260_v37, %v8260_v37  ;;  %v10615_v26 = vpop.f32.mrb[111].mxu0  ;;  %v8321_v19 = vpop.permute.xlu0 %8320 }
0x1827   : > { %v8380_v21 = vsel %vm4396_vm7, %v8287_v28, 0  ;;  %v14630_v11 = vpop.permute.xlu1 %8623 }
0x1828   : > { %10621 = vmatpush3.bf16.msra.mxu0 %v8380_v21  ;;  %15381 = vst [vmem:[#allocation57_spill] sm:$0xff] %v14630_v11 }
0x1829   : > { %v14650_v10 = vpop.permute.xlu0 %8330 }
0x182b   : > { %10623 = vmatmul.mubr.msk.bf16.vlgmr.msra.gmra.mrb[112].mxu0 %vm8363_vm0, %v11412_v6  ;;  %v14632_v31 = vpop.permute.xlu1 %8676 }
0x182c   : > { %10626 = vmatprep.mubr.msk.bf16.mxu0 %vm11855_vm9, %v15346_v49  ;;  %15382 = vst [vmem:[#allocation53_spill] sm:$0xff] %v14632_v31 }
0x182d   : > { %v14654_v25 = vpop.permute.xlu0 %8593 }
0x182f   : > { %v14634_v44 = vpop.permute.xlu1 %8680 }
0x1830   : > { %15383 = vst [vmem:[#allocation54_spill] sm:$0xff] %v14634_v44 }
0x1831   : > { %v14658_v9 = vpop.permute.xlu0 %8608 }
0x1833   : > { %10627 = vmatmul.mubr.msk.bf16.gmra.mrb[116].mxu0 %vm8363_vm0, %v11413_v45  ;;  %v14636_v47 = vpop.permute.xlu1 %9072 }
0x1834   : > { %10630 = vmatprep.mubr.msk.bf16.mxu0 %vm11855_vm9, %v15346_v49  ;;  %15384 = vst [vmem:[#allocation56_spill] sm:$0xff] %v14636_v47 }
0x1835   : > { %v14662_v15 = vpop.permute.xlu0 %8618 }
0x1836   : > { %15393 = vst [vmem:[#allocation60_spill] sm:$0xff] %v14662_v15 }
0x1837   : > { %v14640_v16 = vpop.permute.xlu1 %8736 }
0x1838   : > { %15385 = vst [vmem:[#allocation50_spill] sm:$0xff] %v14640_v16 }
0x183b   : > { %10631 = vmatmul.mubr.msk.bf16.gmra.mrb[120].mxu0 %vm8363_vm0, %v11414_v40  ;;  %v14642_v34 = vpop.permute.xlu1 %8966 }
0x183c   : > { %10634 = vmatprep.mubr.msk.bf16.mxu0 %vm11855_vm9, %v15346_v49  ;;  %15386 = vst [vmem:[#allocation49_spill] sm:$0xff] %v14642_v34 }
0x183f   : > { %v14644_v5 = vpop.permute.xlu1 %8970 }
0x1840   : > { %15387 = vst [vmem:[#allocation62_spill] sm:$0xff] %v14644_v5 }
0x1843   : > { %10635 = vmatmul.mubr.msk.bf16.gmra.mrb[124].mxu0 %vm8363_vm0, %v11415_v1  ;;  %v14646_v30 = vpop.permute.xlu1 %9020 }
0x1844   : > { %10638 = vmatprep.mubr.msk.bf16.mxu0 %vm11855_vm9, %v15346_v49  ;;  %15388 = vst [vmem:[#allocation55_spill] sm:$0xff] %v14646_v30  ;;  %v14673_v49 = vpop.permute.xlu0 %8628 }
0x1845   : > { %15395 = vst [vmem:[#allocation67_spill] sm:$0xff] %v14673_v49 }
0x1847   : > { %v14648_v7 = vpop.permute.xlu1 %8633 }
0x1848   : > { %15389 = vst [vmem:[#allocation58_spill] sm:$0xff] %v14648_v7 }
0x184b   : > { %10639 = vmatmul.mubr.msk.bf16.gmra.mrb[128].mxu0 %vm8363_vm0, %v11416_v57  ;;  %v14652_v54 = vpop.permute.xlu1 %8684 }
0x184c   : > { %15390 = vst [vmem:[#allocation59_spill] sm:$0xff] %v14652_v54 }
0x184f   : > { %v14656_v52 = vpop.permute.xlu1 %8688 }
0x1850   : > { %15391 = vst [vmem:[#allocation61_spill] sm:$0xff] %v14656_v52 }
0x1853   : > { %v14660_v37 = vpop.permute.xlu1 %9080 }
0x1854   : > { %15392 = vst [vmem:[#allocation63_spill] sm:$0xff] %v14660_v37 }
0x1857   : > { %v14664_v28 = vpop.permute.xlu1 %8744 }
0x1858   : > { %15394 = vst [vmem:[#allocation66_spill] sm:$0xff] %v14664_v28 }
0x185b   : > { %v14675_v52 = vpop.permute.xlu1 %8974 }
0x185c   : > { %15396 = vst [vmem:[#allocation68_spill] sm:$0xff] %v14675_v52 }
0x18fe   : > { %v8416_v23 = vpop.f32.mrb[112].mxu0 }
0x18ff   : > { %v14666_v26 = vadd.f32 %v8416_v23, %v8291_v13  ;;  %v10624_v21 = vpop.f32.mrb[113].mxu0 }
0x1900   : > { %v8419_v6 = vpop.f32.mrb[114].mxu0 }
0x1901   : > { %v8455_v45 = vsub.f32 0.0, %v14666_v26  ;;  %v14670_v40 = vadd.f32 %v8419_v6, %v14503_v4  ;;  %v10625_v39 = vpop.f32.mrb[115].mxu0 }
0x1902   : > { %v14685_v39 = vpop.permute.xlu1 %8978 }
0x1903   : > { %v8465_v1 = vmul.f32 1.442695, %v8455_v45  ;;  %v8456_v57 = vsub.f32 0.0, %v14670_v40  ;;  %v14683_v45 = vpop.permute.xlu0 %8638  ;;  %15398 = vst [vmem:[#allocation70_spill] sm:$0xff] %v14685_v39 }
0x1904   : > { %15397 = vst [vmem:[#allocation69_spill] sm:$0xff] %v14683_v45 }
0x1905   : > { %11692 = vpow2.f32 %v8465_v1  ;;  %v8467_v37 = vmul.f32 1.442695, %v8456_v57 }
0x1906   : > { %v8424_v30 = vpop.f32.mrb[116].mxu0  ;;  %v14692_v28 = vpop.permute.xlu1 %9028 }
0x1907   : > { %11694 = vpow2.f32 %v8467_v37  ;;  %v14677_v13 = vadd.f32 %v8424_v30, %v8301_v53  ;;  %v10628_v23 = vpop.f32.mrb[117].mxu0  ;;  %v14690_v52 = vpop.permute.xlu0 %8716  ;;  %15399 = vst [vmem:[#allocation71_spill] sm:$0xff] %v14692_v28 }
0x1908   : > { %v8427_v21 = vpop.f32.mrb[118].mxu0 }
0x1909   : > { %v8457_v5 = vsub.f32 0.0, %v14677_v13  ;;  %v14681_v4 = vadd.f32 %v8427_v21, %v14510_v62  ;;  %v10629_v6 = vpop.f32.mrb[119].mxu0 }
0x190a   : > { %v14701_v28 = vpop.permute.xlu1 %9084 }
0x190b   : > { %v8469_v44 = vmul.f32 1.442695, %v8457_v5  ;;  %v8458_v1 = vsub.f32 0.0, %v14681_v4  ;;  %15401 = vst [vmem:[#allocation72_spill] sm:$0xff] %v14701_v28  ;;  %v14711_v28 = vld [vmem:[%s15400_s2] ss:$0 sm:$0xff] }
0x190c   : > { %s15458_s2 = sld [smem:[#allocation43_spill]] }
0x190d   : > { %11696 = vpow2.f32 %v8469_v44  ;;  %v8471_v57 = vmul.f32 1.442695, %v8458_v1 }
0x190e   : > { %v8432_v37 = vpop.f32.mrb[120].mxu0 }
0x190f   : > { %v11693_v53 = vpop.eup %11692  ;;  %11698 = vpow2.f32 %v8471_v57  ;;  %v14688_v30 = vadd.f32 %v8432_v37, %v8311_v43  ;;  %v10632_v23 = vpop.f32.mrb[121].mxu0 }
0x1910   : > { %v8485_v62 = vadd.f32 1.0, %v11693_v53  ;;  %v8435_v21 = vpop.f32.mrb[122].mxu0  ;;  %v14699_v37 = vpop.permute.xlu0 %8724 }
0x1911   : > { %v11695_v6 = vpop.eup %11694  ;;  %v8459_v39 = vsub.f32 0.0, %v14688_v30  ;;  %v14696_v5 = vadd.f32 %v8435_v21, %v14516_v0  ;;  %v10633_v44 = vpop.f32.mrb[123].mxu0 }
0x1912   : > { %11700 = vrcp.f32 %v8485_v62  ;;  %v8486_v1 = vadd.f32 1.0, %v11695_v6 }
0x1913   : > { %v8473_v45 = vmul.f32 1.442695, %v8459_v39  ;;  %v8460_v43 = vsub.f32 0.0, %v14696_v5 }
0x1914   : > { %11702 = vrcp.f32 %v8486_v1 }
0x1915   : > { %11704 = vpow2.f32 %v8473_v45  ;;  %v8475_v57 = vmul.f32 1.442695, %v8460_v43 }
0x1916   : > { %v8440_v53 = vpop.f32.mrb[124].mxu0 }
0x1917   : > { %v11697_v23 = vpop.eup %11696  ;;  %11706 = vpow2.f32 %v8475_v57  ;;  %v14703_v49 = vadd.f32 %v8440_v53, %v8321_v19  ;;  %v10636_v0 = vpop.f32.mrb[125].mxu0 }
0x1918   : > { %v8487_v21 = vadd.f32 1.0, %v11697_v23  ;;  %v8443_v62 = vpop.f32.mrb[126].mxu0  ;;  %v14713_v19 = vpop.permute.xlu0 %8732 }
0x1919   : > { %v11699_v6 = vpop.eup %11698  ;;  %v8461_v39 = vsub.f32 0.0, %v14703_v49  ;;  %v14707_v44 = vadd.f32 %v8443_v62, %v14522_v58  ;;  %v10637_v45 = vpop.f32.mrb[127].mxu0  ;;  %15402 = vst [vmem:[#allocation73_spill] sm:$0xff] %v14713_v19  ;;  %v8547_v19 = vld [vmem:[%s15373_s1 + $0x30] sm:$0xff] }
0x191a   : > { %11708 = vrcp.f32 %v8487_v21  ;;  %v8488_v1 = vadd.f32 1.0, %v11699_v6  ;;  %v14715_v57 = vpop.permute.xlu1 %8776 }
0x191b   : > { %v8477_v43 = vmul.f32 1.442695, %v8461_v39  ;;  %v8462_v54 = vsub.f32 0.0, %v14707_v44 }
0x191c   : > { %v11701_v47 = vpop.eup %11700  ;;  %11710 = vrcp.f32 %v8488_v1 }
0x191d   : > { %v8505_v53 = vmul.f32 %v11701_v47, %v14666_v26  ;;  %11712 = vpow2.f32 %v8477_v43  ;;  %v8479_v23 = vmul.f32 1.442695, %v8462_v54 }
0x191e   : > { %v11703_v58 = vpop.eup %11702  ;;  %v8448_v0 = vpop.f32.mrb[128].mxu0 }
0x191f   : > { %v11705_v62 = vpop.eup %11704  ;;  %v14719_v21 = vmul.f32 %v14711_v28, %v8505_v53  ;;  %v8506_v6 = vmul.f32 %v11703_v58, %v14670_v40  ;;  %11714 = vpow2.f32 %v8479_v23  ;;  %v14723_v39 = vadd.f32 %v8448_v0, %v14650_v10  ;;  %v10640_v45 = vpop.f32.mrb[129].mxu0 }
0x1920   : > { %v8489_v1 = vadd.f32 1.0, %v11705_v62  ;;  %v8451_v38 = vpop.f32.mrb[130].mxu0  ;;  %v14734_v10 = vpop.permute.xlu0 %8740 }
0x1921   : > { %v11707_v7 = vpop.eup %11706  ;;  %v14726_v47 = vmul.f32 %v14711_v28, %v8506_v6  ;;  %v8463_v54 = vsub.f32 0.0, %v14723_v39  ;;  %v14730_v26 = vadd.f32 %v8451_v38, %v14527_v51  ;;  %8551 = vrot.lane.b32.xlu1 %v14719_v21, %s15295_s22  ;;  %v10641_v40 = vpop.f32.mrb[131].mxu0  ;;  %15403 = vst [vmem:[#allocation74_spill] sm:$0xff] %v14734_v10 }
0x1922   : > { %11716 = vrcp.f32 %v8489_v1  ;;  %v8490_v43 = vadd.f32 1.0, %v11707_v7  ;;  %v14736_v53 = vpop.permute.xlu1 %8822 }
0x1923   : > { %v8481_v23 = vmul.f32 1.442695, %v8463_v54  ;;  %v8464_v58 = vsub.f32 0.0, %v14730_v26  ;;  %8553 = vrot.lane.b32.xlu0 %v14726_v47, %s15295_s22  ;;  %v8692_v46 = vmul.f32 %v14538_v29, %v14726_v47 }
0x1924   : > { %v11709_v0 = vpop.eup %11708  ;;  %11718 = vrcp.f32 %v8490_v43  ;;  %v14750_v40 = vpop.permute.xlu0 %8748 }
0x1925   : > { %v8507_v51 = vmul.f32 %v11709_v0, %v14677_v13  ;;  %11720 = vpow2.f32 %v8481_v23  ;;  %v8483_v38 = vmul.f32 1.442695, %v8464_v58  ;;  %8571 = vrot.lane.b32.xlu1 %v14719_v21, %s15296_s0  ;;  %15404 = vst [vmem:[#allocation75_spill] sm:$0xff] %v14750_v40 }
0x1926   : > { %v11711_v7 = vpop.eup %11710  ;;  %v14752_v13 = vpop.permute.xlu1 %8882 }
0x1927   : > { %v11713_v62 = vpop.eup %11712  ;;  %v14745_v6 = vmul.f32 %v14711_v28, %v8507_v51  ;;  %v8508_v45 = vmul.f32 %v11711_v7, %v14681_v4  ;;  %11722 = vpow2.f32 %v8483_v38  ;;  %8573 = vrot.lane.b32.xlu0 %v14726_v47, %s15296_s0 }
0x1928   : > { %v8491_v1 = vadd.f32 1.0, %v11713_v62  ;;  %v14764_v38 = vpop.permute.xlu0 %8992 }
0x1929   : > { %v11715_v54 = vpop.eup %11714  ;;  %v14755_v43 = vmul.f32 %v14711_v28, %v8508_v45  ;;  %8555 = vrot.lane.b32.xlu1 %v14745_v6, %s15295_s22 }
0x192a   : > { %11724 = vrcp.f32 %v8491_v1  ;;  %v8492_v23 = vadd.f32 1.0, %v11715_v54  ;;  %v14766_v7 = vpop.permute.xlu1 %8886 }
0x192b   : > { %8557 = vrot.lane.b32.xlu0 %v14755_v43, %s15295_s22 }
0x192c   : > { %v11717_v4 = vpop.eup %11716  ;;  %11726 = vrcp.f32 %v8492_v23 }
0x192d   : > { %v8509_v58 = vmul.f32 %v11717_v4, %v14688_v30  ;;  %8575 = vrot.lane.b32.xlu1 %v14745_v6, %s15296_s0 }
0x192e   : > { %v11719_v0 = vpop.eup %11718 }
0x192f   : > { %v11721_v51 = vpop.eup %11720  ;;  %v14769_v62 = vmul.f32 %v14711_v28, %v8509_v58  ;;  %v8510_v45 = vmul.f32 %v11719_v0, %v14696_v5  ;;  %8577 = vrot.lane.b32.xlu0 %v14755_v43, %s15296_s0  ;;  %v14781_v58 = vpop.permute.xlu0 %9000 }
0x1930   : > { %v8493_v1 = vadd.f32 1.0, %v11721_v51  ;;  %v14783_v5 = vpop.permute.xlu1 %8784 }
0x1931   : > { %v11723_v54 = vpop.eup %11722  ;;  %v14775_v30 = vmul.f32 %v14711_v28, %v8510_v45  ;;  %8559 = vrot.lane.b32.xlu1 %v14769_v62, %s15295_s22 }
0x1932   : > { %11728 = vrcp.f32 %v8493_v1  ;;  %v8494_v23 = vadd.f32 1.0, %v11723_v54 }
0x1933   : > { %8561 = vrot.lane.b32.xlu0 %v14775_v30, %s15295_s22 }
0x1934   : > { %v11725_v4 = vpop.eup %11724  ;;  %11730 = vrcp.f32 %v8494_v23 }
0x1935   : > { %v8511_v0 = vmul.f32 %v11725_v4, %v14703_v49  ;;  %8579 = vrot.lane.b32.xlu1 %v14769_v62, %s15296_s0  ;;  %v14799_v49 = vpop.permute.xlu0 %9008  ;;  %v14801_v4 = vpop.permute.xlu1 %8830 }
0x1936   : > { %v11727_v51 = vpop.eup %11726  ;;  %v8863_v29 = vmul.f32 %v14801_v4, %v14745_v6 }
0x1937   : > { %v14789_v45 = vmul.f32 %v14711_v28, %v8511_v0  ;;  %v8512_v1 = vmul.f32 %v11727_v51, %v14707_v44  ;;  %8581 = vrot.lane.b32.xlu0 %v14775_v30, %s15296_s0 }
0x1939   : > { %15405 = vst [vmem:[#allocation76_spill] sm:$0xff] %v14789_v45  ;;  %v14795_v54 = vmul.f32 %v14711_v28, %v8512_v1  ;;  %8563 = vrot.lane.b32.xlu1 %v14789_v45, %s15295_s22  ;;  %v14811_v1 = vpop.permute.xlu0 %9016  ;;  %v14813_v40 = vpop.permute.xlu1 %8890 }
0x193a   : > { %15408 = vst [vmem:[#allocation79_spill] sm:$0xff] %v14811_v1 }
0x193b   : > { %15406 = vst [vmem:[#allocation77_spill] sm:$0xff] %v14795_v54  ;;  %8565 = vrot.lane.b32.xlu0 %v14795_v54, %s15295_s22 }
0x193c   : > { %v11729_v23 = vpop.eup %11728 }
0x193d   : > { %v8513_v0 = vmul.f32 %v11729_v23, %v14723_v39  ;;  %8583 = vrot.lane.b32.xlu1 %v14789_v45, %s15296_s0  ;;  %v14823_v23 = vpop.permute.xlu0 %9024 }
0x193e   : > { %v11731_v51 = vpop.eup %11730  ;;  %15409 = vst [vmem:[#allocation80_spill] sm:$0xff] %v14823_v23 }
0x193f   : > { %v14809_v44 = vmul.f32 %v14711_v28, %v8513_v0  ;;  %v8514_v39 = vmul.f32 %v11731_v51, %v14730_v26  ;;  %v14825_v0 = vpop.permute.xlu1 %8894 }
0x1941   : > { %15407 = vst [vmem:[#allocation78_spill] sm:$0xff] %v14809_v44  ;;  %8567 = vrot.lane.b32.xlu0 %v14809_v44, %s15295_s22  ;;  %8585 = vrot.lane.b32.xlu1 %v14795_v54, %s15296_s0  ;;  %v14828_v10 = vmul.f32 %v14711_v28, %v8514_v39  ;;  %v14834_v26 = vpop.permute.xlu0 %9052  ;;  %v8545_v28 = vld [vmem:[%s15373_s1 + $0x20] sm:$0xff] }
0x1943   : > { %15410 = vst [vmem:[#allocation81_spill] sm:$0xff] %v14828_v10  ;;  %v14836_v51 = vpop.permute.xlu1 %8792 }
0x1945   : > { %8587 = vrot.lane.b32.xlu0 %v14809_v44, %s15296_s0  ;;  %8918 = vperm.xlu1 %10991, %v14471_v18   ;;  %v14845_v39 = vpop.permute.xlu0 %9060 }
0x1947   : > { %v14847_v23 = vpop.permute.xlu1 %8838 }
0x1949   : > { %8858 = vperm.xlu0 %10986, %v14471_v18   ;;  %8569 = vrot.lane.b32.xlu1 %v14828_v10, %s15295_s22  ;;  %v8548_v18 = vld [vmem:[%s15373_s1 + $0x38] sm:$0xff]  ;;  %s11862_s22 = smov 125  }
0x194a   : > { %10992 = vset.pattern.permute.xlu1 %v15366_v3 }
0x194b   : > { %v14855_v1 = vpop.permute.xlu1 %8898 }
0x194d   : > { %10989 = vset.pattern.permute.xlu0 %v15372_v59  ;;  %8589 = vrot.lane.b32.xlu1 %v14828_v10, %s15296_s0  ;;  %v8550_v59 = vld [vmem:[%s15373_s1 + $0x48] sm:$0xff]  ;;  %v8544_v10 = vld [vmem:[%s15373_s1 + $0x18] sm:$0xff]  ;;  %s11863_s0 = smov 3  }
0x194e   : > { %8906 = vperm.xlu0 %10989, %v14437_v36   ;;  %v14853_v36 = vpop.permute.xlu0 %9068 }
0x194f   : > { %v14860_v44 = vpop.permute.xlu1 %8902 }
0x1950   : > { %15412 = vst [vmem:[#allocation83_spill] sm:$0xff] %v14860_v44 }
0x1951   : > { %9193 = vperm.xlu1 %10992, %v8545_v28  }
0x1952   : > { %8914 = vperm.xlu0 %10989, %v14461_v42   ;;  %v8546_v42 = vld [vmem:[%s15373_s1 + $0x28] sm:$0xff]  ;;  %v14858_v28 = vpop.permute.xlu0 %9076 }
0x1953   : > { %15411 = vst [vmem:[#allocation82_spill] sm:$0xff] %v14858_v28 }
0x1955   : > { %9208 = vperm.xlu1 %10992, %v8548_v18   ;;  %v8549_v18 = vld [vmem:[%s15373_s1 + $0x40] sm:$0xff]  ;;  %s10189_s1 = sshll.u32 %s15477_s16, 6 }
0x1956   : > { %10990 = vset.pattern.permute.xlu0 %v15366_v3  ;;  %v14864_v27 = vpop.permute.xlu0 %9088  ;;  %v14866_v3 = vpop.permute.xlu1 %9178 }
0x1957   : > { %9173 = vperm.xlu0 %10990, %v8541_v55   ;;  %15413 = vst [vmem:[#allocation84_spill] sm:$0xff] %v14864_v27  ;;  %15414 = vst [vmem:[#allocation85_spill] sm:$0xff] %v14866_v3 }
0x1959   : > { %9218 = vperm.xlu1 %10992, %v8550_v59  }
0x195a   : > { %v8773_v55 = vpop.permute.xlu0 %8772  ;;  %v14868_v34 = vpop.permute.xlu1 %8796 }
0x195b   : > { %9188 = vperm.xlu0 %10990, %v8544_v10   ;;  %15415 = vst [vmem:[#allocation86_spill] sm:$0xff] %v14868_v34 }
0x195e   : > { %v8781_v16 = vpop.permute.xlu0 %8780  ;;  %v14870_v59 = vpop.permute.xlu1 %8846 }
0x195f   : > { %9198 = vperm.xlu0 %10990, %v8546_v42   ;;  %15416 = vst [vmem:[#allocation87_spill] sm:$0xff] %v14870_v59 }
0x1962   : > { %v14872_v10 = vpop.permute.xlu0 %8788  ;;  %v14874_v28 = vpop.permute.xlu1 %8850 }
0x1963   : > { %9203 = vperm.xlu0 %10990, %v8547_v19   ;;  %15417 = vst [vmem:[#allocation88_spill] sm:$0xff] %v14874_v28 }
0x1966   : > { %v14876_v15 = vpop.permute.xlu0 %8800  ;;  %v14878_v42 = vpop.permute.xlu1 %8910 }
0x1967   : > { %9213 = vperm.xlu0 %10990, %v8549_v18   ;;  %15418 = vst [vmem:[#allocation89_spill] sm:$0xff] %v14876_v15  ;;  %15419 = vst [vmem:[#allocation90_spill] sm:$0xff] %v14878_v42  ;;  %v8691_v42 = vmul.f32 %v14638_v32, %v14719_v21 }
0x196a   : > { %v14880_v19 = vpop.permute.xlu0 %8804  ;;  %v14882_v27 = vpop.permute.xlu1 %9183 }
0x196b   : > { %15420 = vst [vmem:[#allocation91_spill] sm:$0xff] %v14880_v19  ;;  %15421 = vst [vmem:[#allocation92_spill] sm:$0xff] %v14882_v27  ;;  %v9031_v27 = vmul.f32 %v14764_v38, %v14719_v21 }
0x196e   : > { %v8827_v3 = vpop.permute.xlu0 %8826  ;;  %v14884_v18 = vpop.permute.xlu1 %8808 }
0x196f   : > { %15422 = vst [vmem:[#allocation93_spill] sm:$0xff] %v14884_v18  ;;  %v8861_v18 = vmul.f32 %v14736_v53, %v14719_v21  ;;  %v8862_v45 = vmul.f32 %v8827_v3, %v14726_v47 }
0x1972   : > { %v8835_v8 = vpop.permute.xlu0 %8834  ;;  %v14886_v54 = vpop.permute.xlu1 %8854 }
0x1973   : > { %15423 = vst [vmem:[#allocation94_spill] sm:$0xff] %v14886_v54 }
0x1976   : > { %v14888_v31 = vpop.permute.xlu0 %8842 }
0x1993   : > { %v8552_v63 = vpop.permute.xlu1 %8551 }
0x1994   : > { %v8641_v59 = vmul.f32 %v14654_v25, %v8552_v63  ;;  %v8811_v28 = vmul.f32 %v8773_v55, %v8552_v63  ;;  %v8981_v15 = vmul.f32 %v14551_v61, %v8552_v63 }
0x1995   : > { %v8554_v19 = vpop.permute.xlu0 %8553 }
0x1996   : > { %v8812_v54 = vmul.f32 %v14715_v57, %v8554_v19  ;;  %v8701_v34 = vadd.f32 %v8691_v42, %v8641_v59  ;;  %v9041_v11 = vadd.f32 %v9031_v27, %v8981_v15  ;;  %v8871_v55 = vadd.f32 %v8861_v18, %v8811_v28 }
0x1997   : > { %v8572_v25 = vpop.permute.xlu1 %8571  ;;  %v8642_v61 = vmul.f32 %v14534_v33, %v8554_v19  ;;  %v8982_v15 = vmul.f32 %v14559_v50, %v8554_v19 }
0x1998   : > { %v8751_v63 = vmul.f32 %v14546_v41, %v8572_v25  ;;  %v8921_v32 = vmul.f32 %v14752_v13, %v8572_v25  ;;  %v9091_v38 = vmul.f32 %v14834_v26, %v8572_v25  ;;  %v8872_v53 = vadd.f32 %v8862_v45, %v8812_v54 }
0x1999   : > { %v8574_v21 = vpop.permute.xlu0 %8573  ;;  %v8702_v41 = vadd.f32 %v8692_v46, %v8642_v61 }
0x199a   : > { %v8761_v57 = vadd.f32 %v8751_v63, %v8701_v34  ;;  %v9101_v44 = vadd.f32 %v9091_v38, %v9041_v11  ;;  %v8752_v3 = vmul.f32 %v14690_v52, %v8574_v21  ;;  %v8922_v27 = vmul.f32 %v14766_v7, %v8574_v21 }
0x199b   : > { %v8556_v33 = vpop.permute.xlu1 %8555  ;;  %v14909_v28 = vadd.f32 %v8921_v32, %v8871_v55  ;;  %v9032_v11 = vmul.f32 %v14570_v56, %v14726_v47  ;;  %v9092_v46 = vmul.f32 %v14600_v22, %v8574_v21  ;;  %v8864_v7 = vmul.f32 %v8835_v8, %v14755_v43 }
0x199c   : > { %v8813_v13 = vmul.f32 %v8781_v16, %v8556_v33  ;;  %v8983_v26 = vmul.f32 %v14608_v20, %v8556_v33  ;;  %9141 = vrot.lane.b32.xlu1 %v9101_v44, %s11862_s22  ;;  %9111 = vrot.lane.b32.xlu0 %v8761_v57, %s11863_s0  ;;  %v14918_v34 = vadd.f32 %v8922_v27, %v8872_v53 }
0x199d   : > { %v8558_v50 = vpop.permute.xlu0 %8557  ;;  %v8762_v52 = vadd.f32 %v8752_v3, %v8702_v41  ;;  %v9033_v20 = vmul.f32 %v14781_v58, %v14745_v6  ;;  %v9042_v45 = vadd.f32 %v9032_v11, %v8982_v15  ;;  %v8643_v56 = vmul.f32 %v14576_v17, %v8556_v33  ;;  %v15424_v15 = vld [vmem:[#allocation83_spill] sm:$0xff]  ;;  %v15427_v11 = vld [vmem:[#allocation86_spill] sm:$0xff] }
0x199e   : > { %v8814_v16 = vmul.f32 %v14783_v5, %v8558_v50  ;;  %v8873_v4 = vadd.f32 %v8863_v29, %v8813_v13  ;;  %v8693_v22 = vmul.f32 %v14585_v14, %v14745_v6  ;;  %v8865_v14 = vmul.f32 %v14847_v23, %v14769_v62  ;;  %v15425_v41 = vld [vmem:[#allocation51_spill] sm:$0xff] }
0x199f   : > { %v8576_v54 = vpop.permute.xlu1 %8575  ;;  %v9043_v47 = vadd.f32 %v9033_v20, %v8983_v26  ;;  %v9102_v5 = vadd.f32 %v9092_v46, %v9042_v45  ;;  %v9035_v32 = vmul.f32 %v14799_v49, %v14769_v62  ;;  %v8984_v13 = vmul.f32 %v15425_v41, %v8558_v50  ;;  %v15429_v46 = vld [vmem:[#allocation87_spill] sm:$0xff] }
0x19a0   : > { %v8923_v44 = vmul.f32 %v14813_v40, %v8576_v54  ;;  %v9093_v59 = vmul.f32 %v14845_v39, %v8576_v54  ;;  %9113 = vrot.lane.b32.xlu1 %v8762_v52, %s11863_s0  ;;  %v8874_v42 = vadd.f32 %v8864_v7, %v8814_v16  ;;  %v8753_v8 = vmul.f32 %v14606_v35, %v8576_v54  ;;  %v15431_v7 = vld [vmem:[#allocation53_spill] sm:$0xff]  ;;  %v15447_v41 = vld [vmem:[#allocation91_spill] sm:$0xff] }
0x19a1   : > { %v8578_v58 = vpop.permute.xlu0 %8577  ;;  %v8703_v55 = vadd.f32 %v8693_v22, %v8643_v56  ;;  %v8695_v35 = vmul.f32 %v14616_v60, %v14769_v62  ;;  %v8694_v62 = vmul.f32 %v14591_v2, %v14755_v43  ;;  %v15428_v2 = vld [vmem:[#allocation76_spill] sm:$0xff] }
0x19a2   : > { %v9103_v19 = vadd.f32 %v9093_v59, %v9043_v47  ;;  %v8924_v18 = vmul.f32 %v14825_v0, %v8578_v58  ;;  %v14933_v17 = vadd.f32 %v8923_v44, %v8873_v4  ;;  %v8867_v20 = vmul.f32 %v15429_v46, %v15428_v2  ;;  %v15432_v4 = vld [vmem:[#allocation77_spill] sm:$0xff]  ;;  %v15433_v56 = vld [vmem:[#allocation88_spill] sm:$0xff] }
0x19a3   : > { %v8560_v25 = vpop.permute.xlu1 %8559  ;;  %v8763_v63 = vadd.f32 %v8753_v8, %v8703_v55  ;;  %v8697_v45 = vmul.f32 %v15431_v7, %v15428_v2  ;;  %v8868_v47 = vmul.f32 %v15433_v56, %v15432_v4  ;;  %v15434_v59 = vld [vmem:[#allocation65_spill] sm:$0xff] }
0x19a4   : > { %v8645_v40 = vmul.f32 %v14614_v24, %v8560_v25  ;;  %v8815_v39 = vmul.f32 %v14872_v10, %v8560_v25  ;;  %v8985_v61 = vmul.f32 %v14624_v12, %v8560_v25  ;;  %9143 = vrot.lane.b32.xlu1 %v9102_v5, %s11862_s22  ;;  %v14943_v0 = vadd.f32 %v8924_v18, %v8874_v42  ;;  %v15435_v42 = vld [vmem:[#allocation89_spill] sm:$0xff]  ;;  %v15436_v18 = vld [vmem:[#allocation60_spill] sm:$0xff] }
0x19a5   : > { %v8562_v6 = vpop.permute.xlu0 %8561  ;;  %v8866_v12 = vmul.f32 %v14888_v31, %v14775_v30  ;;  %v8644_v10 = vmul.f32 %v14658_v9, %v8558_v50  ;;  %v8754_v31 = vmul.f32 %v14699_v37, %v8578_v58  ;;  %v15430_v37 = vld [vmem:[#allocation48_spill] sm:$0xff]  ;;  %v9094_v22 = vmul.f32 %v15434_v59, %v8578_v58  ;;  %v15453_v59 = vld [vmem:[#allocation66_spill] sm:$0xff] }
0x19a6   : > { %v8816_v24 = vmul.f32 %v14836_v51, %v8562_v6  ;;  %v8705_v38 = vadd.f32 %v8695_v35, %v8645_v40  ;;  %v8875_v23 = vadd.f32 %v8865_v14, %v8815_v39  ;;  %v9045_v53 = vadd.f32 %v9035_v32, %v8985_v61  ;;  %v15437_v40 = vld [vmem:[#allocation50_spill] sm:$0xff]  ;;  %v15438_v14 = vld [vmem:[#allocation49_spill] sm:$0xff] }
0x19a7   : > { %v8580_v21 = vpop.permute.xlu1 %8579  ;;  %v9034_v16 = vmul.f32 %v15430_v37, %v14755_v43  ;;  %v8646_v25 = vmul.f32 %v15436_v18, %v8562_v6 }
0x19a8   : > { %v8755_v60 = vmul.f32 %v14622_v48, %v8580_v21  ;;  %v8925_v57 = vmul.f32 %v14855_v1, %v8580_v21  ;;  %v9095_v3 = vmul.f32 %v14853_v36, %v8580_v21  ;;  %9115 = vrot.lane.b32.xlu1 %v8763_v63, %s11863_s0  ;;  %v8876_v51 = vadd.f32 %v8866_v12, %v8816_v24  ;;  %v15426_v36 = vld [vmem:[#allocation57_spill] sm:$0xff]  ;;  %v15439_v63 = vld [vmem:[#allocation47_spill] sm:$0xff]  ;;  %v15442_v21 = vld [vmem:[#allocation94_spill] sm:$0xff] }
0x19a9   : > { %v8582_v49 = vpop.permute.xlu0 %8581  ;;  %v8704_v1 = vadd.f32 %v8694_v62, %v8644_v10  ;;  %v9044_v8 = vadd.f32 %v9034_v16, %v8984_v13  ;;  %v8696_v32 = vmul.f32 %v15439_v63, %v14775_v30  ;;  %v15440_v24 = vld [vmem:[#allocation73_spill] sm:$0xff]  ;;  %v15460_v63 = vld [vmem:[#allocation62_spill] sm:$0xff] }
0x19aa   : > { %v8765_v9 = vadd.f32 %v8755_v60, %v8705_v38  ;;  %v9105_v27 = vadd.f32 %v9095_v3, %v9045_v53  ;;  %v8926_v33 = vmul.f32 %v15424_v15, %v8582_v49  ;;  %v14960_v26 = vadd.f32 %v8925_v57, %v8875_v23  ;;  %v15441_v38 = vld [vmem:[#allocation78_spill] sm:$0xff]  ;;  %v15443_v53 = vld [vmem:[#allocation79_spill] sm:$0xff] }
0x19ab   : > { %v8564_v48 = vpop.permute.xlu1 %8563  ;;  %v8764_v44 = vadd.f32 %v8754_v31, %v8704_v1  ;;  %v9104_v58 = vadd.f32 %v9094_v22, %v9044_v8  ;;  %v8756_v12 = vmul.f32 %v15440_v24, %v8582_v49  ;;  %v8869_v23 = vmul.f32 %v15442_v21, %v15441_v38  ;;  %v15444_v57 = vld [vmem:[#allocation82_spill] sm:$0xff] }
0x19ac   : > { %v8647_v29 = vmul.f32 %v15426_v36, %v8564_v48  ;;  %v8817_v52 = vmul.f32 %v15427_v11, %v8564_v48  ;;  %9145 = vrot.lane.b32.xlu1 %v9103_v19, %s11862_s22  ;;  %9119 = vrot.lane.b32.xlu0 %v8765_v9, %s11863_s0  ;;  %v14972_v54 = vadd.f32 %v8926_v33, %v8876_v51  ;;  %v15445_v9 = vld [vmem:[#allocation52_spill] sm:$0xff]  ;;  %v15446_v15 = vld [vmem:[#allocation58_spill] sm:$0xff] }
0x19ad   : > { %v8566_v50 = vpop.permute.xlu0 %8565  ;;  %v8987_v35 = vmul.f32 %v15438_v14, %v8564_v48  ;;  %v9037_v60 = vmul.f32 %v15443_v53, %v15428_v2  ;;  %v8706_v31 = vadd.f32 %v8696_v32, %v8646_v25  ;;  %v15448_v48 = vld [vmem:[#allocation64_spill] sm:$0xff]  ;;  %v15455_v8 = vld [vmem:[#allocation54_spill] sm:$0xff] }
0x19ae   : > { %v8818_v5 = vmul.f32 %v15435_v42, %v8566_v50  ;;  %v14980_v43 = vadd.f32 %v8867_v20, %v8817_v52  ;;  %v8707_v55 = vadd.f32 %v8697_v45, %v8647_v29  ;;  %v9036_v1 = vmul.f32 %v15448_v48, %v14775_v30  ;;  %v15449_v29 = vld [vmem:[#allocation90_spill] sm:$0xff]  ;;  %v15450_v2 = vld [vmem:[#allocation56_spill] sm:$0xff]  ;;  %v15451_v20 = vld [vmem:[#allocation59_spill] sm:$0xff] }
0x19af   : > { %v14978_v19 = vpop.permute.xlu1 %8583  ;;  %v9047_v36 = vadd.f32 %v9037_v60, %v8987_v35  ;;  %v8766_v52 = vadd.f32 %v8756_v12, %v8706_v31  ;;  %v9096_v46 = vmul.f32 %v15450_v2, %v8582_v49  ;;  %v15454_v42 = vld [vmem:[#allocation68_spill] sm:$0xff]  ;;  %v8698_v18 = vmul.f32 %v15455_v8, %v15432_v4  ;;  %v15456_v25 = vld [vmem:[#allocation74_spill] sm:$0xff]  ;;  %v15461_v12 = vld [vmem:[#allocation55_spill] sm:$0xff] }
0x19b0   : > { %v8757_v39 = vmul.f32 %v15437_v40, %v14978_v19  ;;  %9117 = vrot.lane.b32.xlu1 %v8764_v44, %s11863_s0  ;;  %v8878_v61 = vadd.f32 %v8868_v47, %v8818_v5  ;;  %9149 = vrot.lane.b32.xlu0 %v9105_v27, %s11862_s22  ;;  %v9097_v3 = vmul.f32 %v15444_v57, %v14978_v19  ;;  %v15452_v47 = vld [vmem:[#allocation67_spill] sm:$0xff]  ;;  %v15459_v14 = vld [vmem:[#allocation72_spill] sm:$0xff]  ;;  %v15466_v48 = vld [vmem:[#allocation61_spill] sm:$0xff] }
0x19b1   : > { %v8986_v27 = vmul.f32 %v15445_v9, %v8562_v6  ;;  %v8699_v6 = vmul.f32 %v15451_v20, %v15441_v38  ;;  %v8648_v44 = vmul.f32 %v15452_v47, %v8566_v50  ;;  %v8988_v32 = vmul.f32 %v15460_v63, %v8566_v50  ;;  %v9297_v57 = vld [vmem:[%s15458_s2] sm:$0xff] }
0x19b2   : > { %v8767_v10 = vadd.f32 %v8757_v39, %v8707_v55  ;;  %v9107_v16 = vadd.f32 %v9097_v3, %v9047_v36  ;;  %v15457_v39 = vld [vmem:[#allocation80_spill] sm:$0xff]  ;;  %v15469_v47 = vld [vmem:[#allocation71_spill] sm:$0xff] }
0x19b3   : > { %v8568_v62 = vpop.permute.xlu0 %8567  ;;  %v8586_v51 = vpop.permute.xlu1 %8585  ;;  %v9046_v56 = vadd.f32 %v9036_v1, %v8986_v27 }
0x19b4   : > { %v8649_v33 = vmul.f32 %v15446_v15, %v8568_v62  ;;  %v8819_v13 = vmul.f32 %v15447_v41, %v8568_v62  ;;  %9147 = vrot.lane.b32.xlu1 %v9104_v58, %s11862_s22  ;;  %v8928_v11 = vmul.f32 %v15449_v29, %v8586_v51  ;;  %9123 = vrot.lane.b32.xlu0 %v8767_v10, %s11863_s0 }
0x19b5   : > { %v8989_v5 = vmul.f32 %v15454_v42, %v8568_v62  ;;  %v9106_v49 = vadd.f32 %v9096_v46, %v9046_v56  ;;  %v8758_v55 = vmul.f32 %v15456_v25, %v8586_v51  ;;  %v8708_v58 = vadd.f32 %v8698_v18, %v8648_v44  ;;  %v9299_v62 = vld [vmem:[%s15458_s2 + $0x10] sm:$0xff]  ;;  %v15468_v46 = vld [vmem:[#allocation75_spill] sm:$0xff] }
0x19b6   : > { %v8879_v37 = vadd.f32 %v8869_v23, %v8819_v13  ;;  %v15008_v45 = vadd.f32 %v8928_v11, %v8878_v61  ;;  %v8709_v30 = vadd.f32 %v8699_v6, %v8649_v33  ;;  %v9039_v61 = vmul.f32 %v15457_v39, %v15441_v38  ;;  %v15462_v23 = vld [vmem:[#allocation63_spill] sm:$0xff]  ;;  %v15465_v33 = vld [vmem:[#allocation93_spill] sm:$0xff]  ;;  %v9302_v39 = vld [vmem:[%s15458_s2 + $0x28] sm:$0xff] }
0x19b7   : > { %v8588_v7 = vpop.permute.xlu0 %8587  ;;  %v9038_v10 = vmul.f32 %v15461_v12, %v15432_v4  ;;  %v8768_v21 = vadd.f32 %v8758_v55, %v8708_v58  ;;  %v9098_v53 = vmul.f32 %v15462_v23, %v8586_v51  ;;  %v15463_v4 = vld [vmem:[#allocation81_spill] sm:$0xff]  ;;  %v9301_v13 = vld [vmem:[%s15458_s2 + $0x20] sm:$0xff] }
0x19b8   : > { %v8759_v22 = vmul.f32 %v15453_v59, %v8588_v7  ;;  %9121 = vrot.lane.b32.xlu1 %v8766_v52, %s11863_s0  ;;  %9153 = vrot.lane.b32.xlu0 %v9107_v16, %s11862_s22  ;;  %v9099_v35 = vmul.f32 %v15459_v14, %v8588_v7  ;;  %v9049_v24 = vadd.f32 %v9039_v61, %v8989_v5  ;;  %v15464_v51 = vld [vmem:[#allocation69_spill] sm:$0xff]  ;;  %v15467_v52 = vld [vmem:[#allocation70_spill] sm:$0xff]  ;;  %v15470_v59 = vld [vmem:[#allocation84_spill] sm:$0xff] }
0x19b9   : > { %v9048_v38 = vadd.f32 %v9038_v10, %v8988_v32  ;;  %v8700_v1 = vmul.f32 %v15466_v48, %v15463_v4  ;;  %v9040_v44 = vmul.f32 %v15469_v47, %v15463_v4 }
0x19ba   : > { %v8769_v40 = vadd.f32 %v8759_v22, %v8709_v30  ;;  %v9109_v60 = vadd.f32 %v9099_v35, %v9049_v24 }
0x19bb   : > { %v9108_v50 = vadd.f32 %v9098_v53, %v9048_v38 }
0x19bc   : > { %9151 = vrot.lane.b32.xlu1 %v9106_v49, %s11862_s22  ;;  %9127 = vrot.lane.b32.xlu0 %v8769_v40, %s11863_s0  ;;  %v9300_v40 = vld [vmem:[%s15458_s2 + $0x18] sm:$0xff] }
0x19c0   : > { %9125 = vrot.lane.b32.xlu1 %v8768_v21, %s11863_s0  ;;  %9157 = vrot.lane.b32.xlu0 %v9109_v60, %s11862_s22 }
0x19c4   : > { %9155 = vrot.lane.b32.xlu1 %v9108_v50, %s11862_s22  ;;  %v8919_v3 = vpop.permute.xlu1 %8918  ;;  %9310 = vperm.xlu0 %10990, %v9297_v57  }
0x19c8   : > { %v8859_v31 = vpop.permute.xlu0 %8858  ;;  %v8570_v9 = vpop.permute.xlu1 %8569  ;;  %9320 = vperm.xlu0 %10990, %v9299_v62  }
0x19c9   : > { %v8870_v27 = vmul.f32 %v8859_v31, %v15463_v4  ;;  %v8650_v15 = vmul.f32 %v15464_v51, %v8570_v9  ;;  %v8820_v41 = vmul.f32 %v15465_v33, %v8570_v9  ;;  %v8990_v2 = vmul.f32 %v15467_v52, %v8570_v9  ;;  %v15472_v33 = vld [vmem:[#allocation92_spill] sm:$0xff] }
0x19cb   : > { %v8880_v36 = vadd.f32 %v8870_v27, %v8820_v41  ;;  %v8710_v11 = vadd.f32 %v8700_v1, %v8650_v15  ;;  %v9050_v49 = vadd.f32 %v9040_v44, %v8990_v2 }
0x19cc   : > { %v8590_v29 = vpop.permute.xlu1 %8589  ;;  %9330 = vperm.xlu0 %10990, %v9301_v13  }
0x19cd   : > { %v8760_v20 = vmul.f32 %v15468_v46, %v8590_v29  ;;  %v8930_v6 = vmul.f32 %v8919_v3, %v8590_v29  ;;  %v8907_v16 = vpop.permute.xlu0 %8906  ;;  %v9100_v22 = vmul.f32 %v15470_v59, %v8590_v29  ;;  %v15471_v3 = vld [vmem:[#allocation85_spill] sm:$0xff] }
0x19ce   : > { %v8927_v56 = vmul.f32 %v8907_v16, %v14978_v19  ;;  %v9298_v19 = vld [vmem:[%s15458_s2 + $0x8] sm:$0xff]  ;;  %s1763_s2 = scalar_lea.vmem %s12162_s3, %s10189_s1 }
0x19cf   : > { %v8770_v30 = vadd.f32 %v8760_v20, %v8710_v11  ;;  %v15044_v42 = vadd.f32 %v8930_v6, %v8880_v36  ;;  %v9110_v25 = vadd.f32 %v9100_v22, %v9050_v49 }
0x19d0   : > { %v15047_v5 = vadd.f32 %v8927_v56, %v14980_v43  ;;  %v9194_v43 = vpop.permute.xlu1 %9193 }
0x19d1   : > { %v8915_v8 = vpop.permute.xlu0 %8914  ;;  %9129 = vrot.lane.b32.xlu1 %v8770_v30, %s11863_s0  ;;  %s15475_s0 = sld [smem:[#allocation44_spill]] }
0x19d2   : > { %v8929_v18 = vmul.f32 %v8915_v8, %v8588_v7 }
0x19d4   : > { %v15050_v55 = vadd.f32 %v8929_v18, %v8879_v37  ;;  %v15056_v58 = vpop.permute.xlu1 %9208 }
0x19d5   : > { %9159 = vrot.lane.b32.xlu1 %v9110_v25, %s11862_s22  ;;  %s15474_s22 = sld [smem:[#allocation42_spill]] }
0x19d6   : > { %v9174_v61 = vpop.permute.xlu0 %9173 }
0x19d8   : > { %v15058_v32 = vpop.permute.xlu1 %9218 }
0x19d9   : > { %9315 = vperm.xlu1 %10992, %v9298_v19  }
0x19da   : > { %v9189_v14 = vpop.permute.xlu0 %9188 }
0x19dd   : > { %9325 = vperm.xlu1 %10992, %v9300_v40  }
0x19de   : > { %v9199_v35 = vpop.permute.xlu0 %9198 }
0x19e1   : > { %9335 = vperm.xlu1 %10992, %v9302_v39  }
0x19e2   : > { %v9204_v63 = vpop.permute.xlu0 %9203 }
0x19e6   : > { %v15060_v7 = vpop.permute.xlu0 %9213 }
0x1a0e   : > { %v9142_v37 = vpop.permute.xlu1 %9141  ;;  %v9112_v24 = vpop.permute.xlu0 %9111 }
0x1a0f   : > { %v9131_v12 = vadd.f32 %v9112_v24, %v14909_v28 }
0x1a11   : > { %v9161_v10 = vadd.f32 %v9142_v37, %v9131_v12 }
0x1a12   : > { %v9114_v21 = vpop.permute.xlu1 %9113 }
0x1a13   : > { %v15063_v23 = vadd.f32 %v9174_v61, %v9161_v10  ;;  %v9132_v53 = vadd.f32 %v9114_v21, %v14918_v34 }
0x1a15   : > { %v9231_v60 = vsub.f32 0.0, %v15063_v23 }
0x1a16   : > { %v9144_v38 = vpop.permute.xlu1 %9143 }
0x1a17   : > { %v9162_v50 = vadd.f32 %v9144_v38, %v9132_v53  ;;  %v9241_v57 = vmul.f32 1.442695, %v9231_v60 }
0x1a19   : > { %v9222_v62 = vadd.f32 %v15471_v3, %v9162_v50  ;;  %11732 = vpow2.f32 %v9241_v57 }
0x1a1a   : > { %v9116_v31 = vpop.permute.xlu1 %9115 }
0x1a1b   : > { %v9232_v9 = vsub.f32 0.0, %v9222_v62  ;;  %v9133_v27 = vadd.f32 %v9116_v31, %v14933_v17 }
0x1a1d   : > { %v9243_v4 = vmul.f32 1.442695, %v9232_v9 }
0x1a1e   : > { %v9146_v28 = vpop.permute.xlu1 %9145  ;;  %v9120_v51 = vpop.permute.xlu0 %9119 }
0x1a1f   : > { %11734 = vpow2.f32 %v9243_v4  ;;  %v9163_v15 = vadd.f32 %v9146_v28, %v9133_v27  ;;  %v9135_v34 = vadd.f32 %v9120_v51, %v14960_v26 }
0x1a21   : > { %v15070_v41 = vadd.f32 %v15472_v33, %v9163_v15 }
0x1a22   : > { %v9118_v13 = vpop.permute.xlu1 %9117  ;;  %v9150_v1 = vpop.permute.xlu0 %9149 }
0x1a23   : > { %v9233_v48 = vsub.f32 0.0, %v15070_v41  ;;  %v11733_v36 = vpop.eup %11732  ;;  %v9165_v29 = vadd.f32 %v9150_v1, %v9135_v34  ;;  %v9134_v52 = vadd.f32 %v9118_v13, %v14943_v0 }
0x1a24   : > { %v9261_v2 = vadd.f32 1.0, %v11733_v36 }
0x1a25   : > { %v9245_v11 = vmul.f32 1.442695, %v9233_v48  ;;  %v15075_v17 = vadd.f32 %v9194_v43, %v9165_v29 }
0x1a26   : > { %v9148_v46 = vpop.permute.xlu1 %9147  ;;  %v9124_v20 = vpop.permute.xlu0 %9123 }
0x1a27   : > { %v9164_v6 = vadd.f32 %v9148_v46, %v9134_v52  ;;  %11736 = vpow2.f32 %v9245_v11  ;;  %v9235_v56 = vsub.f32 0.0, %v15075_v17  ;;  %v9137_v44 = vadd.f32 %v9124_v20, %v15047_v5 }
0x1a28   : > { %11738 = vrcp.f32 %v9261_v2 }
0x1a29   : > { %v11735_v16 = vpop.eup %11734  ;;  %v15078_v26 = vadd.f32 %v9189_v14, %v9164_v6  ;;  %v9249_v49 = vmul.f32 1.442695, %v9235_v56 }
0x1a2a   : > { %v9262_v47 = vadd.f32 1.0, %v11735_v16  ;;  %v9122_v30 = vpop.permute.xlu1 %9121  ;;  %v9154_v0 = vpop.permute.xlu0 %9153 }
0x1a2b   : > { %v9234_v59 = vsub.f32 0.0, %v15078_v26  ;;  %v9167_v22 = vadd.f32 %v9154_v0, %v9137_v44  ;;  %v9136_v18 = vadd.f32 %v9122_v30, %v14972_v54 }
0x1a2c   : > { %11740 = vrcp.f32 %v9262_v47 }
0x1a2d   : > { %v9247_v8 = vmul.f32 1.442695, %v9234_v59  ;;  %v15083_v25 = vadd.f32 %v9204_v63, %v9167_v22 }
0x1a2e   : > { %v9152_v19 = vpop.permute.xlu1 %9151  ;;  %v9128_v39 = vpop.permute.xlu0 %9127 }
0x1a2f   : > { %11742 = vpow2.f32 %v9247_v8  ;;  %v9166_v40 = vadd.f32 %v9152_v19, %v9136_v18  ;;  %v9237_v61 = vsub.f32 0.0, %v15083_v25  ;;  %v9139_v53 = vadd.f32 %v9128_v39, %v15050_v55 }
0x1a30   : > { %11744 = vpow2.f32 %v9249_v49  ;;  %v15473_v55 = vmov 0.0  }
0x1a31   : > { %v15086_v5 = vadd.f32 %v9199_v35, %v9166_v40  ;;  %v11737_v43 = vpop.eup %11736  ;;  %v9253_v12 = vmul.f32 1.442695, %v9237_v61 }
0x1a32   : > { %v9126_v14 = vpop.permute.xlu1 %9125  ;;  %v11739_v24 = vpop.eup %11738  ;;  %v9263_v21 = vadd.f32 1.0, %v11737_v43 }
0x1a33   : > { %v9236_v37 = vsub.f32 0.0, %v15086_v5  ;;  %v9138_v54 = vadd.f32 %v9126_v14, %v15008_v45  ;;  %v9158_v60 = vpop.permute.xlu0 %9157  ;;  %v9281_v50 = vmul.f32 %v11739_v24, %v15063_v23  ;;  %v11419_v24 = vld [vmem:[%s15474_s22 + $0x10] sm:$0xff]  }
0x1a34   : > { %v9169_v9 = vadd.f32 %v9158_v60, %v9139_v53 }
0x1a35   : > { %v9251_v10 = vmul.f32 1.442695, %v9236_v37  ;;  %v11417_v37 = vld [vmem:[%s15474_s22] sm:$0xff]  }
0x1a36   : > { %v11741_v63 = vpop.eup %11740  ;;  %v9156_v38 = vpop.permute.xlu1 %9155  ;;  %v9229_v51 = vadd.f32 %v15060_v7, %v9169_v9 }
0x1a37   : > { %v9282_v57 = vmul.f32 %v11741_v63, %v9222_v62  ;;  %11746 = vpow2.f32 %v9251_v10  ;;  %v9168_v35 = vadd.f32 %v9156_v38, %v9138_v54 }
0x1a38   : > { %11748 = vpow2.f32 %v9253_v12  ;;  %v9239_v33 = vsub.f32 0.0, %v9229_v51  ;;  %v11420_v12 = vld [vmem:[%s15475_s0] sm:$0xff]  }
0x1a39   : > { %v11743_v3 = vpop.eup %11742  ;;  %v9303_v31 = vpack.c.bf16 %v9282_v57, %v9281_v50  ;;  %v9228_v4 = vadd.f32 %v15056_v58, %v9168_v35  ;;  %11750 = vrcp.f32 %v9263_v21 }
0x1a3a   : > { %v9264_v27 = vadd.f32 1.0, %v11743_v3  ;;  %v11745_v45 = vpop.eup %11744  ;;  %v9257_v1 = vmul.f32 1.442695, %v9239_v33 }
0x1a3b   : > { %v9238_v28 = vsub.f32 0.0, %v9228_v4  ;;  %10643 = vmatpush3.bf16.msra.mxu1 %v9303_v31  ;;  %v9265_v62 = vadd.f32 1.0, %v11745_v45 }
0x1a3c   : > { %11752 = vrcp.f32 %v9264_v27  ;;  %10644 = vmatprep.subr.bf16.mxu1 %v15473_v55 }
0x1a3d   : > { %v9255_v23 = vmul.f32 1.442695, %v9238_v28 }
0x1a3f   : > { %11754 = vpow2.f32 %v9255_v23 }
0x1a40   : > { %11756 = vrcp.f32 %v9265_v62 }
0x1a41   : > { %v11747_v15 = vpop.eup %11746 }
0x1a42   : > { %v9266_v34 = vadd.f32 1.0, %v11747_v15  ;;  %v11749_v13 = vpop.eup %11748 }
0x1a43   : > { %v9130_v48 = vpop.permute.xlu1 %9129  ;;  %v11751_v58 = vpop.eup %11750  ;;  %v9267_v29 = vadd.f32 1.0, %v11749_v13 }
0x1a44   : > { %11758 = vrcp.f32 %v9266_v34  ;;  %v9140_v11 = vadd.f32 %v9130_v48, %v15044_v42  ;;  %v9283_v52 = vmul.f32 %v11751_v58, %v15070_v41  ;;  %v9311_v54 = vpop.permute.xlu0 %9310 }
0x1a45   : > { %11760 = vpow2.f32 %v9257_v1  ;;  %v11421_v1 = vld [vmem:[%s15475_s0 + $0x8] sm:$0xff]  }
0x1a46   : > { %v11753_v36 = vpop.eup %11752  ;;  %11762 = vrcp.f32 %v9267_v29  ;;  %v11423_v29 = vld [vmem:[%s15475_s0 + $0x18] sm:$0xff]  }
0x1a47   : > { %v9284_v7 = vmul.f32 %v11753_v36, %v15078_v26  ;;  %v9160_v2 = vpop.permute.xlu1 %9159  ;;  %v11422_v36 = vld [vmem:[%s15475_s0 + $0x10] sm:$0xff]  }
0x1a48   : > { %v9170_v46 = vadd.f32 %v9160_v2, %v9140_v11  ;;  %v9321_v3 = vpop.permute.xlu0 %9320 }
0x1a49   : > { %v11755_v20 = vpop.eup %11754  ;;  %v9304_v6 = vpack.c.bf16 %v9284_v7, %v9283_v52 }
0x1a4a   : > { %v9268_v16 = vadd.f32 1.0, %v11755_v20  ;;  %v9230_v56 = vadd.f32 %v15058_v32, %v9170_v46  ;;  %v11757_v47 = vpop.eup %11756 }
0x1a4b   : > { %10645 = vmatpush3.bf16.msra.mxu1 %v9304_v6  ;;  %v9285_v41 = vmul.f32 %v11757_v47, %v15075_v17 }
0x1a4c   : > { %11764 = vrcp.f32 %v9268_v16  ;;  %v9240_v44 = vsub.f32 0.0, %v9230_v56  ;;  %10646 = vmatprep.subr.bf16.mxu1 %v15473_v55  ;;  %v9331_v23 = vpop.permute.xlu0 %9330 }
0x1a4e   : > { %v11759_v42 = vpop.eup %11758  ;;  %v9259_v30 = vmul.f32 1.442695, %v9240_v44 }
0x1a4f   : > { %v9286_v26 = vmul.f32 %v11759_v42, %v15086_v5  ;;  %v11761_v0 = vpop.eup %11760 }
0x1a50   : > { %11766 = vpow2.f32 %v9259_v30  ;;  %v11763_v22 = vpop.eup %11762  ;;  %v9269_v8 = vadd.f32 1.0, %v11761_v0 }
0x1a51   : > { %v9305_v59 = vpack.c.bf16 %v9286_v26, %v9285_v41  ;;  %v9287_v49 = vmul.f32 %v11763_v22, %v15083_v25  ;;  %v11418_v25 = vld [vmem:[%s15474_s22 + $0x8] sm:$0xff]  }
0x1a52   : > { %11768 = vrcp.f32 %v9269_v8 }
0x1a53   : > { %10647 = vmatpush3.bf16.msra.mxu1 %v9305_v59 }
0x1a54   : > { %10648 = vmatprep.subr.bf16.mxu1 %v15473_v55 }
0x1a56   : > { %v11765_v32 = vpop.eup %11764 }
0x1a57   : > { %v9288_v18 = vmul.f32 %v11765_v32, %v9228_v4 }
0x1a58   : > { %v9316_v21 = vpop.permute.xlu1 %9315 }
0x1a59   : > { %v9306_v19 = vpack.c.bf16 %v9288_v18, %v9287_v49 }
0x1a5a   : > { %v11767_v40 = vpop.eup %11766 }
0x1a5b   : > { %v9270_v17 = vadd.f32 1.0, %v11767_v40  ;;  %10649 = vmatpush3.bf16.msra.mxu1 %v9306_v19 }
0x1a5c   : > { %10650 = vmatprep.subr.bf16.mxu1 %v15473_v55  ;;  %v11769_v39 = vpop.eup %11768  ;;  %v9326_v9 = vpop.permute.xlu1 %9325 }
0x1a5d   : > { %11770 = vrcp.f32 %v9270_v17  ;;  %v9289_v5 = vmul.f32 %v11769_v39, %v9229_v51 }
0x1a60   : > { %v9336_v15 = vpop.permute.xlu1 %9335 }
0x1a67   : > { %v11771_v61 = vpop.eup %11770 }
0x1a68   : > { %v9290_v14 = vmul.f32 %v11771_v61, %v9230_v56 }
0x1a6a   : > { %v9307_v43 = vpack.c.bf16 %v9290_v14, %v9289_v5 }
0x1a6c   : > { %10651 = vmatpush3.bf16.msra.mxu1 %v9307_v43 }
0x1a6f   : > { %10653 = vmatmul.mubr.msk.bf16.vlgmr.msra.gmra.mrb[28].mxu1 %vm9353_vm1, %v11417_v37 }
0x1a70   : > { %10656 = vmatprep.mubr.msk.bf16.mxu1 %vm11855_vm9, %v15473_v55 }
0x1a77   : > { %10657 = vmatmul.mubr.msk.bf16.gmra.mrb[32].mxu1 %vm9353_vm1, %v11418_v25 }
0x1a78   : > { %10660 = vmatprep.mubr.msk.bf16.mxu1 %vm11855_vm9, %v15473_v55 }
0x1a7f   : > { %10661 = vmatmul.mubr.msk.bf16.gmra.mrb[36].mxu1 %vm9353_vm1, %v11419_v24 }
0x1a80   : > { %10670 = vmatprep.mubr.msk.bf16.mxu1 %vm7135_vm14, %v11420_v12 }
0x1b42   : > { %v9397_v10 = vpop.f32.mrb[28].mxu1 }
0x1b43   : > { %v10654_v63 = vpop.f32.mrb[29].mxu1  ;;  %v9398_v60 = vadd.f32 %v9397_v10, %v9311_v54 }
0x1b44   : > { %v9400_v53 = vpop.f32.mrb[30].mxu1 }
0x1b45   : > { %v9401_v38 = vadd.f32 %v9400_v53, %v9316_v21  ;;  %v10655_v50 = vpop.f32.mrb[31].mxu1 }
0x1b47   : > { %v9428_v57 = vpack.c.bf16 %v9401_v38, %v9398_v60 }
0x1b49   : > { %10664 = vmatprep.subr.bf16.mxu1 %v9428_v57 }
0x1b4a   : > { %v9405_v35 = vpop.f32.mrb[32].mxu1  ;;  %10665 = vmatpush3.bf16.msra.mxu1 %v9428_v57 }
0x1b4b   : > { %v10658_v31 = vpop.f32.mrb[33].mxu1  ;;  %v9406_v27 = vadd.f32 %v9405_v35, %v9321_v3 }
0x1b4c   : > { %v9408_v4 = vpop.f32.mrb[34].mxu1 }
0x1b4d   : > { %v9409_v45 = vadd.f32 %v9408_v4, %v9326_v9  ;;  %v10659_v28 = vpop.f32.mrb[35].mxu1 }
0x1b4f   : > { %v9429_v55 = vpack.c.bf16 %v9409_v45, %v9406_v27 }
0x1b51   : > { %10666 = vmatprep.subr.bf16.mxu1 %v9429_v55 }
0x1b52   : > { %v9413_v51 = vpop.f32.mrb[36].mxu1  ;;  %10667 = vmatpush3.bf16.msra.mxu1 %v9429_v55 }
0x1b53   : > { %v10662_v62 = vpop.f32.mrb[37].mxu1  ;;  %v9414_v34 = vadd.f32 %v9413_v51, %v9331_v23 }
0x1b54   : > { %v9416_v33 = vpop.f32.mrb[38].mxu1 }
0x1b55   : > { %v9417_v13 = vadd.f32 %v9416_v33, %v9336_v15  ;;  %v10663_v48 = vpop.f32.mrb[39].mxu1 }
0x1b57   : > { %v9430_v58 = vpack.c.bf16 %v9417_v13, %v9414_v34 }
0x1b59   : > { %10668 = vmatprep.subr.bf16.mxu1 %v9430_v58 }
0x1b5a   : > { %10669 = vmatpush3.bf16.msra.mxu1 %v9430_v58 }
0x1b5d   : > { %10671 = vmatmul.mubr.msk.bf16.vlgmr.msra.gmra.mrb[40].mxu1 %vm7135_vm14, %v11421_v1 }
0x1b5e   : > { %10674 = vmatprep.mubr.msk.bf16.mxu1 %vm7135_vm14, %v11422_v36 }
0x1b65   : > { %10675 = vmatmul.mubr.msk.bf16.gmra.mrb[44].mxu1 %vm7135_vm14, %v11423_v29 }
0x1c30   : > { %v10672_v11 = vpop.f32.mrb[40].mxu1 }
0x1c31   : > { %9530 = vst [vmem:[%s1763_s2 + $0x10] sm:$0xff] %v10672_v11  ;;  %v9497_v52 = vpop.f32.mrb[41].mxu1 }
0x1c32   : > { %9528 = vst [vmem:[%s1763_s2] sm:$0xff] %v9497_v52  ;;  %v10673_v7 = vpop.f32.mrb[42].mxu1 }
0x1c33   : > { %9531 = vst [vmem:[%s1763_s2 + $0x18] sm:$0xff] %v10673_v7  ;;  %v9500_v2 = vpop.f32.mrb[43].mxu1 }
0x1c34   : > { %9529 = vst [vmem:[%s1763_s2 + $0x8] sm:$0xff] %v9500_v2 }
0x1c38   : > { %v10676_v46 = vpop.f32.mrb[44].mxu1 }
0x1c39   : > { %9534 = vst [vmem:[%s1763_s2 + $0x30] sm:$0xff] %v10676_v46  ;;  %v9513_v20 = vpop.f32.mrb[45].mxu1 }
0x1c3a   : > { %9532 = vst [vmem:[%s1763_s2 + $0x20] sm:$0xff] %v9513_v20  ;;  %v10677_v6 = vpop.f32.mrb[46].mxu1 }
0x1c3b   : > { %9535 = vst [vmem:[%s1763_s2 + $0x38] sm:$0xff] %v10677_v6  ;;  %v9516_v16 = vpop.f32.mrb[47].mxu1 }
0x1c3c   : > { %9533 = vst [vmem:[%s1763_s2 + $0x28] sm:$0xff] %v9516_v16 }
0x1c3d PF: > { %s128_s15 = sadd.s32 1, %s11780_s15  }
0x1c3e   : > { %p125_p4 = scmp.ge.s32.totalorder %s128_s15, 4  }
0x1c40   :  { %127 = sbr.rel (!%p125_p4) target bundleno = 112 (0x70), region = 372 }

</bundles_post_ra>
